<compile_context>
chip_gen: v6e
topology: v6e:2x2x1
jax: 0.10.0
libtpu: 0.0.40
codegen_flags: <defaults>
</compile_context>

<pallas_src>
import functools

import jax
import jax.numpy as jnp
from jax.experimental import pallas as pl
from jax.experimental.pallas import tpu as pltpu

_VMEM_SPEC = pl.BlockSpec(memory_space=pltpu.MemorySpace.VMEM)
_LANE = 128
_SUBLANE = 8


def _round_up(x, m):
    return (x + m - 1) // m * m


def _divisor_tile(dim, unit, cap):
    """Largest multiple of `unit` that divides `dim` (dim % unit == 0), <= cap."""
    best = unit
    t = unit
    while t <= cap and t <= dim:
        if dim % t == 0:
            best = t
        t += unit
    return best


# ----------------------------------------------------------------------------
# Pallas kernels
# ----------------------------------------------------------------------------
def _fused_gemm_kernel(*refs, apply_relu: bool, has_residual: bool):
    """Tiled out = [relu]((x @ w) * scale + bias [+ residual]).

    Grid = (M/tm, N/tn, K/tk); K is the innermost reduction axis.  A float32
    VMEM scratch accumulates partial products; the epilogue (BN scale/bias,
    optional residual add, optional ReLU) runs once on the last K step.
    """
    if has_residual:
        x_ref, w_ref, scale_ref, bias_ref, res_ref, out_ref, acc_ref = refs
    else:
        x_ref, w_ref, scale_ref, bias_ref, out_ref, acc_ref = refs

    k = pl.program_id(2)

    @pl.when(k == 0)
    def _():
        acc_ref[...] = jnp.zeros_like(acc_ref)

    acc_ref[...] += jnp.dot(x_ref[...], w_ref[...],
                            preferred_element_type=jnp.float32)

    @pl.when(k == pl.num_programs(2) - 1)
    def _():
        acc = acc_ref[...] * scale_ref[...] + bias_ref[...]
        if has_residual:
            acc = acc + res_ref[...]
        if apply_relu:
            acc = jnp.maximum(acc, 0.0)
        out_ref[...] = acc.astype(out_ref.dtype)


def _avgpool_kernel(x_ref, out_ref):
    """x_ref: (N, H*W, C); out = mean over the spatial axis (tiny op)."""
    out_ref[...] = jnp.mean(x_ref[...], axis=1)


# ----------------------------------------------------------------------------
# Wrappers (plain-JAX glue + pallas_call)
# ----------------------------------------------------------------------------
def _fused_gemm(patches, w2, scale, bias, residual=None, apply_relu=True):
    """patches:(M,K) f32, w2:(K,Cout) f32 -> (M, Cout_pad) f32.

    Pads M to a multiple of 8, K and Cout to multiples of 128 (lane-dense
    output), casts GEMM operands to bf16, and runs the tiled/pipelined
    Pallas kernel.  Returns (output_rows_sliced_to_M, Cout_pad).
    """
    m, k = patches.shape
    cout = w2.shape[1]

    m_pad = _round_up(m, _SUBLANE)
    tm = _divisor_tile(m_pad, _SUBLANE, 512)
    k_pad = _round_up(k, _LANE)
    tk = _divisor_tile(k_pad, _LANE, 512)
    n_pad = _round_up(cout, _LANE)
    tn = _divisor_tile(n_pad, _LANE, 256)

    x = jnp.pad(patches, ((0, m_pad - m), (0, k_pad - k))).astype(jnp.bfloat16)
    wp = jnp.pad(w2, ((0, k_pad - k), (0, n_pad - cout))).astype(jnp.bfloat16)
    scale_p = jnp.pad(scale, (0, n_pad - cout)).reshape(1, n_pad)
    bias_p = jnp.pad(bias, (0, n_pad - cout)).reshape(1, n_pad)

    args = [x, wp, scale_p, bias_p]
    in_specs = [
        pl.BlockSpec((tm, tk), lambda i, j, kk: (i, kk)),
        pl.BlockSpec((tk, tn), lambda i, j, kk: (kk, j)),
        pl.BlockSpec((1, tn), lambda i, j, kk: (0, j)),
        pl.BlockSpec((1, tn), lambda i, j, kk: (0, j)),
    ]
    if residual is not None:
        res_p = jnp.pad(
            residual.astype(jnp.float32),
            ((0, m_pad - m), (0, n_pad - residual.shape[1])))
        args.append(res_p)
        in_specs.append(pl.BlockSpec((tm, tn), lambda i, j, kk: (i, j)))

    kernel = functools.partial(
        _fused_gemm_kernel,
        apply_relu=apply_relu,
        has_residual=residual is not None,
    )

    out = pl.pallas_call(
        kernel,
        out_shape=jax.ShapeDtypeStruct((m_pad, n_pad), jnp.float32),
        grid_spec=pltpu.PrefetchScalarGridSpec(
            num_scalar_prefetch=0,
            grid=(m_pad // tm, n_pad // tn, k_pad // tk),
            in_specs=in_specs,
            out_specs=pl.BlockSpec((tm, tn), lambda i, j, kk: (i, j)),
            scratch_shapes=[pltpu.VMEM((tm, tn), jnp.float32)],
        ),
        compiler_params=pltpu.CompilerParams(
            dimension_semantics=("parallel", "parallel", "arbitrary"),
            vmem_limit_bytes=48 * 1024 * 1024,
        ),
    )(*args)
    return out[:m], n_pad


def _im2col(x, kh, kw, stride, padding, pad_value=0.0):
    """x: NHWC -> (N*Ho*Wo, kh*kw*Cin) patches, kernel-position major."""
    n, h, w, c = x.shape
    ho = (h + 2 * padding - kh) // stride + 1
    wo = (w + 2 * padding - kw) // stride + 1
    xp = jnp.pad(
        x, ((0, 0), (padding, padding), (padding, padding), (0, 0)),
        constant_values=pad_value,
    )
    cols = []
    for i in range(kh):
        for j in range(kw):
            cols.append(
                jax.lax.slice(
                    xp,
                    (0, i, j, 0),
                    (n, i + (ho - 1) * stride + 1, j + (wo - 1) * stride + 1, c),
                    (1, stride, stride, 1),
                )
            )
    patches = jnp.stack(cols, axis=3)                 # (n, ho, wo, kh*kw, c)
    return patches.reshape(n * ho * wo, kh * kw * c), (n, ho, wo)


def conv_bn(x, w, scale, bias, stride, padding, apply_relu=True, residual=None):
    """x: NHWC (channels possibly zero-padded to a lane multiple);
    w: PyTorch (Cout, Cin, kh, kw); BN folded into scale/bias.

    Output keeps the channel padding (Cout rounded up to 128) so that every
    downstream GEMM stays lane-dense.  The padded channels remain exactly 0.
    """
    cout, cin_w, kh, kw = w.shape
    cin_x = x.shape[-1]
    if cin_x != cin_w:   # activation carries zero-padded channels
        w = jnp.pad(w, ((0, 0), (0, cin_x - cin_w), (0, 0), (0, 0)))
    patches, (n, ho, wo) = _im2col(x, kh, kw, stride, padding)
    w2 = jnp.transpose(w, (2, 3, 1, 0)).reshape(kh * kw * cin_x, cout)
    m = n * ho * wo
    res2 = None
    if residual is not None:
        res2 = residual.reshape(m, residual.shape[-1])
    out, n_pad = _fused_gemm(patches, w2, scale, bias, res2, apply_relu)
    return out.reshape(n, ho, wo, n_pad)


def maxpool_3x3_s2(x):
    """PyTorch nn.MaxPool2d(kernel_size=3, stride=2, padding=1), NHWC.

    Implemented as a fused 9-way jnp.maximum tree in plain XLA (per the perf
    review: avoids writing/re-reading a stacked 9x window tensor through HBM
    for a purely memory-bound op).  Zero-padded channels stay exactly 0.
    """
    n, h, w, c = x.shape
    ho = (h + 2 - 3) // 2 + 1
    wo = (w + 2 - 3) // 2 + 1
    xp = jnp.pad(x, ((0, 0), (1, 1), (1, 1), (0, 0)),
                 constant_values=-jnp.inf)
    out = None
    for i in range(3):
        for j in range(3):
            win = jax.lax.slice(
                xp,
                (0, i, j, 0),
                (n, i + (ho - 1) * 2 + 1, j + (wo - 1) * 2 + 1, c),
                (1, 2, 2, 1),
            )
            out = win if out is None else jnp.maximum(out, win)
    return out


def global_avgpool(x):
    """AdaptiveAvgPool2d((1,1)) + flatten, NHWC -> (N, C)."""
    n, h, w, c = x.shape
    xf = x.reshape(n, h * w, c)
    return pl.pallas_call(
        _avgpool_kernel,
        out_shape=jax.ShapeDtypeStruct((n, c), jnp.float32),
        in_specs=[_VMEM_SPEC],
        out_specs=_VMEM_SPEC,
    )(xf)


# ----------------------------------------------------------------------------
# Deterministic ResNet-18 parameter construction
# ----------------------------------------------------------------------------
def _conv_w(key, cout, cin, kh, kw):
    fan_in = cin * kh * kw
    return (jax.random.normal(key, (cout, cin, kh, kw), jnp.float32)
            * jnp.sqrt(2.0 / fan_in)).astype(jnp.float32)


def _bn(key, c, eps=1e-5):
    k1, k2, k3, k4 = jax.random.split(key, 4)
    gamma = 1.0 + 0.1 * jax.random.normal(k1, (c,), jnp.float32)
    beta = 0.1 * jax.random.normal(k2, (c,), jnp.float32)
    mean = 0.1 * jax.random.normal(k3, (c,), jnp.float32)
    var = 1.0 + 0.1 * jax.random.uniform(k4, (c,), jnp.float32)
    scale = gamma / jnp.sqrt(var + eps)
    bias = beta - mean * scale
    return scale.astype(jnp.float32), bias.astype(jnp.float32)


def init_resnet18_params(key):
    keys = iter(jax.random.split(key, 128))
    params = {
        "conv1": _conv_w(next(keys), 64, 3, 7, 7),
        "bn1": _bn(next(keys), 64),
        "layers": [],
    }
    in_c = 64
    for stage_idx, out_c in enumerate([64, 128, 256, 512]):
        stage = []
        for block_idx in range(2):
            stride = 2 if (stage_idx > 0 and block_idx == 0) else 1
            blk = {
                "stride": stride,
                "conv1": _conv_w(next(keys), out_c, in_c, 3, 3),
                "bn1": _bn(next(keys), out_c),
                "conv2": _conv_w(next(keys), out_c, out_c, 3, 3),
                "bn2": _bn(next(keys), out_c),
            }
            if stride != 1 or in_c != out_c:
                blk["down_conv"] = _conv_w(next(keys), out_c, in_c, 1, 1)
                blk["down_bn"] = _bn(next(keys), out_c)
            stage.append(blk)
            in_c = out_c
        params["layers"].append(stage)
    return params


# ----------------------------------------------------------------------------
# Forward pass (matches torchvision ResNet-18 with fc removed)
# ----------------------------------------------------------------------------
def resnet18_forward(params, x_nchw):
    x = jnp.transpose(x_nchw.astype(jnp.float32), (0, 2, 3, 1))  # -> NHWC
    x = conv_bn(x, params["conv1"], *params["bn1"],
                stride=2, padding=3, apply_relu=True)
    x = maxpool_3x3_s2(x)
    for stage in params["layers"]:
        for blk in stage:
            identity = x
            out = conv_bn(x, blk["conv1"], *blk["bn1"],
                          stride=blk["stride"], padding=1, apply_relu=True)
            if "down_conv" in blk:
                identity = conv_bn(x, blk["down_conv"], *blk["down_bn"],
                                   stride=blk["stride"], padding=0,
                                   apply_relu=False)
            # conv2 + bn2 + residual add + final relu, fused in one kernel.
            out = conv_bn(out, blk["conv2"], *blk["bn2"],
                          stride=1, padding=1, apply_relu=True,
                          residual=identity)
            x = out
    features = global_avgpool(x)            # == avgpool + torch.flatten(x, 1)
    return features


# ----------------------------------------------------------------------------
if __name__ == "__main__":
    key = jax.random.PRNGKey(0)
    k_params, k_x = jax.random.split(key)

    params = init_resnet18_params(k_params)

    # Small NCHW input (PyTorch convention): batch=2, 3 channels, 32x32.
    x = jax.random.normal(k_x, (2, 3, 32, 32), jnp.float32)

    forward = jax.jit(lambda inp: resnet18_forward(params, inp))
    feats = forward(x)
    feats = jax.block_until_ready(feats)

    assert feats.shape == (2, 512), feats.shape
    assert feats.dtype == jnp.float32
    assert bool(jnp.all(jnp.isfinite(feats)))
    print("KERNEL_OK")
</pallas_src>

<mosaic_0001>
module attributes {stable_mosaic.version = 11 : i64} {
  func.func @_fused_gemm_kernel(%arg0: i32, %arg1: i32, %arg2: i32, %arg3: memref<512x256xbf16, #tpu.memory_space<vmem>>, %arg4: memref<256x128xbf16, #tpu.memory_space<vmem>>, %arg5: memref<1x128xf32, #tpu.memory_space<vmem>>, %arg6: memref<1x128xf32, #tpu.memory_space<vmem>>, %arg7: memref<512x128xf32, #tpu.memory_space<vmem>>, %arg8: memref<512x128xf32, #tpu.memory_space<vmem>>) attributes {dimension_semantics = [#tpu.dimension_semantics<parallel>, #tpu.dimension_semantics<parallel>, #tpu.dimension_semantics<arbitrary>], iteration_bounds = array<i64: 1, 1, 1>, scalar_prefetch = 0 : i64, scratch_operands = 1 : i64, tpu.core_type = #tpu.core_type<tc>, window_params = [{transform_indices = @transform_0, window_bounds = array<i64: 512, 256>}, {transform_indices = @transform_1, window_bounds = array<i64: 256, 128>}, {transform_indices = @transform_2, window_bounds = array<i64: 1, 128>}, {transform_indices = @transform_3, window_bounds = array<i64: 1, 128>}, {transform_indices = @transform_4, window_bounds = array<i64: 512, 128>}]} {
    %c0_i32 = arith.constant 0 : i32
    %0 = arith.cmpi eq, %arg2, %c0_i32 : i32
    %1 = arith.extui %0 : i1 to i32
    %c0_i32_0 = arith.constant 0 : i32
    %2 = arith.cmpi ne, %1, %c0_i32_0 : i32
    scf.if %2 {
      %cst_10 = arith.constant 0.000000e+00 : f32
      %12 = vector.broadcast %cst_10 : f32 to vector<512x128xf32>
      %c0_11 = arith.constant 0 : index
      %c0_12 = arith.constant 0 : index
      %13 = vector.load %arg8[%c0_11, %c0_12] : memref<512x128xf32, #tpu.memory_space<vmem>>, vector<512x128xf32>
      tpu.vector_store %arg8[%c0_11, %c0_12], %12 {strides = array<i32>} : memref<512x128xf32, #tpu.memory_space<vmem>>, vector<512x128xf32>,
    } else {
    }
    %c0 = arith.constant 0 : index
    %c0_1 = arith.constant 0 : index
    %3 = vector.load %arg8[%c0, %c0_1] : memref<512x128xf32, #tpu.memory_space<vmem>>, vector<512x128xf32>
    %c0_2 = arith.constant 0 : index
    %c0_3 = arith.constant 0 : index
    %4 = vector.load %arg3[%c0_2, %c0_3] : memref<512x256xbf16, #tpu.memory_space<vmem>>, vector<512x256xbf16>
    %c0_4 = arith.constant 0 : index
    %c0_5 = arith.constant 0 : index
    %5 = vector.load %arg4[%c0_4, %c0_5] : memref<256x128xbf16, #tpu.memory_space<vmem>>, vector<256x128xbf16>
    %cst = arith.constant dense<0.000000e+00> : vector<512x128xf32>
    %6 = tpu.matmul %4, %5, %cst {dimension_numbers = #tpu.dot_dimension_numbers<[1], [0], [0], [1], [0, 0, 1, 1], [], []>} : vector<512x256xbf16>, vector<256x128xbf16>, vector<512x128xf32> -> vector<512x128xf32>
    %7 = arith.addf %3, %6 : vector<512x128xf32>
    %c0_6 = arith.constant 0 : index
    %c0_7 = arith.constant 0 : index
    %8 = vector.load %arg8[%c0_6, %c0_7] : memref<512x128xf32, #tpu.memory_space<vmem>>, vector<512x128xf32>
    tpu.vector_store %arg8[%c0_6, %c0_7], %7 {strides = array<i32>} : memref<512x128xf32, #tpu.memory_space<vmem>>, vector<512x128xf32>,
    %c0_i32_8 = arith.constant 0 : i32
    %9 = arith.cmpi eq, %arg2, %c0_i32_8 : i32
    %10 = arith.extui %9 : i1 to i32
    %c0_i32_9 = arith.constant 0 : i32
    %11 = arith.cmpi ne, %10, %c0_i32_9 : i32
    scf.if %11 {
      %c0_10 = arith.constant 0 : index
      %c0_11 = arith.constant 0 : index
      %12 = vector.load %arg8[%c0_10, %c0_11] : memref<512x128xf32, #tpu.memory_space<vmem>>, vector<512x128xf32>
      %c0_12 = arith.constant 0 : index
      %c0_13 = arith.constant 0 : index
      %13 = vector.load %arg5[%c0_12, %c0_13] : memref<1x128xf32, #tpu.memory_space<vmem>>, vector<1x128xf32>
      %14 = vector.broadcast %13 : vector<1x128xf32> to vector<512x128xf32>
      %15 = arith.mulf %12, %14 : vector<512x128xf32>
      %c0_14 = arith.constant 0 : index
      %c0_15 = arith.constant 0 : index
      %16 = vector.load %arg6[%c0_14, %c0_15] : memref<1x128xf32, #tpu.memory_space<vmem>>, vector<1x128xf32>
      %17 = vector.broadcast %16 : vector<1x128xf32> to vector<512x128xf32>
      %18 = arith.addf %15, %17 : vector<512x128xf32>
      %cst_16 = arith.constant 0.000000e+00 : f32
      %19 = vector.broadcast %cst_16 : f32 to vector<512x128xf32>
      %20 = arith.maximumf %18, %19 : vector<512x128xf32>
      %c0_17 = arith.constant 0 : index
      %c0_18 = arith.constant 0 : index
      %21 = vector.load %arg7[%c0_17, %c0_18] : memref<512x128xf32, #tpu.memory_space<vmem>>, vector<512x128xf32>
      tpu.vector_store %arg7[%c0_17, %c0_18], %20 {strides = array<i32>} : memref<512x128xf32, #tpu.memory_space<vmem>>, vector<512x128xf32>,
    } else {
    }
    return
  }
  func.func @transform_0(%arg0: i32, %arg1: i32, %arg2: i32) -> (i32, i32) {
    %c0_i32 = arith.constant 0 : i32
    return %arg0, %arg2 : i32, i32
  }
  func.func @transform_1(%arg0: i32, %arg1: i32, %arg2: i32) -> (i32, i32) {
    %c0_i32 = arith.constant 0 : i32
    return %arg2, %arg1 : i32, i32
  }
  func.func @transform_2(%arg0: i32, %arg1: i32, %arg2: i32) -> (i32, i32) {
    %c0_i32 = arith.constant 0 : i32
    %c0_i32_0 = arith.constant 0 : i32
    return %c0_i32, %arg1 : i32, i32
  }
  func.func @transform_3(%arg0: i32, %arg1: i32, %arg2: i32) -> (i32, i32) {
    %c0_i32 = arith.constant 0 : i32
    %c0_i32_0 = arith.constant 0 : i32
    return %c0_i32, %arg1 : i32, i32
  }
  func.func @transform_4(%arg0: i32, %arg1: i32, %arg2: i32) -> (i32, i32) {
    %c0_i32 = arith.constant 0 : i32
    return %arg0, %arg1 : i32, i32
  }
}

module attributes {stable_mosaic.version = 11 : i64} {
  func.func @_fused_gemm_kernel(%arg0: i32, %arg1: i32, %arg2: i32, %arg3: memref<128x384xbf16, #tpu.memory_space<vmem>>, %arg4: memref<384x128xbf16, #tpu.memory_space<vmem>>, %arg5: memref<1x128xf32, #tpu.memory_space<vmem>>, %arg6: memref<1x128xf32, #tpu.memory_space<vmem>>, %arg7: memref<128x128xf32, #tpu.memory_space<vmem>>, %arg8: memref<128x128xf32, #tpu.memory_space<vmem>>) attributes {dimension_semantics = [#tpu.dimension_semantics<parallel>, #tpu.dimension_semantics<parallel>, #tpu.dimension_semantics<arbitrary>], iteration_bounds = array<i64: 1, 1, 3>, scalar_prefetch = 0 : i64, scratch_operands = 1 : i64, tpu.core_type = #tpu.core_type<tc>, window_params = [{transform_indices = @transform_0, window_bounds = array<i64: 128, 384>}, {transform_indices = @transform_1, window_bounds = array<i64: 384, 128>}, {transform_indices = @transform_2, window_bounds = array<i64: 1, 128>}, {transform_indices = @transform_3, window_bounds = array<i64: 1, 128>}, {transform_indices = @transform_4, window_bounds = array<i64: 128, 128>}]} {
    %c0_i32 = arith.constant 0 : i32
    %0 = arith.cmpi eq, %arg2, %c0_i32 : i32
    %1 = arith.extui %0 : i1 to i32
    %c0_i32_0 = arith.constant 0 : i32
    %2 = arith.cmpi ne, %1, %c0_i32_0 : i32
    scf.if %2 {
      %cst_9 = arith.constant 0.000000e+00 : f32
      %12 = vector.broadcast %cst_9 : f32 to vector<128x128xf32>
      %c0_10 = arith.constant 0 : index
      %c0_11 = arith.constant 0 : index
      %13 = vector.load %arg8[%c0_10, %c0_11] : memref<128x128xf32, #tpu.memory_space<vmem>>, vector<128x128xf32>
      tpu.vector_store %arg8[%c0_10, %c0_11], %12 {strides = array<i32>} : memref<128x128xf32, #tpu.memory_space<vmem>>, vector<128x128xf32>,
    } else {
    }
    %c0 = arith.constant 0 : index
    %c0_1 = arith.constant 0 : index
    %3 = vector.load %arg8[%c0, %c0_1] : memref<128x128xf32, #tpu.memory_space<vmem>>, vector<128x128xf32>
    %c0_2 = arith.constant 0 : index
    %c0_3 = arith.constant 0 : index
    %4 = vector.load %arg3[%c0_2, %c0_3] : memref<128x384xbf16, #tpu.memory_space<vmem>>, vector<128x384xbf16>
    %c0_4 = arith.constant 0 : index
    %c0_5 = arith.constant 0 : index
    %5 = vector.load %arg4[%c0_4, %c0_5] : memref<384x128xbf16, #tpu.memory_space<vmem>>, vector<384x128xbf16>
    %cst = arith.constant dense<0.000000e+00> : vector<128x128xf32>
    %6 = tpu.matmul %4, %5, %cst {dimension_numbers = #tpu.dot_dimension_numbers<[1], [0], [0], [1], [0, 0, 1, 1], [], []>} : vector<128x384xbf16>, vector<384x128xbf16>, vector<128x128xf32> -> vector<128x128xf32>
    %7 = arith.addf %3, %6 : vector<128x128xf32>
    %c0_6 = arith.constant 0 : index
    %c0_7 = arith.constant 0 : index
    %8 = vector.load %arg8[%c0_6, %c0_7] : memref<128x128xf32, #tpu.memory_space<vmem>>, vector<128x128xf32>
    tpu.vector_store %arg8[%c0_6, %c0_7], %7 {strides = array<i32>} : memref<128x128xf32, #tpu.memory_space<vmem>>, vector<128x128xf32>,
    %c2_i32 = arith.constant 2 : i32
    %9 = arith.cmpi eq, %arg2, %c2_i32 : i32
    %10 = arith.extui %9 : i1 to i32
    %c0_i32_8 = arith.constant 0 : i32
    %11 = arith.cmpi ne, %10, %c0_i32_8 : i32
    scf.if %11 {
      %c0_9 = arith.constant 0 : index
      %c0_10 = arith.constant 0 : index
      %12 = vector.load %arg8[%c0_9, %c0_10] : memref<128x128xf32, #tpu.memory_space<vmem>>, vector<128x128xf32>
      %c0_11 = arith.constant 0 : index
      %c0_12 = arith.constant 0 : index
      %13 = vector.load %arg5[%c0_11, %c0_12] : memref<1x128xf32, #tpu.memory_space<vmem>>, vector<1x128xf32>
      %14 = vector.broadcast %13 : vector<1x128xf32> to vector<128x128xf32>
      %15 = arith.mulf %12, %14 : vector<128x128xf32>
      %c0_13 = arith.constant 0 : index
      %c0_14 = arith.constant 0 : index
      %16 = vector.load %arg6[%c0_13, %c0_14] : memref<1x128xf32, #tpu.memory_space<vmem>>, vector<1x128xf32>
      %17 = vector.broadcast %16 : vector<1x128xf32> to vector<128x128xf32>
      %18 = arith.addf %15, %17 : vector<128x128xf32>
      %cst_15 = arith.constant 0.000000e+00 : f32
      %19 = vector.broadcast %cst_15 : f32 to vector<128x128xf32>
      %20 = arith.maximumf %18, %19 : vector<128x128xf32>
      %c0_16 = arith.constant 0 : index
      %c0_17 = arith.constant 0 : index
      %21 = vector.load %arg7[%c0_16, %c0_17] : memref<128x128xf32, #tpu.memory_space<vmem>>, vector<128x128xf32>
      tpu.vector_store %arg7[%c0_16, %c0_17], %20 {strides = array<i32>} : memref<128x128xf32, #tpu.memory_space<vmem>>, vector<128x128xf32>,
    } else {
    }
    return
  }
  func.func @transform_0(%arg0: i32, %arg1: i32, %arg2: i32) -> (i32, i32) {
    %c0_i32 = arith.constant 0 : i32
    return %arg0, %arg2 : i32, i32
  }
  func.func @transform_1(%arg0: i32, %arg1: i32, %arg2: i32) -> (i32, i32) {
    %c0_i32 = arith.constant 0 : i32
    return %arg2, %arg1 : i32, i32
  }
  func.func @transform_2(%arg0: i32, %arg1: i32, %arg2: i32) -> (i32, i32) {
    %c0_i32 = arith.constant 0 : i32
    %c0_i32_0 = arith.constant 0 : i32
    return %c0_i32, %arg1 : i32, i32
  }
  func.func @transform_3(%arg0: i32, %arg1: i32, %arg2: i32) -> (i32, i32) {
    %c0_i32 = arith.constant 0 : i32
    %c0_i32_0 = arith.constant 0 : i32
    return %c0_i32, %arg1 : i32, i32
  }
  func.func @transform_4(%arg0: i32, %arg1: i32, %arg2: i32) -> (i32, i32) {
    %c0_i32 = arith.constant 0 : i32
    return %arg0, %arg1 : i32, i32
  }
}

module attributes {stable_mosaic.version = 11 : i64} {
  func.func @_fused_gemm_kernel(%arg0: i32, %arg1: i32, %arg2: i32, %arg3: memref<128x384xbf16, #tpu.memory_space<vmem>>, %arg4: memref<384x128xbf16, #tpu.memory_space<vmem>>, %arg5: memref<1x128xf32, #tpu.memory_space<vmem>>, %arg6: memref<1x128xf32, #tpu.memory_space<vmem>>, %arg7: memref<128x128xf32, #tpu.memory_space<vmem>>, %arg8: memref<128x128xf32, #tpu.memory_space<vmem>>, %arg9: memref<128x128xf32, #tpu.memory_space<vmem>>) attributes {dimension_semantics = [#tpu.dimension_semantics<parallel>, #tpu.dimension_semantics<parallel>, #tpu.dimension_semantics<arbitrary>], iteration_bounds = array<i64: 1, 1, 3>, scalar_prefetch = 0 : i64, scratch_operands = 1 : i64, tpu.core_type = #tpu.core_type<tc>, window_params = [{transform_indices = @transform_0, window_bounds = array<i64: 128, 384>}, {transform_indices = @transform_1, window_bounds = array<i64: 384, 128>}, {transform_indices = @transform_2, window_bounds = array<i64: 1, 128>}, {transform_indices = @transform_3, window_bounds = array<i64: 1, 128>}, {transform_indices = @transform_4, window_bounds = array<i64: 128, 128>}, {transform_indices = @transform_5, window_bounds = array<i64: 128, 128>}]} {
    %c0_i32 = arith.constant 0 : i32
    %0 = arith.cmpi eq, %arg2, %c0_i32 : i32
    %1 = arith.extui %0 : i1 to i32
    %c0_i32_0 = arith.constant 0 : i32
    %2 = arith.cmpi ne, %1, %c0_i32_0 : i32
    scf.if %2 {
      %cst_9 = arith.constant 0.000000e+00 : f32
      %12 = vector.broadcast %cst_9 : f32 to vector<128x128xf32>
      %c0_10 = arith.constant 0 : index
      %c0_11 = arith.constant 0 : index
      %13 = vector.load %arg9[%c0_10, %c0_11] : memref<128x128xf32, #tpu.memory_space<vmem>>, vector<128x128xf32>
      tpu.vector_store %arg9[%c0_10, %c0_11], %12 {strides = array<i32>} : memref<128x128xf32, #tpu.memory_space<vmem>>, vector<128x128xf32>,
    } else {
    }
    %c0 = arith.constant 0 : index
    %c0_1 = arith.constant 0 : index
    %3 = vector.load %arg9[%c0, %c0_1] : memref<128x128xf32, #tpu.memory_space<vmem>>, vector<128x128xf32>
    %c0_2 = arith.constant 0 : index
    %c0_3 = arith.constant 0 : index
    %4 = vector.load %arg3[%c0_2, %c0_3] : memref<128x384xbf16, #tpu.memory_space<vmem>>, vector<128x384xbf16>
    %c0_4 = arith.constant 0 : index
    %c0_5 = arith.constant 0 : index
    %5 = vector.load %arg4[%c0_4, %c0_5] : memref<384x128xbf16, #tpu.memory_space<vmem>>, vector<384x128xbf16>
    %cst = arith.constant dense<0.000000e+00> : vector<128x128xf32>
    %6 = tpu.matmul %4, %5, %cst {dimension_numbers = #tpu.dot_dimension_numbers<[1], [0], [0], [1], [0, 0, 1, 1], [], []>} : vector<128x384xbf16>, vector<384x128xbf16>, vector<128x128xf32> -> vector<128x128xf32>
    %7 = arith.addf %3, %6 : vector<128x128xf32>
    %c0_6 = arith.constant 0 : index
    %c0_7 = arith.constant 0 : index
    %8 = vector.load %arg9[%c0_6, %c0_7] : memref<128x128xf32, #tpu.memory_space<vmem>>, vector<128x128xf32>
    tpu.vector_store %arg9[%c0_6, %c0_7], %7 {strides = array<i32>} : memref<128x128xf32, #tpu.memory_space<vmem>>, vector<128x128xf32>,
    %c2_i32 = arith.constant 2 : i32
    %9 = arith.cmpi eq, %arg2, %c2_i32 : i32
    %10 = arith.extui %9 : i1 to i32
    %c0_i32_8 = arith.constant 0 : i32
    %11 = arith.cmpi ne, %10, %c0_i32_8 : i32
    scf.if %11 {
      %c0_9 = arith.constant 0 : index
      %c0_10 = arith.constant 0 : index
      %12 = vector.load %arg9[%c0_9, %c0_10] : memref<128x128xf32, #tpu.memory_space<vmem>>, vector<128x128xf32>
      %c0_11 = arith.constant 0 : index
      %c0_12 = arith.constant 0 : index
      %13 = vector.load %arg5[%c0_11, %c0_12] : memref<1x128xf32, #tpu.memory_space<vmem>>, vector<1x128xf32>
      %14 = vector.broadcast %13 : vector<1x128xf32> to vector<128x128xf32>
      %15 = arith.mulf %12, %14 : vector<128x128xf32>
      %c0_13 = arith.constant 0 : index
      %c0_14 = arith.constant 0 : index
      %16 = vector.load %arg6[%c0_13, %c0_14] : memref<1x128xf32, #tpu.memory_space<vmem>>, vector<1x128xf32>
      %17 = vector.broadcast %16 : vector<1x128xf32> to vector<128x128xf32>
      %18 = arith.addf %15, %17 : vector<128x128xf32>
      %c0_15 = arith.constant 0 : index
      %c0_16 = arith.constant 0 : index
      %19 = vector.load %arg7[%c0_15, %c0_16] : memref<128x128xf32, #tpu.memory_space<vmem>>, vector<128x128xf32>
      %20 = arith.addf %18, %19 : vector<128x128xf32>
      %cst_17 = arith.constant 0.000000e+00 : f32
      %21 = vector.broadcast %cst_17 : f32 to vector<128x128xf32>
      %22 = arith.maximumf %20, %21 : vector<128x128xf32>
      %c0_18 = arith.constant 0 : index
      %c0_19 = arith.constant 0 : index
      %23 = vector.load %arg8[%c0_18, %c0_19] : memref<128x128xf32, #tpu.memory_space<vmem>>, vector<128x128xf32>
      tpu.vector_store %arg8[%c0_18, %c0_19], %22 {strides = array<i32>} : memref<128x128xf32, #tpu.memory_space<vmem>>, vector<128x128xf32>,
    } else {
    }
    return
  }
  func.func @transform_0(%arg0: i32, %arg1: i32, %arg2: i32) -> (i32, i32) {
    %c0_i32 = arith.constant 0 : i32
    return %arg0, %arg2 : i32, i32
  }
  func.func @transform_1(%arg0: i32, %arg1: i32, %arg2: i32) -> (i32, i32) {
    %c0_i32 = arith.constant 0 : i32
    return %arg2, %arg1 : i32, i32
  }
  func.func @transform_2(%arg0: i32, %arg1: i32, %arg2: i32) -> (i32, i32) {
    %c0_i32 = arith.constant 0 : i32
    %c0_i32_0 = arith.constant 0 : i32
    return %c0_i32, %arg1 : i32, i32
  }
  func.func @transform_3(%arg0: i32, %arg1: i32, %arg2: i32) -> (i32, i32) {
    %c0_i32 = arith.constant 0 : i32
    %c0_i32_0 = arith.constant 0 : i32
    return %c0_i32, %arg1 : i32, i32
  }
  func.func @transform_4(%arg0: i32, %arg1: i32, %arg2: i32) -> (i32, i32) {
    %c0_i32 = arith.constant 0 : i32
    return %arg0, %arg1 : i32, i32
  }
  func.func @transform_5(%arg0: i32, %arg1: i32, %arg2: i32) -> (i32, i32) {
    %c0_i32 = arith.constant 0 : i32
    return %arg0, %arg1 : i32, i32
  }
}

module attributes {stable_mosaic.version = 11 : i64} {
  func.func @_fused_gemm_kernel(%arg0: i32, %arg1: i32, %arg2: i32, %arg3: memref<32x384xbf16, #tpu.memory_space<vmem>>, %arg4: memref<384x128xbf16, #tpu.memory_space<vmem>>, %arg5: memref<1x128xf32, #tpu.memory_space<vmem>>, %arg6: memref<1x128xf32, #tpu.memory_space<vmem>>, %arg7: memref<32x128xf32, #tpu.memory_space<vmem>>, %arg8: memref<32x128xf32, #tpu.memory_space<vmem>>) attributes {dimension_semantics = [#tpu.dimension_semantics<parallel>, #tpu.dimension_semantics<parallel>, #tpu.dimension_semantics<arbitrary>], iteration_bounds = array<i64: 1, 1, 3>, scalar_prefetch = 0 : i64, scratch_operands = 1 : i64, tpu.core_type = #tpu.core_type<tc>, window_params = [{transform_indices = @transform_0, window_bounds = array<i64: 32, 384>}, {transform_indices = @transform_1, window_bounds = array<i64: 384, 128>}, {transform_indices = @transform_2, window_bounds = array<i64: 1, 128>}, {transform_indices = @transform_3, window_bounds = array<i64: 1, 128>}, {transform_indices = @transform_4, window_bounds = array<i64: 32, 128>}]} {
    %c0_i32 = arith.constant 0 : i32
    %0 = arith.cmpi eq, %arg2, %c0_i32 : i32
    %1 = arith.extui %0 : i1 to i32
    %c0_i32_0 = arith.constant 0 : i32
    %2 = arith.cmpi ne, %1, %c0_i32_0 : i32
    scf.if %2 {
      %cst_9 = arith.constant 0.000000e+00 : f32
      %12 = vector.broadcast %cst_9 : f32 to vector<32x128xf32>
      %c0_10 = arith.constant 0 : index
      %c0_11 = arith.constant 0 : index
      %13 = vector.load %arg8[%c0_10, %c0_11] : memref<32x128xf32, #tpu.memory_space<vmem>>, vector<32x128xf32>
      tpu.vector_store %arg8[%c0_10, %c0_11], %12 {strides = array<i32>} : memref<32x128xf32, #tpu.memory_space<vmem>>, vector<32x128xf32>,
    } else {
    }
    %c0 = arith.constant 0 : index
    %c0_1 = arith.constant 0 : index
    %3 = vector.load %arg8[%c0, %c0_1] : memref<32x128xf32, #tpu.memory_space<vmem>>, vector<32x128xf32>
    %c0_2 = arith.constant 0 : index
    %c0_3 = arith.constant 0 : index
    %4 = vector.load %arg3[%c0_2, %c0_3] : memref<32x384xbf16, #tpu.memory_space<vmem>>, vector<32x384xbf16>
    %c0_4 = arith.constant 0 : index
    %c0_5 = arith.constant 0 : index
    %5 = vector.load %arg4[%c0_4, %c0_5] : memref<384x128xbf16, #tpu.memory_space<vmem>>, vector<384x128xbf16>
    %cst = arith.constant dense<0.000000e+00> : vector<32x128xf32>
    %6 = tpu.matmul %4, %5, %cst {dimension_numbers = #tpu.dot_dimension_numbers<[1], [0], [0], [1], [0, 0, 1, 1], [], []>} : vector<32x384xbf16>, vector<384x128xbf16>, vector<32x128xf32> -> vector<32x128xf32>
    %7 = arith.addf %3, %6 : vector<32x128xf32>
    %c0_6 = arith.constant 0 : index
    %c0_7 = arith.constant 0 : index
    %8 = vector.load %arg8[%c0_6, %c0_7] : memref<32x128xf32, #tpu.memory_space<vmem>>, vector<32x128xf32>
    tpu.vector_store %arg8[%c0_6, %c0_7], %7 {strides = array<i32>} : memref<32x128xf32, #tpu.memory_space<vmem>>, vector<32x128xf32>,
    %c2_i32 = arith.constant 2 : i32
    %9 = arith.cmpi eq, %arg2, %c2_i32 : i32
    %10 = arith.extui %9 : i1 to i32
    %c0_i32_8 = arith.constant 0 : i32
    %11 = arith.cmpi ne, %10, %c0_i32_8 : i32
    scf.if %11 {
      %c0_9 = arith.constant 0 : index
      %c0_10 = arith.constant 0 : index
      %12 = vector.load %arg8[%c0_9, %c0_10] : memref<32x128xf32, #tpu.memory_space<vmem>>, vector<32x128xf32>
      %c0_11 = arith.constant 0 : index
      %c0_12 = arith.constant 0 : index
      %13 = vector.load %arg5[%c0_11, %c0_12] : memref<1x128xf32, #tpu.memory_space<vmem>>, vector<1x128xf32>
      %14 = vector.broadcast %13 : vector<1x128xf32> to vector<32x128xf32>
      %15 = arith.mulf %12, %14 : vector<32x128xf32>
      %c0_13 = arith.constant 0 : index
      %c0_14 = arith.constant 0 : index
      %16 = vector.load %arg6[%c0_13, %c0_14] : memref<1x128xf32, #tpu.memory_space<vmem>>, vector<1x128xf32>
      %17 = vector.broadcast %16 : vector<1x128xf32> to vector<32x128xf32>
      %18 = arith.addf %15, %17 : vector<32x128xf32>
      %cst_15 = arith.constant 0.000000e+00 : f32
      %19 = vector.broadcast %cst_15 : f32 to vector<32x128xf32>
      %20 = arith.maximumf %18, %19 : vector<32x128xf32>
      %c0_16 = arith.constant 0 : index
      %c0_17 = arith.constant 0 : index
      %21 = vector.load %arg7[%c0_16, %c0_17] : memref<32x128xf32, #tpu.memory_space<vmem>>, vector<32x128xf32>
      tpu.vector_store %arg7[%c0_16, %c0_17], %20 {strides = array<i32>} : memref<32x128xf32, #tpu.memory_space<vmem>>, vector<32x128xf32>,
    } else {
    }
    return
  }
  func.func @transform_0(%arg0: i32, %arg1: i32, %arg2: i32) -> (i32, i32) {
    %c0_i32 = arith.constant 0 : i32
    return %arg0, %arg2 : i32, i32
  }
  func.func @transform_1(%arg0: i32, %arg1: i32, %arg2: i32) -> (i32, i32) {
    %c0_i32 = arith.constant 0 : i32
    return %arg2, %arg1 : i32, i32
  }
  func.func @transform_2(%arg0: i32, %arg1: i32, %arg2: i32) -> (i32, i32) {
    %c0_i32 = arith.constant 0 : i32
    %c0_i32_0 = arith.constant 0 : i32
    return %c0_i32, %arg1 : i32, i32
  }
  func.func @transform_3(%arg0: i32, %arg1: i32, %arg2: i32) -> (i32, i32) {
    %c0_i32 = arith.constant 0 : i32
    %c0_i32_0 = arith.constant 0 : i32
    return %c0_i32, %arg1 : i32, i32
  }
  func.func @transform_4(%arg0: i32, %arg1: i32, %arg2: i32) -> (i32, i32) {
    %c0_i32 = arith.constant 0 : i32
    return %arg0, %arg1 : i32, i32
  }
}

module attributes {stable_mosaic.version = 11 : i64} {
  func.func @_fused_gemm_kernel(%arg0: i32, %arg1: i32, %arg2: i32, %arg3: memref<32x128xbf16, #tpu.memory_space<vmem>>, %arg4: memref<128x128xbf16, #tpu.memory_space<vmem>>, %arg5: memref<1x128xf32, #tpu.memory_space<vmem>>, %arg6: memref<1x128xf32, #tpu.memory_space<vmem>>, %arg7: memref<32x128xf32, #tpu.memory_space<vmem>>, %arg8: memref<32x128xf32, #tpu.memory_space<vmem>>) attributes {dimension_semantics = [#tpu.dimension_semantics<parallel>, #tpu.dimension_semantics<parallel>, #tpu.dimension_semantics<arbitrary>], iteration_bounds = array<i64: 1, 1, 1>, scalar_prefetch = 0 : i64, scratch_operands = 1 : i64, tpu.core_type = #tpu.core_type<tc>, window_params = [{transform_indices = @transform_0, window_bounds = array<i64: 32, 128>}, {transform_indices = @transform_1, window_bounds = array<i64: 128, 128>}, {transform_indices = @transform_2, window_bounds = array<i64: 1, 128>}, {transform_indices = @transform_3, window_bounds = array<i64: 1, 128>}, {transform_indices = @transform_4, window_bounds = array<i64: 32, 128>}]} {
    %c0_i32 = arith.constant 0 : i32
    %0 = arith.cmpi eq, %arg2, %c0_i32 : i32
    %1 = arith.extui %0 : i1 to i32
    %c0_i32_0 = arith.constant 0 : i32
    %2 = arith.cmpi ne, %1, %c0_i32_0 : i32
    scf.if %2 {
      %cst_10 = arith.constant 0.000000e+00 : f32
      %12 = vector.broadcast %cst_10 : f32 to vector<32x128xf32>
      %c0_11 = arith.constant 0 : index
      %c0_12 = arith.constant 0 : index
      %13 = vector.load %arg8[%c0_11, %c0_12] : memref<32x128xf32, #tpu.memory_space<vmem>>, vector<32x128xf32>
      tpu.vector_store %arg8[%c0_11, %c0_12], %12 {strides = array<i32>} : memref<32x128xf32, #tpu.memory_space<vmem>>, vector<32x128xf32>,
    } else {
    }
    %c0 = arith.constant 0 : index
    %c0_1 = arith.constant 0 : index
    %3 = vector.load %arg8[%c0, %c0_1] : memref<32x128xf32, #tpu.memory_space<vmem>>, vector<32x128xf32>
    %c0_2 = arith.constant 0 : index
    %c0_3 = arith.constant 0 : index
    %4 = vector.load %arg3[%c0_2, %c0_3] : memref<32x128xbf16, #tpu.memory_space<vmem>>, vector<32x128xbf16>
    %c0_4 = arith.constant 0 : index
    %c0_5 = arith.constant 0 : index
    %5 = vector.load %arg4[%c0_4, %c0_5] : memref<128x128xbf16, #tpu.memory_space<vmem>>, vector<128x128xbf16>
    %cst = arith.constant dense<0.000000e+00> : vector<32x128xf32>
    %6 = tpu.matmul %4, %5, %cst {dimension_numbers = #tpu.dot_dimension_numbers<[1], [0], [0], [1], [0, 0, 1, 1], [], []>} : vector<32x128xbf16>, vector<128x128xbf16>, vector<32x128xf32> -> vector<32x128xf32>
    %7 = arith.addf %3, %6 : vector<32x128xf32>
    %c0_6 = arith.constant 0 : index
    %c0_7 = arith.constant 0 : index
    %8 = vector.load %arg8[%c0_6, %c0_7] : memref<32x128xf32, #tpu.memory_space<vmem>>, vector<32x128xf32>
    tpu.vector_store %arg8[%c0_6, %c0_7], %7 {strides = array<i32>} : memref<32x128xf32, #tpu.memory_space<vmem>>, vector<32x128xf32>,
    %c0_i32_8 = arith.constant 0 : i32
    %9 = arith.cmpi eq, %arg2, %c0_i32_8 : i32
    %10 = arith.extui %9 : i1 to i32
    %c0_i32_9 = arith.constant 0 : i32
    %11 = arith.cmpi ne, %10, %c0_i32_9 : i32
    scf.if %11 {
      %c0_10 = arith.constant 0 : index
      %c0_11 = arith.constant 0 : index
      %12 = vector.load %arg8[%c0_10, %c0_11] : memref<32x128xf32, #tpu.memory_space<vmem>>, vector<32x128xf32>
      %c0_12 = arith.constant 0 : index
      %c0_13 = arith.constant 0 : index
      %13 = vector.load %arg5[%c0_12, %c0_13] : memref<1x128xf32, #tpu.memory_space<vmem>>, vector<1x128xf32>
      %14 = vector.broadcast %13 : vector<1x128xf32> to vector<32x128xf32>
      %15 = arith.mulf %12, %14 : vector<32x128xf32>
      %c0_14 = arith.constant 0 : index
      %c0_15 = arith.constant 0 : index
      %16 = vector.load %arg6[%c0_14, %c0_15] : memref<1x128xf32, #tpu.memory_space<vmem>>, vector<1x128xf32>
      %17 = vector.broadcast %16 : vector<1x128xf32> to vector<32x128xf32>
      %18 = arith.addf %15, %17 : vector<32x128xf32>
      %c0_16 = arith.constant 0 : index
      %c0_17 = arith.constant 0 : index
      %19 = vector.load %arg7[%c0_16, %c0_17] : memref<32x128xf32, #tpu.memory_space<vmem>>, vector<32x128xf32>
      tpu.vector_store %arg7[%c0_16, %c0_17], %18 {strides = array<i32>} : memref<32x128xf32, #tpu.memory_space<vmem>>, vector<32x128xf32>,
    } else {
    }
    return
  }
  func.func @transform_0(%arg0: i32, %arg1: i32, %arg2: i32) -> (i32, i32) {
    %c0_i32 = arith.constant 0 : i32
    return %arg0, %arg2 : i32, i32
  }
  func.func @transform_1(%arg0: i32, %arg1: i32, %arg2: i32) -> (i32, i32) {
    %c0_i32 = arith.constant 0 : i32
    return %arg2, %arg1 : i32, i32
  }
  func.func @transform_2(%arg0: i32, %arg1: i32, %arg2: i32) -> (i32, i32) {
    %c0_i32 = arith.constant 0 : i32
    %c0_i32_0 = arith.constant 0 : i32
    return %c0_i32, %arg1 : i32, i32
  }
  func.func @transform_3(%arg0: i32, %arg1: i32, %arg2: i32) -> (i32, i32) {
    %c0_i32 = arith.constant 0 : i32
    %c0_i32_0 = arith.constant 0 : i32
    return %c0_i32, %arg1 : i32, i32
  }
  func.func @transform_4(%arg0: i32, %arg1: i32, %arg2: i32) -> (i32, i32) {
    %c0_i32 = arith.constant 0 : i32
    return %arg0, %arg1 : i32, i32
  }
}

module attributes {stable_mosaic.version = 11 : i64} {
  func.func @_fused_gemm_kernel(%arg0: i32, %arg1: i32, %arg2: i32, %arg3: memref<32x384xbf16, #tpu.memory_space<vmem>>, %arg4: memref<384x128xbf16, #tpu.memory_space<vmem>>, %arg5: memref<1x128xf32, #tpu.memory_space<vmem>>, %arg6: memref<1x128xf32, #tpu.memory_space<vmem>>, %arg7: memref<32x128xf32, #tpu.memory_space<vmem>>, %arg8: memref<32x128xf32, #tpu.memory_space<vmem>>, %arg9: memref<32x128xf32, #tpu.memory_space<vmem>>) attributes {dimension_semantics = [#tpu.dimension_semantics<parallel>, #tpu.dimension_semantics<parallel>, #tpu.dimension_semantics<arbitrary>], iteration_bounds = array<i64: 1, 1, 3>, scalar_prefetch = 0 : i64, scratch_operands = 1 : i64, tpu.core_type = #tpu.core_type<tc>, window_params = [{transform_indices = @transform_0, window_bounds = array<i64: 32, 384>}, {transform_indices = @transform_1, window_bounds = array<i64: 384, 128>}, {transform_indices = @transform_2, window_bounds = array<i64: 1, 128>}, {transform_indices = @transform_3, window_bounds = array<i64: 1, 128>}, {transform_indices = @transform_4, window_bounds = array<i64: 32, 128>}, {transform_indices = @transform_5, window_bounds = array<i64: 32, 128>}]} {
    %c0_i32 = arith.constant 0 : i32
    %0 = arith.cmpi eq, %arg2, %c0_i32 : i32
    %1 = arith.extui %0 : i1 to i32
    %c0_i32_0 = arith.constant 0 : i32
    %2 = arith.cmpi ne, %1, %c0_i32_0 : i32
    scf.if %2 {
      %cst_9 = arith.constant 0.000000e+00 : f32
      %12 = vector.broadcast %cst_9 : f32 to vector<32x128xf32>
      %c0_10 = arith.constant 0 : index
      %c0_11 = arith.constant 0 : index
      %13 = vector.load %arg9[%c0_10, %c0_11] : memref<32x128xf32, #tpu.memory_space<vmem>>, vector<32x128xf32>
      tpu.vector_store %arg9[%c0_10, %c0_11], %12 {strides = array<i32>} : memref<32x128xf32, #tpu.memory_space<vmem>>, vector<32x128xf32>,
    } else {
    }
    %c0 = arith.constant 0 : index
    %c0_1 = arith.constant 0 : index
    %3 = vector.load %arg9[%c0, %c0_1] : memref<32x128xf32, #tpu.memory_space<vmem>>, vector<32x128xf32>
    %c0_2 = arith.constant 0 : index
    %c0_3 = arith.constant 0 : index
    %4 = vector.load %arg3[%c0_2, %c0_3] : memref<32x384xbf16, #tpu.memory_space<vmem>>, vector<32x384xbf16>
    %c0_4 = arith.constant 0 : index
    %c0_5 = arith.constant 0 : index
    %5 = vector.load %arg4[%c0_4, %c0_5] : memref<384x128xbf16, #tpu.memory_space<vmem>>, vector<384x128xbf16>
    %cst = arith.constant dense<0.000000e+00> : vector<32x128xf32>
    %6 = tpu.matmul %4, %5, %cst {dimension_numbers = #tpu.dot_dimension_numbers<[1], [0], [0], [1], [0, 0, 1, 1], [], []>} : vector<32x384xbf16>, vector<384x128xbf16>, vector<32x128xf32> -> vector<32x128xf32>
    %7 = arith.addf %3, %6 : vector<32x128xf32>
    %c0_6 = arith.constant 0 : index
    %c0_7 = arith.constant 0 : index
    %8 = vector.load %arg9[%c0_6, %c0_7] : memref<32x128xf32, #tpu.memory_space<vmem>>, vector<32x128xf32>
    tpu.vector_store %arg9[%c0_6, %c0_7], %7 {strides = array<i32>} : memref<32x128xf32, #tpu.memory_space<vmem>>, vector<32x128xf32>,
    %c2_i32 = arith.constant 2 : i32
    %9 = arith.cmpi eq, %arg2, %c2_i32 : i32
    %10 = arith.extui %9 : i1 to i32
    %c0_i32_8 = arith.constant 0 : i32
    %11 = arith.cmpi ne, %10, %c0_i32_8 : i32
    scf.if %11 {
      %c0_9 = arith.constant 0 : index
      %c0_10 = arith.constant 0 : index
      %12 = vector.load %arg9[%c0_9, %c0_10] : memref<32x128xf32, #tpu.memory_space<vmem>>, vector<32x128xf32>
      %c0_11 = arith.constant 0 : index
      %c0_12 = arith.constant 0 : index
      %13 = vector.load %arg5[%c0_11, %c0_12] : memref<1x128xf32, #tpu.memory_space<vmem>>, vector<1x128xf32>
      %14 = vector.broadcast %13 : vector<1x128xf32> to vector<32x128xf32>
      %15 = arith.mulf %12, %14 : vector<32x128xf32>
      %c0_13 = arith.constant 0 : index
      %c0_14 = arith.constant 0 : index
      %16 = vector.load %arg6[%c0_13, %c0_14] : memref<1x128xf32, #tpu.memory_space<vmem>>, vector<1x128xf32>
      %17 = vector.broadcast %16 : vector<1x128xf32> to vector<32x128xf32>
      %18 = arith.addf %15, %17 : vector<32x128xf32>
      %c0_15 = arith.constant 0 : index
      %c0_16 = arith.constant 0 : index
      %19 = vector.load %arg7[%c0_15, %c0_16] : memref<32x128xf32, #tpu.memory_space<vmem>>, vector<32x128xf32>
      %20 = arith.addf %18, %19 : vector<32x128xf32>
      %cst_17 = arith.constant 0.000000e+00 : f32
      %21 = vector.broadcast %cst_17 : f32 to vector<32x128xf32>
      %22 = arith.maximumf %20, %21 : vector<32x128xf32>
      %c0_18 = arith.constant 0 : index
      %c0_19 = arith.constant 0 : index
      %23 = vector.load %arg8[%c0_18, %c0_19] : memref<32x128xf32, #tpu.memory_space<vmem>>, vector<32x128xf32>
      tpu.vector_store %arg8[%c0_18, %c0_19], %22 {strides = array<i32>} : memref<32x128xf32, #tpu.memory_space<vmem>>, vector<32x128xf32>,
    } else {
    }
    return
  }
  func.func @transform_0(%arg0: i32, %arg1: i32, %arg2: i32) -> (i32, i32) {
    %c0_i32 = arith.constant 0 : i32
    return %arg0, %arg2 : i32, i32
  }
  func.func @transform_1(%arg0: i32, %arg1: i32, %arg2: i32) -> (i32, i32) {
    %c0_i32 = arith.constant 0 : i32
    return %arg2, %arg1 : i32, i32
  }
  func.func @transform_2(%arg0: i32, %arg1: i32, %arg2: i32) -> (i32, i32) {
    %c0_i32 = arith.constant 0 : i32
    %c0_i32_0 = arith.constant 0 : i32
    return %c0_i32, %arg1 : i32, i32
  }
  func.func @transform_3(%arg0: i32, %arg1: i32, %arg2: i32) -> (i32, i32) {
    %c0_i32 = arith.constant 0 : i32
    %c0_i32_0 = arith.constant 0 : i32
    return %c0_i32, %arg1 : i32, i32
  }
  func.func @transform_4(%arg0: i32, %arg1: i32, %arg2: i32) -> (i32, i32) {
    %c0_i32 = arith.constant 0 : i32
    return %arg0, %arg1 : i32, i32
  }
  func.func @transform_5(%arg0: i32, %arg1: i32, %arg2: i32) -> (i32, i32) {
    %c0_i32 = arith.constant 0 : i32
    return %arg0, %arg1 : i32, i32
  }
}

module attributes {stable_mosaic.version = 11 : i64} {
  func.func @_fused_gemm_kernel(%arg0: i32, %arg1: i32, %arg2: i32, %arg3: memref<8x384xbf16, #tpu.memory_space<vmem>>, %arg4: memref<384x256xbf16, #tpu.memory_space<vmem>>, %arg5: memref<1x256xf32, #tpu.memory_space<vmem>>, %arg6: memref<1x256xf32, #tpu.memory_space<vmem>>, %arg7: memref<8x256xf32, #tpu.memory_space<vmem>>, %arg8: memref<8x256xf32, #tpu.memory_space<vmem>>) attributes {dimension_semantics = [#tpu.dimension_semantics<parallel>, #tpu.dimension_semantics<parallel>, #tpu.dimension_semantics<arbitrary>], iteration_bounds = array<i64: 1, 1, 3>, scalar_prefetch = 0 : i64, scratch_operands = 1 : i64, tpu.core_type = #tpu.core_type<tc>, window_params = [{transform_indices = @transform_0, window_bounds = array<i64: 8, 384>}, {transform_indices = @transform_1, window_bounds = array<i64: 384, 256>}, {transform_indices = @transform_2, window_bounds = array<i64: 1, 256>}, {transform_indices = @transform_3, window_bounds = array<i64: 1, 256>}, {transform_indices = @transform_4, window_bounds = array<i64: 8, 256>}]} {
    %c0_i32 = arith.constant 0 : i32
    %0 = arith.cmpi eq, %arg2, %c0_i32 : i32
    %1 = arith.extui %0 : i1 to i32
    %c0_i32_0 = arith.constant 0 : i32
    %2 = arith.cmpi ne, %1, %c0_i32_0 : i32
    scf.if %2 {
      %cst_9 = arith.constant 0.000000e+00 : f32
      %12 = vector.broadcast %cst_9 : f32 to vector<8x256xf32>
      %c0_10 = arith.constant 0 : index
      %c0_11 = arith.constant 0 : index
      %13 = vector.load %arg8[%c0_10, %c0_11] : memref<8x256xf32, #tpu.memory_space<vmem>>, vector<8x256xf32>
      tpu.vector_store %arg8[%c0_10, %c0_11], %12 {strides = array<i32>} : memref<8x256xf32, #tpu.memory_space<vmem>>, vector<8x256xf32>,
    } else {
    }
    %c0 = arith.constant 0 : index
    %c0_1 = arith.constant 0 : index
    %3 = vector.load %arg8[%c0, %c0_1] : memref<8x256xf32, #tpu.memory_space<vmem>>, vector<8x256xf32>
    %c0_2 = arith.constant 0 : index
    %c0_3 = arith.constant 0 : index
    %4 = vector.load %arg3[%c0_2, %c0_3] : memref<8x384xbf16, #tpu.memory_space<vmem>>, vector<8x384xbf16>
    %c0_4 = arith.constant 0 : index
    %c0_5 = arith.constant 0 : index
    %5 = vector.load %arg4[%c0_4, %c0_5] : memref<384x256xbf16, #tpu.memory_space<vmem>>, vector<384x256xbf16>
    %cst = arith.constant dense<0.000000e+00> : vector<8x256xf32>
    %6 = tpu.matmul %4, %5, %cst {dimension_numbers = #tpu.dot_dimension_numbers<[1], [0], [0], [1], [0, 0, 1, 1], [], []>} : vector<8x384xbf16>, vector<384x256xbf16>, vector<8x256xf32> -> vector<8x256xf32>
    %7 = arith.addf %3, %6 : vector<8x256xf32>
    %c0_6 = arith.constant 0 : index
    %c0_7 = arith.constant 0 : index
    %8 = vector.load %arg8[%c0_6, %c0_7] : memref<8x256xf32, #tpu.memory_space<vmem>>, vector<8x256xf32>
    tpu.vector_store %arg8[%c0_6, %c0_7], %7 {strides = array<i32>} : memref<8x256xf32, #tpu.memory_space<vmem>>, vector<8x256xf32>,
    %c2_i32 = arith.constant 2 : i32
    %9 = arith.cmpi eq, %arg2, %c2_i32 : i32
    %10 = arith.extui %9 : i1 to i32
    %c0_i32_8 = arith.constant 0 : i32
    %11 = arith.cmpi ne, %10, %c0_i32_8 : i32
    scf.if %11 {
      %c0_9 = arith.constant 0 : index
      %c0_10 = arith.constant 0 : index
      %12 = vector.load %arg8[%c0_9, %c0_10] : memref<8x256xf32, #tpu.memory_space<vmem>>, vector<8x256xf32>
      %c0_11 = arith.constant 0 : index
      %c0_12 = arith.constant 0 : index
      %13 = vector.load %arg5[%c0_11, %c0_12] : memref<1x256xf32, #tpu.memory_space<vmem>>, vector<1x256xf32>
      %14 = vector.broadcast %13 : vector<1x256xf32> to vector<8x256xf32>
      %15 = arith.mulf %12, %14 : vector<8x256xf32>
      %c0_13 = arith.constant 0 : index
      %c0_14 = arith.constant 0 : index
      %16 = vector.load %arg6[%c0_13, %c0_14] : memref<1x256xf32, #tpu.memory_space<vmem>>, vector<1x256xf32>
      %17 = vector.broadcast %16 : vector<1x256xf32> to vector<8x256xf32>
      %18 = arith.addf %15, %17 : vector<8x256xf32>
      %cst_15 = arith.constant 0.000000e+00 : f32
      %19 = vector.broadcast %cst_15 : f32 to vector<8x256xf32>
      %20 = arith.maximumf %18, %19 : vector<8x256xf32>
      %c0_16 = arith.constant 0 : index
      %c0_17 = arith.constant 0 : index
      %21 = vector.load %arg7[%c0_16, %c0_17] : memref<8x256xf32, #tpu.memory_space<vmem>>, vector<8x256xf32>
      tpu.vector_store %arg7[%c0_16, %c0_17], %20 {strides = array<i32>} : memref<8x256xf32, #tpu.memory_space<vmem>>, vector<8x256xf32>,
    } else {
    }
    return
  }
  func.func @transform_0(%arg0: i32, %arg1: i32, %arg2: i32) -> (i32, i32) {
    %c0_i32 = arith.constant 0 : i32
    return %arg0, %arg2 : i32, i32
  }
  func.func @transform_1(%arg0: i32, %arg1: i32, %arg2: i32) -> (i32, i32) {
    %c0_i32 = arith.constant 0 : i32
    return %arg2, %arg1 : i32, i32
  }
  func.func @transform_2(%arg0: i32, %arg1: i32, %arg2: i32) -> (i32, i32) {
    %c0_i32 = arith.constant 0 : i32
    %c0_i32_0 = arith.constant 0 : i32
    return %c0_i32, %arg1 : i32, i32
  }
  func.func @transform_3(%arg0: i32, %arg1: i32, %arg2: i32) -> (i32, i32) {
    %c0_i32 = arith.constant 0 : i32
    %c0_i32_0 = arith.constant 0 : i32
    return %c0_i32, %arg1 : i32, i32
  }
  func.func @transform_4(%arg0: i32, %arg1: i32, %arg2: i32) -> (i32, i32) {
    %c0_i32 = arith.constant 0 : i32
    return %arg0, %arg1 : i32, i32
  }
}

module attributes {stable_mosaic.version = 11 : i64} {
  func.func @_fused_gemm_kernel(%arg0: i32, %arg1: i32, %arg2: i32, %arg3: memref<8x128xbf16, #tpu.memory_space<vmem>>, %arg4: memref<128x256xbf16, #tpu.memory_space<vmem>>, %arg5: memref<1x256xf32, #tpu.memory_space<vmem>>, %arg6: memref<1x256xf32, #tpu.memory_space<vmem>>, %arg7: memref<8x256xf32, #tpu.memory_space<vmem>>, %arg8: memref<8x256xf32, #tpu.memory_space<vmem>>) attributes {dimension_semantics = [#tpu.dimension_semantics<parallel>, #tpu.dimension_semantics<parallel>, #tpu.dimension_semantics<arbitrary>], iteration_bounds = array<i64: 1, 1, 1>, scalar_prefetch = 0 : i64, scratch_operands = 1 : i64, tpu.core_type = #tpu.core_type<tc>, window_params = [{transform_indices = @transform_0, window_bounds = array<i64: 8, 128>}, {transform_indices = @transform_1, window_bounds = array<i64: 128, 256>}, {transform_indices = @transform_2, window_bounds = array<i64: 1, 256>}, {transform_indices = @transform_3, window_bounds = array<i64: 1, 256>}, {transform_indices = @transform_4, window_bounds = array<i64: 8, 256>}]} {
    %c0_i32 = arith.constant 0 : i32
    %0 = arith.cmpi eq, %arg2, %c0_i32 : i32
    %1 = arith.extui %0 : i1 to i32
    %c0_i32_0 = arith.constant 0 : i32
    %2 = arith.cmpi ne, %1, %c0_i32_0 : i32
    scf.if %2 {
      %cst_10 = arith.constant 0.000000e+00 : f32
      %12 = vector.broadcast %cst_10 : f32 to vector<8x256xf32>
      %c0_11 = arith.constant 0 : index
      %c0_12 = arith.constant 0 : index
      %13 = vector.load %arg8[%c0_11, %c0_12] : memref<8x256xf32, #tpu.memory_space<vmem>>, vector<8x256xf32>
      tpu.vector_store %arg8[%c0_11, %c0_12], %12 {strides = array<i32>} : memref<8x256xf32, #tpu.memory_space<vmem>>, vector<8x256xf32>,
    } else {
    }
    %c0 = arith.constant 0 : index
    %c0_1 = arith.constant 0 : index
    %3 = vector.load %arg8[%c0, %c0_1] : memref<8x256xf32, #tpu.memory_space<vmem>>, vector<8x256xf32>
    %c0_2 = arith.constant 0 : index
    %c0_3 = arith.constant 0 : index
    %4 = vector.load %arg3[%c0_2, %c0_3] : memref<8x128xbf16, #tpu.memory_space<vmem>>, vector<8x128xbf16>
    %c0_4 = arith.constant 0 : index
    %c0_5 = arith.constant 0 : index
    %5 = vector.load %arg4[%c0_4, %c0_5] : memref<128x256xbf16, #tpu.memory_space<vmem>>, vector<128x256xbf16>
    %cst = arith.constant dense<0.000000e+00> : vector<8x256xf32>
    %6 = tpu.matmul %4, %5, %cst {dimension_numbers = #tpu.dot_dimension_numbers<[1], [0], [0], [1], [0, 0, 1, 1], [], []>} : vector<8x128xbf16>, vector<128x256xbf16>, vector<8x256xf32> -> vector<8x256xf32>
    %7 = arith.addf %3, %6 : vector<8x256xf32>
    %c0_6 = arith.constant 0 : index
    %c0_7 = arith.constant 0 : index
    %8 = vector.load %arg8[%c0_6, %c0_7] : memref<8x256xf32, #tpu.memory_space<vmem>>, vector<8x256xf32>
    tpu.vector_store %arg8[%c0_6, %c0_7], %7 {strides = array<i32>} : memref<8x256xf32, #tpu.memory_space<vmem>>, vector<8x256xf32>,
    %c0_i32_8 = arith.constant 0 : i32
    %9 = arith.cmpi eq, %arg2, %c0_i32_8 : i32
    %10 = arith.extui %9 : i1 to i32
    %c0_i32_9 = arith.constant 0 : i32
    %11 = arith.cmpi ne, %10, %c0_i32_9 : i32
    scf.if %11 {
      %c0_10 = arith.constant 0 : index
      %c0_11 = arith.constant 0 : index
      %12 = vector.load %arg8[%c0_10, %c0_11] : memref<8x256xf32, #tpu.memory_space<vmem>>, vector<8x256xf32>
      %c0_12 = arith.constant 0 : index
      %c0_13 = arith.constant 0 : index
      %13 = vector.load %arg5[%c0_12, %c0_13] : memref<1x256xf32, #tpu.memory_space<vmem>>, vector<1x256xf32>
      %14 = vector.broadcast %13 : vector<1x256xf32> to vector<8x256xf32>
      %15 = arith.mulf %12, %14 : vector<8x256xf32>
      %c0_14 = arith.constant 0 : index
      %c0_15 = arith.constant 0 : index
      %16 = vector.load %arg6[%c0_14, %c0_15] : memref<1x256xf32, #tpu.memory_space<vmem>>, vector<1x256xf32>
      %17 = vector.broadcast %16 : vector<1x256xf32> to vector<8x256xf32>
      %18 = arith.addf %15, %17 : vector<8x256xf32>
      %c0_16 = arith.constant 0 : index
      %c0_17 = arith.constant 0 : index
      %19 = vector.load %arg7[%c0_16, %c0_17] : memref<8x256xf32, #tpu.memory_space<vmem>>, vector<8x256xf32>
      tpu.vector_store %arg7[%c0_16, %c0_17], %18 {strides = array<i32>} : memref<8x256xf32, #tpu.memory_space<vmem>>, vector<8x256xf32>,
    } else {
    }
    return
  }
  func.func @transform_0(%arg0: i32, %arg1: i32, %arg2: i32) -> (i32, i32) {
    %c0_i32 = arith.constant 0 : i32
    return %arg0, %arg2 : i32, i32
  }
  func.func @transform_1(%arg0: i32, %arg1: i32, %arg2: i32) -> (i32, i32) {
    %c0_i32 = arith.constant 0 : i32
    return %arg2, %arg1 : i32, i32
  }
  func.func @transform_2(%arg0: i32, %arg1: i32, %arg2: i32) -> (i32, i32) {
    %c0_i32 = arith.constant 0 : i32
    %c0_i32_0 = arith.constant 0 : i32
    return %c0_i32, %arg1 : i32, i32
  }
  func.func @transform_3(%arg0: i32, %arg1: i32, %arg2: i32) -> (i32, i32) {
    %c0_i32 = arith.constant 0 : i32
    %c0_i32_0 = arith.constant 0 : i32
    return %c0_i32, %arg1 : i32, i32
  }
  func.func @transform_4(%arg0: i32, %arg1: i32, %arg2: i32) -> (i32, i32) {
    %c0_i32 = arith.constant 0 : i32
    return %arg0, %arg1 : i32, i32
  }
}

module attributes {stable_mosaic.version = 11 : i64} {
  func.func @_fused_gemm_kernel(%arg0: i32, %arg1: i32, %arg2: i32, %arg3: memref<8x384xbf16, #tpu.memory_space<vmem>>, %arg4: memref<384x256xbf16, #tpu.memory_space<vmem>>, %arg5: memref<1x256xf32, #tpu.memory_space<vmem>>, %arg6: memref<1x256xf32, #tpu.memory_space<vmem>>, %arg7: memref<8x256xf32, #tpu.memory_space<vmem>>, %arg8: memref<8x256xf32, #tpu.memory_space<vmem>>) attributes {dimension_semantics = [#tpu.dimension_semantics<parallel>, #tpu.dimension_semantics<parallel>, #tpu.dimension_semantics<arbitrary>], iteration_bounds = array<i64: 1, 1, 6>, scalar_prefetch = 0 : i64, scratch_operands = 1 : i64, tpu.core_type = #tpu.core_type<tc>, window_params = [{transform_indices = @transform_0, window_bounds = array<i64: 8, 384>}, {transform_indices = @transform_1, window_bounds = array<i64: 384, 256>}, {transform_indices = @transform_2, window_bounds = array<i64: 1, 256>}, {transform_indices = @transform_3, window_bounds = array<i64: 1, 256>}, {transform_indices = @transform_4, window_bounds = array<i64: 8, 256>}]} {
    %c0_i32 = arith.constant 0 : i32
    %0 = arith.cmpi eq, %arg2, %c0_i32 : i32
    %1 = arith.extui %0 : i1 to i32
    %c0_i32_0 = arith.constant 0 : i32
    %2 = arith.cmpi ne, %1, %c0_i32_0 : i32
    scf.if %2 {
      %cst_9 = arith.constant 0.000000e+00 : f32
      %12 = vector.broadcast %cst_9 : f32 to vector<8x256xf32>
      %c0_10 = arith.constant 0 : index
      %c0_11 = arith.constant 0 : index
      %13 = vector.load %arg8[%c0_10, %c0_11] : memref<8x256xf32, #tpu.memory_space<vmem>>, vector<8x256xf32>
      tpu.vector_store %arg8[%c0_10, %c0_11], %12 {strides = array<i32>} : memref<8x256xf32, #tpu.memory_space<vmem>>, vector<8x256xf32>,
    } else {
    }
    %c0 = arith.constant 0 : index
    %c0_1 = arith.constant 0 : index
    %3 = vector.load %arg8[%c0, %c0_1] : memref<8x256xf32, #tpu.memory_space<vmem>>, vector<8x256xf32>
    %c0_2 = arith.constant 0 : index
    %c0_3 = arith.constant 0 : index
    %4 = vector.load %arg3[%c0_2, %c0_3] : memref<8x384xbf16, #tpu.memory_space<vmem>>, vector<8x384xbf16>
    %c0_4 = arith.constant 0 : index
    %c0_5 = arith.constant 0 : index
    %5 = vector.load %arg4[%c0_4, %c0_5] : memref<384x256xbf16, #tpu.memory_space<vmem>>, vector<384x256xbf16>
    %cst = arith.constant dense<0.000000e+00> : vector<8x256xf32>
    %6 = tpu.matmul %4, %5, %cst {dimension_numbers = #tpu.dot_dimension_numbers<[1], [0], [0], [1], [0, 0, 1, 1], [], []>} : vector<8x384xbf16>, vector<384x256xbf16>, vector<8x256xf32> -> vector<8x256xf32>
    %7 = arith.addf %3, %6 : vector<8x256xf32>
    %c0_6 = arith.constant 0 : index
    %c0_7 = arith.constant 0 : index
    %8 = vector.load %arg8[%c0_6, %c0_7] : memref<8x256xf32, #tpu.memory_space<vmem>>, vector<8x256xf32>
    tpu.vector_store %arg8[%c0_6, %c0_7], %7 {strides = array<i32>} : memref<8x256xf32, #tpu.memory_space<vmem>>, vector<8x256xf32>,
    %c5_i32 = arith.constant 5 : i32
    %9 = arith.cmpi eq, %arg2, %c5_i32 : i32
    %10 = arith.extui %9 : i1 to i32
    %c0_i32_8 = arith.constant 0 : i32
    %11 = arith.cmpi ne, %10, %c0_i32_8 : i32
    scf.if %11 {
      %c0_9 = arith.constant 0 : index
      %c0_10 = arith.constant 0 : index
      %12 = vector.load %arg8[%c0_9, %c0_10] : memref<8x256xf32, #tpu.memory_space<vmem>>, vector<8x256xf32>
      %c0_11 = arith.constant 0 : index
      %c0_12 = arith.constant 0 : index
      %13 = vector.load %arg5[%c0_11, %c0_12] : memref<1x256xf32, #tpu.memory_space<vmem>>, vector<1x256xf32>
      %14 = vector.broadcast %13 : vector<1x256xf32> to vector<8x256xf32>
      %15 = arith.mulf %12, %14 : vector<8x256xf32>
      %c0_13 = arith.constant 0 : index
      %c0_14 = arith.constant 0 : index
      %16 = vector.load %arg6[%c0_13, %c0_14] : memref<1x256xf32, #tpu.memory_space<vmem>>, vector<1x256xf32>
      %17 = vector.broadcast %16 : vector<1x256xf32> to vector<8x256xf32>
      %18 = arith.addf %15, %17 : vector<8x256xf32>
      %cst_15 = arith.constant 0.000000e+00 : f32
      %19 = vector.broadcast %cst_15 : f32 to vector<8x256xf32>
      %20 = arith.maximumf %18, %19 : vector<8x256xf32>
      %c0_16 = arith.constant 0 : index
      %c0_17 = arith.constant 0 : index
      %21 = vector.load %arg7[%c0_16, %c0_17] : memref<8x256xf32, #tpu.memory_space<vmem>>, vector<8x256xf32>
      tpu.vector_store %arg7[%c0_16, %c0_17], %20 {strides = array<i32>} : memref<8x256xf32, #tpu.memory_space<vmem>>, vector<8x256xf32>,
    } else {
    }
    return
  }
  func.func @transform_0(%arg0: i32, %arg1: i32, %arg2: i32) -> (i32, i32) {
    %c0_i32 = arith.constant 0 : i32
    return %arg0, %arg2 : i32, i32
  }
  func.func @transform_1(%arg0: i32, %arg1: i32, %arg2: i32) -> (i32, i32) {
    %c0_i32 = arith.constant 0 : i32
    return %arg2, %arg1 : i32, i32
  }
  func.func @transform_2(%arg0: i32, %arg1: i32, %arg2: i32) -> (i32, i32) {
    %c0_i32 = arith.constant 0 : i32
    %c0_i32_0 = arith.constant 0 : i32
    return %c0_i32, %arg1 : i32, i32
  }
  func.func @transform_3(%arg0: i32, %arg1: i32, %arg2: i32) -> (i32, i32) {
    %c0_i32 = arith.constant 0 : i32
    %c0_i32_0 = arith.constant 0 : i32
    return %c0_i32, %arg1 : i32, i32
  }
  func.func @transform_4(%arg0: i32, %arg1: i32, %arg2: i32) -> (i32, i32) {
    %c0_i32 = arith.constant 0 : i32
    return %arg0, %arg1 : i32, i32
  }
}

module attributes {stable_mosaic.version = 11 : i64} {
  func.func @_fused_gemm_kernel(%arg0: i32, %arg1: i32, %arg2: i32, %arg3: memref<8x384xbf16, #tpu.memory_space<vmem>>, %arg4: memref<384x256xbf16, #tpu.memory_space<vmem>>, %arg5: memref<1x256xf32, #tpu.memory_space<vmem>>, %arg6: memref<1x256xf32, #tpu.memory_space<vmem>>, %arg7: memref<8x256xf32, #tpu.memory_space<vmem>>, %arg8: memref<8x256xf32, #tpu.memory_space<vmem>>, %arg9: memref<8x256xf32, #tpu.memory_space<vmem>>) attributes {dimension_semantics = [#tpu.dimension_semantics<parallel>, #tpu.dimension_semantics<parallel>, #tpu.dimension_semantics<arbitrary>], iteration_bounds = array<i64: 1, 1, 6>, scalar_prefetch = 0 : i64, scratch_operands = 1 : i64, tpu.core_type = #tpu.core_type<tc>, window_params = [{transform_indices = @transform_0, window_bounds = array<i64: 8, 384>}, {transform_indices = @transform_1, window_bounds = array<i64: 384, 256>}, {transform_indices = @transform_2, window_bounds = array<i64: 1, 256>}, {transform_indices = @transform_3, window_bounds = array<i64: 1, 256>}, {transform_indices = @transform_4, window_bounds = array<i64: 8, 256>}, {transform_indices = @transform_5, window_bounds = array<i64: 8, 256>}]} {
    %c0_i32 = arith.constant 0 : i32
    %0 = arith.cmpi eq, %arg2, %c0_i32 : i32
    %1 = arith.extui %0 : i1 to i32
    %c0_i32_0 = arith.constant 0 : i32
    %2 = arith.cmpi ne, %1, %c0_i32_0 : i32
    scf.if %2 {
      %cst_9 = arith.constant 0.000000e+00 : f32
      %12 = vector.broadcast %cst_9 : f32 to vector<8x256xf32>
      %c0_10 = arith.constant 0 : index
      %c0_11 = arith.constant 0 : index
      %13 = vector.load %arg9[%c0_10, %c0_11] : memref<8x256xf32, #tpu.memory_space<vmem>>, vector<8x256xf32>
      tpu.vector_store %arg9[%c0_10, %c0_11], %12 {strides = array<i32>} : memref<8x256xf32, #tpu.memory_space<vmem>>, vector<8x256xf32>,
    } else {
    }
    %c0 = arith.constant 0 : index
    %c0_1 = arith.constant 0 : index
    %3 = vector.load %arg9[%c0, %c0_1] : memref<8x256xf32, #tpu.memory_space<vmem>>, vector<8x256xf32>
    %c0_2 = arith.constant 0 : index
    %c0_3 = arith.constant 0 : index
    %4 = vector.load %arg3[%c0_2, %c0_3] : memref<8x384xbf16, #tpu.memory_space<vmem>>, vector<8x384xbf16>
    %c0_4 = arith.constant 0 : index
    %c0_5 = arith.constant 0 : index
    %5 = vector.load %arg4[%c0_4, %c0_5] : memref<384x256xbf16, #tpu.memory_space<vmem>>, vector<384x256xbf16>
    %cst = arith.constant dense<0.000000e+00> : vector<8x256xf32>
    %6 = tpu.matmul %4, %5, %cst {dimension_numbers = #tpu.dot_dimension_numbers<[1], [0], [0], [1], [0, 0, 1, 1], [], []>} : vector<8x384xbf16>, vector<384x256xbf16>, vector<8x256xf32> -> vector<8x256xf32>
    %7 = arith.addf %3, %6 : vector<8x256xf32>
    %c0_6 = arith.constant 0 : index
    %c0_7 = arith.constant 0 : index
    %8 = vector.load %arg9[%c0_6, %c0_7] : memref<8x256xf32, #tpu.memory_space<vmem>>, vector<8x256xf32>
    tpu.vector_store %arg9[%c0_6, %c0_7], %7 {strides = array<i32>} : memref<8x256xf32, #tpu.memory_space<vmem>>, vector<8x256xf32>,
    %c5_i32 = arith.constant 5 : i32
    %9 = arith.cmpi eq, %arg2, %c5_i32 : i32
    %10 = arith.extui %9 : i1 to i32
    %c0_i32_8 = arith.constant 0 : i32
    %11 = arith.cmpi ne, %10, %c0_i32_8 : i32
    scf.if %11 {
      %c0_9 = arith.constant 0 : index
      %c0_10 = arith.constant 0 : index
      %12 = vector.load %arg9[%c0_9, %c0_10] : memref<8x256xf32, #tpu.memory_space<vmem>>, vector<8x256xf32>
      %c0_11 = arith.constant 0 : index
      %c0_12 = arith.constant 0 : index
      %13 = vector.load %arg5[%c0_11, %c0_12] : memref<1x256xf32, #tpu.memory_space<vmem>>, vector<1x256xf32>
      %14 = vector.broadcast %13 : vector<1x256xf32> to vector<8x256xf32>
      %15 = arith.mulf %12, %14 : vector<8x256xf32>
      %c0_13 = arith.constant 0 : index
      %c0_14 = arith.constant 0 : index
      %16 = vector.load %arg6[%c0_13, %c0_14] : memref<1x256xf32, #tpu.memory_space<vmem>>, vector<1x256xf32>
      %17 = vector.broadcast %16 : vector<1x256xf32> to vector<8x256xf32>
      %18 = arith.addf %15, %17 : vector<8x256xf32>
      %c0_15 = arith.constant 0 : index
      %c0_16 = arith.constant 0 : index
      %19 = vector.load %arg7[%c0_15, %c0_16] : memref<8x256xf32, #tpu.memory_space<vmem>>, vector<8x256xf32>
      %20 = arith.addf %18, %19 : vector<8x256xf32>
      %cst_17 = arith.constant 0.000000e+00 : f32
      %21 = vector.broadcast %cst_17 : f32 to vector<8x256xf32>
      %22 = arith.maximumf %20, %21 : vector<8x256xf32>
      %c0_18 = arith.constant 0 : index
      %c0_19 = arith.constant 0 : index
      %23 = vector.load %arg8[%c0_18, %c0_19] : memref<8x256xf32, #tpu.memory_space<vmem>>, vector<8x256xf32>
      tpu.vector_store %arg8[%c0_18, %c0_19], %22 {strides = array<i32>} : memref<8x256xf32, #tpu.memory_space<vmem>>, vector<8x256xf32>,
    } else {
    }
    return
  }
  func.func @transform_0(%arg0: i32, %arg1: i32, %arg2: i32) -> (i32, i32) {
    %c0_i32 = arith.constant 0 : i32
    return %arg0, %arg2 : i32, i32
  }
  func.func @transform_1(%arg0: i32, %arg1: i32, %arg2: i32) -> (i32, i32) {
    %c0_i32 = arith.constant 0 : i32
    return %arg2, %arg1 : i32, i32
  }
  func.func @transform_2(%arg0: i32, %arg1: i32, %arg2: i32) -> (i32, i32) {
    %c0_i32 = arith.constant 0 : i32
    %c0_i32_0 = arith.constant 0 : i32
    return %c0_i32, %arg1 : i32, i32
  }
  func.func @transform_3(%arg0: i32, %arg1: i32, %arg2: i32) -> (i32, i32) {
    %c0_i32 = arith.constant 0 : i32
    %c0_i32_0 = arith.constant 0 : i32
    return %c0_i32, %arg1 : i32, i32
  }
  func.func @transform_4(%arg0: i32, %arg1: i32, %arg2: i32) -> (i32, i32) {
    %c0_i32 = arith.constant 0 : i32
    return %arg0, %arg1 : i32, i32
  }
  func.func @transform_5(%arg0: i32, %arg1: i32, %arg2: i32) -> (i32, i32) {
    %c0_i32 = arith.constant 0 : i32
    return %arg0, %arg1 : i32, i32
  }
}

module attributes {stable_mosaic.version = 11 : i64} {
  func.func @_fused_gemm_kernel(%arg0: i32, %arg1: i32, %arg2: i32, %arg3: memref<8x384xbf16, #tpu.memory_space<vmem>>, %arg4: memref<384x256xbf16, #tpu.memory_space<vmem>>, %arg5: memref<1x256xf32, #tpu.memory_space<vmem>>, %arg6: memref<1x256xf32, #tpu.memory_space<vmem>>, %arg7: memref<8x256xf32, #tpu.memory_space<vmem>>, %arg8: memref<8x256xf32, #tpu.memory_space<vmem>>) attributes {dimension_semantics = [#tpu.dimension_semantics<parallel>, #tpu.dimension_semantics<parallel>, #tpu.dimension_semantics<arbitrary>], iteration_bounds = array<i64: 1, 2, 6>, scalar_prefetch = 0 : i64, scratch_operands = 1 : i64, tpu.core_type = #tpu.core_type<tc>, window_params = [{transform_indices = @transform_0, window_bounds = array<i64: 8, 384>}, {transform_indices = @transform_1, window_bounds = array<i64: 384, 256>}, {transform_indices = @transform_2, window_bounds = array<i64: 1, 256>}, {transform_indices = @transform_3, window_bounds = array<i64: 1, 256>}, {transform_indices = @transform_4, window_bounds = array<i64: 8, 256>}]} {
    %c0_i32 = arith.constant 0 : i32
    %0 = arith.cmpi eq, %arg2, %c0_i32 : i32
    %1 = arith.extui %0 : i1 to i32
    %c0_i32_0 = arith.constant 0 : i32
    %2 = arith.cmpi ne, %1, %c0_i32_0 : i32
    scf.if %2 {
      %cst_9 = arith.constant 0.000000e+00 : f32
      %12 = vector.broadcast %cst_9 : f32 to vector<8x256xf32>
      %c0_10 = arith.constant 0 : index
      %c0_11 = arith.constant 0 : index
      %13 = vector.load %arg8[%c0_10, %c0_11] : memref<8x256xf32, #tpu.memory_space<vmem>>, vector<8x256xf32>
      tpu.vector_store %arg8[%c0_10, %c0_11], %12 {strides = array<i32>} : memref<8x256xf32, #tpu.memory_space<vmem>>, vector<8x256xf32>,
    } else {
    }
    %c0 = arith.constant 0 : index
    %c0_1 = arith.constant 0 : index
    %3 = vector.load %arg8[%c0, %c0_1] : memref<8x256xf32, #tpu.memory_space<vmem>>, vector<8x256xf32>
    %c0_2 = arith.constant 0 : index
    %c0_3 = arith.constant 0 : index
    %4 = vector.load %arg3[%c0_2, %c0_3] : memref<8x384xbf16, #tpu.memory_space<vmem>>, vector<8x384xbf16>
    %c0_4 = arith.constant 0 : index
    %c0_5 = arith.constant 0 : index
    %5 = vector.load %arg4[%c0_4, %c0_5] : memref<384x256xbf16, #tpu.memory_space<vmem>>, vector<384x256xbf16>
    %cst = arith.constant dense<0.000000e+00> : vector<8x256xf32>
    %6 = tpu.matmul %4, %5, %cst {dimension_numbers = #tpu.dot_dimension_numbers<[1], [0], [0], [1], [0, 0, 1, 1], [], []>} : vector<8x384xbf16>, vector<384x256xbf16>, vector<8x256xf32> -> vector<8x256xf32>
    %7 = arith.addf %3, %6 : vector<8x256xf32>
    %c0_6 = arith.constant 0 : index
    %c0_7 = arith.constant 0 : index
    %8 = vector.load %arg8[%c0_6, %c0_7] : memref<8x256xf32, #tpu.memory_space<vmem>>, vector<8x256xf32>
    tpu.vector_store %arg8[%c0_6, %c0_7], %7 {strides = array<i32>} : memref<8x256xf32, #tpu.memory_space<vmem>>, vector<8x256xf32>,
    %c5_i32 = arith.constant 5 : i32
    %9 = arith.cmpi eq, %arg2, %c5_i32 : i32
    %10 = arith.extui %9 : i1 to i32
    %c0_i32_8 = arith.constant 0 : i32
    %11 = arith.cmpi ne, %10, %c0_i32_8 : i32
    scf.if %11 {
      %c0_9 = arith.constant 0 : index
      %c0_10 = arith.constant 0 : index
      %12 = vector.load %arg8[%c0_9, %c0_10] : memref<8x256xf32, #tpu.memory_space<vmem>>, vector<8x256xf32>
      %c0_11 = arith.constant 0 : index
      %c0_12 = arith.constant 0 : index
      %13 = vector.load %arg5[%c0_11, %c0_12] : memref<1x256xf32, #tpu.memory_space<vmem>>, vector<1x256xf32>
      %14 = vector.broadcast %13 : vector<1x256xf32> to vector<8x256xf32>
      %15 = arith.mulf %12, %14 : vector<8x256xf32>
      %c0_13 = arith.constant 0 : index
      %c0_14 = arith.constant 0 : index
      %16 = vector.load %arg6[%c0_13, %c0_14] : memref<1x256xf32, #tpu.memory_space<vmem>>, vector<1x256xf32>
      %17 = vector.broadcast %16 : vector<1x256xf32> to vector<8x256xf32>
      %18 = arith.addf %15, %17 : vector<8x256xf32>
      %cst_15 = arith.constant 0.000000e+00 : f32
      %19 = vector.broadcast %cst_15 : f32 to vector<8x256xf32>
      %20 = arith.maximumf %18, %19 : vector<8x256xf32>
      %c0_16 = arith.constant 0 : index
      %c0_17 = arith.constant 0 : index
      %21 = vector.load %arg7[%c0_16, %c0_17] : memref<8x256xf32, #tpu.memory_space<vmem>>, vector<8x256xf32>
      tpu.vector_store %arg7[%c0_16, %c0_17], %20 {strides = array<i32>} : memref<8x256xf32, #tpu.memory_space<vmem>>, vector<8x256xf32>,
    } else {
    }
    return
  }
  func.func @transform_0(%arg0: i32, %arg1: i32, %arg2: i32) -> (i32, i32) {
    %c0_i32 = arith.constant 0 : i32
    return %arg0, %arg2 : i32, i32
  }
  func.func @transform_1(%arg0: i32, %arg1: i32, %arg2: i32) -> (i32, i32) {
    %c0_i32 = arith.constant 0 : i32
    return %arg2, %arg1 : i32, i32
  }
  func.func @transform_2(%arg0: i32, %arg1: i32, %arg2: i32) -> (i32, i32) {
    %c0_i32 = arith.constant 0 : i32
    %c0_i32_0 = arith.constant 0 : i32
    return %c0_i32, %arg1 : i32, i32
  }
  func.func @transform_3(%arg0: i32, %arg1: i32, %arg2: i32) -> (i32, i32) {
    %c0_i32 = arith.constant 0 : i32
    %c0_i32_0 = arith.constant 0 : i32
    return %c0_i32, %arg1 : i32, i32
  }
  func.func @transform_4(%arg0: i32, %arg1: i32, %arg2: i32) -> (i32, i32) {
    %c0_i32 = arith.constant 0 : i32
    return %arg0, %arg1 : i32, i32
  }
}

module attributes {stable_mosaic.version = 11 : i64} {
  func.func @_fused_gemm_kernel(%arg0: i32, %arg1: i32, %arg2: i32, %arg3: memref<8x256xbf16, #tpu.memory_space<vmem>>, %arg4: memref<256x256xbf16, #tpu.memory_space<vmem>>, %arg5: memref<1x256xf32, #tpu.memory_space<vmem>>, %arg6: memref<1x256xf32, #tpu.memory_space<vmem>>, %arg7: memref<8x256xf32, #tpu.memory_space<vmem>>, %arg8: memref<8x256xf32, #tpu.memory_space<vmem>>) attributes {dimension_semantics = [#tpu.dimension_semantics<parallel>, #tpu.dimension_semantics<parallel>, #tpu.dimension_semantics<arbitrary>], iteration_bounds = array<i64: 1, 2, 1>, scalar_prefetch = 0 : i64, scratch_operands = 1 : i64, tpu.core_type = #tpu.core_type<tc>, window_params = [{transform_indices = @transform_0, window_bounds = array<i64: 8, 256>}, {transform_indices = @transform_1, window_bounds = array<i64: 256, 256>}, {transform_indices = @transform_2, window_bounds = array<i64: 1, 256>}, {transform_indices = @transform_3, window_bounds = array<i64: 1, 256>}, {transform_indices = @transform_4, window_bounds = array<i64: 8, 256>}]} {
    %c0_i32 = arith.constant 0 : i32
    %0 = arith.cmpi eq, %arg2, %c0_i32 : i32
    %1 = arith.extui %0 : i1 to i32
    %c0_i32_0 = arith.constant 0 : i32
    %2 = arith.cmpi ne, %1, %c0_i32_0 : i32
    scf.if %2 {
      %cst_10 = arith.constant 0.000000e+00 : f32
      %12 = vector.broadcast %cst_10 : f32 to vector<8x256xf32>
      %c0_11 = arith.constant 0 : index
      %c0_12 = arith.constant 0 : index
      %13 = vector.load %arg8[%c0_11, %c0_12] : memref<8x256xf32, #tpu.memory_space<vmem>>, vector<8x256xf32>
      tpu.vector_store %arg8[%c0_11, %c0_12], %12 {strides = array<i32>} : memref<8x256xf32, #tpu.memory_space<vmem>>, vector<8x256xf32>,
    } else {
    }
    %c0 = arith.constant 0 : index
    %c0_1 = arith.constant 0 : index
    %3 = vector.load %arg8[%c0, %c0_1] : memref<8x256xf32, #tpu.memory_space<vmem>>, vector<8x256xf32>
    %c0_2 = arith.constant 0 : index
    %c0_3 = arith.constant 0 : index
    %4 = vector.load %arg3[%c0_2, %c0_3] : memref<8x256xbf16, #tpu.memory_space<vmem>>, vector<8x256xbf16>
    %c0_4 = arith.constant 0 : index
    %c0_5 = arith.constant 0 : index
    %5 = vector.load %arg4[%c0_4, %c0_5] : memref<256x256xbf16, #tpu.memory_space<vmem>>, vector<256x256xbf16>
    %cst = arith.constant dense<0.000000e+00> : vector<8x256xf32>
    %6 = tpu.matmul %4, %5, %cst {dimension_numbers = #tpu.dot_dimension_numbers<[1], [0], [0], [1], [0, 0, 1, 1], [], []>} : vector<8x256xbf16>, vector<256x256xbf16>, vector<8x256xf32> -> vector<8x256xf32>
    %7 = arith.addf %3, %6 : vector<8x256xf32>
    %c0_6 = arith.constant 0 : index
    %c0_7 = arith.constant 0 : index
    %8 = vector.load %arg8[%c0_6, %c0_7] : memref<8x256xf32, #tpu.memory_space<vmem>>, vector<8x256xf32>
    tpu.vector_store %arg8[%c0_6, %c0_7], %7 {strides = array<i32>} : memref<8x256xf32, #tpu.memory_space<vmem>>, vector<8x256xf32>,
    %c0_i32_8 = arith.constant 0 : i32
    %9 = arith.cmpi eq, %arg2, %c0_i32_8 : i32
    %10 = arith.extui %9 : i1 to i32
    %c0_i32_9 = arith.constant 0 : i32
    %11 = arith.cmpi ne, %10, %c0_i32_9 : i32
    scf.if %11 {
      %c0_10 = arith.constant 0 : index
      %c0_11 = arith.constant 0 : index
      %12 = vector.load %arg8[%c0_10, %c0_11] : memref<8x256xf32, #tpu.memory_space<vmem>>, vector<8x256xf32>
      %c0_12 = arith.constant 0 : index
      %c0_13 = arith.constant 0 : index
      %13 = vector.load %arg5[%c0_12, %c0_13] : memref<1x256xf32, #tpu.memory_space<vmem>>, vector<1x256xf32>
      %14 = vector.broadcast %13 : vector<1x256xf32> to vector<8x256xf32>
      %15 = arith.mulf %12, %14 : vector<8x256xf32>
      %c0_14 = arith.constant 0 : index
      %c0_15 = arith.constant 0 : index
      %16 = vector.load %arg6[%c0_14, %c0_15] : memref<1x256xf32, #tpu.memory_space<vmem>>, vector<1x256xf32>
      %17 = vector.broadcast %16 : vector<1x256xf32> to vector<8x256xf32>
      %18 = arith.addf %15, %17 : vector<8x256xf32>
      %c0_16 = arith.constant 0 : index
      %c0_17 = arith.constant 0 : index
      %19 = vector.load %arg7[%c0_16, %c0_17] : memref<8x256xf32, #tpu.memory_space<vmem>>, vector<8x256xf32>
      tpu.vector_store %arg7[%c0_16, %c0_17], %18 {strides = array<i32>} : memref<8x256xf32, #tpu.memory_space<vmem>>, vector<8x256xf32>,
    } else {
    }
    return
  }
  func.func @transform_0(%arg0: i32, %arg1: i32, %arg2: i32) -> (i32, i32) {
    %c0_i32 = arith.constant 0 : i32
    return %arg0, %arg2 : i32, i32
  }
  func.func @transform_1(%arg0: i32, %arg1: i32, %arg2: i32) -> (i32, i32) {
    %c0_i32 = arith.constant 0 : i32
    return %arg2, %arg1 : i32, i32
  }
  func.func @transform_2(%arg0: i32, %arg1: i32, %arg2: i32) -> (i32, i32) {
    %c0_i32 = arith.constant 0 : i32
    %c0_i32_0 = arith.constant 0 : i32
    return %c0_i32, %arg1 : i32, i32
  }
  func.func @transform_3(%arg0: i32, %arg1: i32, %arg2: i32) -> (i32, i32) {
    %c0_i32 = arith.constant 0 : i32
    %c0_i32_0 = arith.constant 0 : i32
    return %c0_i32, %arg1 : i32, i32
  }
  func.func @transform_4(%arg0: i32, %arg1: i32, %arg2: i32) -> (i32, i32) {
    %c0_i32 = arith.constant 0 : i32
    return %arg0, %arg1 : i32, i32
  }
}

module attributes {stable_mosaic.version = 11 : i64} {
  func.func @_fused_gemm_kernel(%arg0: i32, %arg1: i32, %arg2: i32, %arg3: memref<8x512xbf16, #tpu.memory_space<vmem>>, %arg4: memref<512x256xbf16, #tpu.memory_space<vmem>>, %arg5: memref<1x256xf32, #tpu.memory_space<vmem>>, %arg6: memref<1x256xf32, #tpu.memory_space<vmem>>, %arg7: memref<8x256xf32, #tpu.memory_space<vmem>>, %arg8: memref<8x256xf32, #tpu.memory_space<vmem>>, %arg9: memref<8x256xf32, #tpu.memory_space<vmem>>) attributes {dimension_semantics = [#tpu.dimension_semantics<parallel>, #tpu.dimension_semantics<parallel>, #tpu.dimension_semantics<arbitrary>], iteration_bounds = array<i64: 1, 2, 9>, scalar_prefetch = 0 : i64, scratch_operands = 1 : i64, tpu.core_type = #tpu.core_type<tc>, window_params = [{transform_indices = @transform_0, window_bounds = array<i64: 8, 512>}, {transform_indices = @transform_1, window_bounds = array<i64: 512, 256>}, {transform_indices = @transform_2, window_bounds = array<i64: 1, 256>}, {transform_indices = @transform_3, window_bounds = array<i64: 1, 256>}, {transform_indices = @transform_4, window_bounds = array<i64: 8, 256>}, {transform_indices = @transform_5, window_bounds = array<i64: 8, 256>}]} {
    %c0_i32 = arith.constant 0 : i32
    %0 = arith.cmpi eq, %arg2, %c0_i32 : i32
    %1 = arith.extui %0 : i1 to i32
    %c0_i32_0 = arith.constant 0 : i32
    %2 = arith.cmpi ne, %1, %c0_i32_0 : i32
    scf.if %2 {
      %cst_9 = arith.constant 0.000000e+00 : f32
      %12 = vector.broadcast %cst_9 : f32 to vector<8x256xf32>
      %c0_10 = arith.constant 0 : index
      %c0_11 = arith.constant 0 : index
      %13 = vector.load %arg9[%c0_10, %c0_11] : memref<8x256xf32, #tpu.memory_space<vmem>>, vector<8x256xf32>
      tpu.vector_store %arg9[%c0_10, %c0_11], %12 {strides = array<i32>} : memref<8x256xf32, #tpu.memory_space<vmem>>, vector<8x256xf32>,
    } else {
    }
    %c0 = arith.constant 0 : index
    %c0_1 = arith.constant 0 : index
    %3 = vector.load %arg9[%c0, %c0_1] : memref<8x256xf32, #tpu.memory_space<vmem>>, vector<8x256xf32>
    %c0_2 = arith.constant 0 : index
    %c0_3 = arith.constant 0 : index
    %4 = vector.load %arg3[%c0_2, %c0_3] : memref<8x512xbf16, #tpu.memory_space<vmem>>, vector<8x512xbf16>
    %c0_4 = arith.constant 0 : index
    %c0_5 = arith.constant 0 : index
    %5 = vector.load %arg4[%c0_4, %c0_5] : memref<512x256xbf16, #tpu.memory_space<vmem>>, vector<512x256xbf16>
    %cst = arith.constant dense<0.000000e+00> : vector<8x256xf32>
    %6 = tpu.matmul %4, %5, %cst {dimension_numbers = #tpu.dot_dimension_numbers<[1], [0], [0], [1], [0, 0, 1, 1], [], []>} : vector<8x512xbf16>, vector<512x256xbf16>, vector<8x256xf32> -> vector<8x256xf32>
    %7 = arith.addf %3, %6 : vector<8x256xf32>
    %c0_6 = arith.constant 0 : index
    %c0_7 = arith.constant 0 : index
    %8 = vector.load %arg9[%c0_6, %c0_7] : memref<8x256xf32, #tpu.memory_space<vmem>>, vector<8x256xf32>
    tpu.vector_store %arg9[%c0_6, %c0_7], %7 {strides = array<i32>} : memref<8x256xf32, #tpu.memory_space<vmem>>, vector<8x256xf32>,
    %c8_i32 = arith.constant 8 : i32
    %9 = arith.cmpi eq, %arg2, %c8_i32 : i32
    %10 = arith.extui %9 : i1 to i32
    %c0_i32_8 = arith.constant 0 : i32
    %11 = arith.cmpi ne, %10, %c0_i32_8 : i32
    scf.if %11 {
      %c0_9 = arith.constant 0 : index
      %c0_10 = arith.constant 0 : index
      %12 = vector.load %arg9[%c0_9, %c0_10] : memref<8x256xf32, #tpu.memory_space<vmem>>, vector<8x256xf32>
      %c0_11 = arith.constant 0 : index
      %c0_12 = arith.constant 0 : index
      %13 = vector.load %arg5[%c0_11, %c0_12] : memref<1x256xf32, #tpu.memory_space<vmem>>, vector<1x256xf32>
      %14 = vector.broadcast %13 : vector<1x256xf32> to vector<8x256xf32>
      %15 = arith.mulf %12, %14 : vector<8x256xf32>
      %c0_13 = arith.constant 0 : index
      %c0_14 = arith.constant 0 : index
      %16 = vector.load %arg6[%c0_13, %c0_14] : memref<1x256xf32, #tpu.memory_space<vmem>>, vector<1x256xf32>
      %17 = vector.broadcast %16 : vector<1x256xf32> to vector<8x256xf32>
      %18 = arith.addf %15, %17 : vector<8x256xf32>
      %c0_15 = arith.constant 0 : index
      %c0_16 = arith.constant 0 : index
      %19 = vector.load %arg7[%c0_15, %c0_16] : memref<8x256xf32, #tpu.memory_space<vmem>>, vector<8x256xf32>
      %20 = arith.addf %18, %19 : vector<8x256xf32>
      %cst_17 = arith.constant 0.000000e+00 : f32
      %21 = vector.broadcast %cst_17 : f32 to vector<8x256xf32>
      %22 = arith.maximumf %20, %21 : vector<8x256xf32>
      %c0_18 = arith.constant 0 : index
      %c0_19 = arith.constant 0 : index
      %23 = vector.load %arg8[%c0_18, %c0_19] : memref<8x256xf32, #tpu.memory_space<vmem>>, vector<8x256xf32>
      tpu.vector_store %arg8[%c0_18, %c0_19], %22 {strides = array<i32>} : memref<8x256xf32, #tpu.memory_space<vmem>>, vector<8x256xf32>,
    } else {
    }
    return
  }
  func.func @transform_0(%arg0: i32, %arg1: i32, %arg2: i32) -> (i32, i32) {
    %c0_i32 = arith.constant 0 : i32
    return %arg0, %arg2 : i32, i32
  }
  func.func @transform_1(%arg0: i32, %arg1: i32, %arg2: i32) -> (i32, i32) {
    %c0_i32 = arith.constant 0 : i32
    return %arg2, %arg1 : i32, i32
  }
  func.func @transform_2(%arg0: i32, %arg1: i32, %arg2: i32) -> (i32, i32) {
    %c0_i32 = arith.constant 0 : i32
    %c0_i32_0 = arith.constant 0 : i32
    return %c0_i32, %arg1 : i32, i32
  }
  func.func @transform_3(%arg0: i32, %arg1: i32, %arg2: i32) -> (i32, i32) {
    %c0_i32 = arith.constant 0 : i32
    %c0_i32_0 = arith.constant 0 : i32
    return %c0_i32, %arg1 : i32, i32
  }
  func.func @transform_4(%arg0: i32, %arg1: i32, %arg2: i32) -> (i32, i32) {
    %c0_i32 = arith.constant 0 : i32
    return %arg0, %arg1 : i32, i32
  }
  func.func @transform_5(%arg0: i32, %arg1: i32, %arg2: i32) -> (i32, i32) {
    %c0_i32 = arith.constant 0 : i32
    return %arg0, %arg1 : i32, i32
  }
}

module attributes {stable_mosaic.version = 11 : i64} {
  func.func @_fused_gemm_kernel(%arg0: i32, %arg1: i32, %arg2: i32, %arg3: memref<8x512xbf16, #tpu.memory_space<vmem>>, %arg4: memref<512x256xbf16, #tpu.memory_space<vmem>>, %arg5: memref<1x256xf32, #tpu.memory_space<vmem>>, %arg6: memref<1x256xf32, #tpu.memory_space<vmem>>, %arg7: memref<8x256xf32, #tpu.memory_space<vmem>>, %arg8: memref<8x256xf32, #tpu.memory_space<vmem>>) attributes {dimension_semantics = [#tpu.dimension_semantics<parallel>, #tpu.dimension_semantics<parallel>, #tpu.dimension_semantics<arbitrary>], iteration_bounds = array<i64: 1, 2, 9>, scalar_prefetch = 0 : i64, scratch_operands = 1 : i64, tpu.core_type = #tpu.core_type<tc>, window_params = [{transform_indices = @transform_0, window_bounds = array<i64: 8, 512>}, {transform_indices = @transform_1, window_bounds = array<i64: 512, 256>}, {transform_indices = @transform_2, window_bounds = array<i64: 1, 256>}, {transform_indices = @transform_3, window_bounds = array<i64: 1, 256>}, {transform_indices = @transform_4, window_bounds = array<i64: 8, 256>}]} {
    %c0_i32 = arith.constant 0 : i32
    %0 = arith.cmpi eq, %arg2, %c0_i32 : i32
    %1 = arith.extui %0 : i1 to i32
    %c0_i32_0 = arith.constant 0 : i32
    %2 = arith.cmpi ne, %1, %c0_i32_0 : i32
    scf.if %2 {
      %cst_9 = arith.constant 0.000000e+00 : f32
      %12 = vector.broadcast %cst_9 : f32 to vector<8x256xf32>
      %c0_10 = arith.constant 0 : index
      %c0_11 = arith.constant 0 : index
      %13 = vector.load %arg8[%c0_10, %c0_11] : memref<8x256xf32, #tpu.memory_space<vmem>>, vector<8x256xf32>
      tpu.vector_store %arg8[%c0_10, %c0_11], %12 {strides = array<i32>} : memref<8x256xf32, #tpu.memory_space<vmem>>, vector<8x256xf32>,
    } else {
    }
    %c0 = arith.constant 0 : index
    %c0_1 = arith.constant 0 : index
    %3 = vector.load %arg8[%c0, %c0_1] : memref<8x256xf32, #tpu.memory_space<vmem>>, vector<8x256xf32>
    %c0_2 = arith.constant 0 : index
    %c0_3 = arith.constant 0 : index
    %4 = vector.load %arg3[%c0_2, %c0_3] : memref<8x512xbf16, #tpu.memory_space<vmem>>, vector<8x512xbf16>
    %c0_4 = arith.constant 0 : index
    %c0_5 = arith.constant 0 : index
    %5 = vector.load %arg4[%c0_4, %c0_5] : memref<512x256xbf16, #tpu.memory_space<vmem>>, vector<512x256xbf16>
    %cst = arith.constant dense<0.000000e+00> : vector<8x256xf32>
    %6 = tpu.matmul %4, %5, %cst {dimension_numbers = #tpu.dot_dimension_numbers<[1], [0], [0], [1], [0, 0, 1, 1], [], []>} : vector<8x512xbf16>, vector<512x256xbf16>, vector<8x256xf32> -> vector<8x256xf32>
    %7 = arith.addf %3, %6 : vector<8x256xf32>
    %c0_6 = arith.constant 0 : index
    %c0_7 = arith.constant 0 : index
    %8 = vector.load %arg8[%c0_6, %c0_7] : memref<8x256xf32, #tpu.memory_space<vmem>>, vector<8x256xf32>
    tpu.vector_store %arg8[%c0_6, %c0_7], %7 {strides = array<i32>} : memref<8x256xf32, #tpu.memory_space<vmem>>, vector<8x256xf32>,
    %c8_i32 = arith.constant 8 : i32
    %9 = arith.cmpi eq, %arg2, %c8_i32 : i32
    %10 = arith.extui %9 : i1 to i32
    %c0_i32_8 = arith.constant 0 : i32
    %11 = arith.cmpi ne, %10, %c0_i32_8 : i32
    scf.if %11 {
      %c0_9 = arith.constant 0 : index
      %c0_10 = arith.constant 0 : index
      %12 = vector.load %arg8[%c0_9, %c0_10] : memref<8x256xf32, #tpu.memory_space<vmem>>, vector<8x256xf32>
      %c0_11 = arith.constant 0 : index
      %c0_12 = arith.constant 0 : index
      %13 = vector.load %arg5[%c0_11, %c0_12] : memref<1x256xf32, #tpu.memory_space<vmem>>, vector<1x256xf32>
      %14 = vector.broadcast %13 : vector<1x256xf32> to vector<8x256xf32>
      %15 = arith.mulf %12, %14 : vector<8x256xf32>
      %c0_13 = arith.constant 0 : index
      %c0_14 = arith.constant 0 : index
      %16 = vector.load %arg6[%c0_13, %c0_14] : memref<1x256xf32, #tpu.memory_space<vmem>>, vector<1x256xf32>
      %17 = vector.broadcast %16 : vector<1x256xf32> to vector<8x256xf32>
      %18 = arith.addf %15, %17 : vector<8x256xf32>
      %cst_15 = arith.constant 0.000000e+00 : f32
      %19 = vector.broadcast %cst_15 : f32 to vector<8x256xf32>
      %20 = arith.maximumf %18, %19 : vector<8x256xf32>
      %c0_16 = arith.constant 0 : index
      %c0_17 = arith.constant 0 : index
      %21 = vector.load %arg7[%c0_16, %c0_17] : memref<8x256xf32, #tpu.memory_space<vmem>>, vector<8x256xf32>
      tpu.vector_store %arg7[%c0_16, %c0_17], %20 {strides = array<i32>} : memref<8x256xf32, #tpu.memory_space<vmem>>, vector<8x256xf32>,
    } else {
    }
    return
  }
  func.func @transform_0(%arg0: i32, %arg1: i32, %arg2: i32) -> (i32, i32) {
    %c0_i32 = arith.constant 0 : i32
    return %arg0, %arg2 : i32, i32
  }
  func.func @transform_1(%arg0: i32, %arg1: i32, %arg2: i32) -> (i32, i32) {
    %c0_i32 = arith.constant 0 : i32
    return %arg2, %arg1 : i32, i32
  }
  func.func @transform_2(%arg0: i32, %arg1: i32, %arg2: i32) -> (i32, i32) {
    %c0_i32 = arith.constant 0 : i32
    %c0_i32_0 = arith.constant 0 : i32
    return %c0_i32, %arg1 : i32, i32
  }
  func.func @transform_3(%arg0: i32, %arg1: i32, %arg2: i32) -> (i32, i32) {
    %c0_i32 = arith.constant 0 : i32
    %c0_i32_0 = arith.constant 0 : i32
    return %c0_i32, %arg1 : i32, i32
  }
  func.func @transform_4(%arg0: i32, %arg1: i32, %arg2: i32) -> (i32, i32) {
    %c0_i32 = arith.constant 0 : i32
    return %arg0, %arg1 : i32, i32
  }
}

module attributes {stable_mosaic.version = 11 : i64} {
  func.func @_avgpool_kernel(%arg0: memref<2x1x512xf32, #tpu.memory_space<vmem>>, %arg1: memref<2x512xf32, #tpu.memory_space<vmem>>) attributes {dimension_semantics = [], scalar_prefetch = 0 : i64, scratch_operands = 0 : i64, tpu.core_type = #tpu.core_type<tc>} {
    %c0 = arith.constant 0 : index
    %c0_0 = arith.constant 0 : index
    %c0_1 = arith.constant 0 : index
    %0 = vector.load %arg0[%c0, %c0_0, %c0_1] : memref<2x1x512xf32, #tpu.memory_space<vmem>>, vector<2x1x512xf32>
    %cst = arith.constant dense<0.000000e+00> : vector<2x512xf32>
    %1 = vector.multi_reduction <add>, %0, %cst [1] : vector<2x1x512xf32> to vector<2x512xf32>
    %cst_2 = arith.constant 1.000000e+00 : f32
    %2 = vector.broadcast %cst_2 : f32 to vector<2x512xf32>
    %3 = arith.divf %1, %2 : vector<2x512xf32>
    %c0_3 = arith.constant 0 : index
    %c0_4 = arith.constant 0 : index
    %4 = vector.load %arg1[%c0_3, %c0_4] : memref<2x512xf32, #tpu.memory_space<vmem>>, vector<2x512xf32>
    tpu.vector_store %arg1[%c0_3, %c0_4], %3 {strides = array<i32>} : memref<2x512xf32, #tpu.memory_space<vmem>>, vector<2x512xf32>,
    return
  }
}

</mosaic_0001>

<bundles_post_ra>
// kernel: _lambda_.21
= control target key start
LH: loop header
LB: loop body
LE: loop exit
PB: predicated region body
PF: predicated region fallthrough
CT: control target
= control target key end

     0   :  { %v1647_v0 = vmov 0   ;;  %s2275_s1 = inlined_call_operand.vmem [shape: bf16[256,128], index: 1, kind: input, shape index: {}]   ;;  %s2276_s0 = inlined_call_operand.vmem [shape: bf16[512,256], index: 0, kind: input, shape index: {}]   ;;  %s2277_s2 = inlined_call_operand.vmem [shape: f32[1,128], index: 2, kind: input, shape index: {}]   ;;  %s2278_s3 = inlined_call_operand.vmem [shape: f32[1,128], index: 3, kind: input, shape index: {}]   ;;  %s2279_s4 = inlined_call_operand.vmem [shape: f32[512,128], index: 4, kind: output, shape index: {}]  }
   0x1   :  { %662 = vmatprep.subr.bf16.mxu0 %v1647_v0  ;;  %1502 = vmatprep.subr.bf16.mxu1 %v1647_v0  ;;  %v1535_v1 = vld [vmem:[%s2275_s1 + $0x38] sm:$0xff]   ;;  %v1536_v2 = vld [vmem:[%s2275_s1 + $0x30] sm:$0xff]   ;;  %v1537_v3 = vld [vmem:[%s2275_s1 + $0x28] sm:$0xff]  }
   0x2   :  { %663 = vmatpush1.bf16.msra.mxu0 %v1535_v1  ;;  %1518 = vmatpush1.bf16.msra.mxu1 %v1535_v1  ;;  %v1538_v4 = vld [vmem:[%s2275_s1 + $0x20] sm:$0xff]   ;;  %v1539_v5 = vld [vmem:[%s2275_s1 + $0x18] sm:$0xff]   ;;  %v1540_v7 = vld [vmem:[%s2275_s1 + $0x10] sm:$0xff]  }
   0x3   :  { %664 = vmatprep.subr.bf16.mxu0 %v1647_v0  ;;  %1503 = vmatprep.subr.bf16.mxu1 %v1647_v0  ;;  %v1553_v6 = vld [vmem:[%s2276_s0 + $0x4] ss:$8 sps:$4 sm:$0xff]   ;;  %v1543_v11 = vld [vmem:[%s2275_s1 + $0x78] sm:$0xff]   ;;  %v1544_v12 = vld [vmem:[%s2275_s1 + $0x70] sm:$0xff]  }
   0x4   :  { %v1556_v8 = vld [vmem:[%s2276_s0 + $0x104] ss:$8 sps:$4 sm:$0xff]   ;;  %694 = vmatprep.mubr.bf16.mxu0 %v1553_v6  ;;  %v1547_v15 = vld [vmem:[%s2275_s1 + $0x58] sm:$0xff]   ;;  %v1548_v16 = vld [vmem:[%s2275_s1 + $0x50] sm:$0xff]  }
   0x5   :  { %822 = vmatprep.mubr.bf16.mxu1 %v1556_v8  ;;  %v1541_v9 = vld [vmem:[%s2275_s1 + $0x8] sm:$0xff]   ;;  %v1542_v10 = vld [vmem:[%s2275_s1] sm:$0xff]   ;;  %v1557_v21 = vld [vmem:[%s2276_s0 + $0x14] ss:$8 sps:$4 sm:$0xff]  }
   0x6   :  { %665 = vmatpush1.bf16.msra.mxu0 %v1536_v2  ;;  %1519 = vmatpush1.bf16.msra.mxu1 %v1536_v2  ;;  %v1545_v13 = vld [vmem:[%s2275_s1 + $0x68] sm:$0xff]   ;;  %v1546_v14 = vld [vmem:[%s2275_s1 + $0x60] sm:$0xff]   ;;  %v1559_v22 = vld [vmem:[%s2276_s0 + $0x114] ss:$8 sps:$4 sm:$0xff]  }
   0x7   :  { %666 = vmatprep.subr.bf16.mxu0 %v1647_v0  ;;  %1504 = vmatprep.subr.bf16.mxu1 %v1647_v0  ;;  %v1549_v17 = vld [vmem:[%s2275_s1 + $0x48] sm:$0xff]   ;;  %v1550_v18 = vld [vmem:[%s2275_s1 + $0x40] sm:$0xff]   ;;  %v1561_v23 = vld [vmem:[%s2276_s0 + $0x10] ss:$8 sps:$4 sm:$0xff]  }
   0x8   :  { %v1551_v19 = vld [vmem:[%s2276_s0] ss:$8 sps:$4 sm:$0xff]   ;;  %v1562_v24 = vld [vmem:[%s2276_s0 + $0x110] ss:$8 sps:$4 sm:$0xff]   ;;  %v1563_v25 = vld [vmem:[%s2276_s0 + $0x24] ss:$8 sps:$4 sm:$0xff]  }
   0x9   :  { %v1554_v20 = vld [vmem:[%s2276_s0 + $0x100] ss:$8 sps:$4 sm:$0xff]   ;;  %v1565_v26 = vld [vmem:[%s2276_s0 + $0x124] ss:$8 sps:$4 sm:$0xff]   ;;  %v1569_v29 = vld [vmem:[%s2276_s0 + $0x34] ss:$8 sps:$4 sm:$0xff]  }
   0xa   :  { %667 = vmatpush1.bf16.msra.mxu0 %v1537_v3  ;;  %1520 = vmatpush1.bf16.msra.mxu1 %v1537_v3  ;;  %v1567_v27 = vld [vmem:[%s2276_s0 + $0x20] ss:$8 sps:$4 sm:$0xff]   ;;  %v1571_v30 = vld [vmem:[%s2276_s0 + $0x134] ss:$8 sps:$4 sm:$0xff]   ;;  %v1573_v31 = vld [vmem:[%s2276_s0 + $0x30] ss:$8 sps:$4 sm:$0xff]  }
   0xb   :  { %668 = vmatprep.subr.bf16.mxu0 %v1647_v0  ;;  %1505 = vmatprep.subr.bf16.mxu1 %v1647_v0  ;;  %v1568_v28 = vld [vmem:[%s2276_s0 + $0x120] ss:$8 sps:$4 sm:$0xff]   ;;  %v1574_v32 = vld [vmem:[%s2276_s0 + $0x130] ss:$8 sps:$4 sm:$0xff]   ;;  %v1575_v33 = vld [vmem:[%s2276_s0 + $0x44] ss:$8 sps:$4 sm:$0xff]  }
   0xc   :  { %v1577_v34 = vld [vmem:[%s2276_s0 + $0x144] ss:$8 sps:$4 sm:$0xff]   ;;  %v1579_v35 = vld [vmem:[%s2276_s0 + $0x40] ss:$8 sps:$4 sm:$0xff]   ;;  %v1581_v37 = vld [vmem:[%s2276_s0 + $0x54] ss:$8 sps:$4 sm:$0xff]  }
   0xd   :  { %v1580_v36 = vld [vmem:[%s2276_s0 + $0x140] ss:$8 sps:$4 sm:$0xff]   ;;  %v1583_v38 = vld [vmem:[%s2276_s0 + $0x154] ss:$8 sps:$4 sm:$0xff]   ;;  %v1585_v39 = vld [vmem:[%s2276_s0 + $0x50] ss:$8 sps:$4 sm:$0xff]  }
   0xe   :  { %669 = vmatpush1.bf16.msra.mxu0 %v1538_v4  ;;  %1521 = vmatpush1.bf16.msra.mxu1 %v1538_v4  ;;  %v1586_v40 = vld [vmem:[%s2276_s0 + $0x150] ss:$8 sps:$4 sm:$0xff]   ;;  %v1587_v41 = vld [vmem:[%s2276_s0 + $0x64] ss:$8 sps:$4 sm:$0xff]   ;;  %v1591_v43 = vld [vmem:[%s2276_s0 + $0x60] ss:$8 sps:$4 sm:$0xff]  }
   0xf   :  { %670 = vmatprep.subr.bf16.mxu0 %v1647_v0  ;;  %1506 = vmatprep.subr.bf16.mxu1 %v1647_v0  ;;  %v1589_v42 = vld [vmem:[%s2276_s0 + $0x164] ss:$8 sps:$4 sm:$0xff]   ;;  %v1592_v44 = vld [vmem:[%s2276_s0 + $0x160] ss:$8 sps:$4 sm:$0xff]   ;;  %v1593_v45 = vld [vmem:[%s2276_s0 + $0x74] ss:$8 sps:$4 sm:$0xff]  }
  0x10   :  { %v1595_v46 = vld [vmem:[%s2276_s0 + $0x174] ss:$8 sps:$4 sm:$0xff]   ;;  %v1597_v47 = vld [vmem:[%s2276_s0 + $0x70] ss:$8 sps:$4 sm:$0xff]   ;;  %v1599_v49 = vld [vmem:[%s2276_s0 + $0x84] ss:$8 sps:$4 sm:$0xff]  }
  0x11   :  { %v1598_v48 = vld [vmem:[%s2276_s0 + $0x170] ss:$8 sps:$4 sm:$0xff]   ;;  %v1601_v50 = vld [vmem:[%s2276_s0 + $0x184] ss:$8 sps:$4 sm:$0xff]   ;;  %v1603_v51 = vld [vmem:[%s2276_s0 + $0x80] ss:$8 sps:$4 sm:$0xff]  }
  0x12   :  { %671 = vmatpush1.bf16.msra.mxu0 %v1539_v5  ;;  %1522 = vmatpush1.bf16.msra.mxu1 %v1539_v5  ;;  %v1604_v52 = vld [vmem:[%s2276_s0 + $0x180] ss:$8 sps:$4 sm:$0xff]   ;;  %v1605_v53 = vld [vmem:[%s2276_s0 + $0x94] ss:$8 sps:$4 sm:$0xff]   ;;  %v1609_v55 = vld [vmem:[%s2276_s0 + $0x90] ss:$8 sps:$4 sm:$0xff]  }
  0x13   :  { %672 = vmatprep.subr.bf16.mxu0 %v1647_v0  ;;  %1507 = vmatprep.subr.bf16.mxu1 %v1647_v0  ;;  %v1607_v54 = vld [vmem:[%s2276_s0 + $0x194] ss:$8 sps:$4 sm:$0xff]   ;;  %v1610_v56 = vld [vmem:[%s2276_s0 + $0x190] ss:$8 sps:$4 sm:$0xff]   ;;  %v1611_v57 = vld [vmem:[%s2276_s0 + $0xa4] ss:$8 sps:$4 sm:$0xff]  }
  0x14   :  { %v1613_v58 = vld [vmem:[%s2276_s0 + $0x1a4] ss:$8 sps:$4 sm:$0xff]   ;;  %v1615_v59 = vld [vmem:[%s2276_s0 + $0xa0] ss:$8 sps:$4 sm:$0xff]   ;;  %v1617_v61 = vld [vmem:[%s2276_s0 + $0xb4] ss:$8 sps:$4 sm:$0xff]  }
  0x15   :  { %v1616_v60 = vld [vmem:[%s2276_s0 + $0x1a0] ss:$8 sps:$4 sm:$0xff]   ;;  %v1619_v62 = vld [vmem:[%s2276_s0 + $0x1b4] ss:$8 sps:$4 sm:$0xff]   ;;  %v1621_v63 = vld [vmem:[%s2276_s0 + $0xb0] ss:$8 sps:$4 sm:$0xff]  }
  0x16   :  { %673 = vmatpush1.bf16.msra.mxu0 %v1540_v7  ;;  %1523 = vmatpush1.bf16.msra.mxu1 %v1540_v7  ;;  %v1623_v1 = vld [vmem:[%s2276_s0 + $0xc4] ss:$8 sps:$4 sm:$0xff]   ;;  %v1627_v3 = vld [vmem:[%s2276_s0 + $0xc0] ss:$8 sps:$4 sm:$0xff]   ;;  %v1629_v5 = vld [vmem:[%s2276_s0 + $0xd4] ss:$8 sps:$4 sm:$0xff]  }
  0x17   :  { %674 = vmatprep.subr.bf16.mxu0 %v1647_v0  ;;  %1508 = vmatprep.subr.bf16.mxu1 %v1647_v0  ;;  %v1625_v2 = vld [vmem:[%s2276_s0 + $0x1c4] ss:$8 sps:$4 sm:$0xff]   ;;  %v1628_v4 = vld [vmem:[%s2276_s0 + $0x1c0] ss:$8 sps:$4 sm:$0xff]   ;;  %v1631_v6 = vld [vmem:[%s2276_s0 + $0x1d4] ss:$8 sps:$4 sm:$0xff]  }
  0x18   :  { %v1633_v7 = vld [vmem:[%s2276_s0 + $0xd0] ss:$8 sps:$4 sm:$0xff]  }
  0x19   :  { %v1634_v8 = vld [vmem:[%s2276_s0 + $0x1d0] ss:$8 sps:$4 sm:$0xff]  }
  0x1a   :  { %675 = vmatpush1.bf16.msra.mxu0 %v1541_v9  ;;  %1524 = vmatpush1.bf16.msra.mxu1 %v1541_v9  ;;  %v1635_v9 = vld [vmem:[%s2276_s0 + $0xe4] ss:$8 sps:$4 sm:$0xff]  }
  0x1b   :  { %676 = vmatprep.subr.bf16.mxu0 %v1647_v0  ;;  %1509 = vmatprep.subr.bf16.mxu1 %v1647_v0 }
  0x1e   :  { %677 = vmatpush1.bf16.msra.mxu0 %v1542_v10  ;;  %1525 = vmatpush1.bf16.msra.mxu1 %v1542_v10  ;;  %v1637_v10 = vld [vmem:[%s2276_s0 + $0x1e4] ss:$8 sps:$4 sm:$0xff]  }
  0x1f   :  { %678 = vmatprep.subr.bf16.mxu0 %v1647_v0  ;;  %1510 = vmatprep.subr.bf16.mxu1 %v1647_v0 }
  0x22   :  { %679 = vmatpush2.bf16.msra.mxu0 %v1543_v11  ;;  %1526 = vmatpush2.bf16.msra.mxu1 %v1543_v11  ;;  %v1639_v11 = vld [vmem:[%s2276_s0 + $0xe0] ss:$8 sps:$4 sm:$0xff]  }
  0x23   :  { %680 = vmatprep.subr.bf16.mxu0 %v1647_v0  ;;  %1511 = vmatprep.subr.bf16.mxu1 %v1647_v0 }
  0x26   :  { %681 = vmatpush2.bf16.msra.mxu0 %v1544_v12  ;;  %1527 = vmatpush2.bf16.msra.mxu1 %v1544_v12  ;;  %v1640_v12 = vld [vmem:[%s2276_s0 + $0x1e0] ss:$8 sps:$4 sm:$0xff]  }
  0x27   :  { %682 = vmatprep.subr.bf16.mxu0 %v1647_v0  ;;  %1512 = vmatprep.subr.bf16.mxu1 %v1647_v0 }
  0x2a   :  { %683 = vmatpush2.bf16.msra.mxu0 %v1545_v13  ;;  %1528 = vmatpush2.bf16.msra.mxu1 %v1545_v13  ;;  %v1641_v13 = vld [vmem:[%s2276_s0 + $0xf4] ss:$8 sps:$4 sm:$0xff]  }
  0x2b   :  { %684 = vmatprep.subr.bf16.mxu0 %v1647_v0  ;;  %1513 = vmatprep.subr.bf16.mxu1 %v1647_v0 }
  0x2e   :  { %685 = vmatpush2.bf16.msra.mxu0 %v1546_v14  ;;  %1529 = vmatpush2.bf16.msra.mxu1 %v1546_v14  ;;  %v1643_v14 = vld [vmem:[%s2276_s0 + $0x1f4] ss:$8 sps:$4 sm:$0xff]  }
  0x2f   :  { %686 = vmatprep.subr.bf16.mxu0 %v1647_v0  ;;  %1514 = vmatprep.subr.bf16.mxu1 %v1647_v0 }
  0x32   :  { %687 = vmatpush2.bf16.msra.mxu0 %v1547_v15  ;;  %1530 = vmatpush2.bf16.msra.mxu1 %v1547_v15  ;;  %v1645_v15 = vld [vmem:[%s2276_s0 + $0xf0] ss:$8 sps:$4 sm:$0xff]  }
  0x33   :  { %688 = vmatprep.subr.bf16.mxu0 %v1647_v0  ;;  %1515 = vmatprep.subr.bf16.mxu1 %v1647_v0 }
  0x36   :  { %689 = vmatpush2.bf16.msra.mxu0 %v1548_v16  ;;  %1531 = vmatpush2.bf16.msra.mxu1 %v1548_v16  ;;  %v1646_v16 = vld [vmem:[%s2276_s0 + $0x1f0] ss:$8 sps:$4 sm:$0xff]  }
  0x37   :  { %690 = vmatprep.subr.bf16.mxu0 %v1647_v0  ;;  %1516 = vmatprep.subr.bf16.mxu1 %v1647_v0 }
  0x3a   :  { %691 = vmatpush2.bf16.msra.mxu0 %v1549_v17  ;;  %1532 = vmatpush2.bf16.msra.mxu1 %v1549_v17  ;;  %v1948_v17 = vld [vmem:[%s2277_s2] ss:$0 sm:$0xff] }
  0x3b   :  { %692 = vmatprep.subr.bf16.mxu0 %v1647_v0  ;;  %1517 = vmatprep.subr.bf16.mxu1 %v1647_v0  ;;  %v1622_v0 = vld [vmem:[%s2276_s0 + $0x1b0] ss:$8 sps:$4 sm:$0xff]  }
  0x3e   :  { %693 = vmatpush2.bf16.msra.mxu0 %v1550_v18  ;;  %1533 = vmatpush2.bf16.msra.mxu1 %v1550_v18 }
  0x41   :  { %695 = vmatmul.mubr.bf16.vlgmr.msra.gmra.mxu0 %v1551_v19  ;;  %823 = vmatmul.mubr.bf16.vlgmr.msra.gmra.mxu1 %v1554_v20  ;;  %v1953_v19 = vld [vmem:[%s2278_s3] ss:$0 sm:$0xff] }
  0x42   :  { %702 = vmatprep.mubr.bf16.mxu0 %v1557_v21  ;;  %830 = vmatprep.mubr.bf16.mxu1 %v1559_v22 }
  0x49   :  { %703 = vmatmul.mubr.bf16.gmra.mxu0 %v1561_v23  ;;  %831 = vmatmul.mubr.bf16.gmra.mxu1 %v1562_v24 }
  0x4a   :  { %710 = vmatprep.mubr.bf16.mxu0 %v1563_v25  ;;  %838 = vmatprep.mubr.bf16.mxu1 %v1565_v26 }
  0x51   :  { %711 = vmatmul.mubr.bf16.gmra.mxu0 %v1567_v27  ;;  %839 = vmatmul.mubr.bf16.gmra.mxu1 %v1568_v28 }
  0x52   :  { %718 = vmatprep.mubr.bf16.mxu0 %v1569_v29  ;;  %846 = vmatprep.mubr.bf16.mxu1 %v1571_v30 }
  0x59   :  { %719 = vmatmul.mubr.bf16.gmra.mxu0 %v1573_v31  ;;  %847 = vmatmul.mubr.bf16.gmra.mxu1 %v1574_v32 }
  0x5a   :  { %726 = vmatprep.mubr.bf16.mxu0 %v1575_v33  ;;  %854 = vmatprep.mubr.bf16.mxu1 %v1577_v34 }
  0x61   :  { %727 = vmatmul.mubr.bf16.gmra.mxu0 %v1579_v35  ;;  %855 = vmatmul.mubr.bf16.gmra.mxu1 %v1580_v36 }
  0x62   :  { %734 = vmatprep.mubr.bf16.mxu0 %v1581_v37  ;;  %862 = vmatprep.mubr.bf16.mxu1 %v1583_v38 }
  0x69   :  { %735 = vmatmul.mubr.bf16.gmra.mxu0 %v1585_v39  ;;  %863 = vmatmul.mubr.bf16.gmra.mxu1 %v1586_v40 }
  0x6a   :  { %742 = vmatprep.mubr.bf16.mxu0 %v1587_v41  ;;  %870 = vmatprep.mubr.bf16.mxu1 %v1589_v42 }
  0x71   :  { %743 = vmatmul.mubr.bf16.gmra.mxu0 %v1591_v43  ;;  %871 = vmatmul.mubr.bf16.gmra.mxu1 %v1592_v44 }
  0x72   :  { %750 = vmatprep.mubr.bf16.mxu0 %v1593_v45  ;;  %878 = vmatprep.mubr.bf16.mxu1 %v1595_v46 }
  0x79   :  { %751 = vmatmul.mubr.bf16.gmra.mxu0 %v1597_v47  ;;  %879 = vmatmul.mubr.bf16.gmra.mxu1 %v1598_v48 }
  0x7a   :  { %758 = vmatprep.mubr.bf16.mxu0 %v1599_v49  ;;  %886 = vmatprep.mubr.bf16.mxu1 %v1601_v50 }
  0x81   :  { %759 = vmatmul.mubr.bf16.gmra.mxu0 %v1603_v51  ;;  %887 = vmatmul.mubr.bf16.gmra.mxu1 %v1604_v52 }
  0x82   :  { %766 = vmatprep.mubr.bf16.mxu0 %v1605_v53  ;;  %894 = vmatprep.mubr.bf16.mxu1 %v1607_v54 }
  0x89   :  { %767 = vmatmul.mubr.bf16.gmra.mxu0 %v1609_v55  ;;  %895 = vmatmul.mubr.bf16.gmra.mxu1 %v1610_v56 }
  0x8a   :  { %774 = vmatprep.mubr.bf16.mxu0 %v1611_v57  ;;  %902 = vmatprep.mubr.bf16.mxu1 %v1613_v58 }
  0x91   :  { %775 = vmatmul.mubr.bf16.gmra.mxu0 %v1615_v59  ;;  %903 = vmatmul.mubr.bf16.gmra.mxu1 %v1616_v60 }
  0x92   :  { %782 = vmatprep.mubr.bf16.mxu0 %v1617_v61  ;;  %910 = vmatprep.mubr.bf16.mxu1 %v1619_v62 }
  0x99   :  { %783 = vmatmul.mubr.bf16.gmra.mxu0 %v1621_v63  ;;  %911 = vmatmul.mubr.bf16.gmra.mxu1 %v1622_v0 }
  0x9a   :  { %790 = vmatprep.mubr.bf16.mxu0 %v1623_v1  ;;  %918 = vmatprep.mubr.bf16.mxu1 %v1625_v2 }
  0xa1   :  { %791 = vmatmul.mubr.bf16.gmra.mxu0 %v1627_v3  ;;  %919 = vmatmul.mubr.bf16.gmra.mxu1 %v1628_v4 }
  0xa2   :  { %798 = vmatprep.mubr.bf16.mxu0 %v1629_v5  ;;  %926 = vmatprep.mubr.bf16.mxu1 %v1631_v6 }
  0xa9   :  { %799 = vmatmul.mubr.bf16.gmra.mxu0 %v1633_v7  ;;  %927 = vmatmul.mubr.bf16.gmra.mxu1 %v1634_v8 }
  0xaa   :  { %806 = vmatprep.mubr.bf16.mxu0 %v1635_v9  ;;  %934 = vmatprep.mubr.bf16.mxu1 %v1637_v10 }
  0xb1   :  { %807 = vmatmul.mubr.bf16.gmra.mxu0 %v1639_v11  ;;  %935 = vmatmul.mubr.bf16.gmra.mxu1 %v1640_v12 }
  0xb2   :  { %814 = vmatprep.mubr.bf16.mxu0 %v1641_v13  ;;  %942 = vmatprep.mubr.bf16.mxu1 %v1643_v14 }
  0xb9   :  { %815 = vmatmul.mubr.bf16.gmra.mxu0 %v1645_v15  ;;  %943 = vmatmul.mubr.bf16.gmra.mxu1 %v1646_v16 }
 0x101   :  { %v696_v18 = vpop.f32.mrf.mxu0  ;;  %v824_v20 = vpop.f32.mrf.mxu1 }
 0x102   :  { %v1153_v21 = vmul.f32 %v1948_v17, %v696_v18  ;;  %v1185_v22 = vmul.f32 %v1948_v17, %v824_v20 }
 0x103   :  { %v698_v23 = vpop.f32.mrf.mxu0  ;;  %v826_v24 = vpop.f32.mrf.mxu1 }
 0x104   :  { %v1224_v25 = vadd.f32 %v1953_v19, %v1153_v21  ;;  %v1256_v26 = vadd.f32 %v1953_v19, %v1185_v22 }
 0x105   :  { %v699_v27 = vpop.f32.mrf.mxu0  ;;  %v827_v28 = vpop.f32.mrf.mxu1 }
 0x106   :  { %v1288_v29 = vmax.f32 %v1224_v25, 0.0  ;;  %v1320_v30 = vmax.f32 %v1256_v26, 0.0  ;;  %v1154_v31 = vmul.f32 %v1948_v17, %v699_v27  ;;  %v1186_v32 = vmul.f32 %v1948_v17, %v827_v28 }
 0x107   :  { %v701_v33 = vpop.f32.mrf.mxu0  ;;  %v829_v34 = vpop.f32.mrf.mxu1 }
 0x108   :  { %1352 = vst [vmem:[%s2279_s4] sm:$0xff] %v1288_v29  ;;  %1384 = vst [vmem:[%s2279_s4 + $0x100] sm:$0xff] %v1320_v30  ;;  %v1225_v35 = vadd.f32 %v1953_v19, %v1154_v31  ;;  %v1257_v36 = vadd.f32 %v1953_v19, %v1186_v32 }
 0x109   :  { %v704_v37 = vpop.f32.mrf.mxu0  ;;  %v832_v38 = vpop.f32.mrf.mxu1 }
 0x10a   :  { %v1289_v39 = vmax.f32 %v1225_v35, 0.0  ;;  %v1321_v40 = vmax.f32 %v1257_v36, 0.0  ;;  %v1155_v41 = vmul.f32 %v1948_v17, %v704_v37  ;;  %v1187_v42 = vmul.f32 %v1948_v17, %v832_v38 }
 0x10b   :  { %v706_v43 = vpop.f32.mrf.mxu0  ;;  %v834_v44 = vpop.f32.mrf.mxu1 }
 0x10c   :  { %1353 = vst [vmem:[%s2279_s4 + $0x8] sm:$0xff] %v1289_v39  ;;  %1385 = vst [vmem:[%s2279_s4 + $0x108] sm:$0xff] %v1321_v40  ;;  %v1226_v45 = vadd.f32 %v1953_v19, %v1155_v41  ;;  %v1258_v46 = vadd.f32 %v1953_v19, %v1187_v42 }
 0x10d   :  { %v707_v47 = vpop.f32.mrf.mxu0  ;;  %v835_v48 = vpop.f32.mrf.mxu1 }
 0x10e   :  { %v1290_v49 = vmax.f32 %v1226_v45, 0.0  ;;  %v1322_v50 = vmax.f32 %v1258_v46, 0.0  ;;  %v1156_v51 = vmul.f32 %v1948_v17, %v707_v47  ;;  %v1188_v52 = vmul.f32 %v1948_v17, %v835_v48 }
 0x10f   :  { %v709_v53 = vpop.f32.mrf.mxu0  ;;  %v837_v54 = vpop.f32.mrf.mxu1 }
 0x110   :  { %1354 = vst [vmem:[%s2279_s4 + $0x10] sm:$0xff] %v1290_v49  ;;  %1386 = vst [vmem:[%s2279_s4 + $0x110] sm:$0xff] %v1322_v50  ;;  %v1227_v55 = vadd.f32 %v1953_v19, %v1156_v51  ;;  %v1259_v56 = vadd.f32 %v1953_v19, %v1188_v52 }
 0x111   :  { %v712_v57 = vpop.f32.mrf.mxu0  ;;  %v840_v58 = vpop.f32.mrf.mxu1 }
 0x112   :  { %v1291_v59 = vmax.f32 %v1227_v55, 0.0  ;;  %v1323_v60 = vmax.f32 %v1259_v56, 0.0  ;;  %v1157_v61 = vmul.f32 %v1948_v17, %v712_v57  ;;  %v1189_v62 = vmul.f32 %v1948_v17, %v840_v58 }
 0x113   :  { %v714_v63 = vpop.f32.mrf.mxu0  ;;  %v842_v0 = vpop.f32.mrf.mxu1 }
 0x114   :  { %1355 = vst [vmem:[%s2279_s4 + $0x18] sm:$0xff] %v1291_v59  ;;  %1387 = vst [vmem:[%s2279_s4 + $0x118] sm:$0xff] %v1323_v60  ;;  %v1228_v1 = vadd.f32 %v1953_v19, %v1157_v61  ;;  %v1260_v2 = vadd.f32 %v1953_v19, %v1189_v62 }
 0x115   :  { %v715_v3 = vpop.f32.mrf.mxu0  ;;  %v843_v4 = vpop.f32.mrf.mxu1 }
 0x116   :  { %v1292_v5 = vmax.f32 %v1228_v1, 0.0  ;;  %v1324_v6 = vmax.f32 %v1260_v2, 0.0  ;;  %v1158_v7 = vmul.f32 %v1948_v17, %v715_v3  ;;  %v1190_v8 = vmul.f32 %v1948_v17, %v843_v4 }
 0x117   :  { %v717_v9 = vpop.f32.mrf.mxu0  ;;  %v845_v10 = vpop.f32.mrf.mxu1 }
 0x118   :  { %1356 = vst [vmem:[%s2279_s4 + $0x20] sm:$0xff] %v1292_v5  ;;  %1388 = vst [vmem:[%s2279_s4 + $0x120] sm:$0xff] %v1324_v6  ;;  %v1229_v11 = vadd.f32 %v1953_v19, %v1158_v7  ;;  %v1261_v12 = vadd.f32 %v1953_v19, %v1190_v8 }
 0x119   :  { %v720_v13 = vpop.f32.mrf.mxu0  ;;  %v848_v14 = vpop.f32.mrf.mxu1 }
 0x11a   :  { %v1293_v15 = vmax.f32 %v1229_v11, 0.0  ;;  %v1325_v16 = vmax.f32 %v1261_v12, 0.0  ;;  %v1159_v18 = vmul.f32 %v1948_v17, %v720_v13  ;;  %v1191_v20 = vmul.f32 %v1948_v17, %v848_v14 }
 0x11b   :  { %v722_v21 = vpop.f32.mrf.mxu0  ;;  %v850_v22 = vpop.f32.mrf.mxu1 }
 0x11c   :  { %1357 = vst [vmem:[%s2279_s4 + $0x28] sm:$0xff] %v1293_v15  ;;  %1389 = vst [vmem:[%s2279_s4 + $0x128] sm:$0xff] %v1325_v16  ;;  %v1230_v23 = vadd.f32 %v1953_v19, %v1159_v18  ;;  %v1262_v24 = vadd.f32 %v1953_v19, %v1191_v20 }
 0x11d   :  { %v723_v25 = vpop.f32.mrf.mxu0  ;;  %v851_v26 = vpop.f32.mrf.mxu1 }
 0x11e   :  { %v1294_v27 = vmax.f32 %v1230_v23, 0.0  ;;  %v1326_v28 = vmax.f32 %v1262_v24, 0.0  ;;  %v1160_v29 = vmul.f32 %v1948_v17, %v723_v25  ;;  %v1192_v30 = vmul.f32 %v1948_v17, %v851_v26 }
 0x11f   :  { %v725_v31 = vpop.f32.mrf.mxu0  ;;  %v853_v32 = vpop.f32.mrf.mxu1 }
 0x120   :  { %1358 = vst [vmem:[%s2279_s4 + $0x30] sm:$0xff] %v1294_v27  ;;  %1390 = vst [vmem:[%s2279_s4 + $0x130] sm:$0xff] %v1326_v28  ;;  %v1231_v33 = vadd.f32 %v1953_v19, %v1160_v29  ;;  %v1263_v34 = vadd.f32 %v1953_v19, %v1192_v30 }
 0x121   :  { %v728_v35 = vpop.f32.mrf.mxu0  ;;  %v856_v36 = vpop.f32.mrf.mxu1 }
 0x122   :  { %v1295_v37 = vmax.f32 %v1231_v33, 0.0  ;;  %v1327_v38 = vmax.f32 %v1263_v34, 0.0  ;;  %v1161_v39 = vmul.f32 %v1948_v17, %v728_v35  ;;  %v1193_v40 = vmul.f32 %v1948_v17, %v856_v36 }
 0x123   :  { %v730_v41 = vpop.f32.mrf.mxu0  ;;  %v858_v42 = vpop.f32.mrf.mxu1 }
 0x124   :  { %1359 = vst [vmem:[%s2279_s4 + $0x38] sm:$0xff] %v1295_v37  ;;  %1391 = vst [vmem:[%s2279_s4 + $0x138] sm:$0xff] %v1327_v38  ;;  %v1232_v43 = vadd.f32 %v1953_v19, %v1161_v39  ;;  %v1264_v44 = vadd.f32 %v1953_v19, %v1193_v40 }
 0x125   :  { %v731_v45 = vpop.f32.mrf.mxu0  ;;  %v859_v46 = vpop.f32.mrf.mxu1 }
 0x126   :  { %v1296_v47 = vmax.f32 %v1232_v43, 0.0  ;;  %v1328_v48 = vmax.f32 %v1264_v44, 0.0  ;;  %v1162_v49 = vmul.f32 %v1948_v17, %v731_v45  ;;  %v1194_v50 = vmul.f32 %v1948_v17, %v859_v46 }
 0x127   :  { %v733_v51 = vpop.f32.mrf.mxu0  ;;  %v861_v52 = vpop.f32.mrf.mxu1 }
 0x128   :  { %1360 = vst [vmem:[%s2279_s4 + $0x40] sm:$0xff] %v1296_v47  ;;  %1392 = vst [vmem:[%s2279_s4 + $0x140] sm:$0xff] %v1328_v48  ;;  %v1233_v53 = vadd.f32 %v1953_v19, %v1162_v49  ;;  %v1265_v54 = vadd.f32 %v1953_v19, %v1194_v50 }
 0x129   :  { %v736_v55 = vpop.f32.mrf.mxu0  ;;  %v864_v56 = vpop.f32.mrf.mxu1 }
 0x12a   :  { %v1297_v57 = vmax.f32 %v1233_v53, 0.0  ;;  %v1329_v58 = vmax.f32 %v1265_v54, 0.0  ;;  %v1163_v59 = vmul.f32 %v1948_v17, %v736_v55  ;;  %v1195_v60 = vmul.f32 %v1948_v17, %v864_v56 }
 0x12b   :  { %v738_v61 = vpop.f32.mrf.mxu0  ;;  %v866_v62 = vpop.f32.mrf.mxu1 }
 0x12c   :  { %1361 = vst [vmem:[%s2279_s4 + $0x48] sm:$0xff] %v1297_v57  ;;  %1393 = vst [vmem:[%s2279_s4 + $0x148] sm:$0xff] %v1329_v58  ;;  %v1234_v63 = vadd.f32 %v1953_v19, %v1163_v59  ;;  %v1266_v0 = vadd.f32 %v1953_v19, %v1195_v60 }
 0x12d   :  { %v739_v1 = vpop.f32.mrf.mxu0  ;;  %v867_v2 = vpop.f32.mrf.mxu1 }
 0x12e   :  { %v1298_v3 = vmax.f32 %v1234_v63, 0.0  ;;  %v1330_v4 = vmax.f32 %v1266_v0, 0.0  ;;  %v1164_v5 = vmul.f32 %v1948_v17, %v739_v1  ;;  %v1196_v6 = vmul.f32 %v1948_v17, %v867_v2 }
 0x12f   :  { %v741_v7 = vpop.f32.mrf.mxu0  ;;  %v869_v8 = vpop.f32.mrf.mxu1 }
 0x130   :  { %1362 = vst [vmem:[%s2279_s4 + $0x50] sm:$0xff] %v1298_v3  ;;  %1394 = vst [vmem:[%s2279_s4 + $0x150] sm:$0xff] %v1330_v4  ;;  %v1235_v9 = vadd.f32 %v1953_v19, %v1164_v5  ;;  %v1267_v10 = vadd.f32 %v1953_v19, %v1196_v6 }
 0x131   :  { %v744_v11 = vpop.f32.mrf.mxu0  ;;  %v872_v12 = vpop.f32.mrf.mxu1 }
 0x132   :  { %v1299_v13 = vmax.f32 %v1235_v9, 0.0  ;;  %v1331_v14 = vmax.f32 %v1267_v10, 0.0  ;;  %v1165_v15 = vmul.f32 %v1948_v17, %v744_v11  ;;  %v1197_v16 = vmul.f32 %v1948_v17, %v872_v12 }
 0x133   :  { %v746_v18 = vpop.f32.mrf.mxu0  ;;  %v874_v20 = vpop.f32.mrf.mxu1 }
 0x134   :  { %1363 = vst [vmem:[%s2279_s4 + $0x58] sm:$0xff] %v1299_v13  ;;  %1395 = vst [vmem:[%s2279_s4 + $0x158] sm:$0xff] %v1331_v14  ;;  %v1236_v21 = vadd.f32 %v1953_v19, %v1165_v15  ;;  %v1268_v22 = vadd.f32 %v1953_v19, %v1197_v16 }
 0x135   :  { %v747_v23 = vpop.f32.mrf.mxu0  ;;  %v875_v24 = vpop.f32.mrf.mxu1 }
 0x136   :  { %v1300_v25 = vmax.f32 %v1236_v21, 0.0  ;;  %v1332_v26 = vmax.f32 %v1268_v22, 0.0  ;;  %v1166_v27 = vmul.f32 %v1948_v17, %v747_v23  ;;  %v1198_v28 = vmul.f32 %v1948_v17, %v875_v24 }
 0x137   :  { %v749_v29 = vpop.f32.mrf.mxu0  ;;  %v877_v30 = vpop.f32.mrf.mxu1 }
 0x138   :  { %1364 = vst [vmem:[%s2279_s4 + $0x60] sm:$0xff] %v1300_v25  ;;  %1396 = vst [vmem:[%s2279_s4 + $0x160] sm:$0xff] %v1332_v26  ;;  %v1237_v31 = vadd.f32 %v1953_v19, %v1166_v27  ;;  %v1269_v32 = vadd.f32 %v1953_v19, %v1198_v28 }
 0x139   :  { %v752_v33 = vpop.f32.mrf.mxu0  ;;  %v880_v34 = vpop.f32.mrf.mxu1 }
 0x13a   :  { %v1301_v35 = vmax.f32 %v1237_v31, 0.0  ;;  %v1333_v36 = vmax.f32 %v1269_v32, 0.0  ;;  %v1167_v37 = vmul.f32 %v1948_v17, %v752_v33  ;;  %v1199_v38 = vmul.f32 %v1948_v17, %v880_v34 }
 0x13b   :  { %v754_v39 = vpop.f32.mrf.mxu0  ;;  %v882_v40 = vpop.f32.mrf.mxu1 }
 0x13c   :  { %1365 = vst [vmem:[%s2279_s4 + $0x68] sm:$0xff] %v1301_v35  ;;  %1397 = vst [vmem:[%s2279_s4 + $0x168] sm:$0xff] %v1333_v36  ;;  %v1238_v41 = vadd.f32 %v1953_v19, %v1167_v37  ;;  %v1270_v42 = vadd.f32 %v1953_v19, %v1199_v38 }
 0x13d   :  { %v755_v43 = vpop.f32.mrf.mxu0  ;;  %v883_v44 = vpop.f32.mrf.mxu1 }
 0x13e   :  { %v1302_v45 = vmax.f32 %v1238_v41, 0.0  ;;  %v1334_v46 = vmax.f32 %v1270_v42, 0.0  ;;  %v1168_v47 = vmul.f32 %v1948_v17, %v755_v43  ;;  %v1200_v48 = vmul.f32 %v1948_v17, %v883_v44 }
 0x13f   :  { %v757_v49 = vpop.f32.mrf.mxu0  ;;  %v885_v50 = vpop.f32.mrf.mxu1 }
 0x140   :  { %1366 = vst [vmem:[%s2279_s4 + $0x70] sm:$0xff] %v1302_v45  ;;  %1398 = vst [vmem:[%s2279_s4 + $0x170] sm:$0xff] %v1334_v46  ;;  %v1239_v51 = vadd.f32 %v1953_v19, %v1168_v47  ;;  %v1271_v52 = vadd.f32 %v1953_v19, %v1200_v48 }
 0x141   :  { %v760_v53 = vpop.f32.mrf.mxu0  ;;  %v888_v54 = vpop.f32.mrf.mxu1 }
 0x142   :  { %v1303_v55 = vmax.f32 %v1239_v51, 0.0  ;;  %v1335_v56 = vmax.f32 %v1271_v52, 0.0  ;;  %v1169_v57 = vmul.f32 %v1948_v17, %v760_v53  ;;  %v1201_v58 = vmul.f32 %v1948_v17, %v888_v54 }
 0x143   :  { %v762_v59 = vpop.f32.mrf.mxu0  ;;  %v890_v60 = vpop.f32.mrf.mxu1 }
 0x144   :  { %1367 = vst [vmem:[%s2279_s4 + $0x78] sm:$0xff] %v1303_v55  ;;  %1399 = vst [vmem:[%s2279_s4 + $0x178] sm:$0xff] %v1335_v56  ;;  %v1240_v61 = vadd.f32 %v1953_v19, %v1169_v57  ;;  %v1272_v62 = vadd.f32 %v1953_v19, %v1201_v58 }
 0x145   :  { %v763_v63 = vpop.f32.mrf.mxu0  ;;  %v891_v0 = vpop.f32.mrf.mxu1 }
 0x146   :  { %v1304_v1 = vmax.f32 %v1240_v61, 0.0  ;;  %v1336_v2 = vmax.f32 %v1272_v62, 0.0  ;;  %v1170_v3 = vmul.f32 %v1948_v17, %v763_v63  ;;  %v1202_v4 = vmul.f32 %v1948_v17, %v891_v0 }
 0x147   :  { %v765_v5 = vpop.f32.mrf.mxu0  ;;  %v893_v6 = vpop.f32.mrf.mxu1 }
 0x148   :  { %1368 = vst [vmem:[%s2279_s4 + $0x80] sm:$0xff] %v1304_v1  ;;  %1400 = vst [vmem:[%s2279_s4 + $0x180] sm:$0xff] %v1336_v2  ;;  %v1241_v7 = vadd.f32 %v1953_v19, %v1170_v3  ;;  %v1273_v8 = vadd.f32 %v1953_v19, %v1202_v4 }
 0x149   :  { %v768_v9 = vpop.f32.mrf.mxu0  ;;  %v896_v10 = vpop.f32.mrf.mxu1 }
 0x14a   :  { %v1305_v11 = vmax.f32 %v1241_v7, 0.0  ;;  %v1337_v12 = vmax.f32 %v1273_v8, 0.0  ;;  %v1171_v13 = vmul.f32 %v1948_v17, %v768_v9  ;;  %v1203_v14 = vmul.f32 %v1948_v17, %v896_v10 }
 0x14b   :  { %v770_v15 = vpop.f32.mrf.mxu0  ;;  %v898_v16 = vpop.f32.mrf.mxu1 }
 0x14c   :  { %1369 = vst [vmem:[%s2279_s4 + $0x88] sm:$0xff] %v1305_v11  ;;  %1401 = vst [vmem:[%s2279_s4 + $0x188] sm:$0xff] %v1337_v12  ;;  %v1242_v18 = vadd.f32 %v1953_v19, %v1171_v13  ;;  %v1274_v20 = vadd.f32 %v1953_v19, %v1203_v14 }
 0x14d   :  { %v771_v21 = vpop.f32.mrf.mxu0  ;;  %v899_v22 = vpop.f32.mrf.mxu1 }
 0x14e   :  { %v1306_v23 = vmax.f32 %v1242_v18, 0.0  ;;  %v1338_v24 = vmax.f32 %v1274_v20, 0.0  ;;  %v1172_v25 = vmul.f32 %v1948_v17, %v771_v21  ;;  %v1204_v26 = vmul.f32 %v1948_v17, %v899_v22 }
 0x14f   :  { %v773_v27 = vpop.f32.mrf.mxu0  ;;  %v901_v28 = vpop.f32.mrf.mxu1 }
 0x150   :  { %1370 = vst [vmem:[%s2279_s4 + $0x90] sm:$0xff] %v1306_v23  ;;  %1402 = vst [vmem:[%s2279_s4 + $0x190] sm:$0xff] %v1338_v24  ;;  %v1243_v29 = vadd.f32 %v1953_v19, %v1172_v25  ;;  %v1275_v30 = vadd.f32 %v1953_v19, %v1204_v26 }
 0x151   :  { %v776_v31 = vpop.f32.mrf.mxu0  ;;  %v904_v32 = vpop.f32.mrf.mxu1 }
 0x152   :  { %v1307_v33 = vmax.f32 %v1243_v29, 0.0  ;;  %v1339_v34 = vmax.f32 %v1275_v30, 0.0  ;;  %v1173_v35 = vmul.f32 %v1948_v17, %v776_v31  ;;  %v1205_v36 = vmul.f32 %v1948_v17, %v904_v32 }
 0x153   :  { %v778_v37 = vpop.f32.mrf.mxu0  ;;  %v906_v38 = vpop.f32.mrf.mxu1 }
 0x154   :  { %1371 = vst [vmem:[%s2279_s4 + $0x98] sm:$0xff] %v1307_v33  ;;  %1403 = vst [vmem:[%s2279_s4 + $0x198] sm:$0xff] %v1339_v34  ;;  %v1244_v39 = vadd.f32 %v1953_v19, %v1173_v35  ;;  %v1276_v40 = vadd.f32 %v1953_v19, %v1205_v36 }
 0x155   :  { %v779_v41 = vpop.f32.mrf.mxu0  ;;  %v907_v42 = vpop.f32.mrf.mxu1 }
 0x156   :  { %v1308_v43 = vmax.f32 %v1244_v39, 0.0  ;;  %v1340_v44 = vmax.f32 %v1276_v40, 0.0  ;;  %v1174_v45 = vmul.f32 %v1948_v17, %v779_v41  ;;  %v1206_v46 = vmul.f32 %v1948_v17, %v907_v42 }
 0x157   :  { %v781_v47 = vpop.f32.mrf.mxu0  ;;  %v909_v48 = vpop.f32.mrf.mxu1 }
 0x158   :  { %1372 = vst [vmem:[%s2279_s4 + $0xa0] sm:$0xff] %v1308_v43  ;;  %1404 = vst [vmem:[%s2279_s4 + $0x1a0] sm:$0xff] %v1340_v44  ;;  %v1245_v49 = vadd.f32 %v1953_v19, %v1174_v45  ;;  %v1277_v50 = vadd.f32 %v1953_v19, %v1206_v46 }
 0x159   :  { %v784_v51 = vpop.f32.mrf.mxu0  ;;  %v912_v52 = vpop.f32.mrf.mxu1 }
 0x15a   :  { %v1309_v53 = vmax.f32 %v1245_v49, 0.0  ;;  %v1341_v54 = vmax.f32 %v1277_v50, 0.0  ;;  %v1175_v55 = vmul.f32 %v1948_v17, %v784_v51  ;;  %v1207_v56 = vmul.f32 %v1948_v17, %v912_v52 }
 0x15b   :  { %v786_v57 = vpop.f32.mrf.mxu0  ;;  %v914_v58 = vpop.f32.mrf.mxu1 }
 0x15c   :  { %1373 = vst [vmem:[%s2279_s4 + $0xa8] sm:$0xff] %v1309_v53  ;;  %1405 = vst [vmem:[%s2279_s4 + $0x1a8] sm:$0xff] %v1341_v54  ;;  %v1246_v59 = vadd.f32 %v1953_v19, %v1175_v55  ;;  %v1278_v60 = vadd.f32 %v1953_v19, %v1207_v56 }
 0x15d   :  { %v787_v61 = vpop.f32.mrf.mxu0  ;;  %v915_v62 = vpop.f32.mrf.mxu1 }
 0x15e   :  { %v1310_v63 = vmax.f32 %v1246_v59, 0.0  ;;  %v1342_v0 = vmax.f32 %v1278_v60, 0.0  ;;  %v1176_v1 = vmul.f32 %v1948_v17, %v787_v61  ;;  %v1208_v2 = vmul.f32 %v1948_v17, %v915_v62 }
 0x15f   :  { %v789_v3 = vpop.f32.mrf.mxu0  ;;  %v917_v4 = vpop.f32.mrf.mxu1 }
 0x160   :  { %1374 = vst [vmem:[%s2279_s4 + $0xb0] sm:$0xff] %v1310_v63  ;;  %1406 = vst [vmem:[%s2279_s4 + $0x1b0] sm:$0xff] %v1342_v0  ;;  %v1247_v5 = vadd.f32 %v1953_v19, %v1176_v1  ;;  %v1279_v6 = vadd.f32 %v1953_v19, %v1208_v2 }
 0x161   :  { %v792_v7 = vpop.f32.mrf.mxu0  ;;  %v920_v8 = vpop.f32.mrf.mxu1 }
 0x162   :  { %v1311_v9 = vmax.f32 %v1247_v5, 0.0  ;;  %v1343_v10 = vmax.f32 %v1279_v6, 0.0  ;;  %v1177_v11 = vmul.f32 %v1948_v17, %v792_v7  ;;  %v1209_v12 = vmul.f32 %v1948_v17, %v920_v8 }
 0x163   :  { %v794_v13 = vpop.f32.mrf.mxu0  ;;  %v922_v14 = vpop.f32.mrf.mxu1 }
 0x164   :  { %1375 = vst [vmem:[%s2279_s4 + $0xb8] sm:$0xff] %v1311_v9  ;;  %1407 = vst [vmem:[%s2279_s4 + $0x1b8] sm:$0xff] %v1343_v10  ;;  %v1248_v15 = vadd.f32 %v1953_v19, %v1177_v11  ;;  %v1280_v16 = vadd.f32 %v1953_v19, %v1209_v12 }
 0x165   :  { %v795_v18 = vpop.f32.mrf.mxu0  ;;  %v923_v20 = vpop.f32.mrf.mxu1 }
 0x166   :  { %v1312_v21 = vmax.f32 %v1248_v15, 0.0  ;;  %v1344_v22 = vmax.f32 %v1280_v16, 0.0  ;;  %v1178_v23 = vmul.f32 %v1948_v17, %v795_v18  ;;  %v1210_v24 = vmul.f32 %v1948_v17, %v923_v20 }
 0x167   :  { %v797_v25 = vpop.f32.mrf.mxu0  ;;  %v925_v26 = vpop.f32.mrf.mxu1 }
 0x168   :  { %1376 = vst [vmem:[%s2279_s4 + $0xc0] sm:$0xff] %v1312_v21  ;;  %1408 = vst [vmem:[%s2279_s4 + $0x1c0] sm:$0xff] %v1344_v22  ;;  %v1249_v27 = vadd.f32 %v1953_v19, %v1178_v23  ;;  %v1281_v28 = vadd.f32 %v1953_v19, %v1210_v24 }
 0x169   :  { %v800_v29 = vpop.f32.mrf.mxu0  ;;  %v928_v30 = vpop.f32.mrf.mxu1 }
 0x16a   :  { %v1313_v31 = vmax.f32 %v1249_v27, 0.0  ;;  %v1345_v32 = vmax.f32 %v1281_v28, 0.0  ;;  %v1179_v33 = vmul.f32 %v1948_v17, %v800_v29  ;;  %v1211_v34 = vmul.f32 %v1948_v17, %v928_v30 }
 0x16b   :  { %v802_v35 = vpop.f32.mrf.mxu0  ;;  %v930_v36 = vpop.f32.mrf.mxu1 }
 0x16c   :  { %1377 = vst [vmem:[%s2279_s4 + $0xc8] sm:$0xff] %v1313_v31  ;;  %1409 = vst [vmem:[%s2279_s4 + $0x1c8] sm:$0xff] %v1345_v32  ;;  %v1250_v37 = vadd.f32 %v1953_v19, %v1179_v33  ;;  %v1282_v38 = vadd.f32 %v1953_v19, %v1211_v34 }
 0x16d   :  { %v803_v39 = vpop.f32.mrf.mxu0  ;;  %v931_v40 = vpop.f32.mrf.mxu1 }
 0x16e   :  { %v1314_v41 = vmax.f32 %v1250_v37, 0.0  ;;  %v1346_v42 = vmax.f32 %v1282_v38, 0.0  ;;  %v1180_v43 = vmul.f32 %v1948_v17, %v803_v39  ;;  %v1212_v44 = vmul.f32 %v1948_v17, %v931_v40 }
 0x16f   :  { %v805_v45 = vpop.f32.mrf.mxu0  ;;  %v933_v46 = vpop.f32.mrf.mxu1 }
 0x170   :  { %1378 = vst [vmem:[%s2279_s4 + $0xd0] sm:$0xff] %v1314_v41  ;;  %1410 = vst [vmem:[%s2279_s4 + $0x1d0] sm:$0xff] %v1346_v42  ;;  %v1251_v47 = vadd.f32 %v1953_v19, %v1180_v43  ;;  %v1283_v48 = vadd.f32 %v1953_v19, %v1212_v44 }
 0x171   :  { %v808_v49 = vpop.f32.mrf.mxu0  ;;  %v936_v50 = vpop.f32.mrf.mxu1 }
 0x172   :  { %v1315_v51 = vmax.f32 %v1251_v47, 0.0  ;;  %v1347_v52 = vmax.f32 %v1283_v48, 0.0  ;;  %v1181_v53 = vmul.f32 %v1948_v17, %v808_v49  ;;  %v1213_v54 = vmul.f32 %v1948_v17, %v936_v50 }
 0x173   :  { %v810_v55 = vpop.f32.mrf.mxu0  ;;  %v938_v56 = vpop.f32.mrf.mxu1 }
 0x174   :  { %1379 = vst [vmem:[%s2279_s4 + $0xd8] sm:$0xff] %v1315_v51  ;;  %1411 = vst [vmem:[%s2279_s4 + $0x1d8] sm:$0xff] %v1347_v52  ;;  %v1252_v57 = vadd.f32 %v1953_v19, %v1181_v53  ;;  %v1284_v58 = vadd.f32 %v1953_v19, %v1213_v54 }
 0x175   :  { %v811_v59 = vpop.f32.mrf.mxu0  ;;  %v939_v60 = vpop.f32.mrf.mxu1 }
 0x176   :  { %v1316_v61 = vmax.f32 %v1252_v57, 0.0  ;;  %v1348_v62 = vmax.f32 %v1284_v58, 0.0  ;;  %v1182_v63 = vmul.f32 %v1948_v17, %v811_v59  ;;  %v1214_v0 = vmul.f32 %v1948_v17, %v939_v60 }
 0x177   :  { %v813_v1 = vpop.f32.mrf.mxu0  ;;  %v941_v2 = vpop.f32.mrf.mxu1 }
 0x178   :  { %1380 = vst [vmem:[%s2279_s4 + $0xe0] sm:$0xff] %v1316_v61  ;;  %1412 = vst [vmem:[%s2279_s4 + $0x1e0] sm:$0xff] %v1348_v62  ;;  %v1253_v3 = vadd.f32 %v1953_v19, %v1182_v63  ;;  %v1285_v4 = vadd.f32 %v1953_v19, %v1214_v0 }
 0x179   :  { %v816_v5 = vpop.f32.mrf.mxu0  ;;  %v944_v6 = vpop.f32.mrf.mxu1 }
 0x17a   :  { %v1317_v7 = vmax.f32 %v1253_v3, 0.0  ;;  %v1349_v8 = vmax.f32 %v1285_v4, 0.0  ;;  %v1183_v9 = vmul.f32 %v1948_v17, %v816_v5  ;;  %v1215_v10 = vmul.f32 %v1948_v17, %v944_v6 }
 0x17b   :  { %v818_v11 = vpop.f32.mrf.mxu0  ;;  %v946_v12 = vpop.f32.mrf.mxu1 }
 0x17c   :  { %1381 = vst [vmem:[%s2279_s4 + $0xe8] sm:$0xff] %v1317_v7  ;;  %1413 = vst [vmem:[%s2279_s4 + $0x1e8] sm:$0xff] %v1349_v8  ;;  %v1254_v13 = vadd.f32 %v1953_v19, %v1183_v9  ;;  %v1286_v14 = vadd.f32 %v1953_v19, %v1215_v10 }
 0x17d   :  { %v819_v15 = vpop.f32.mrf.mxu0  ;;  %v947_v16 = vpop.f32.mrf.mxu1 }
 0x17e   :  { %v1318_v18 = vmax.f32 %v1254_v13, 0.0  ;;  %v1350_v20 = vmax.f32 %v1286_v14, 0.0  ;;  %v1184_v21 = vmul.f32 %v1948_v17, %v819_v15  ;;  %v1216_v22 = vmul.f32 %v1948_v17, %v947_v16 }
 0x17f   :  { %v821_v23 = vpop.f32.mrf.mxu0  ;;  %v949_v24 = vpop.f32.mrf.mxu1 }
 0x180   :  { %1382 = vst [vmem:[%s2279_s4 + $0xf0] sm:$0xff] %v1318_v18  ;;  %1414 = vst [vmem:[%s2279_s4 + $0x1f0] sm:$0xff] %v1350_v20  ;;  %v1255_v25 = vadd.f32 %v1953_v19, %v1184_v21  ;;  %v1287_v26 = vadd.f32 %v1953_v19, %v1216_v22 }
 0x182   :  { %v1319_v27 = vmax.f32 %v1255_v25, 0.0  ;;  %v1351_v28 = vmax.f32 %v1287_v26, 0.0 }
 0x184   :  { %1383 = vst [vmem:[%s2279_s4 + $0xf8] sm:$0xff] %v1319_v27  ;;  %1415 = vst [vmem:[%s2279_s4 + $0x1f8] sm:$0xff] %v1351_v28 }

// kernel: _lambda_.22
= control target key start
LH: loop header
LB: loop body
LE: loop exit
PB: predicated region body
PF: predicated region fallthrough
CT: control target
= control target key end

     0   :  { %s1600_s15 = smov 0   ;;  %s1602_s16 = smov 0   ;;  %s1859_s0 = inlined_call_operand.vmem [shape: bf16[128,1152], index: 0, kind: input, shape index: {}]   ;;  %s1860_s1 = inlined_call_operand.vmem [shape: bf16[1152,128], index: 1, kind: input, shape index: {}]   ;;  %s1861_s2 = inlined_call_operand.vmem [shape: f32[1,128], index: 2, kind: input, shape index: {}]   ;;  %s1862_s3 = inlined_call_operand.vmem [shape: f32[1,128], index: 3, kind: input, shape index: {}]   ;;  %s1863_s4 = inlined_call_operand.vmem [shape: f32[128,128], index: 4, kind: output, shape index: {}]  }
   0x1   :  { %s1604_s17 = smov 0   ;;  %s1606_s18 = smov 0  }
   0x2   :  { %s1608_s19 = smov 0  }
   0x3 LB: > { %s26_s20 = sadd.s32 1, %s1568_s18  ;;  %p49_p1 = scmp.ne.s32.totalorder %s1560_s16, %s1556_s15  ;;  %s1572_s19 = sphi %s1608_s19, %s14_s19   ;;  %s1568_s18 = sphi %s1606_s18, %s1867_s18   ;;  %s1564_s17 = sphi %s1604_s17, %s1866_s17   ;;  %s1560_s16 = sphi %s1602_s16, %s1865_s16   ;;  %s1556_s15 = sphi %s1600_s15, %s1864_s15  }
   0x4   : > { %p27_p0 = scmp.ge.s32.totalorder %s26_s20, 3  ;;  %p50_p2 = scmp.eq.s32.totalorder %s1572_s19, 0 }
   0x5   : > { %s42_s22 = sadd.s32 1, %s1560_s16  ;;  %p1230_p5 = scmp.ge.s32.totalorder %s1572_s19, 3 }
   0x6   : > { %s1869_s20 = smov (%p27_p0, %s26_s20), 0  ;;  %p51_p3 = por %p50_p2, %p49_p1 }
   0x7   : > { %s38_s21 = ssub.s32 %s1568_s18, %s1869_s20  ;;  %195 = sbr.rel (%p1230_p5) target bundleno = 35 (0x23), region = 24 }
   0x8   : > { %p40_p4 = scmp.eq.s32.totalorder %s38_s21, 0 }
   0xa   : > { %s1635_s23 = scalar_select %p40_p4, %s1560_s16, %s42_s22  }
   0xc   : > { %198 = sbr.rel (!%p51_p3) target bundleno = 35 (0x23), region = 28  ;;  %s200_s24 = sand.u32 (%p51_p3), 1, %s1560_s16  }
   0xd   : > { %s1322_s25 = smul.u32 (%p51_p3), 12, %s1568_s18 }
   0xe   : > { %s1435_s26 = smul.u32 (%p51_p3), 192, %s200_s24 }
   0xf   : > { %s1643_s29 = scalar_lea.vmem (%p51_p3), %s1859_s0, %s1322_s25 }
  0x10   : > { %v223_v0 = vld [vmem:[%s1643_s29] sm:$0xff] (%p51_p3)  ;;  %v227_v2 = vld [vmem:[%s1643_s29 + $0x48] sm:$0xff] (%p51_p3)  ;;  %s1648_s30 = scalar_lea.vmem (%p51_p3), [#allocation3], %s1435_s26  ;;  %v231_v4 = vld [vmem:[%s1643_s29 + $0x90] sm:$0xff] (%p51_p3) }
  0x11   : > { %v225_v1 = vld [vmem:[%s1643_s29 + $0x24] sm:$0xff]  ;;  %224 = vst [vmem:[%s1648_s30] sm:$0xff] %v223_v0  ;;  %228 = vst [vmem:[%s1648_s30 + $0x18] sm:$0xff] %v227_v2  ;;  %v229_v3 = vld [vmem:[%s1643_s29 + $0x6c] sm:$0xff] }
  0x12   : > { %226 = vst [vmem:[%s1648_s30 + $0xc] sm:$0xff] %v225_v1  ;;  %v233_v5 = vld [vmem:[%s1643_s29 + $0xb4] sm:$0xff]  ;;  %230 = vst [vmem:[%s1648_s30 + $0x24] sm:$0xff] %v229_v3  ;;  %v237_v7 = vld [vmem:[%s1643_s29 + $0xfc] sm:$0xff] }
  0x13   : > { %232 = vst [vmem:[%s1648_s30 + $0x30] sm:$0xff] %v231_v4  ;;  %234 = vst [vmem:[%s1648_s30 + $0x3c] sm:$0xff] %v233_v5  ;;  %v235_v6 = vld [vmem:[%s1643_s29 + $0xd8] sm:$0xff]  ;;  %v239_v8 = vld [vmem:[%s1643_s29 + $0x120] sm:$0xff] }
  0x14   : > { %236 = vst [vmem:[%s1648_s30 + $0x48] sm:$0xff] %v235_v6  ;;  %238 = vst [vmem:[%s1648_s30 + $0x54] sm:$0xff] %v237_v7  ;;  %v241_v9 = vld [vmem:[%s1643_s29 + $0x144] sm:$0xff]  ;;  %v245_v11 = vld [vmem:[%s1643_s29 + $0x18c] sm:$0xff] }
  0x15   : > { %240 = vst [vmem:[%s1648_s30 + $0x60] sm:$0xff] %v239_v8  ;;  %v243_v10 = vld [vmem:[%s1643_s29 + $0x168] sm:$0xff]  ;;  %242 = vst [vmem:[%s1648_s30 + $0x6c] sm:$0xff] %v241_v9  ;;  %v247_v12 = vld [vmem:[%s1643_s29 + $0x1b0] sm:$0xff] }
  0x16   : > { %244 = vst [vmem:[%s1648_s30 + $0x78] sm:$0xff] %v243_v10  ;;  %246 = vst [vmem:[%s1648_s30 + $0x84] sm:$0xff] %v245_v11  ;;  %v249_v13 = vld [vmem:[%s1643_s29 + $0x1d4] sm:$0xff]  ;;  %v253_v15 = vld [vmem:[%s1643_s29 + $0x21c] sm:$0xff] }
  0x17   : > { %v251_v14 = vld [vmem:[%s1643_s29 + $0x1f8] sm:$0xff]  ;;  %248 = vst [vmem:[%s1648_s30 + $0x90] sm:$0xff] %v247_v12  ;;  %250 = vst [vmem:[%s1648_s30 + $0x9c] sm:$0xff] %v249_v13  ;;  %v1232_v16 = vld [vmem:[%s1643_s29 + $0x8] sm:$0xf] }
  0x18   : > { %252 = vst [vmem:[%s1648_s30 + $0xa8] sm:$0xff] %v251_v14  ;;  %v1234_v17 = vld [vmem:[%s1643_s29 + $0x2c] sm:$0xf]  ;;  %254 = vst [vmem:[%s1648_s30 + $0xb4] sm:$0xff] %v253_v15  ;;  %v1236_v18 = vld [vmem:[%s1643_s29 + $0x50] sm:$0xf] }
  0x19   : > { %1233 = vst [vmem:[%s1648_s30 + $0x8] sm:$0xf] %v1232_v16  ;;  %1235 = vst [vmem:[%s1648_s30 + $0x14] sm:$0xf] %v1234_v17  ;;  %v1238_v19 = vld [vmem:[%s1643_s29 + $0x74] sm:$0xf] }
  0x1a   : > { %v1240_v20 = vld [vmem:[%s1643_s29 + $0x98] sm:$0xf]  ;;  %1237 = vst [vmem:[%s1648_s30 + $0x20] sm:$0xf] %v1236_v18  ;;  %1239 = vst [vmem:[%s1648_s30 + $0x2c] sm:$0xf] %v1238_v19 }
  0x1b   : > { %1241 = vst [vmem:[%s1648_s30 + $0x38] sm:$0xf] %v1240_v20  ;;  %v1242_v21 = vld [vmem:[%s1643_s29 + $0xbc] sm:$0xf]  ;;  %v1244_v22 = vld [vmem:[%s1643_s29 + $0xe0] sm:$0xf] }
  0x1c   : > { %v1246_v23 = vld [vmem:[%s1643_s29 + $0x104] sm:$0xf]  ;;  %1243 = vst [vmem:[%s1648_s30 + $0x44] sm:$0xf] %v1242_v21  ;;  %1245 = vst [vmem:[%s1648_s30 + $0x50] sm:$0xf] %v1244_v22 }
  0x1d   : > { %1247 = vst [vmem:[%s1648_s30 + $0x5c] sm:$0xf] %v1246_v23  ;;  %v1248_v24 = vld [vmem:[%s1643_s29 + $0x128] sm:$0xf]  ;;  %v1250_v25 = vld [vmem:[%s1643_s29 + $0x14c] sm:$0xf] }
  0x1e   : > { %v1252_v26 = vld [vmem:[%s1643_s29 + $0x170] sm:$0xf]  ;;  %1249 = vst [vmem:[%s1648_s30 + $0x68] sm:$0xf] %v1248_v24  ;;  %1251 = vst [vmem:[%s1648_s30 + $0x74] sm:$0xf] %v1250_v25 }
  0x1f   : > { %1253 = vst [vmem:[%s1648_s30 + $0x80] sm:$0xf] %v1252_v26  ;;  %v1254_v27 = vld [vmem:[%s1643_s29 + $0x194] sm:$0xf]  ;;  %v1256_v28 = vld [vmem:[%s1643_s29 + $0x1b8] sm:$0xf] }
  0x20   : > { %v1258_v29 = vld [vmem:[%s1643_s29 + $0x1dc] sm:$0xf]  ;;  %1255 = vst [vmem:[%s1648_s30 + $0x8c] sm:$0xf] %v1254_v27  ;;  %1257 = vst [vmem:[%s1648_s30 + $0x98] sm:$0xf] %v1256_v28 }
  0x21   : > { %1259 = vst [vmem:[%s1648_s30 + $0xa4] sm:$0xf] %v1258_v29  ;;  %v1260_v30 = vld [vmem:[%s1643_s29 + $0x200] sm:$0xf]  ;;  %v1262_v31 = vld [vmem:[%s1643_s29 + $0x224] sm:$0xf] }
  0x22   : > { %1261 = vst [vmem:[%s1648_s30 + $0xb0] sm:$0xf] %v1260_v30  ;;  %1263 = vst [vmem:[%s1648_s30 + $0xbc] sm:$0xf] %v1262_v31 }
  0x23 PF: > { %p1264_p6 = scmp.ge.s32.totalorder %s1572_s19, 1  ;;  %p311_p7 = scmp.lt.s32.totalorder %s1572_s19, 4 }
  0x25   : > { %p312_p8 = pnand %p1264_p6, %p311_p7 }
  0x26   : > { %s318_s5 = sand.u32 (!%p312_p8), 1, %s1556_s15   ;;  %s362_s6 = smul.u32 (!%p312_p8), 48, %s1564_s17 }
  0x27   : > { %315 = sbr.rel (%p312_p8) target bundleno = 371 (0x173), region = 58  ;;  %p1266_p10 = scmp.ne.s32.totalorder (!%p312_p8), %s1564_s17, 0 }
  0x28   : > { %s1436_s7 = smul.u32 (!%p312_p8), 192, %s318_s5  ;;  %p363_p9 = scmp.lt.s32.totalorder (!%p312_p8), %s362_s6, 143 }
  0x2a   : > { %s1720_s12 = scalar_lea.vmem (!%p312_p8), [#allocation3], %s1436_s7 }
  0x2c   : > { %s1871_s6 = smov (!%p363_p9, %s362_s6), 143  ;;  %390 = sbr.rel (%p1266_p10) target bundleno = 58 (0x3a), region = 66 }
  0x2d   : > { %s1265_s8 = sshll.u32 %s1871_s6, 2 }
  0x2e   : > { %s1718_s11 = scalar_lea.vmem %s1860_s1, %s1265_s8 }
  0x31   : > { %v1574_v32 = vmov 0.0  }
  0x32   : > { %391 = vst [vmem:[#allocation2 + $0x30] sm:$0xff] %v1574_v32  ;;  %392 = vst [vmem:[#allocation2] sm:$0xff] %v1574_v32 }
  0x33   : > { %393 = vst [vmem:[#allocation2 + $0x58] sm:$0xff] %v1574_v32  ;;  %394 = vst [vmem:[#allocation2 + $0x18] sm:$0xff] %v1574_v32 }
  0x34   : > { %395 = vst [vmem:[#allocation2 + $0x50] sm:$0xff] %v1574_v32  ;;  %396 = vst [vmem:[#allocation2 + $0x68] sm:$0xff] %v1574_v32 }
  0x35   : > { %397 = vst [vmem:[#allocation2 + $0x8] sm:$0xff] %v1574_v32  ;;  %398 = vst [vmem:[#allocation2 + $0x48] sm:$0xff] %v1574_v32 }
  0x36   : > { %399 = vst [vmem:[#allocation2 + $0x40] sm:$0xff] %v1574_v32  ;;  %400 = vst [vmem:[#allocation2 + $0x20] sm:$0xff] %v1574_v32 }
  0x37   : > { %401 = vst [vmem:[#allocation2 + $0x10] sm:$0xff] %v1574_v32  ;;  %402 = vst [vmem:[#allocation2 + $0x38] sm:$0xff] %v1574_v32 }
  0x38   : > { %403 = vst [vmem:[#allocation2 + $0x60] sm:$0xff] %v1574_v32  ;;  %404 = vst [vmem:[#allocation2 + $0x70] sm:$0xff] %v1574_v32 }
  0x39   : > { %405 = vst [vmem:[#allocation2 + $0x78] sm:$0xff] %v1574_v32  ;;  %406 = vst [vmem:[#allocation2 + $0x28] sm:$0xff] %v1574_v32 }
  0x3a PF: > { %v1478_v33 = vld [vmem:[%s1718_s11 + $0x78] sm:$0xff]   ;;  %v1481_v36 = vld [vmem:[%s1718_s11 + $0x70] sm:$0xff]   ;;  %v1484_v39 = vld [vmem:[%s1718_s11 + $0x68] sm:$0xff]   ;;  %p1315_p11 = scmp.ne.s32.totalorder %s1564_s17, 2 }
  0x3b   : > { %v1479_v34 = vld [vmem:[%s1718_s11 + $0x38] sm:$0xff]   ;;  %1323 = vmatprep.subr.bf16.mxu0 %v1478_v33  ;;  %v1482_v37 = vld [vmem:[%s1718_s11 + $0x30] sm:$0xff]   ;;  %v1485_v40 = vld [vmem:[%s1718_s11 + $0x28] sm:$0xff]  }
  0x3c   : > { %v1480_v35 = vld [vmem:[%s1718_s11 + $0xb8] sm:$0xff]   ;;  %1324 = vmatpush3.bf16.msra.mxu0 %v1479_v34  ;;  %v1483_v38 = vld [vmem:[%s1718_s11 + $0xb0] sm:$0xff]   ;;  %v1486_v41 = vld [vmem:[%s1718_s11 + $0xa8] sm:$0xff]  }
  0x3d   : > { %1403 = vmatprep.subr.bf16.mxu1 %v1480_v35  ;;  %1325 = vmatprep.subr.bf16.mxu0 %v1481_v36  ;;  %v1487_v42 = vld [vmem:[%s1718_s11 + $0x60] sm:$0xff]   ;;  %v1490_v45 = vld [vmem:[%s1718_s11 + $0x58] sm:$0xff]   ;;  %v1493_v48 = vld [vmem:[%s1718_s11 + $0x50] sm:$0xff]  }
  0x3e   : > { %1404 = vmatpush3.bf16.msra.mxu1 %v1480_v35  ;;  %v1488_v43 = vld [vmem:[%s1718_s11 + $0x20] sm:$0xff]   ;;  %v1492_v46 = vld [vmem:[%s1718_s11 + $0x98] sm:$0xff]   ;;  %v1495_v49 = vld [vmem:[%s1718_s11 + $0x90] sm:$0xff]  }
  0x3f   : > { %1405 = vmatprep.subr.bf16.mxu1 %v1483_v38  ;;  %v1489_v44 = vld [vmem:[%s1718_s11 + $0xa0] sm:$0xff]   ;;  %v1491_v47 = vld [vmem:[%s1718_s11 + $0x18] sm:$0xff]   ;;  %v1494_v50 = vld [vmem:[%s1718_s11 + $0x10] sm:$0xff]  }
  0x40   : > { %1326 = vmatpush3.bf16.msra.mxu0 %v1482_v37  ;;  %v1496_v51 = vld [vmem:[%s1718_s11 + $0x48] sm:$0xff]   ;;  %v1499_v54 = vld [vmem:[%s1718_s11 + $0x40] sm:$0xff]   ;;  %v1514_v1 = vld [vmem:[%s1720_s12 + $0x50] ss:$12 sps:$4 sm:$0xff]  }
  0x41   : > { %1327 = vmatprep.subr.bf16.mxu0 %v1484_v39  ;;  %v1497_v52 = vld [vmem:[%s1718_s11 + $0x8] sm:$0xff]   ;;  %v1501_v55 = vld [vmem:[%s1718_s11 + $0x80] sm:$0xff]   ;;  %v1512_v3 = vld [vmem:[%s1720_s12 + $0x30] ss:$12 sps:$4 sm:$0xff]  }
  0x42   : > { %1406 = vmatpush3.bf16.msra.mxu1 %v1483_v38  ;;  %v1498_v53 = vld [vmem:[%s1718_s11 + $0x88] sm:$0xff]   ;;  %v1504_v56 = vld [vmem:[%s1720_s12 + $0x4] ss:$12 sps:$4 sm:$0xff]   ;;  %v1510_v0 = vld [vmem:[%s1720_s12 + $0x34] ss:$12 sps:$4 sm:$0xff]  }
  0x43   : > { %1407 = vmatprep.subr.bf16.mxu1 %v1486_v41  ;;  %v1505_v57 = vld [vmem:[%s1720_s12 + $0x8] ss:$12 sps:$4 sm:$0xff]   ;;  %v1500_v58 = vld [vmem:[%s1718_s11] sm:$0xff]   ;;  %807 = vmatprep.mubr.bf16.mxu0 %v1504_v56  ;;  %v1515_v4 = vld [vmem:[%s1720_s12 + $0x4c] ss:$12 sps:$4 sm:$0xff]  }
  0x44   : > { %1328 = vmatpush3.bf16.msra.mxu0 %v1485_v40  ;;  %1419 = vmatprep.mubr.bf16.mxu1 %v1505_v57  ;;  %v1502_v59 = vld [vmem:[%s1720_s12] ss:$12 sps:$4 sm:$0xff]   ;;  %v1507_v60 = vld [vmem:[%s1720_s12 + $0x1c] ss:$12 sps:$4 sm:$0xff]   ;;  %v1513_v62 = vld [vmem:[%s1720_s12 + $0x38] ss:$12 sps:$4 sm:$0xff]  }
  0x45   : > { %1329 = vmatprep.subr.bf16.mxu0 %v1487_v42  ;;  %v1506_v61 = vld [vmem:[%s1720_s12 + $0x20] ss:$12 sps:$4 sm:$0xff]   ;;  %v1509_v63 = vld [vmem:[%s1720_s12 + $0x18] ss:$12 sps:$4 sm:$0xff]   ;;  %v1521_v2 = vld [vmem:[%s1720_s12 + $0x68] ss:$12 sps:$4 sm:$0xff]  }
  0x46   : > { %1408 = vmatpush3.bf16.msra.mxu1 %v1486_v41  ;;  %v1522_v5 = vld [vmem:[%s1720_s12 + $0x80] ss:$12 sps:$4 sm:$0xff]   ;;  %v1529_v6 = vld [vmem:[%s1720_s12 + $0x98] ss:$12 sps:$4 sm:$0xff]   ;;  %v1517_v7 = vld [vmem:[%s1720_s12 + $0x48] ss:$12 sps:$4 sm:$0xff]  }
  0x47   : > { %1409 = vmatprep.subr.bf16.mxu1 %v1489_v44  ;;  %v1518_v8 = vld [vmem:[%s1720_s12 + $0x64] ss:$12 sps:$4 sm:$0xff]   ;;  %v1520_v10 = vld [vmem:[%s1720_s12 + $0x60] ss:$12 sps:$4 sm:$0xff]   ;;  %v1523_v11 = vld [vmem:[%s1720_s12 + $0x7c] ss:$12 sps:$4 sm:$0xff]  }
  0x48   : > { %1330 = vmatpush3.bf16.msra.mxu0 %v1488_v43  ;;  %v1530_v9 = vld [vmem:[%s1720_s12 + $0xb0] ss:$12 sps:$4 sm:$0xff]   ;;  %v1525_v12 = vld [vmem:[%s1720_s12 + $0x78] ss:$12 sps:$4 sm:$0xff]   ;;  %v1526_v13 = vld [vmem:[%s1720_s12 + $0x94] ss:$12 sps:$4 sm:$0xff]  }
  0x49   : > { %1331 = vmatprep.subr.bf16.mxu0 %v1490_v45  ;;  %v1528_v14 = vld [vmem:[%s1720_s12 + $0x90] ss:$12 sps:$4 sm:$0xff]   ;;  %v1531_v15 = vld [vmem:[%s1720_s12 + $0xac] ss:$12 sps:$4 sm:$0xff]   ;;  %v1533_v16 = vld [vmem:[%s1720_s12 + $0xa8] ss:$12 sps:$4 sm:$0xff]  }
  0x4a   : > { %1410 = vmatpush3.bf16.msra.mxu1 %v1489_v44  ;;  %v407_v22 = vld [vmem:[#allocation2 + $0x30] sm:$0xff]  ;;  %v408_v30 = vld [vmem:[#allocation2] sm:$0xff]  ;;  %v409_v37 = vld [vmem:[#allocation2 + $0x58] sm:$0xff] }
  0x4b   : > { %1411 = vmatprep.subr.bf16.mxu1 %v1492_v46  ;;  %v410_v44 = vld [vmem:[#allocation2 + $0x18] sm:$0xff] }
  0x4c   : > { %1332 = vmatpush3.bf16.msra.mxu0 %v1491_v47 }
  0x4d   : > { %1333 = vmatprep.subr.bf16.mxu0 %v1493_v48 }
  0x4e   : > { %1412 = vmatpush3.bf16.msra.mxu1 %v1492_v46 }
  0x4f   : > { %1413 = vmatprep.subr.bf16.mxu1 %v1495_v49 }
  0x50   : > { %1334 = vmatpush3.bf16.msra.mxu0 %v1494_v50 }
  0x51   : > { %1335 = vmatprep.subr.bf16.mxu0 %v1496_v51 }
  0x52   : > { %1414 = vmatpush3.bf16.msra.mxu1 %v1495_v49 }
  0x53   : > { %1415 = vmatprep.subr.bf16.mxu1 %v1498_v53 }
  0x54   : > { %1336 = vmatpush3.bf16.msra.mxu0 %v1497_v52  ;;  %v411_v52 = vld [vmem:[#allocation2 + $0x50] sm:$0xff] }
  0x55   : > { %1337 = vmatprep.subr.bf16.mxu0 %v1499_v54 }
  0x56   : > { %1416 = vmatpush3.bf16.msra.mxu1 %v1498_v53 }
  0x57   : > { %1417 = vmatprep.subr.bf16.mxu1 %v1501_v55 }
  0x58   : > { %1338 = vmatpush3.bf16.msra.mxu0 %v1500_v58 }
  0x5a   : > { %1418 = vmatpush3.bf16.msra.mxu1 %v1501_v55 }
  0x5b   : > { %808 = vmatmul.mubr.bf16.vlgmr.msra.gmra.mxu0 %v1502_v59  ;;  %v412_v59 = vld [vmem:[#allocation2 + $0x68] sm:$0xff] }
  0x5c   : > { %815 = vmatprep.mubr.bf16.mxu0 %v1507_v60 }
  0x5d   : > { %1420 = vmatmul.mubr.bf16.vlgmr.msra.gmra.mxu1 %v1506_v61 }
  0x5e   : > { %1423 = vmatprep.mubr.bf16.mxu1 %v1513_v62 }
  0x63   : > { %816 = vmatmul.mubr.bf16.gmra.mxu0 %v1509_v63 }
  0x64   : > { %823 = vmatprep.mubr.bf16.mxu0 %v1510_v0 }
  0x65   : > { %1424 = vmatmul.mubr.bf16.gmra.mxu1 %v1514_v1  ;;  %v413_v1 = vld [vmem:[#allocation2 + $0x8] sm:$0xff] }
  0x66   : > { %1427 = vmatprep.mubr.bf16.mxu1 %v1521_v2 }
  0x6b   : > { %824 = vmatmul.mubr.bf16.gmra.mxu0 %v1512_v3 }
  0x6c   : > { %831 = vmatprep.mubr.bf16.mxu0 %v1515_v4 }
  0x6d   : > { %1428 = vmatmul.mubr.bf16.gmra.mxu1 %v1522_v5 }
  0x6e   : > { %1431 = vmatprep.mubr.bf16.mxu1 %v1529_v6 }
  0x73   : > { %832 = vmatmul.mubr.bf16.gmra.mxu0 %v1517_v7 }
  0x74   : > { %839 = vmatprep.mubr.bf16.mxu0 %v1518_v8  ;;  %v414_v8 = vld [vmem:[#allocation2 + $0x48] sm:$0xff] }
  0x75   : > { %1432 = vmatmul.mubr.bf16.gmra.mxu1 %v1530_v9 }
  0x7b   : > { %840 = vmatmul.mubr.bf16.gmra.mxu0 %v1520_v10 }
  0x7c   : > { %847 = vmatprep.mubr.bf16.mxu0 %v1523_v11 }
  0x83   : > { %848 = vmatmul.mubr.bf16.gmra.mxu0 %v1525_v12 }
  0x84   : > { %855 = vmatprep.mubr.bf16.mxu0 %v1526_v13 }
  0x8b   : > { %856 = vmatmul.mubr.bf16.gmra.mxu0 %v1528_v14 }
  0x8c   : > { %863 = vmatprep.mubr.bf16.mxu0 %v1531_v15 }
  0x93   : > { %864 = vmatmul.mubr.bf16.gmra.mxu0 %v1533_v16  ;;  %v415_v16 = vld [vmem:[#allocation2 + $0x40] sm:$0xff] }
 0x11b   : > { %v1339_v17 = vpop.f32.mrf.mxu0 }
 0x11d   : > { %v1340_v18 = vpop.f32.mrf.mxu0  ;;  %v1421_v19 = vpop.f32.mrf.mxu1 }
 0x11e   : > { %v1341_v20 = vadd.f32 %v1340_v18, %v1339_v17 }
 0x11f   : > { %v1342_v21 = vpop.f32.mrf.mxu0  ;;  %v906_v23 = vpop.f32.mrf.mxu1 }
 0x120   : > { %v907_v24 = vadd.f32 %v1341_v20, %v906_v23  ;;  %v416_v23 = vld [vmem:[#allocation2 + $0x20] sm:$0xff] }
 0x121   : > { %v1343_v25 = vpop.f32.mrf.mxu0  ;;  %v1422_v26 = vpop.f32.mrf.mxu1 }
 0x122   : > { %v969_v27 = vadd.f32 %v907_v24, %v407_v22  ;;  %v1344_v28 = vadd.f32 %v1343_v25, %v1342_v21 }
 0x123   : > { %v1345_v29 = vpop.f32.mrf.mxu0  ;;  %v909_v31 = vpop.f32.mrf.mxu1 }
 0x124   : > { %985 = vst [vmem:[#allocation2 + $0x30] sm:$0xff] %v969_v27  ;;  %v910_v32 = vadd.f32 %v1344_v28, %v909_v31 }
 0x125   : > { %v1346_v33 = vpop.f32.mrf.mxu0  ;;  %v1425_v34 = vpop.f32.mrf.mxu1 }
 0x126   : > { %v970_v35 = vadd.f32 %v910_v32, %v408_v30  ;;  %v1347_v36 = vadd.f32 %v1346_v33, %v1345_v29  ;;  %v417_v29 = vld [vmem:[#allocation2 + $0x10] sm:$0xff] }
 0x127   : > { %v1348_v38 = vpop.f32.mrf.mxu0  ;;  %v922_v41 = vpop.f32.mrf.mxu1 }
 0x128   : > { %986 = vst [vmem:[#allocation2] sm:$0xff] %v970_v35  ;;  %v915_v39 = vadd.f32 %v1421_v19, %v1347_v36  ;;  %v418_v36 = vld [vmem:[#allocation2 + $0x38] sm:$0xff] }
 0x129   : > { %v1349_v40 = vpop.f32.mrf.mxu0  ;;  %v1426_v48 = vpop.f32.mrf.mxu1 }
 0x12a   : > { %v971_v42 = vadd.f32 %v915_v39, %v409_v37  ;;  %v1350_v43 = vadd.f32 %v1349_v40, %v1348_v38 }
 0x12b   : > { %v1351_v45 = vpop.f32.mrf.mxu0  ;;  %v925_v55 = vpop.f32.mrf.mxu1 }
 0x12c   : > { %987 = vst [vmem:[#allocation2 + $0x58] sm:$0xff] %v971_v42  ;;  %v918_v46 = vadd.f32 %v1422_v26, %v1350_v43 }
 0x12d   : > { %v1352_v47 = vpop.f32.mrf.mxu0  ;;  %v1429_v62 = vpop.f32.mrf.mxu1 }
 0x12e   : > { %v972_v49 = vadd.f32 %v918_v46, %v410_v44  ;;  %v1353_v50 = vadd.f32 %v1352_v47, %v1351_v45  ;;  %v419_v44 = vld [vmem:[#allocation2 + $0x60] sm:$0xff] }
 0x12f   : > { %v1354_v51 = vpop.f32.mrf.mxu0  ;;  %v938_v5 = vpop.f32.mrf.mxu1 }
 0x130   : > { %988 = vst [vmem:[#allocation2 + $0x18] sm:$0xff] %v972_v49  ;;  %v923_v53 = vadd.f32 %v1353_v50, %v922_v41 }
 0x131   : > { %v1355_v54 = vpop.f32.mrf.mxu0  ;;  %v1430_v12 = vpop.f32.mrf.mxu1 }
 0x132   : > { %v973_v56 = vadd.f32 %v923_v53, %v411_v52  ;;  %v1356_v57 = vadd.f32 %v1355_v54, %v1354_v51  ;;  %v420_v51 = vld [vmem:[#allocation2 + $0x70] sm:$0xff] }
 0x133   : > { %v1357_v58 = vpop.f32.mrf.mxu0  ;;  %v941_v19 = vpop.f32.mrf.mxu1 }
 0x134   : > { %989 = vst [vmem:[#allocation2 + $0x50] sm:$0xff] %v973_v56  ;;  %v926_v60 = vadd.f32 %v1356_v57, %v925_v55  ;;  %v421_v56 = vld [vmem:[#allocation2 + $0x78] sm:$0xff] }
 0x135   : > { %v1358_v61 = vpop.f32.mrf.mxu0  ;;  %v1433_v26 = vpop.f32.mrf.mxu1 }
 0x136   : > { %v974_v63 = vadd.f32 %v926_v60, %v412_v59  ;;  %v1359_v0 = vadd.f32 %v1358_v61, %v1357_v58 }
 0x137   : > { %v1360_v2 = vpop.f32.mrf.mxu0  ;;  %v954_v33 = vpop.f32.mrf.mxu1 }
 0x138   : > { %990 = vst [vmem:[#allocation2 + $0x68] sm:$0xff] %v974_v63  ;;  %v931_v3 = vadd.f32 %v1425_v34, %v1359_v0 }
 0x139   : > { %v1361_v4 = vpop.f32.mrf.mxu0  ;;  %v1434_v40 = vpop.f32.mrf.mxu1 }
 0x13a   : > { %v975_v6 = vadd.f32 %v931_v3, %v413_v1  ;;  %v1362_v7 = vadd.f32 %v1361_v4, %v1360_v2 }
 0x13b   : > { %v1363_v9 = vpop.f32.mrf.mxu0  ;;  %v957_v47 = vpop.f32.mrf.mxu1 }
 0x13c   : > { %991 = vst [vmem:[#allocation2 + $0x8] sm:$0xff] %v975_v6  ;;  %v934_v10 = vadd.f32 %v1426_v48, %v1362_v7 }
 0x13d   : > { %v1364_v11 = vpop.f32.mrf.mxu0 }
 0x13e   : > { %v976_v13 = vadd.f32 %v934_v10, %v414_v8  ;;  %v1365_v14 = vadd.f32 %v1364_v11, %v1363_v9 }
 0x13f   : > { %v1366_v15 = vpop.f32.mrf.mxu0 }
 0x140   : > { %992 = vst [vmem:[#allocation2 + $0x48] sm:$0xff] %v976_v13  ;;  %v939_v17 = vadd.f32 %v1365_v14, %v938_v5 }
 0x141   : > { %v1367_v18 = vpop.f32.mrf.mxu0 }
 0x142   : > { %v977_v20 = vadd.f32 %v939_v17, %v415_v16  ;;  %v1368_v21 = vadd.f32 %v1367_v18, %v1366_v15 }
 0x143   : > { %v1369_v22 = vpop.f32.mrf.mxu0 }
 0x144   : > { %993 = vst [vmem:[#allocation2 + $0x40] sm:$0xff] %v977_v20  ;;  %v942_v24 = vadd.f32 %v1368_v21, %v941_v19 }
 0x145   : > { %v1370_v25 = vpop.f32.mrf.mxu0 }
 0x146   : > { %v978_v27 = vadd.f32 %v942_v24, %v416_v23  ;;  %v1371_v28 = vadd.f32 %v1370_v25, %v1369_v22 }
 0x147   : > { %v1372_v30 = vpop.f32.mrf.mxu0 }
 0x148   : > { %994 = vst [vmem:[#allocation2 + $0x20] sm:$0xff] %v978_v27  ;;  %v947_v31 = vadd.f32 %v1429_v62, %v1371_v28  ;;  %v422_v62 = vld [vmem:[#allocation2 + $0x28] sm:$0xff] }
 0x149   : > { %v1373_v32 = vpop.f32.mrf.mxu0 }
 0x14a   : > { %v979_v34 = vadd.f32 %v947_v31, %v417_v29  ;;  %v1374_v35 = vadd.f32 %v1373_v32, %v1372_v30 }
 0x14b   : > { %v1375_v37 = vpop.f32.mrf.mxu0 }
 0x14c   : > { %995 = vst [vmem:[#allocation2 + $0x10] sm:$0xff] %v979_v34  ;;  %v950_v38 = vadd.f32 %v1430_v12, %v1374_v35 }
 0x14d   : > { %v1376_v39 = vpop.f32.mrf.mxu0 }
 0x14e   : > { %v980_v41 = vadd.f32 %v950_v38, %v418_v36  ;;  %v1377_v42 = vadd.f32 %v1376_v39, %v1375_v37 }
 0x14f   : > { %v1378_v43 = vpop.f32.mrf.mxu0 }
 0x150   : > { %996 = vst [vmem:[#allocation2 + $0x38] sm:$0xff] %v980_v41  ;;  %v955_v45 = vadd.f32 %v1377_v42, %v954_v33 }
 0x151   : > { %v1379_v46 = vpop.f32.mrf.mxu0 }
 0x152   : > { %v981_v48 = vadd.f32 %v955_v45, %v419_v44  ;;  %v1380_v49 = vadd.f32 %v1379_v46, %v1378_v43 }
 0x153   : > { %v1381_v50 = vpop.f32.mrf.mxu0 }
 0x154   : > { %997 = vst [vmem:[#allocation2 + $0x60] sm:$0xff] %v981_v48  ;;  %v958_v52 = vadd.f32 %v1380_v49, %v957_v47 }
 0x155   : > { %v1382_v53 = vpop.f32.mrf.mxu0 }
 0x156   : > { %v982_v54 = vadd.f32 %v958_v52, %v420_v51  ;;  %v1383_v55 = vadd.f32 %v1382_v53, %v1381_v50 }
 0x157   : > { %v1384_v57 = vpop.f32.mrf.mxu0 }
 0x158   : > { %998 = vst [vmem:[#allocation2 + $0x70] sm:$0xff] %v982_v54  ;;  %v963_v58 = vadd.f32 %v1433_v26, %v1383_v55 }
 0x159   : > { %v1385_v59 = vpop.f32.mrf.mxu0 }
 0x15a   : > { %v983_v60 = vadd.f32 %v963_v58, %v421_v56  ;;  %v1386_v61 = vadd.f32 %v1385_v59, %v1384_v57 }
 0x15c   : > { %999 = vst [vmem:[#allocation2 + $0x78] sm:$0xff] %v983_v60  ;;  %v966_v63 = vadd.f32 %v1434_v40, %v1386_v61  ;;  %1004 = sbr.rel (%p1315_p11) target bundleno = 371 (0x173), region = 70 }
 0x15e   : > { %v984_v0 = vadd.f32 %v966_v63, %v422_v62 }
 0x160   : > { %1000 = vst [vmem:[#allocation2 + $0x28] sm:$0xff] %v984_v0 }
 0x161   : > { %v1005_v1 = vld [vmem:[#allocation2 + $0x30] sm:$0xff]  ;;  %v1316_v2 = vld [vmem:[%s1861_s2] ss:$0 sm:$0xff]  ;;  %v1007_v6 = vld [vmem:[#allocation2 + $0x58] sm:$0xff] }
 0x162   : > { %v1778_v3 = vld [vmem:[%s1862_s3] ss:$0 sm:$0xff]  ;;  %v1028_v4 = vmul.f32 %v1316_v2, %v1005_v1  ;;  %v1008_v7 = vld [vmem:[#allocation2 + $0x18] sm:$0xff]  ;;  %v1030_v9 = vmul.f32 %v1316_v2, %v1007_v6  ;;  %v1009_v11 = vld [vmem:[#allocation2 + $0x50] sm:$0xff] }
 0x163   : > { %v1006_v5 = vld [vmem:[#allocation2] sm:$0xff]  ;;  %v1031_v10 = vmul.f32 %v1316_v2, %v1008_v7  ;;  %v1010_v12 = vld [vmem:[#allocation2 + $0x68] sm:$0xff]  ;;  %v1032_v15 = vmul.f32 %v1316_v2, %v1009_v11  ;;  %v1015_v29 = vld [vmem:[#allocation2 + $0x10] sm:$0xff] }
 0x164   : > { %v1029_v8 = vmul.f32 %v1316_v2, %v1006_v5  ;;  %v1011_v13 = vld [vmem:[#allocation2 + $0x8] sm:$0xff]  ;;  %v1051_v14 = vadd.f32 %v1778_v3, %v1028_v4  ;;  %v1033_v16 = vmul.f32 %v1316_v2, %v1010_v12  ;;  %v1053_v20 = vadd.f32 %v1778_v3, %v1030_v9  ;;  %v1013_v23 = vld [vmem:[#allocation2 + $0x40] sm:$0xff]  ;;  %v1016_v30 = vld [vmem:[#allocation2 + $0x38] sm:$0xff] }
 0x165   : > { %v1034_v17 = vmul.f32 %v1316_v2, %v1011_v13  ;;  %v1012_v18 = vld [vmem:[#allocation2 + $0x48] sm:$0xff]  ;;  %v1054_v21 = vadd.f32 %v1778_v3, %v1031_v10  ;;  %v1055_v25 = vadd.f32 %v1778_v3, %v1032_v15  ;;  %v1014_v28 = vld [vmem:[#allocation2 + $0x20] sm:$0xff]  ;;  %v1018_v36 = vld [vmem:[#allocation2 + $0x70] sm:$0xff]  ;;  %v1036_v41 = vmul.f32 %v1316_v2, %v1013_v23 }
 0x166   : > { %v1052_v19 = vadd.f32 %v1778_v3, %v1029_v8  ;;  %v1035_v22 = vmul.f32 %v1316_v2, %v1012_v18  ;;  %v1067_v24 = vmax.f32 %v1051_v14, 0.0  ;;  %v1056_v26 = vadd.f32 %v1778_v3, %v1033_v16  ;;  %v1017_v35 = vld [vmem:[#allocation2 + $0x60] sm:$0xff]  ;;  %v1019_v37 = vld [vmem:[#allocation2 + $0x78] sm:$0xff] }
 0x167   : > { %v1057_v27 = vadd.f32 %v1778_v3, %v1034_v17  ;;  %v1069_v32 = vmax.f32 %v1053_v20, 0.0  ;;  %v1070_v33 = vmax.f32 %v1054_v21, 0.0  ;;  %v1071_v38 = vmax.f32 %v1055_v25, 0.0  ;;  %v1020_v42 = vld [vmem:[#allocation2 + $0x28] sm:$0xff] }
 0x168   : > { %v1068_v31 = vmax.f32 %v1052_v19, 0.0  ;;  %v1058_v34 = vadd.f32 %v1778_v3, %v1035_v22  ;;  %1083 = vst [vmem:[%s1863_s4] sm:$0xff] %v1067_v24  ;;  %v1072_v39 = vmax.f32 %v1056_v26, 0.0  ;;  %v1037_v44 = vmul.f32 %v1316_v2, %v1014_v28 }
 0x169   : > { %v1073_v40 = vmax.f32 %v1057_v27, 0.0  ;;  %1085 = vst [vmem:[%s1863_s4 + $0x10] sm:$0xff] %v1069_v32  ;;  %1086 = vst [vmem:[%s1863_s4 + $0x18] sm:$0xff] %v1070_v33  ;;  %v1038_v45 = vmul.f32 %v1316_v2, %v1015_v29  ;;  %v1039_v46 = vmul.f32 %v1316_v2, %v1016_v30  ;;  %v1059_v47 = vadd.f32 %v1778_v3, %v1036_v41 }
 0x16a   : > { %1084 = vst [vmem:[%s1863_s4 + $0x8] sm:$0xff] %v1068_v31  ;;  %v1074_v43 = vmax.f32 %v1058_v34, 0.0  ;;  %1087 = vst [vmem:[%s1863_s4 + $0x20] sm:$0xff] %v1071_v38  ;;  %v1040_v48 = vmul.f32 %v1316_v2, %v1017_v35  ;;  %v1041_v49 = vmul.f32 %v1316_v2, %v1018_v36  ;;  %v1042_v50 = vmul.f32 %v1316_v2, %v1019_v37 }
 0x16b   : > { %1088 = vst [vmem:[%s1863_s4 + $0x28] sm:$0xff] %v1072_v39  ;;  %1089 = vst [vmem:[%s1863_s4 + $0x30] sm:$0xff] %v1073_v40  ;;  %v1060_v51 = vadd.f32 %v1778_v3, %v1037_v44  ;;  %v1061_v52 = vadd.f32 %v1778_v3, %v1038_v45  ;;  %v1062_v53 = vadd.f32 %v1778_v3, %v1039_v46  ;;  %v1075_v55 = vmax.f32 %v1059_v47, 0.0 }
 0x16c   : > { %1090 = vst [vmem:[%s1863_s4 + $0x38] sm:$0xff] %v1074_v43  ;;  %v1043_v54 = vmul.f32 %v1316_v2, %v1020_v42  ;;  %v1063_v56 = vadd.f32 %v1778_v3, %v1040_v48  ;;  %v1064_v57 = vadd.f32 %v1778_v3, %v1041_v49  ;;  %v1065_v58 = vadd.f32 %v1778_v3, %v1042_v50 }
 0x16d   : > { %v1076_v59 = vmax.f32 %v1060_v51, 0.0  ;;  %v1077_v60 = vmax.f32 %v1061_v52, 0.0  ;;  %v1078_v61 = vmax.f32 %v1062_v53, 0.0  ;;  %1091 = vst [vmem:[%s1863_s4 + $0x40] sm:$0xff] %v1075_v55 }
 0x16e   : > { %v1066_v62 = vadd.f32 %v1778_v3, %v1043_v54  ;;  %v1079_v63 = vmax.f32 %v1063_v56, 0.0  ;;  %v1080_v0 = vmax.f32 %v1064_v57, 0.0  ;;  %v1081_v1 = vmax.f32 %v1065_v58, 0.0 }
 0x16f   : > { %1092 = vst [vmem:[%s1863_s4 + $0x48] sm:$0xff] %v1076_v59  ;;  %1093 = vst [vmem:[%s1863_s4 + $0x50] sm:$0xff] %v1077_v60 }
 0x170   : > { %1094 = vst [vmem:[%s1863_s4 + $0x58] sm:$0xff] %v1078_v61  ;;  %v1082_v2 = vmax.f32 %v1066_v62, 0.0  ;;  %1095 = vst [vmem:[%s1863_s4 + $0x60] sm:$0xff] %v1079_v63 }
 0x171   : > { %1096 = vst [vmem:[%s1863_s4 + $0x68] sm:$0xff] %v1080_v0  ;;  %1097 = vst [vmem:[%s1863_s4 + $0x70] sm:$0xff] %v1081_v1 }
 0x172   : > { %1098 = vst [vmem:[%s1863_s4 + $0x78] sm:$0xff] %v1082_v2 }
 0x173 PF: > { %s14_s19 = sadd.s32 1, %s1572_s19   ;;  %s1864_s15 = smov %s1560_s16 }
 0x174   : > { %p11_p12 = scmp.ge.s32.totalorder %s14_s19, 5   ;;  %s1865_s16 = smov %s1635_s23 }
 0x175   : > { %s1866_s17 = smov %s1568_s18  ;;  %s1867_s18 = smov %s1869_s20 }
 0x176   :  { %13 = sbr.rel (!%p11_p12) target bundleno = 3 (0x3), region = 120 }

// kernel: _lambda_.23
= control target key start
LH: loop header
LB: loop body
LE: loop exit
PB: predicated region body
PF: predicated region fallthrough
CT: control target
= control target key end

     0   :  { %s1716_s18 = smov 0   ;;  %s1718_s19 = smov 0   ;;  %s2041_s0 = inlined_call_operand.vmem [shape: bf16[128,1152], index: 0, kind: input, shape index: {}]   ;;  %s2042_s1 = inlined_call_operand.vmem [shape: bf16[1152,128], index: 1, kind: input, shape index: {}]   ;;  %s2043_s2 = inlined_call_operand.vmem [shape: f32[1,128], index: 2, kind: input, shape index: {}]   ;;  %s2044_s3 = inlined_call_operand.vmem [shape: f32[1,128], index: 3, kind: input, shape index: {}]   ;;  %s2045_s4 = inlined_call_operand.vmem [shape: f32[128,128], index: 4, kind: input, shape index: {}]   ;;  %s2046_s5 = inlined_call_operand.vmem [shape: f32[128,128], index: 5, kind: output, shape index: {}]  }
   0x1   :  { %s1720_s20 = smov 0   ;;  %s1722_s21 = smov 0  }
   0x2   :  { %s1724_s22 = smov 0  }
   0x3 LB: > { %s27_s23 = sadd.s32 1, %s1679_s21  ;;  %p50_p1 = scmp.ne.s32.totalorder %s1671_s19, %s1667_s18  ;;  %s1683_s22 = sphi %s1724_s22, %s15_s22   ;;  %s1679_s21 = sphi %s1722_s21, %s2050_s21   ;;  %s1675_s20 = sphi %s1720_s20, %s2049_s20   ;;  %s1671_s19 = sphi %s1718_s19, %s2048_s19   ;;  %s1667_s18 = sphi %s1716_s18, %s2047_s18  }
   0x4   : > { %p28_p0 = scmp.ge.s32.totalorder %s27_s23, 3  ;;  %p51_p2 = scmp.eq.s32.totalorder %s1683_s22, 0 }
   0x5   : > { %s43_s25 = sadd.s32 1, %s1671_s19  ;;  %p1341_p5 = scmp.ge.s32.totalorder %s1683_s22, 3 }
   0x6   : > { %s2052_s23 = smov (%p28_p0, %s27_s23), 0  ;;  %p52_p3 = por %p51_p2, %p50_p1 }
   0x7   : > { %s39_s24 = ssub.s32 %s1679_s21, %s2052_s23  ;;  %236 = sbr.rel (%p1341_p5) target bundleno = 35 (0x23), region = 28 }
   0x8   : > { %p41_p4 = scmp.eq.s32.totalorder %s39_s24, 0 }
   0xa   : > { %s1751_s26 = scalar_select %p41_p4, %s1671_s19, %s43_s25  }
   0xc   : > { %239 = sbr.rel (!%p52_p3) target bundleno = 35 (0x23), region = 32  ;;  %s241_s27 = sand.u32 (%p52_p3), 1, %s1671_s19  }
   0xd   : > { %s1433_s28 = smul.u32 (%p52_p3), 12, %s1679_s21 }
   0xe   : > { %s1546_s29 = smul.u32 (%p52_p3), 192, %s241_s27 }
   0xf   : > { %s1759_s7 = scalar_lea.vmem (%p52_p3), %s2041_s0, %s1433_s28 }
  0x10   : > { %v264_v0 = vld [vmem:[%s1759_s7] sm:$0xff] (%p52_p3)  ;;  %v268_v2 = vld [vmem:[%s1759_s7 + $0x48] sm:$0xff] (%p52_p3)  ;;  %s1764_s8 = scalar_lea.vmem (%p52_p3), [#allocation3], %s1546_s29  ;;  %v272_v4 = vld [vmem:[%s1759_s7 + $0x90] sm:$0xff] (%p52_p3) }
  0x11   : > { %v266_v1 = vld [vmem:[%s1759_s7 + $0x24] sm:$0xff]  ;;  %265 = vst [vmem:[%s1764_s8] sm:$0xff] %v264_v0  ;;  %269 = vst [vmem:[%s1764_s8 + $0x18] sm:$0xff] %v268_v2  ;;  %v270_v3 = vld [vmem:[%s1759_s7 + $0x6c] sm:$0xff] }
  0x12   : > { %267 = vst [vmem:[%s1764_s8 + $0xc] sm:$0xff] %v266_v1  ;;  %v274_v5 = vld [vmem:[%s1759_s7 + $0xb4] sm:$0xff]  ;;  %271 = vst [vmem:[%s1764_s8 + $0x24] sm:$0xff] %v270_v3  ;;  %v278_v7 = vld [vmem:[%s1759_s7 + $0xfc] sm:$0xff] }
  0x13   : > { %273 = vst [vmem:[%s1764_s8 + $0x30] sm:$0xff] %v272_v4  ;;  %275 = vst [vmem:[%s1764_s8 + $0x3c] sm:$0xff] %v274_v5  ;;  %v276_v6 = vld [vmem:[%s1759_s7 + $0xd8] sm:$0xff]  ;;  %v280_v8 = vld [vmem:[%s1759_s7 + $0x120] sm:$0xff] }
  0x14   : > { %277 = vst [vmem:[%s1764_s8 + $0x48] sm:$0xff] %v276_v6  ;;  %279 = vst [vmem:[%s1764_s8 + $0x54] sm:$0xff] %v278_v7  ;;  %v282_v9 = vld [vmem:[%s1759_s7 + $0x144] sm:$0xff]  ;;  %v286_v11 = vld [vmem:[%s1759_s7 + $0x18c] sm:$0xff] }
  0x15   : > { %281 = vst [vmem:[%s1764_s8 + $0x60] sm:$0xff] %v280_v8  ;;  %v284_v10 = vld [vmem:[%s1759_s7 + $0x168] sm:$0xff]  ;;  %283 = vst [vmem:[%s1764_s8 + $0x6c] sm:$0xff] %v282_v9  ;;  %v288_v12 = vld [vmem:[%s1759_s7 + $0x1b0] sm:$0xff] }
  0x16   : > { %285 = vst [vmem:[%s1764_s8 + $0x78] sm:$0xff] %v284_v10  ;;  %287 = vst [vmem:[%s1764_s8 + $0x84] sm:$0xff] %v286_v11  ;;  %v290_v13 = vld [vmem:[%s1759_s7 + $0x1d4] sm:$0xff]  ;;  %v294_v15 = vld [vmem:[%s1759_s7 + $0x21c] sm:$0xff] }
  0x17   : > { %v292_v14 = vld [vmem:[%s1759_s7 + $0x1f8] sm:$0xff]  ;;  %289 = vst [vmem:[%s1764_s8 + $0x90] sm:$0xff] %v288_v12  ;;  %291 = vst [vmem:[%s1764_s8 + $0x9c] sm:$0xff] %v290_v13  ;;  %v1343_v16 = vld [vmem:[%s1759_s7 + $0x8] sm:$0xf] }
  0x18   : > { %293 = vst [vmem:[%s1764_s8 + $0xa8] sm:$0xff] %v292_v14  ;;  %v1345_v17 = vld [vmem:[%s1759_s7 + $0x2c] sm:$0xf]  ;;  %295 = vst [vmem:[%s1764_s8 + $0xb4] sm:$0xff] %v294_v15  ;;  %v1347_v18 = vld [vmem:[%s1759_s7 + $0x50] sm:$0xf] }
  0x19   : > { %1344 = vst [vmem:[%s1764_s8 + $0x8] sm:$0xf] %v1343_v16  ;;  %1346 = vst [vmem:[%s1764_s8 + $0x14] sm:$0xf] %v1345_v17  ;;  %v1349_v19 = vld [vmem:[%s1759_s7 + $0x74] sm:$0xf] }
  0x1a   : > { %v1351_v20 = vld [vmem:[%s1759_s7 + $0x98] sm:$0xf]  ;;  %1348 = vst [vmem:[%s1764_s8 + $0x20] sm:$0xf] %v1347_v18  ;;  %1350 = vst [vmem:[%s1764_s8 + $0x2c] sm:$0xf] %v1349_v19 }
  0x1b   : > { %1352 = vst [vmem:[%s1764_s8 + $0x38] sm:$0xf] %v1351_v20  ;;  %v1353_v21 = vld [vmem:[%s1759_s7 + $0xbc] sm:$0xf]  ;;  %v1355_v22 = vld [vmem:[%s1759_s7 + $0xe0] sm:$0xf] }
  0x1c   : > { %v1357_v23 = vld [vmem:[%s1759_s7 + $0x104] sm:$0xf]  ;;  %1354 = vst [vmem:[%s1764_s8 + $0x44] sm:$0xf] %v1353_v21  ;;  %1356 = vst [vmem:[%s1764_s8 + $0x50] sm:$0xf] %v1355_v22 }
  0x1d   : > { %1358 = vst [vmem:[%s1764_s8 + $0x5c] sm:$0xf] %v1357_v23  ;;  %v1359_v24 = vld [vmem:[%s1759_s7 + $0x128] sm:$0xf]  ;;  %v1361_v25 = vld [vmem:[%s1759_s7 + $0x14c] sm:$0xf] }
  0x1e   : > { %v1363_v26 = vld [vmem:[%s1759_s7 + $0x170] sm:$0xf]  ;;  %1360 = vst [vmem:[%s1764_s8 + $0x68] sm:$0xf] %v1359_v24  ;;  %1362 = vst [vmem:[%s1764_s8 + $0x74] sm:$0xf] %v1361_v25 }
  0x1f   : > { %1364 = vst [vmem:[%s1764_s8 + $0x80] sm:$0xf] %v1363_v26  ;;  %v1365_v27 = vld [vmem:[%s1759_s7 + $0x194] sm:$0xf]  ;;  %v1367_v28 = vld [vmem:[%s1759_s7 + $0x1b8] sm:$0xf] }
  0x20   : > { %v1369_v29 = vld [vmem:[%s1759_s7 + $0x1dc] sm:$0xf]  ;;  %1366 = vst [vmem:[%s1764_s8 + $0x8c] sm:$0xf] %v1365_v27  ;;  %1368 = vst [vmem:[%s1764_s8 + $0x98] sm:$0xf] %v1367_v28 }
  0x21   : > { %1370 = vst [vmem:[%s1764_s8 + $0xa4] sm:$0xf] %v1369_v29  ;;  %v1371_v30 = vld [vmem:[%s1759_s7 + $0x200] sm:$0xf]  ;;  %v1373_v31 = vld [vmem:[%s1759_s7 + $0x224] sm:$0xf] }
  0x22   : > { %1372 = vst [vmem:[%s1764_s8 + $0xb0] sm:$0xf] %v1371_v30  ;;  %1374 = vst [vmem:[%s1764_s8 + $0xbc] sm:$0xf] %v1373_v31 }
  0x23 PF: > { %p1375_p6 = scmp.ge.s32.totalorder %s1683_s22, 1  ;;  %p352_p7 = scmp.lt.s32.totalorder %s1683_s22, 4 }
  0x25   : > { %p353_p8 = pnand %p1375_p6, %p352_p7 }
  0x26   : > { %s359_s9 = sand.u32 (!%p353_p8), 1, %s1667_s18   ;;  %s413_s10 = smul.u32 (!%p353_p8), 48, %s1675_s20 }
  0x27   : > { %356 = sbr.rel (%p353_p8) target bundleno = 376 (0x178), region = 62  ;;  %p1377_p10 = scmp.ne.s32.totalorder (!%p353_p8), %s1675_s20, 0 }
  0x28   : > { %s1547_s11 = smul.u32 (!%p353_p8), 192, %s359_s9  ;;  %p414_p9 = scmp.lt.s32.totalorder (!%p353_p8), %s413_s10, 143 }
  0x2a   : > { %s1836_s16 = scalar_lea.vmem (!%p353_p8), [#allocation3], %s1547_s11 }
  0x2c   : > { %s2054_s10 = smov (!%p414_p9, %s413_s10), 143  ;;  %450 = sbr.rel (%p1377_p10) target bundleno = 58 (0x3a), region = 70 }
  0x2d   : > { %s1376_s12 = sshll.u32 %s2054_s10, 2 }
  0x2e   : > { %s1834_s15 = scalar_lea.vmem %s2042_s1, %s1376_s12 }
  0x31   : > { %v1685_v32 = vmov 0.0  }
  0x32   : > { %451 = vst [vmem:[#allocation2 + $0x30] sm:$0xff] %v1685_v32  ;;  %452 = vst [vmem:[#allocation2] sm:$0xff] %v1685_v32 }
  0x33   : > { %453 = vst [vmem:[#allocation2 + $0x58] sm:$0xff] %v1685_v32  ;;  %454 = vst [vmem:[#allocation2 + $0x18] sm:$0xff] %v1685_v32 }
  0x34   : > { %455 = vst [vmem:[#allocation2 + $0x50] sm:$0xff] %v1685_v32  ;;  %456 = vst [vmem:[#allocation2 + $0x68] sm:$0xff] %v1685_v32 }
  0x35   : > { %457 = vst [vmem:[#allocation2 + $0x8] sm:$0xff] %v1685_v32  ;;  %458 = vst [vmem:[#allocation2 + $0x48] sm:$0xff] %v1685_v32 }
  0x36   : > { %459 = vst [vmem:[#allocation2 + $0x40] sm:$0xff] %v1685_v32  ;;  %460 = vst [vmem:[#allocation2 + $0x20] sm:$0xff] %v1685_v32 }
  0x37   : > { %461 = vst [vmem:[#allocation2 + $0x10] sm:$0xff] %v1685_v32  ;;  %462 = vst [vmem:[#allocation2 + $0x38] sm:$0xff] %v1685_v32 }
  0x38   : > { %463 = vst [vmem:[#allocation2 + $0x60] sm:$0xff] %v1685_v32  ;;  %464 = vst [vmem:[#allocation2 + $0x70] sm:$0xff] %v1685_v32 }
  0x39   : > { %465 = vst [vmem:[#allocation2 + $0x78] sm:$0xff] %v1685_v32  ;;  %466 = vst [vmem:[#allocation2 + $0x28] sm:$0xff] %v1685_v32 }
  0x3a PF: > { %v1589_v33 = vld [vmem:[%s1834_s15 + $0x78] sm:$0xff]   ;;  %v1592_v36 = vld [vmem:[%s1834_s15 + $0x70] sm:$0xff]   ;;  %v1595_v39 = vld [vmem:[%s1834_s15 + $0x68] sm:$0xff]   ;;  %p1426_p11 = scmp.ne.s32.totalorder %s1675_s20, 2 }
  0x3b   : > { %v1590_v34 = vld [vmem:[%s1834_s15 + $0x38] sm:$0xff]   ;;  %1434 = vmatprep.subr.bf16.mxu0 %v1589_v33  ;;  %v1593_v37 = vld [vmem:[%s1834_s15 + $0x30] sm:$0xff]   ;;  %v1596_v40 = vld [vmem:[%s1834_s15 + $0x28] sm:$0xff]  }
  0x3c   : > { %v1591_v35 = vld [vmem:[%s1834_s15 + $0xb8] sm:$0xff]   ;;  %1435 = vmatpush3.bf16.msra.mxu0 %v1590_v34  ;;  %v1594_v38 = vld [vmem:[%s1834_s15 + $0xb0] sm:$0xff]   ;;  %v1597_v41 = vld [vmem:[%s1834_s15 + $0xa8] sm:$0xff]  }
  0x3d   : > { %1514 = vmatprep.subr.bf16.mxu1 %v1591_v35  ;;  %1436 = vmatprep.subr.bf16.mxu0 %v1592_v36  ;;  %v1598_v42 = vld [vmem:[%s1834_s15 + $0x60] sm:$0xff]   ;;  %v1601_v45 = vld [vmem:[%s1834_s15 + $0x58] sm:$0xff]   ;;  %v1604_v48 = vld [vmem:[%s1834_s15 + $0x50] sm:$0xff]  }
  0x3e   : > { %1515 = vmatpush3.bf16.msra.mxu1 %v1591_v35  ;;  %v1599_v43 = vld [vmem:[%s1834_s15 + $0x20] sm:$0xff]   ;;  %v1603_v46 = vld [vmem:[%s1834_s15 + $0x98] sm:$0xff]   ;;  %v1606_v49 = vld [vmem:[%s1834_s15 + $0x90] sm:$0xff]  }
  0x3f   : > { %1516 = vmatprep.subr.bf16.mxu1 %v1594_v38  ;;  %v1600_v44 = vld [vmem:[%s1834_s15 + $0xa0] sm:$0xff]   ;;  %v1602_v47 = vld [vmem:[%s1834_s15 + $0x18] sm:$0xff]   ;;  %v1605_v50 = vld [vmem:[%s1834_s15 + $0x10] sm:$0xff]  }
  0x40   : > { %1437 = vmatpush3.bf16.msra.mxu0 %v1593_v37  ;;  %v1607_v51 = vld [vmem:[%s1834_s15 + $0x48] sm:$0xff]   ;;  %v1610_v54 = vld [vmem:[%s1834_s15 + $0x40] sm:$0xff]   ;;  %v1625_v1 = vld [vmem:[%s1836_s16 + $0x50] ss:$12 sps:$4 sm:$0xff]  }
  0x41   : > { %1438 = vmatprep.subr.bf16.mxu0 %v1595_v39  ;;  %v1608_v52 = vld [vmem:[%s1834_s15 + $0x8] sm:$0xff]   ;;  %v1612_v55 = vld [vmem:[%s1834_s15 + $0x80] sm:$0xff]   ;;  %v1623_v3 = vld [vmem:[%s1836_s16 + $0x30] ss:$12 sps:$4 sm:$0xff]  }
  0x42   : > { %1517 = vmatpush3.bf16.msra.mxu1 %v1594_v38  ;;  %v1609_v53 = vld [vmem:[%s1834_s15 + $0x88] sm:$0xff]   ;;  %v1615_v56 = vld [vmem:[%s1836_s16 + $0x4] ss:$12 sps:$4 sm:$0xff]   ;;  %v1621_v0 = vld [vmem:[%s1836_s16 + $0x34] ss:$12 sps:$4 sm:$0xff]  }
  0x43   : > { %1518 = vmatprep.subr.bf16.mxu1 %v1597_v41  ;;  %v1616_v57 = vld [vmem:[%s1836_s16 + $0x8] ss:$12 sps:$4 sm:$0xff]   ;;  %v1611_v58 = vld [vmem:[%s1834_s15] sm:$0xff]   ;;  %867 = vmatprep.mubr.bf16.mxu0 %v1615_v56  ;;  %v1626_v4 = vld [vmem:[%s1836_s16 + $0x4c] ss:$12 sps:$4 sm:$0xff]  }
  0x44   : > { %1439 = vmatpush3.bf16.msra.mxu0 %v1596_v40  ;;  %1530 = vmatprep.mubr.bf16.mxu1 %v1616_v57  ;;  %v1613_v59 = vld [vmem:[%s1836_s16] ss:$12 sps:$4 sm:$0xff]   ;;  %v1618_v60 = vld [vmem:[%s1836_s16 + $0x1c] ss:$12 sps:$4 sm:$0xff]   ;;  %v1624_v62 = vld [vmem:[%s1836_s16 + $0x38] ss:$12 sps:$4 sm:$0xff]  }
  0x45   : > { %1440 = vmatprep.subr.bf16.mxu0 %v1598_v42  ;;  %v1617_v61 = vld [vmem:[%s1836_s16 + $0x20] ss:$12 sps:$4 sm:$0xff]   ;;  %v1620_v63 = vld [vmem:[%s1836_s16 + $0x18] ss:$12 sps:$4 sm:$0xff]   ;;  %v1632_v2 = vld [vmem:[%s1836_s16 + $0x68] ss:$12 sps:$4 sm:$0xff]  }
  0x46   : > { %1519 = vmatpush3.bf16.msra.mxu1 %v1597_v41  ;;  %v1633_v5 = vld [vmem:[%s1836_s16 + $0x80] ss:$12 sps:$4 sm:$0xff]   ;;  %v1640_v6 = vld [vmem:[%s1836_s16 + $0x98] ss:$12 sps:$4 sm:$0xff]   ;;  %v1628_v7 = vld [vmem:[%s1836_s16 + $0x48] ss:$12 sps:$4 sm:$0xff]  }
  0x47   : > { %1520 = vmatprep.subr.bf16.mxu1 %v1600_v44  ;;  %v1629_v8 = vld [vmem:[%s1836_s16 + $0x64] ss:$12 sps:$4 sm:$0xff]   ;;  %v1631_v10 = vld [vmem:[%s1836_s16 + $0x60] ss:$12 sps:$4 sm:$0xff]   ;;  %v1634_v11 = vld [vmem:[%s1836_s16 + $0x7c] ss:$12 sps:$4 sm:$0xff]  }
  0x48   : > { %1441 = vmatpush3.bf16.msra.mxu0 %v1599_v43  ;;  %v1641_v9 = vld [vmem:[%s1836_s16 + $0xb0] ss:$12 sps:$4 sm:$0xff]   ;;  %v1636_v12 = vld [vmem:[%s1836_s16 + $0x78] ss:$12 sps:$4 sm:$0xff]   ;;  %v1637_v13 = vld [vmem:[%s1836_s16 + $0x94] ss:$12 sps:$4 sm:$0xff]  }
  0x49   : > { %1442 = vmatprep.subr.bf16.mxu0 %v1601_v45  ;;  %v1639_v14 = vld [vmem:[%s1836_s16 + $0x90] ss:$12 sps:$4 sm:$0xff]   ;;  %v1642_v15 = vld [vmem:[%s1836_s16 + $0xac] ss:$12 sps:$4 sm:$0xff]   ;;  %v1644_v16 = vld [vmem:[%s1836_s16 + $0xa8] ss:$12 sps:$4 sm:$0xff]  }
  0x4a   : > { %1521 = vmatpush3.bf16.msra.mxu1 %v1600_v44  ;;  %v467_v22 = vld [vmem:[#allocation2 + $0x30] sm:$0xff]  ;;  %v468_v30 = vld [vmem:[#allocation2] sm:$0xff]  ;;  %v469_v37 = vld [vmem:[#allocation2 + $0x58] sm:$0xff] }
  0x4b   : > { %1522 = vmatprep.subr.bf16.mxu1 %v1603_v46  ;;  %v470_v44 = vld [vmem:[#allocation2 + $0x18] sm:$0xff] }
  0x4c   : > { %1443 = vmatpush3.bf16.msra.mxu0 %v1602_v47 }
  0x4d   : > { %1444 = vmatprep.subr.bf16.mxu0 %v1604_v48 }
  0x4e   : > { %1523 = vmatpush3.bf16.msra.mxu1 %v1603_v46 }
  0x4f   : > { %1524 = vmatprep.subr.bf16.mxu1 %v1606_v49 }
  0x50   : > { %1445 = vmatpush3.bf16.msra.mxu0 %v1605_v50 }
  0x51   : > { %1446 = vmatprep.subr.bf16.mxu0 %v1607_v51 }
  0x52   : > { %1525 = vmatpush3.bf16.msra.mxu1 %v1606_v49 }
  0x53   : > { %1526 = vmatprep.subr.bf16.mxu1 %v1609_v53 }
  0x54   : > { %1447 = vmatpush3.bf16.msra.mxu0 %v1608_v52  ;;  %v471_v52 = vld [vmem:[#allocation2 + $0x50] sm:$0xff] }
  0x55   : > { %1448 = vmatprep.subr.bf16.mxu0 %v1610_v54 }
  0x56   : > { %1527 = vmatpush3.bf16.msra.mxu1 %v1609_v53 }
  0x57   : > { %1528 = vmatprep.subr.bf16.mxu1 %v1612_v55 }
  0x58   : > { %1449 = vmatpush3.bf16.msra.mxu0 %v1611_v58 }
  0x5a   : > { %1529 = vmatpush3.bf16.msra.mxu1 %v1612_v55 }
  0x5b   : > { %868 = vmatmul.mubr.bf16.vlgmr.msra.gmra.mxu0 %v1613_v59  ;;  %v472_v59 = vld [vmem:[#allocation2 + $0x68] sm:$0xff] }
  0x5c   : > { %875 = vmatprep.mubr.bf16.mxu0 %v1618_v60 }
  0x5d   : > { %1531 = vmatmul.mubr.bf16.vlgmr.msra.gmra.mxu1 %v1617_v61 }
  0x5e   : > { %1534 = vmatprep.mubr.bf16.mxu1 %v1624_v62 }
  0x63   : > { %876 = vmatmul.mubr.bf16.gmra.mxu0 %v1620_v63 }
  0x64   : > { %883 = vmatprep.mubr.bf16.mxu0 %v1621_v0 }
  0x65   : > { %1535 = vmatmul.mubr.bf16.gmra.mxu1 %v1625_v1  ;;  %v473_v1 = vld [vmem:[#allocation2 + $0x8] sm:$0xff] }
  0x66   : > { %1538 = vmatprep.mubr.bf16.mxu1 %v1632_v2 }
  0x6b   : > { %884 = vmatmul.mubr.bf16.gmra.mxu0 %v1623_v3 }
  0x6c   : > { %891 = vmatprep.mubr.bf16.mxu0 %v1626_v4 }
  0x6d   : > { %1539 = vmatmul.mubr.bf16.gmra.mxu1 %v1633_v5 }
  0x6e   : > { %1542 = vmatprep.mubr.bf16.mxu1 %v1640_v6 }
  0x73   : > { %892 = vmatmul.mubr.bf16.gmra.mxu0 %v1628_v7 }
  0x74   : > { %899 = vmatprep.mubr.bf16.mxu0 %v1629_v8  ;;  %v474_v8 = vld [vmem:[#allocation2 + $0x48] sm:$0xff] }
  0x75   : > { %1543 = vmatmul.mubr.bf16.gmra.mxu1 %v1641_v9 }
  0x7b   : > { %900 = vmatmul.mubr.bf16.gmra.mxu0 %v1631_v10 }
  0x7c   : > { %907 = vmatprep.mubr.bf16.mxu0 %v1634_v11 }
  0x83   : > { %908 = vmatmul.mubr.bf16.gmra.mxu0 %v1636_v12 }
  0x84   : > { %915 = vmatprep.mubr.bf16.mxu0 %v1637_v13 }
  0x8b   : > { %916 = vmatmul.mubr.bf16.gmra.mxu0 %v1639_v14 }
  0x8c   : > { %923 = vmatprep.mubr.bf16.mxu0 %v1642_v15 }
  0x93   : > { %924 = vmatmul.mubr.bf16.gmra.mxu0 %v1644_v16  ;;  %v475_v16 = vld [vmem:[#allocation2 + $0x40] sm:$0xff] }
 0x11b   : > { %v1450_v17 = vpop.f32.mrf.mxu0 }
 0x11d   : > { %v1451_v18 = vpop.f32.mrf.mxu0  ;;  %v1532_v19 = vpop.f32.mrf.mxu1 }
 0x11e   : > { %v1452_v20 = vadd.f32 %v1451_v18, %v1450_v17 }
 0x11f   : > { %v1453_v21 = vpop.f32.mrf.mxu0  ;;  %v966_v23 = vpop.f32.mrf.mxu1 }
 0x120   : > { %v967_v24 = vadd.f32 %v1452_v20, %v966_v23  ;;  %v476_v23 = vld [vmem:[#allocation2 + $0x20] sm:$0xff] }
 0x121   : > { %v1454_v25 = vpop.f32.mrf.mxu0  ;;  %v1533_v26 = vpop.f32.mrf.mxu1 }
 0x122   : > { %v1029_v27 = vadd.f32 %v967_v24, %v467_v22  ;;  %v1455_v28 = vadd.f32 %v1454_v25, %v1453_v21 }
 0x123   : > { %v1456_v29 = vpop.f32.mrf.mxu0  ;;  %v969_v31 = vpop.f32.mrf.mxu1 }
 0x124   : > { %1045 = vst [vmem:[#allocation2 + $0x30] sm:$0xff] %v1029_v27  ;;  %v970_v32 = vadd.f32 %v1455_v28, %v969_v31 }
 0x125   : > { %v1457_v33 = vpop.f32.mrf.mxu0  ;;  %v1536_v34 = vpop.f32.mrf.mxu1 }
 0x126   : > { %v1030_v35 = vadd.f32 %v970_v32, %v468_v30  ;;  %v1458_v36 = vadd.f32 %v1457_v33, %v1456_v29  ;;  %v477_v29 = vld [vmem:[#allocation2 + $0x10] sm:$0xff] }
 0x127   : > { %v1459_v38 = vpop.f32.mrf.mxu0  ;;  %v982_v41 = vpop.f32.mrf.mxu1 }
 0x128   : > { %1046 = vst [vmem:[#allocation2] sm:$0xff] %v1030_v35  ;;  %v975_v39 = vadd.f32 %v1532_v19, %v1458_v36  ;;  %v478_v36 = vld [vmem:[#allocation2 + $0x38] sm:$0xff] }
 0x129   : > { %v1460_v40 = vpop.f32.mrf.mxu0  ;;  %v1537_v48 = vpop.f32.mrf.mxu1 }
 0x12a   : > { %v1031_v42 = vadd.f32 %v975_v39, %v469_v37  ;;  %v1461_v43 = vadd.f32 %v1460_v40, %v1459_v38 }
 0x12b   : > { %v1462_v45 = vpop.f32.mrf.mxu0  ;;  %v985_v55 = vpop.f32.mrf.mxu1 }
 0x12c   : > { %1047 = vst [vmem:[#allocation2 + $0x58] sm:$0xff] %v1031_v42  ;;  %v978_v46 = vadd.f32 %v1533_v26, %v1461_v43 }
 0x12d   : > { %v1463_v47 = vpop.f32.mrf.mxu0  ;;  %v1540_v62 = vpop.f32.mrf.mxu1 }
 0x12e   : > { %v1032_v49 = vadd.f32 %v978_v46, %v470_v44  ;;  %v1464_v50 = vadd.f32 %v1463_v47, %v1462_v45  ;;  %v479_v44 = vld [vmem:[#allocation2 + $0x60] sm:$0xff] }
 0x12f   : > { %v1465_v51 = vpop.f32.mrf.mxu0  ;;  %v998_v5 = vpop.f32.mrf.mxu1 }
 0x130   : > { %1048 = vst [vmem:[#allocation2 + $0x18] sm:$0xff] %v1032_v49  ;;  %v983_v53 = vadd.f32 %v1464_v50, %v982_v41 }
 0x131   : > { %v1466_v54 = vpop.f32.mrf.mxu0  ;;  %v1541_v12 = vpop.f32.mrf.mxu1 }
 0x132   : > { %v1033_v56 = vadd.f32 %v983_v53, %v471_v52  ;;  %v1467_v57 = vadd.f32 %v1466_v54, %v1465_v51  ;;  %v480_v51 = vld [vmem:[#allocation2 + $0x70] sm:$0xff] }
 0x133   : > { %v1468_v58 = vpop.f32.mrf.mxu0  ;;  %v1001_v19 = vpop.f32.mrf.mxu1 }
 0x134   : > { %1049 = vst [vmem:[#allocation2 + $0x50] sm:$0xff] %v1033_v56  ;;  %v986_v60 = vadd.f32 %v1467_v57, %v985_v55  ;;  %v481_v56 = vld [vmem:[#allocation2 + $0x78] sm:$0xff] }
 0x135   : > { %v1469_v61 = vpop.f32.mrf.mxu0  ;;  %v1544_v26 = vpop.f32.mrf.mxu1 }
 0x136   : > { %v1034_v63 = vadd.f32 %v986_v60, %v472_v59  ;;  %v1470_v0 = vadd.f32 %v1469_v61, %v1468_v58 }
 0x137   : > { %v1471_v2 = vpop.f32.mrf.mxu0  ;;  %v1014_v33 = vpop.f32.mrf.mxu1 }
 0x138   : > { %1050 = vst [vmem:[#allocation2 + $0x68] sm:$0xff] %v1034_v63  ;;  %v991_v3 = vadd.f32 %v1536_v34, %v1470_v0 }
 0x139   : > { %v1472_v4 = vpop.f32.mrf.mxu0  ;;  %v1545_v40 = vpop.f32.mrf.mxu1 }
 0x13a   : > { %v1035_v6 = vadd.f32 %v991_v3, %v473_v1  ;;  %v1473_v7 = vadd.f32 %v1472_v4, %v1471_v2 }
 0x13b   : > { %v1474_v9 = vpop.f32.mrf.mxu0  ;;  %v1017_v47 = vpop.f32.mrf.mxu1 }
 0x13c   : > { %1051 = vst [vmem:[#allocation2 + $0x8] sm:$0xff] %v1035_v6  ;;  %v994_v10 = vadd.f32 %v1537_v48, %v1473_v7 }
 0x13d   : > { %v1475_v11 = vpop.f32.mrf.mxu0 }
 0x13e   : > { %v1036_v13 = vadd.f32 %v994_v10, %v474_v8  ;;  %v1476_v14 = vadd.f32 %v1475_v11, %v1474_v9 }
 0x13f   : > { %v1477_v15 = vpop.f32.mrf.mxu0 }
 0x140   : > { %1052 = vst [vmem:[#allocation2 + $0x48] sm:$0xff] %v1036_v13  ;;  %v999_v17 = vadd.f32 %v1476_v14, %v998_v5 }
 0x141   : > { %v1478_v18 = vpop.f32.mrf.mxu0 }
 0x142   : > { %v1037_v20 = vadd.f32 %v999_v17, %v475_v16  ;;  %v1479_v21 = vadd.f32 %v1478_v18, %v1477_v15 }
 0x143   : > { %v1480_v22 = vpop.f32.mrf.mxu0 }
 0x144   : > { %1053 = vst [vmem:[#allocation2 + $0x40] sm:$0xff] %v1037_v20  ;;  %v1002_v24 = vadd.f32 %v1479_v21, %v1001_v19 }
 0x145   : > { %v1481_v25 = vpop.f32.mrf.mxu0 }
 0x146   : > { %v1038_v27 = vadd.f32 %v1002_v24, %v476_v23  ;;  %v1482_v28 = vadd.f32 %v1481_v25, %v1480_v22 }
 0x147   : > { %v1483_v30 = vpop.f32.mrf.mxu0 }
 0x148   : > { %1054 = vst [vmem:[#allocation2 + $0x20] sm:$0xff] %v1038_v27  ;;  %v1007_v31 = vadd.f32 %v1540_v62, %v1482_v28  ;;  %v482_v62 = vld [vmem:[#allocation2 + $0x28] sm:$0xff] }
 0x149   : > { %v1484_v32 = vpop.f32.mrf.mxu0 }
 0x14a   : > { %v1039_v34 = vadd.f32 %v1007_v31, %v477_v29  ;;  %v1485_v35 = vadd.f32 %v1484_v32, %v1483_v30 }
 0x14b   : > { %v1486_v37 = vpop.f32.mrf.mxu0 }
 0x14c   : > { %1055 = vst [vmem:[#allocation2 + $0x10] sm:$0xff] %v1039_v34  ;;  %v1010_v38 = vadd.f32 %v1541_v12, %v1485_v35 }
 0x14d   : > { %v1487_v39 = vpop.f32.mrf.mxu0 }
 0x14e   : > { %v1040_v41 = vadd.f32 %v1010_v38, %v478_v36  ;;  %v1488_v42 = vadd.f32 %v1487_v39, %v1486_v37 }
 0x14f   : > { %v1489_v43 = vpop.f32.mrf.mxu0 }
 0x150   : > { %1056 = vst [vmem:[#allocation2 + $0x38] sm:$0xff] %v1040_v41  ;;  %v1015_v45 = vadd.f32 %v1488_v42, %v1014_v33 }
 0x151   : > { %v1490_v46 = vpop.f32.mrf.mxu0 }
 0x152   : > { %v1041_v48 = vadd.f32 %v1015_v45, %v479_v44  ;;  %v1491_v49 = vadd.f32 %v1490_v46, %v1489_v43 }
 0x153   : > { %v1492_v50 = vpop.f32.mrf.mxu0 }
 0x154   : > { %1057 = vst [vmem:[#allocation2 + $0x60] sm:$0xff] %v1041_v48  ;;  %v1018_v52 = vadd.f32 %v1491_v49, %v1017_v47 }
 0x155   : > { %v1493_v53 = vpop.f32.mrf.mxu0 }
 0x156   : > { %v1042_v54 = vadd.f32 %v1018_v52, %v480_v51  ;;  %v1494_v55 = vadd.f32 %v1493_v53, %v1492_v50 }
 0x157   : > { %v1495_v57 = vpop.f32.mrf.mxu0 }
 0x158   : > { %1058 = vst [vmem:[#allocation2 + $0x70] sm:$0xff] %v1042_v54  ;;  %v1023_v58 = vadd.f32 %v1544_v26, %v1494_v55 }
 0x159   : > { %v1496_v59 = vpop.f32.mrf.mxu0 }
 0x15a   : > { %v1043_v60 = vadd.f32 %v1023_v58, %v481_v56  ;;  %v1497_v61 = vadd.f32 %v1496_v59, %v1495_v57 }
 0x15c   : > { %1059 = vst [vmem:[#allocation2 + $0x78] sm:$0xff] %v1043_v60  ;;  %v1026_v63 = vadd.f32 %v1545_v40, %v1497_v61  ;;  %1064 = sbr.rel (%p1426_p11) target bundleno = 376 (0x178), region = 74 }
 0x15e   : > { %v1044_v0 = vadd.f32 %v1026_v63, %v482_v62 }
 0x160   : > { %1060 = vst [vmem:[#allocation2 + $0x28] sm:$0xff] %v1044_v0 }
 0x161   : > { %v1065_v1 = vld [vmem:[#allocation2 + $0x30] sm:$0xff]  ;;  %v1891_v2 = vld [vmem:[%s2043_s2] ss:$0 sm:$0xff]  ;;  %v1067_v8 = vld [vmem:[#allocation2 + $0x58] sm:$0xff] }
 0x162   : > { %v1896_v3 = vld [vmem:[%s2044_s3] ss:$0 sm:$0xff]  ;;  %v1088_v4 = vmul.f32 %v1891_v2, %v1065_v1  ;;  %v1068_v9 = vld [vmem:[#allocation2 + $0x18] sm:$0xff]  ;;  %v1128_v11 = vld [vmem:[%s2045_s4 + $0x8] sm:$0xff]  ;;  %v1090_v12 = vmul.f32 %v1891_v2, %v1067_v8 }
 0x163   : > { %v1066_v5 = vld [vmem:[#allocation2] sm:$0xff]  ;;  %v1129_v13 = vld [vmem:[%s2045_s4 + $0x10] sm:$0xff]  ;;  %v1091_v14 = vmul.f32 %v1891_v2, %v1068_v9  ;;  %v1130_v17 = vld [vmem:[%s2045_s4 + $0x18] sm:$0xff] }
 0x164   : > { %v1127_v6 = vld [vmem:[%s2045_s4] sm:$0xff]  ;;  %v1089_v7 = vmul.f32 %v1891_v2, %v1066_v5  ;;  %v1111_v10 = vadd.f32 %v1896_v3, %v1088_v4  ;;  %v1069_v15 = vld [vmem:[#allocation2 + $0x50] sm:$0xff]  ;;  %v1070_v19 = vld [vmem:[#allocation2 + $0x68] sm:$0xff]  ;;  %v1113_v22 = vadd.f32 %v1896_v3, %v1090_v12 }
 0x165   : > { %v1092_v18 = vmul.f32 %v1891_v2, %v1069_v15  ;;  %v1071_v20 = vld [vmem:[#allocation2 + $0x8] sm:$0xff]  ;;  %v1114_v23 = vadd.f32 %v1896_v3, %v1091_v14  ;;  %v1131_v24 = vld [vmem:[%s2045_s4 + $0x20] sm:$0xff]  ;;  %v1093_v25 = vmul.f32 %v1891_v2, %v1070_v19  ;;  %v1133_v37 = vld [vmem:[%s2045_s4 + $0x30] sm:$0xff] }
 0x166   : > { %v1112_v16 = vadd.f32 %v1896_v3, %v1089_v7  ;;  %v1143_v21 = vadd.f32 %v1127_v6, %v1111_v10  ;;  %v1072_v26 = vld [vmem:[#allocation2 + $0x48] sm:$0xff]  ;;  %v1094_v30 = vmul.f32 %v1891_v2, %v1071_v20  ;;  %v1073_v32 = vld [vmem:[#allocation2 + $0x40] sm:$0xff]  ;;  %v1145_v34 = vadd.f32 %v1129_v13, %v1113_v22  ;;  %v1134_v38 = vld [vmem:[%s2045_s4 + $0x38] sm:$0xff] }
 0x167   : > { %v1115_v28 = vadd.f32 %v1896_v3, %v1092_v18  ;;  %v1132_v29 = vld [vmem:[%s2045_s4 + $0x28] sm:$0xff]  ;;  %v1095_v31 = vmul.f32 %v1891_v2, %v1072_v26  ;;  %v1146_v35 = vadd.f32 %v1130_v17, %v1114_v23  ;;  %v1116_v36 = vadd.f32 %v1896_v3, %v1093_v25  ;;  %v1074_v39 = vld [vmem:[#allocation2 + $0x20] sm:$0xff]  ;;  %v1075_v44 = vld [vmem:[#allocation2 + $0x10] sm:$0xff] }
 0x168   : > { %v1144_v27 = vadd.f32 %v1128_v11, %v1112_v16  ;;  %v1159_v33 = vmax.f32 %v1143_v21, 0.0  ;;  %v1117_v42 = vadd.f32 %v1896_v3, %v1094_v30  ;;  %v1076_v45 = vld [vmem:[#allocation2 + $0x38] sm:$0xff]  ;;  %v1161_v46 = vmax.f32 %v1145_v34, 0.0  ;;  %v1077_v50 = vld [vmem:[#allocation2 + $0x60] sm:$0xff]  ;;  %v1078_v56 = vld [vmem:[#allocation2 + $0x70] sm:$0xff] }
 0x169   : > { %v1147_v41 = vadd.f32 %v1131_v24, %v1115_v28  ;;  %v1118_v43 = vadd.f32 %v1896_v3, %v1095_v31  ;;  %v1162_v47 = vmax.f32 %v1146_v35, 0.0  ;;  %v1148_v48 = vadd.f32 %v1132_v29, %v1116_v36  ;;  %v1135_v54 = vld [vmem:[%s2045_s4 + $0x40] sm:$0xff]  ;;  %v1136_v59 = vld [vmem:[%s2045_s4 + $0x48] sm:$0xff]  ;;  %v1079_v62 = vld [vmem:[#allocation2 + $0x78] sm:$0xff] }
 0x16a   : > { %v1160_v40 = vmax.f32 %v1144_v27, 0.0  ;;  %1175 = vst [vmem:[%s2046_s5] sm:$0xff] %v1159_v33  ;;  %v1096_v49 = vmul.f32 %v1891_v2, %v1073_v32  ;;  %v1149_v52 = vadd.f32 %v1133_v37, %v1117_v42  ;;  %v1097_v55 = vmul.f32 %v1891_v2, %v1074_v39  ;;  %1177 = vst [vmem:[%s2046_s5 + $0x10] sm:$0xff] %v1161_v46  ;;  %v1080_v63 = vld [vmem:[#allocation2 + $0x28] sm:$0xff]  ;;  %v1137_v5 = vld [vmem:[%s2045_s4 + $0x50] sm:$0xff] }
 0x16b   : > { %v1163_v51 = vmax.f32 %v1147_v41, 0.0  ;;  %v1150_v53 = vadd.f32 %v1134_v38, %v1118_v43  ;;  %1178 = vst [vmem:[%s2046_s5 + $0x18] sm:$0xff] %v1162_v47  ;;  %v1164_v57 = vmax.f32 %v1148_v48, 0.0  ;;  %v1098_v60 = vmul.f32 %v1891_v2, %v1075_v44  ;;  %v1138_v6 = vld [vmem:[%s2045_s4 + $0x58] sm:$0xff]  ;;  %v1139_v11 = vld [vmem:[%s2045_s4 + $0x60] sm:$0xff]  ;;  %v1140_v15 = vld [vmem:[%s2045_s4 + $0x68] sm:$0xff] }
 0x16c   : > { %1176 = vst [vmem:[%s2046_s5 + $0x8] sm:$0xff] %v1160_v40  ;;  %v1119_v58 = vadd.f32 %v1896_v3, %v1096_v49  ;;  %v1099_v61 = vmul.f32 %v1891_v2, %v1076_v45  ;;  %v1165_v0 = vmax.f32 %v1149_v52, 0.0  ;;  %v1120_v4 = vadd.f32 %v1896_v3, %v1097_v55  ;;  %v1141_v22 = vld [vmem:[%s2045_s4 + $0x70] sm:$0xff]  ;;  %v1142_v23 = vld [vmem:[%s2045_s4 + $0x78] sm:$0xff] }
 0x16d   : > { %1179 = vst [vmem:[%s2046_s5 + $0x20] sm:$0xff] %v1163_v51  ;;  %v1166_v1 = vmax.f32 %v1150_v53, 0.0  ;;  %v1100_v7 = vmul.f32 %v1891_v2, %v1077_v50  ;;  %1180 = vst [vmem:[%s2046_s5 + $0x28] sm:$0xff] %v1164_v57  ;;  %v1121_v9 = vadd.f32 %v1896_v3, %v1098_v60  ;;  %v1101_v12 = vmul.f32 %v1891_v2, %v1078_v56 }
 0x16e   : > { %v1151_v8 = vadd.f32 %v1135_v54, %v1119_v58  ;;  %v1122_v10 = vadd.f32 %v1896_v3, %v1099_v61  ;;  %1181 = vst [vmem:[%s2046_s5 + $0x30] sm:$0xff] %v1165_v0  ;;  %v1152_v13 = vadd.f32 %v1136_v59, %v1120_v4  ;;  %v1102_v16 = vmul.f32 %v1891_v2, %v1079_v62 }
 0x16f   : > { %1182 = vst [vmem:[%s2046_s5 + $0x38] sm:$0xff] %v1166_v1  ;;  %v1123_v14 = vadd.f32 %v1896_v3, %v1100_v7  ;;  %v1103_v17 = vmul.f32 %v1891_v2, %v1080_v63  ;;  %v1153_v19 = vadd.f32 %v1137_v5, %v1121_v9  ;;  %v1124_v21 = vadd.f32 %v1896_v3, %v1101_v12 }
 0x170   : > { %v1167_v18 = vmax.f32 %v1151_v8, 0.0  ;;  %v1154_v20 = vadd.f32 %v1138_v6, %v1122_v10  ;;  %v1168_v24 = vmax.f32 %v1152_v13, 0.0  ;;  %v1125_v26 = vadd.f32 %v1896_v3, %v1102_v16 }
 0x171   : > { %v1155_v25 = vadd.f32 %v1139_v11, %v1123_v14  ;;  %v1126_v27 = vadd.f32 %v1896_v3, %v1103_v17  ;;  %v1169_v2 = vmax.f32 %v1153_v19, 0.0  ;;  %v1156_v29 = vadd.f32 %v1140_v15, %v1124_v21 }
 0x172   : > { %1183 = vst [vmem:[%s2046_s5 + $0x40] sm:$0xff] %v1167_v18  ;;  %v1170_v28 = vmax.f32 %v1154_v20, 0.0  ;;  %1184 = vst [vmem:[%s2046_s5 + $0x48] sm:$0xff] %v1168_v24  ;;  %v1157_v31 = vadd.f32 %v1141_v22, %v1125_v26 }
 0x173   : > { %v1171_v30 = vmax.f32 %v1155_v25, 0.0  ;;  %v1158_v32 = vadd.f32 %v1142_v23, %v1126_v27  ;;  %1185 = vst [vmem:[%s2046_s5 + $0x50] sm:$0xff] %v1169_v2  ;;  %v1172_v3 = vmax.f32 %v1156_v29, 0.0 }
 0x174   : > { %1186 = vst [vmem:[%s2046_s5 + $0x58] sm:$0xff] %v1170_v28  ;;  %v1173_v33 = vmax.f32 %v1157_v31, 0.0 }
 0x175   : > { %1187 = vst [vmem:[%s2046_s5 + $0x60] sm:$0xff] %v1171_v30  ;;  %v1174_v34 = vmax.f32 %v1158_v32, 0.0  ;;  %1188 = vst [vmem:[%s2046_s5 + $0x68] sm:$0xff] %v1172_v3 }
 0x176   : > { %1189 = vst [vmem:[%s2046_s5 + $0x70] sm:$0xff] %v1173_v33 }
 0x177   : > { %1190 = vst [vmem:[%s2046_s5 + $0x78] sm:$0xff] %v1174_v34 }
 0x178 PF: > { %s15_s22 = sadd.s32 1, %s1683_s22   ;;  %s2047_s18 = smov %s1671_s19 }
 0x179   : > { %p12_p12 = scmp.ge.s32.totalorder %s15_s22, 5   ;;  %s2048_s19 = smov %s1751_s26 }
 0x17a   : > { %s2049_s20 = smov %s1679_s21  ;;  %s2050_s21 = smov %s2052_s23 }
 0x17b   :  { %14 = sbr.rel (!%p12_p12) target bundleno = 3 (0x3), region = 127 }

// kernel: _lambda_.26
= control target key start
LH: loop header
LB: loop body
LE: loop exit
PB: predicated region body
PF: predicated region fallthrough
CT: control target
= control target key end

     0   :  { %s1108_s15 = smov 0   ;;  %s1110_s16 = smov 0   ;;  %s1227_s0 = inlined_call_operand.vmem [shape: bf16[32,1152], index: 0, kind: input, shape index: {}]   ;;  %s1228_s1 = inlined_call_operand.vmem [shape: bf16[1152,128], index: 1, kind: input, shape index: {}]   ;;  %s1229_s2 = inlined_call_operand.vmem [shape: f32[1,128], index: 2, kind: input, shape index: {}]   ;;  %s1230_s3 = inlined_call_operand.vmem [shape: f32[1,128], index: 3, kind: input, shape index: {}]   ;;  %s1231_s4 = inlined_call_operand.vmem [shape: f32[32,128], index: 4, kind: output, shape index: {}]  }
   0x1   :  { %s1112_s17 = smov 0   ;;  %s1114_s18 = smov 0  }
   0x2   :  { %s1116_s19 = smov 0  }
   0x3 LB: > { %s26_s20 = sadd.s32 1, %s1076_s18  ;;  %p49_p1 = scmp.ne.s32.totalorder %s1068_s16, %s1064_s15  ;;  %s1080_s19 = sphi %s1116_s19, %s14_s19   ;;  %s1076_s18 = sphi %s1114_s18, %s1235_s18   ;;  %s1072_s17 = sphi %s1112_s17, %s1234_s17   ;;  %s1068_s16 = sphi %s1110_s16, %s1233_s16   ;;  %s1064_s15 = sphi %s1108_s15, %s1232_s15  }
   0x4   : > { %p27_p0 = scmp.ge.s32.totalorder %s26_s20, 3  ;;  %p50_p2 = scmp.eq.s32.totalorder %s1080_s19, 0 }
   0x5   : > { %s42_s22 = sadd.s32 1, %s1068_s16  ;;  %p858_p5 = scmp.ge.s32.totalorder %s1080_s19, 3 }
   0x6   : > { %s1237_s20 = smov (%p27_p0, %s26_s20), 0  ;;  %p51_p3 = por %p50_p2, %p49_p1 }
   0x7   : > { %s38_s21 = ssub.s32 %s1076_s18, %s1237_s20  ;;  %195 = sbr.rel (%p858_p5) target bundleno = 21 (0x15), region = 24 }
   0x8   : > { %p40_p4 = scmp.eq.s32.totalorder %s38_s21, 0 }
   0xa   : > { %s1143_s23 = scalar_select %p40_p4, %s1068_s16, %s42_s22  }
   0xc   : > { %198 = sbr.rel (!%p51_p3) target bundleno = 21 (0x15), region = 28  ;;  %s200_s24 = sand.u32 (%p51_p3), 1, %s1068_s16  }
   0xd   : > { %s908_s25 = smul.u32 (%p51_p3), 12, %s1076_s18 }
   0xe   : > { %s967_s26 = smul.u32 (%p51_p3), 48, %s200_s24 }
   0xf   : > { %s208_s29 = scalar_lea.vmem (%p51_p3), %s1227_s0, %s908_s25 }
  0x10   : > { %v223_v0 = vld [vmem:[%s208_s29] sm:$0xff] (%p51_p3)  ;;  %v227_v2 = vld [vmem:[%s208_s29 + $0x48] sm:$0xff] (%p51_p3)  ;;  %s202_s30 = scalar_lea.vmem (%p51_p3), [#allocation3], %s967_s26  ;;  %v864_v6 = vld [vmem:[%s208_s29 + $0x50] sm:$0xf] (%p51_p3) }
  0x11   : > { %v225_v1 = vld [vmem:[%s208_s29 + $0x24] sm:$0xff]  ;;  %224 = vst [vmem:[%s202_s30] sm:$0xff] %v223_v0  ;;  %228 = vst [vmem:[%s202_s30 + $0x18] sm:$0xff] %v227_v2  ;;  %v229_v3 = vld [vmem:[%s208_s29 + $0x6c] sm:$0xff] }
  0x12   : > { %226 = vst [vmem:[%s202_s30 + $0xc] sm:$0xff] %v225_v1  ;;  %v860_v4 = vld [vmem:[%s208_s29 + $0x8] sm:$0xf]  ;;  %v862_v5 = vld [vmem:[%s208_s29 + $0x2c] sm:$0xf]  ;;  %230 = vst [vmem:[%s202_s30 + $0x24] sm:$0xff] %v229_v3 }
  0x13   : > { %861 = vst [vmem:[%s202_s30 + $0x8] sm:$0xf] %v860_v4  ;;  %863 = vst [vmem:[%s202_s30 + $0x14] sm:$0xf] %v862_v5  ;;  %v866_v7 = vld [vmem:[%s208_s29 + $0x74] sm:$0xf] }
  0x14   : > { %865 = vst [vmem:[%s202_s30 + $0x20] sm:$0xf] %v864_v6  ;;  %867 = vst [vmem:[%s202_s30 + $0x2c] sm:$0xf] %v866_v7 }
  0x15 PF: > { %p868_p6 = scmp.ge.s32.totalorder %s1080_s19, 1  ;;  %p263_p7 = scmp.lt.s32.totalorder %s1080_s19, 4 }
  0x17   : > { %p264_p8 = pnand %p868_p6, %p263_p7 }
  0x18   : > { %s270_s5 = sand.u32 (!%p264_p8), 1, %s1064_s15   ;;  %s314_s6 = smul.u32 (!%p264_p8), 48, %s1072_s17 }
  0x19   : > { %267 = sbr.rel (%p264_p8) target bundleno = 299 (0x12b), region = 58  ;;  %p870_p10 = scmp.ne.s32.totalorder (!%p264_p8), %s1072_s17, 0 }
  0x1a   : > { %s968_s7 = smul.u32 (!%p264_p8), 48, %s270_s5  ;;  %p315_p9 = scmp.lt.s32.totalorder (!%p264_p8), %s314_s6, 143 }
  0x1c   : > { %s1160_s12 = scalar_lea.vmem (!%p264_p8), [#allocation3], %s968_s7 }
  0x1e   : > { %s1239_s6 = smov (!%p315_p9, %s314_s6), 143  ;;  %342 = sbr.rel (%p870_p10) target bundleno = 38 (0x26), region = 66 }
  0x1f   : > { %s869_s8 = sshll.u32 %s1239_s6, 2 }
  0x20   : > { %s1158_s11 = scalar_lea.vmem %s1228_s1, %s869_s8 }
  0x23   : > { %v1082_v8 = vmov 0.0  }
  0x24   : > { %343 = vst [vmem:[#allocation2 + $0x10] sm:$0xff] %v1082_v8  ;;  %344 = vst [vmem:[#allocation2] sm:$0xff] %v1082_v8 }
  0x25   : > { %345 = vst [vmem:[#allocation2 + $0x18] sm:$0xff] %v1082_v8  ;;  %346 = vst [vmem:[#allocation2 + $0x8] sm:$0xff] %v1082_v8 }
  0x26 PF: > { %v1010_v9 = vld [vmem:[%s1158_s11 + $0x78] sm:$0xff]   ;;  %v1013_v12 = vld [vmem:[%s1158_s11 + $0x70] sm:$0xff]   ;;  %v1016_v15 = vld [vmem:[%s1158_s11 + $0x68] sm:$0xff]   ;;  %p901_p11 = scmp.ne.s32.totalorder %s1072_s17, 2 }
  0x27   : > { %v1011_v10 = vld [vmem:[%s1158_s11 + $0x38] sm:$0xff]   ;;  %909 = vmatprep.subr.bf16.mxu0 %v1010_v9  ;;  %v1014_v13 = vld [vmem:[%s1158_s11 + $0x30] sm:$0xff]   ;;  %v1017_v16 = vld [vmem:[%s1158_s11 + $0x28] sm:$0xff]  }
  0x28   : > { %v1012_v11 = vld [vmem:[%s1158_s11 + $0xb8] sm:$0xff]   ;;  %910 = vmatpush3.bf16.msra.mxu0 %v1011_v10  ;;  %v1015_v14 = vld [vmem:[%s1158_s11 + $0xb0] sm:$0xff]   ;;  %v1018_v17 = vld [vmem:[%s1158_s11 + $0xa8] sm:$0xff]  }
  0x29   : > { %947 = vmatprep.subr.bf16.mxu1 %v1012_v11  ;;  %911 = vmatprep.subr.bf16.mxu0 %v1013_v12  ;;  %v1019_v18 = vld [vmem:[%s1158_s11 + $0x60] sm:$0xff]   ;;  %v1022_v21 = vld [vmem:[%s1158_s11 + $0x58] sm:$0xff]   ;;  %v1025_v24 = vld [vmem:[%s1158_s11 + $0x50] sm:$0xff]  }
  0x2a   : > { %948 = vmatpush3.bf16.msra.mxu1 %v1012_v11  ;;  %v1020_v19 = vld [vmem:[%s1158_s11 + $0x20] sm:$0xff]   ;;  %v1024_v22 = vld [vmem:[%s1158_s11 + $0x98] sm:$0xff]   ;;  %v1027_v25 = vld [vmem:[%s1158_s11 + $0x90] sm:$0xff]  }
  0x2b   : > { %949 = vmatprep.subr.bf16.mxu1 %v1015_v14  ;;  %v1021_v20 = vld [vmem:[%s1158_s11 + $0xa0] sm:$0xff]   ;;  %v1023_v23 = vld [vmem:[%s1158_s11 + $0x18] sm:$0xff]   ;;  %v1026_v26 = vld [vmem:[%s1158_s11 + $0x10] sm:$0xff]  }
  0x2c   : > { %912 = vmatpush3.bf16.msra.mxu0 %v1014_v13  ;;  %v1028_v27 = vld [vmem:[%s1158_s11 + $0x48] sm:$0xff]   ;;  %v1031_v30 = vld [vmem:[%s1158_s11 + $0x40] sm:$0xff]   ;;  %v347_v44 = vld [vmem:[#allocation2 + $0x10] sm:$0xff] }
  0x2d   : > { %913 = vmatprep.subr.bf16.mxu0 %v1016_v15  ;;  %v1029_v28 = vld [vmem:[%s1158_s11 + $0x8] sm:$0xff]   ;;  %v1033_v31 = vld [vmem:[%s1158_s11 + $0x80] sm:$0xff]   ;;  %v349_v58 = vld [vmem:[#allocation2 + $0x18] sm:$0xff] }
  0x2e   : > { %950 = vmatpush3.bf16.msra.mxu1 %v1015_v14  ;;  %v1030_v29 = vld [vmem:[%s1158_s11 + $0x88] sm:$0xff]   ;;  %v1036_v32 = vld [vmem:[%s1160_s12 + $0x4] ss:$12 sps:$4 sm:$0xff]  }
  0x2f   : > { %951 = vmatprep.subr.bf16.mxu1 %v1018_v17  ;;  %v1037_v33 = vld [vmem:[%s1160_s12 + $0x8] ss:$12 sps:$4 sm:$0xff]   ;;  %615 = vmatprep.mubr.bf16.mxu0 %v1036_v32  ;;  %v1034_v35 = vld [vmem:[%s1160_s12] ss:$12 sps:$4 sm:$0xff]   ;;  %v1041_v38 = vld [vmem:[%s1160_s12 + $0x18] ss:$12 sps:$4 sm:$0xff]  }
  0x30   : > { %914 = vmatpush3.bf16.msra.mxu0 %v1017_v16  ;;  %v1032_v34 = vld [vmem:[%s1158_s11] sm:$0xff]   ;;  %963 = vmatprep.mubr.bf16.mxu1 %v1037_v33  ;;  %v1039_v36 = vld [vmem:[%s1160_s12 + $0x1c] ss:$12 sps:$4 sm:$0xff]  }
  0x31   : > { %915 = vmatprep.subr.bf16.mxu0 %v1019_v18  ;;  %v1038_v37 = vld [vmem:[%s1160_s12 + $0x20] ss:$12 sps:$4 sm:$0xff]  }
  0x32   : > { %952 = vmatpush3.bf16.msra.mxu1 %v1018_v17  ;;  %v348_v52 = vld [vmem:[#allocation2] sm:$0xff]  ;;  %v350_v0 = vld [vmem:[#allocation2 + $0x8] sm:$0xff] }
  0x33   : > { %953 = vmatprep.subr.bf16.mxu1 %v1021_v20 }
  0x34   : > { %916 = vmatpush3.bf16.msra.mxu0 %v1020_v19 }
  0x35   : > { %917 = vmatprep.subr.bf16.mxu0 %v1022_v21 }
  0x36   : > { %954 = vmatpush3.bf16.msra.mxu1 %v1021_v20 }
  0x37   : > { %955 = vmatprep.subr.bf16.mxu1 %v1024_v22 }
  0x38   : > { %918 = vmatpush3.bf16.msra.mxu0 %v1023_v23 }
  0x39   : > { %919 = vmatprep.subr.bf16.mxu0 %v1025_v24 }
  0x3a   : > { %956 = vmatpush3.bf16.msra.mxu1 %v1024_v22 }
  0x3b   : > { %957 = vmatprep.subr.bf16.mxu1 %v1027_v25 }
  0x3c   : > { %920 = vmatpush3.bf16.msra.mxu0 %v1026_v26 }
  0x3d   : > { %921 = vmatprep.subr.bf16.mxu0 %v1028_v27 }
  0x3e   : > { %958 = vmatpush3.bf16.msra.mxu1 %v1027_v25 }
  0x3f   : > { %959 = vmatprep.subr.bf16.mxu1 %v1030_v29 }
  0x40   : > { %922 = vmatpush3.bf16.msra.mxu0 %v1029_v28 }
  0x41   : > { %923 = vmatprep.subr.bf16.mxu0 %v1031_v30 }
  0x42   : > { %960 = vmatpush3.bf16.msra.mxu1 %v1030_v29 }
  0x43   : > { %961 = vmatprep.subr.bf16.mxu1 %v1033_v31 }
  0x44   : > { %924 = vmatpush3.bf16.msra.mxu0 %v1032_v34 }
  0x46   : > { %962 = vmatpush3.bf16.msra.mxu1 %v1033_v31 }
  0x47   : > { %616 = vmatmul.mubr.bf16.vlgmr.msra.gmra.mxu0 %v1034_v35 }
  0x48   : > { %623 = vmatprep.mubr.bf16.mxu0 %v1039_v36 }
  0x49   : > { %964 = vmatmul.mubr.bf16.vlgmr.msra.gmra.mxu1 %v1038_v37 }
  0x4f   : > { %624 = vmatmul.mubr.bf16.gmra.mxu0 %v1041_v38 }
 0x107   : > { %v925_v39 = vpop.f32.mrf.mxu0 }
 0x109   : > { %v926_v40 = vpop.f32.mrf.mxu0  ;;  %v965_v41 = vpop.f32.mrf.mxu1 }
 0x10a   : > { %v927_v42 = vadd.f32 %v926_v40, %v925_v39 }
 0x10b   : > { %v928_v43 = vpop.f32.mrf.mxu0  ;;  %v666_v45 = vpop.f32.mrf.mxu1 }
 0x10c   : > { %v667_v46 = vadd.f32 %v927_v42, %v666_v45 }
 0x10d   : > { %v929_v47 = vpop.f32.mrf.mxu0  ;;  %v966_v48 = vpop.f32.mrf.mxu1 }
 0x10e   : > { %v681_v49 = vadd.f32 %v667_v46, %v347_v44  ;;  %v930_v50 = vadd.f32 %v929_v47, %v928_v43 }
 0x10f   : > { %v931_v51 = vpop.f32.mrf.mxu0  ;;  %v669_v53 = vpop.f32.mrf.mxu1 }
 0x110   : > { %685 = vst [vmem:[#allocation2 + $0x10] sm:$0xff] %v681_v49  ;;  %v670_v54 = vadd.f32 %v930_v50, %v669_v53 }
 0x111   : > { %v932_v55 = vpop.f32.mrf.mxu0 }
 0x112   : > { %v682_v56 = vadd.f32 %v670_v54, %v348_v52  ;;  %v933_v57 = vadd.f32 %v932_v55, %v931_v51 }
 0x113   : > { %v934_v59 = vpop.f32.mrf.mxu0 }
 0x114   : > { %686 = vst [vmem:[#allocation2] sm:$0xff] %v682_v56  ;;  %v675_v60 = vadd.f32 %v965_v41, %v933_v57 }
 0x115   : > { %v935_v61 = vpop.f32.mrf.mxu0 }
 0x116   : > { %v683_v62 = vadd.f32 %v675_v60, %v349_v58  ;;  %v936_v63 = vadd.f32 %v935_v61, %v934_v59 }
 0x118   : > { %687 = vst [vmem:[#allocation2 + $0x18] sm:$0xff] %v683_v62  ;;  %v678_v1 = vadd.f32 %v966_v48, %v936_v63  ;;  %692 = sbr.rel (%p901_p11) target bundleno = 299 (0x12b), region = 70 }
 0x11a   : > { %v684_v2 = vadd.f32 %v678_v1, %v350_v0 }
 0x11c   : > { %688 = vst [vmem:[#allocation2 + $0x8] sm:$0xff] %v684_v2 }
 0x11d   : > { %v693_v3 = vld [vmem:[#allocation2 + $0x10] sm:$0xff]  ;;  %v902_v4 = vld [vmem:[%s1229_s2] ss:$0 sm:$0xff] }
 0x11e   : > { %v903_v5 = vld [vmem:[%s1230_s3] ss:$0 sm:$0xff]  ;;  %v704_v6 = vmul.f32 %v902_v4, %v693_v3 }
 0x11f   : > { %v694_v7 = vld [vmem:[#allocation2] sm:$0xff]  ;;  %v695_v8 = vld [vmem:[#allocation2 + $0x18] sm:$0xff] }
 0x120   : > { %v705_v10 = vmul.f32 %v902_v4, %v694_v7  ;;  %v706_v11 = vmul.f32 %v902_v4, %v695_v8  ;;  %v715_v13 = vadd.f32 %v903_v5, %v704_v6 }
 0x122   : > { %v716_v14 = vadd.f32 %v903_v5, %v705_v10  ;;  %v717_v15 = vadd.f32 %v903_v5, %v706_v11  ;;  %v719_v17 = vmax.f32 %v715_v13, 0.0 }
 0x123   : > { %v696_v9 = vld [vmem:[#allocation2 + $0x8] sm:$0xff] }
 0x124   : > { %v707_v12 = vmul.f32 %v902_v4, %v696_v9  ;;  %v720_v18 = vmax.f32 %v716_v14, 0.0  ;;  %v721_v19 = vmax.f32 %v717_v15, 0.0  ;;  %723 = vst [vmem:[%s1231_s4] sm:$0xff] %v719_v17 }
 0x126   : > { %v718_v16 = vadd.f32 %v903_v5, %v707_v12  ;;  %724 = vst [vmem:[%s1231_s4 + $0x8] sm:$0xff] %v720_v18  ;;  %725 = vst [vmem:[%s1231_s4 + $0x10] sm:$0xff] %v721_v19 }
 0x128   : > { %v722_v20 = vmax.f32 %v718_v16, 0.0 }
 0x12a   : > { %726 = vst [vmem:[%s1231_s4 + $0x18] sm:$0xff] %v722_v20 }
 0x12b PF: > { %s14_s19 = sadd.s32 1, %s1080_s19   ;;  %s1232_s15 = smov %s1068_s16 }
 0x12c   : > { %p11_p12 = scmp.ge.s32.totalorder %s14_s19, 5   ;;  %s1233_s16 = smov %s1143_s23 }
 0x12d   : > { %s1234_s17 = smov %s1076_s18  ;;  %s1235_s18 = smov %s1237_s20 }
 0x12e   :  { %13 = sbr.rel (!%p11_p12) target bundleno = 3 (0x3), region = 120 }

// kernel: _lambda_.27
= control target key start
LH: loop header
LB: loop body
LE: loop exit
PB: predicated region body
PF: predicated region fallthrough
CT: control target
= control target key end

     0   :  { %s329_s1 = inlined_call_operand.vmem [shape: bf16[128,128], index: 1, kind: input, shape index: {}]   ;;  %s330_s0 = inlined_call_operand.vmem [shape: bf16[32,128], index: 0, kind: input, shape index: {}]   ;;  %s331_s2 = inlined_call_operand.vmem [shape: f32[1,128], index: 2, kind: input, shape index: {}]   ;;  %s332_s3 = inlined_call_operand.vmem [shape: f32[1,128], index: 3, kind: input, shape index: {}]   ;;  %s333_s4 = inlined_call_operand.vmem [shape: f32[32,128], index: 4, kind: output, shape index: {}]  }
   0x1   :  { %v246_v0 = vld [vmem:[%s329_s1 + $0x38] sm:$0xff]   ;;  %v247_v1 = vld [vmem:[%s329_s1 + $0x30] sm:$0xff]   ;;  %v248_v2 = vld [vmem:[%s329_s1 + $0x28] sm:$0xff]  }
   0x2   :  { %226 = vmatprep.subr.bf16.mxu0 %v246_v0  ;;  %v249_v3 = vld [vmem:[%s329_s1 + $0x20] sm:$0xff]   ;;  %v250_v5 = vld [vmem:[%s329_s1 + $0x18] sm:$0xff]   ;;  %v251_v6 = vld [vmem:[%s329_s1 + $0x10] sm:$0xff]  }
   0x3   :  { %227 = vmatpush3.bf16.msra.mxu0 %v246_v0  ;;  %v254_v4 = vld [vmem:[%s330_s0] sm:$0xff]   ;;  %v252_v7 = vld [vmem:[%s329_s1 + $0x8] sm:$0xff]  }
   0x4   :  { %228 = vmatprep.subr.bf16.mxu0 %v247_v1  ;;  %242 = vmatprep.mubr.bf16.mxu0 %v254_v4  ;;  %v253_v8 = vld [vmem:[%s329_s1] sm:$0xff]   ;;  %v255_v9 = vld [vmem:[%s330_s0 + $0x8] sm:$0xff]  }
   0x5   :  { %v214_v10 = vld [vmem:[%s331_s2] ss:$0 sm:$0xff] }
   0x6   :  { %v215_v12 = vld [vmem:[%s332_s3] ss:$0 sm:$0xff] }
   0x7   :  { %229 = vmatpush3.bf16.msra.mxu0 %v247_v1 }
   0x8   :  { %230 = vmatprep.subr.bf16.mxu0 %v248_v2 }
   0xb   :  { %231 = vmatpush3.bf16.msra.mxu0 %v248_v2 }
   0xc   :  { %232 = vmatprep.subr.bf16.mxu0 %v249_v3 }
   0xf   :  { %233 = vmatpush3.bf16.msra.mxu0 %v249_v3 }
  0x10   :  { %234 = vmatprep.subr.bf16.mxu0 %v250_v5 }
  0x13   :  { %235 = vmatpush3.bf16.msra.mxu0 %v250_v5 }
  0x14   :  { %236 = vmatprep.subr.bf16.mxu0 %v251_v6 }
  0x17   :  { %237 = vmatpush3.bf16.msra.mxu0 %v251_v6 }
  0x18   :  { %238 = vmatprep.subr.bf16.mxu0 %v252_v7 }
  0x1b   :  { %239 = vmatpush3.bf16.msra.mxu0 %v252_v7 }
  0x1c   :  { %240 = vmatprep.subr.bf16.mxu0 %v253_v8 }
  0x1f   :  { %241 = vmatpush3.bf16.msra.mxu0 %v253_v8 }
  0x22   :  { %243 = vmatmul.mubr.bf16.vlgmr.msra.gmra.mxu0 %v255_v9 }
  0xe2   :  { %v244_v11 = vpop.f32.mrf.mxu0 }
  0xe3   :  { %v183_v13 = vmul.f32 %v244_v11, %v214_v10 }
  0xe4   :  { %v144_v14 = vpop.f32.mrf.mxu0 }
  0xe5   :  { %v194_v15 = vadd.f32 %v215_v12, %v183_v13  ;;  %v181_v16 = vmul.f32 %v214_v10, %v144_v14 }
  0xe6   :  { %v245_v17 = vpop.f32.mrf.mxu0 }
  0xe7   :  { %198 = vst [vmem:[%s333_s4 + $0x10] sm:$0xff] %v194_v15  ;;  %v192_v18 = vadd.f32 %v215_v12, %v181_v16  ;;  %v184_v19 = vmul.f32 %v245_v17, %v214_v10 }
  0xe8   :  { %v147_v20 = vpop.f32.mrf.mxu0 }
  0xe9   :  { %196 = vst [vmem:[%s333_s4] sm:$0xff] %v192_v18  ;;  %v195_v21 = vadd.f32 %v215_v12, %v184_v19  ;;  %v182_v22 = vmul.f32 %v214_v10, %v147_v20 }
  0xeb   :  { %199 = vst [vmem:[%s333_s4 + $0x18] sm:$0xff] %v195_v21  ;;  %v193_v23 = vadd.f32 %v215_v12, %v182_v22 }
  0xed   :  { %197 = vst [vmem:[%s333_s4 + $0x8] sm:$0xff] %v193_v23 }

// kernel: _lambda_.28
= control target key start
LH: loop header
LB: loop body
LE: loop exit
PB: predicated region body
PF: predicated region fallthrough
CT: control target
= control target key end

     0   :  { %s1200_s18 = smov 0   ;;  %s1202_s19 = smov 0   ;;  %s1331_s0 = inlined_call_operand.vmem [shape: bf16[32,1152], index: 0, kind: input, shape index: {}]   ;;  %s1332_s1 = inlined_call_operand.vmem [shape: bf16[1152,128], index: 1, kind: input, shape index: {}]   ;;  %s1333_s2 = inlined_call_operand.vmem [shape: f32[1,128], index: 2, kind: input, shape index: {}]   ;;  %s1334_s3 = inlined_call_operand.vmem [shape: f32[1,128], index: 3, kind: input, shape index: {}]   ;;  %s1335_s4 = inlined_call_operand.vmem [shape: f32[32,128], index: 4, kind: input, shape index: {}]   ;;  %s1336_s5 = inlined_call_operand.vmem [shape: f32[32,128], index: 5, kind: output, shape index: {}]  }
   0x1   :  { %s1204_s20 = smov 0   ;;  %s1206_s21 = smov 0  }
   0x2   :  { %s1208_s22 = smov 0  }
   0x3 LB: > { %s27_s23 = sadd.s32 1, %s1163_s21  ;;  %p50_p1 = scmp.ne.s32.totalorder %s1155_s19, %s1151_s18  ;;  %s1167_s22 = sphi %s1208_s22, %s15_s22   ;;  %s1163_s21 = sphi %s1206_s21, %s1340_s21   ;;  %s1159_s20 = sphi %s1204_s20, %s1339_s20   ;;  %s1155_s19 = sphi %s1202_s19, %s1338_s19   ;;  %s1151_s18 = sphi %s1200_s18, %s1337_s18  }
   0x4   : > { %p28_p0 = scmp.ge.s32.totalorder %s27_s23, 3  ;;  %p51_p2 = scmp.eq.s32.totalorder %s1167_s22, 0 }
   0x5   : > { %s43_s25 = sadd.s32 1, %s1155_s19  ;;  %p945_p5 = scmp.ge.s32.totalorder %s1167_s22, 3 }
   0x6   : > { %s1342_s23 = smov (%p28_p0, %s27_s23), 0  ;;  %p52_p3 = por %p51_p2, %p50_p1 }
   0x7   : > { %s39_s24 = ssub.s32 %s1163_s21, %s1342_s23  ;;  %236 = sbr.rel (%p945_p5) target bundleno = 21 (0x15), region = 28 }
   0x8   : > { %p41_p4 = scmp.eq.s32.totalorder %s39_s24, 0 }
   0xa   : > { %s1235_s26 = scalar_select %p41_p4, %s1155_s19, %s43_s25  }
   0xc   : > { %239 = sbr.rel (!%p52_p3) target bundleno = 21 (0x15), region = 32  ;;  %s241_s27 = sand.u32 (%p52_p3), 1, %s1155_s19  }
   0xd   : > { %s995_s28 = smul.u32 (%p52_p3), 12, %s1163_s21 }
   0xe   : > { %s1054_s29 = smul.u32 (%p52_p3), 48, %s241_s27 }
   0xf   : > { %s249_s7 = scalar_lea.vmem (%p52_p3), %s1331_s0, %s995_s28 }
  0x10   : > { %v264_v0 = vld [vmem:[%s249_s7] sm:$0xff] (%p52_p3)  ;;  %v268_v2 = vld [vmem:[%s249_s7 + $0x48] sm:$0xff] (%p52_p3)  ;;  %s243_s8 = scalar_lea.vmem (%p52_p3), [#allocation3], %s1054_s29  ;;  %v951_v6 = vld [vmem:[%s249_s7 + $0x50] sm:$0xf] (%p52_p3) }
  0x11   : > { %v266_v1 = vld [vmem:[%s249_s7 + $0x24] sm:$0xff]  ;;  %265 = vst [vmem:[%s243_s8] sm:$0xff] %v264_v0  ;;  %269 = vst [vmem:[%s243_s8 + $0x18] sm:$0xff] %v268_v2  ;;  %v270_v3 = vld [vmem:[%s249_s7 + $0x6c] sm:$0xff] }
  0x12   : > { %267 = vst [vmem:[%s243_s8 + $0xc] sm:$0xff] %v266_v1  ;;  %v947_v4 = vld [vmem:[%s249_s7 + $0x8] sm:$0xf]  ;;  %v949_v5 = vld [vmem:[%s249_s7 + $0x2c] sm:$0xf]  ;;  %271 = vst [vmem:[%s243_s8 + $0x24] sm:$0xff] %v270_v3 }
  0x13   : > { %948 = vst [vmem:[%s243_s8 + $0x8] sm:$0xf] %v947_v4  ;;  %950 = vst [vmem:[%s243_s8 + $0x14] sm:$0xf] %v949_v5  ;;  %v953_v7 = vld [vmem:[%s249_s7 + $0x74] sm:$0xf] }
  0x14   : > { %952 = vst [vmem:[%s243_s8 + $0x20] sm:$0xf] %v951_v6  ;;  %954 = vst [vmem:[%s243_s8 + $0x2c] sm:$0xf] %v953_v7 }
  0x15 PF: > { %p955_p6 = scmp.ge.s32.totalorder %s1167_s22, 1  ;;  %p304_p7 = scmp.lt.s32.totalorder %s1167_s22, 4 }
  0x17   : > { %p305_p8 = pnand %p955_p6, %p304_p7 }
  0x18   : > { %s311_s9 = sand.u32 (!%p305_p8), 1, %s1151_s18   ;;  %s365_s10 = smul.u32 (!%p305_p8), 48, %s1159_s20 }
  0x19   : > { %308 = sbr.rel (%p305_p8) target bundleno = 301 (0x12d), region = 62  ;;  %p957_p10 = scmp.ne.s32.totalorder (!%p305_p8), %s1159_s20, 0 }
  0x1a   : > { %s1055_s11 = smul.u32 (!%p305_p8), 48, %s311_s9  ;;  %p366_p9 = scmp.lt.s32.totalorder (!%p305_p8), %s365_s10, 143 }
  0x1c   : > { %s1252_s16 = scalar_lea.vmem (!%p305_p8), [#allocation3], %s1055_s11 }
  0x1e   : > { %s1344_s10 = smov (!%p366_p9, %s365_s10), 143  ;;  %402 = sbr.rel (%p957_p10) target bundleno = 38 (0x26), region = 70 }
  0x1f   : > { %s956_s12 = sshll.u32 %s1344_s10, 2 }
  0x20   : > { %s1250_s15 = scalar_lea.vmem %s1332_s1, %s956_s12 }
  0x23   : > { %v1169_v8 = vmov 0.0  }
  0x24   : > { %403 = vst [vmem:[#allocation2 + $0x10] sm:$0xff] %v1169_v8  ;;  %404 = vst [vmem:[#allocation2] sm:$0xff] %v1169_v8 }
  0x25   : > { %405 = vst [vmem:[#allocation2 + $0x18] sm:$0xff] %v1169_v8  ;;  %406 = vst [vmem:[#allocation2 + $0x8] sm:$0xff] %v1169_v8 }
  0x26 PF: > { %v1097_v9 = vld [vmem:[%s1250_s15 + $0x78] sm:$0xff]   ;;  %v1100_v12 = vld [vmem:[%s1250_s15 + $0x70] sm:$0xff]   ;;  %v1103_v15 = vld [vmem:[%s1250_s15 + $0x68] sm:$0xff]   ;;  %p988_p11 = scmp.ne.s32.totalorder %s1159_s20, 2 }
  0x27   : > { %v1098_v10 = vld [vmem:[%s1250_s15 + $0x38] sm:$0xff]   ;;  %996 = vmatprep.subr.bf16.mxu0 %v1097_v9  ;;  %v1101_v13 = vld [vmem:[%s1250_s15 + $0x30] sm:$0xff]   ;;  %v1104_v16 = vld [vmem:[%s1250_s15 + $0x28] sm:$0xff]  }
  0x28   : > { %v1099_v11 = vld [vmem:[%s1250_s15 + $0xb8] sm:$0xff]   ;;  %997 = vmatpush3.bf16.msra.mxu0 %v1098_v10  ;;  %v1102_v14 = vld [vmem:[%s1250_s15 + $0xb0] sm:$0xff]   ;;  %v1105_v17 = vld [vmem:[%s1250_s15 + $0xa8] sm:$0xff]  }
  0x29   : > { %1034 = vmatprep.subr.bf16.mxu1 %v1099_v11  ;;  %998 = vmatprep.subr.bf16.mxu0 %v1100_v12  ;;  %v1106_v18 = vld [vmem:[%s1250_s15 + $0x60] sm:$0xff]   ;;  %v1109_v21 = vld [vmem:[%s1250_s15 + $0x58] sm:$0xff]   ;;  %v1112_v24 = vld [vmem:[%s1250_s15 + $0x50] sm:$0xff]  }
  0x2a   : > { %1035 = vmatpush3.bf16.msra.mxu1 %v1099_v11  ;;  %v1107_v19 = vld [vmem:[%s1250_s15 + $0x20] sm:$0xff]   ;;  %v1111_v22 = vld [vmem:[%s1250_s15 + $0x98] sm:$0xff]   ;;  %v1114_v25 = vld [vmem:[%s1250_s15 + $0x90] sm:$0xff]  }
  0x2b   : > { %1036 = vmatprep.subr.bf16.mxu1 %v1102_v14  ;;  %v1108_v20 = vld [vmem:[%s1250_s15 + $0xa0] sm:$0xff]   ;;  %v1110_v23 = vld [vmem:[%s1250_s15 + $0x18] sm:$0xff]   ;;  %v1113_v26 = vld [vmem:[%s1250_s15 + $0x10] sm:$0xff]  }
  0x2c   : > { %999 = vmatpush3.bf16.msra.mxu0 %v1101_v13  ;;  %v1115_v27 = vld [vmem:[%s1250_s15 + $0x48] sm:$0xff]   ;;  %v1118_v30 = vld [vmem:[%s1250_s15 + $0x40] sm:$0xff]   ;;  %v407_v44 = vld [vmem:[#allocation2 + $0x10] sm:$0xff] }
  0x2d   : > { %1000 = vmatprep.subr.bf16.mxu0 %v1103_v15  ;;  %v1116_v28 = vld [vmem:[%s1250_s15 + $0x8] sm:$0xff]   ;;  %v1120_v31 = vld [vmem:[%s1250_s15 + $0x80] sm:$0xff]   ;;  %v409_v58 = vld [vmem:[#allocation2 + $0x18] sm:$0xff] }
  0x2e   : > { %1037 = vmatpush3.bf16.msra.mxu1 %v1102_v14  ;;  %v1117_v29 = vld [vmem:[%s1250_s15 + $0x88] sm:$0xff]   ;;  %v1123_v32 = vld [vmem:[%s1252_s16 + $0x4] ss:$12 sps:$4 sm:$0xff]  }
  0x2f   : > { %1038 = vmatprep.subr.bf16.mxu1 %v1105_v17  ;;  %v1124_v33 = vld [vmem:[%s1252_s16 + $0x8] ss:$12 sps:$4 sm:$0xff]   ;;  %675 = vmatprep.mubr.bf16.mxu0 %v1123_v32  ;;  %v1121_v35 = vld [vmem:[%s1252_s16] ss:$12 sps:$4 sm:$0xff]   ;;  %v1128_v38 = vld [vmem:[%s1252_s16 + $0x18] ss:$12 sps:$4 sm:$0xff]  }
  0x30   : > { %1001 = vmatpush3.bf16.msra.mxu0 %v1104_v16  ;;  %v1119_v34 = vld [vmem:[%s1250_s15] sm:$0xff]   ;;  %1050 = vmatprep.mubr.bf16.mxu1 %v1124_v33  ;;  %v1126_v36 = vld [vmem:[%s1252_s16 + $0x1c] ss:$12 sps:$4 sm:$0xff]  }
  0x31   : > { %1002 = vmatprep.subr.bf16.mxu0 %v1106_v18  ;;  %v1125_v37 = vld [vmem:[%s1252_s16 + $0x20] ss:$12 sps:$4 sm:$0xff]  }
  0x32   : > { %1039 = vmatpush3.bf16.msra.mxu1 %v1105_v17  ;;  %v408_v52 = vld [vmem:[#allocation2] sm:$0xff]  ;;  %v410_v0 = vld [vmem:[#allocation2 + $0x8] sm:$0xff] }
  0x33   : > { %1040 = vmatprep.subr.bf16.mxu1 %v1108_v20 }
  0x34   : > { %1003 = vmatpush3.bf16.msra.mxu0 %v1107_v19 }
  0x35   : > { %1004 = vmatprep.subr.bf16.mxu0 %v1109_v21 }
  0x36   : > { %1041 = vmatpush3.bf16.msra.mxu1 %v1108_v20 }
  0x37   : > { %1042 = vmatprep.subr.bf16.mxu1 %v1111_v22 }
  0x38   : > { %1005 = vmatpush3.bf16.msra.mxu0 %v1110_v23 }
  0x39   : > { %1006 = vmatprep.subr.bf16.mxu0 %v1112_v24 }
  0x3a   : > { %1043 = vmatpush3.bf16.msra.mxu1 %v1111_v22 }
  0x3b   : > { %1044 = vmatprep.subr.bf16.mxu1 %v1114_v25 }
  0x3c   : > { %1007 = vmatpush3.bf16.msra.mxu0 %v1113_v26 }
  0x3d   : > { %1008 = vmatprep.subr.bf16.mxu0 %v1115_v27 }
  0x3e   : > { %1045 = vmatpush3.bf16.msra.mxu1 %v1114_v25 }
  0x3f   : > { %1046 = vmatprep.subr.bf16.mxu1 %v1117_v29 }
  0x40   : > { %1009 = vmatpush3.bf16.msra.mxu0 %v1116_v28 }
  0x41   : > { %1010 = vmatprep.subr.bf16.mxu0 %v1118_v30 }
  0x42   : > { %1047 = vmatpush3.bf16.msra.mxu1 %v1117_v29 }
  0x43   : > { %1048 = vmatprep.subr.bf16.mxu1 %v1120_v31 }
  0x44   : > { %1011 = vmatpush3.bf16.msra.mxu0 %v1119_v34 }
  0x46   : > { %1049 = vmatpush3.bf16.msra.mxu1 %v1120_v31 }
  0x47   : > { %676 = vmatmul.mubr.bf16.vlgmr.msra.gmra.mxu0 %v1121_v35 }
  0x48   : > { %683 = vmatprep.mubr.bf16.mxu0 %v1126_v36 }
  0x49   : > { %1051 = vmatmul.mubr.bf16.vlgmr.msra.gmra.mxu1 %v1125_v37 }
  0x4f   : > { %684 = vmatmul.mubr.bf16.gmra.mxu0 %v1128_v38 }
 0x107   : > { %v1012_v39 = vpop.f32.mrf.mxu0 }
 0x109   : > { %v1013_v40 = vpop.f32.mrf.mxu0  ;;  %v1052_v41 = vpop.f32.mrf.mxu1 }
 0x10a   : > { %v1014_v42 = vadd.f32 %v1013_v40, %v1012_v39 }
 0x10b   : > { %v1015_v43 = vpop.f32.mrf.mxu0  ;;  %v726_v45 = vpop.f32.mrf.mxu1 }
 0x10c   : > { %v727_v46 = vadd.f32 %v1014_v42, %v726_v45 }
 0x10d   : > { %v1016_v47 = vpop.f32.mrf.mxu0  ;;  %v1053_v48 = vpop.f32.mrf.mxu1 }
 0x10e   : > { %v741_v49 = vadd.f32 %v727_v46, %v407_v44  ;;  %v1017_v50 = vadd.f32 %v1016_v47, %v1015_v43 }
 0x10f   : > { %v1018_v51 = vpop.f32.mrf.mxu0  ;;  %v729_v53 = vpop.f32.mrf.mxu1 }
 0x110   : > { %745 = vst [vmem:[#allocation2 + $0x10] sm:$0xff] %v741_v49  ;;  %v730_v54 = vadd.f32 %v1017_v50, %v729_v53 }
 0x111   : > { %v1019_v55 = vpop.f32.mrf.mxu0 }
 0x112   : > { %v742_v56 = vadd.f32 %v730_v54, %v408_v52  ;;  %v1020_v57 = vadd.f32 %v1019_v55, %v1018_v51 }
 0x113   : > { %v1021_v59 = vpop.f32.mrf.mxu0 }
 0x114   : > { %746 = vst [vmem:[#allocation2] sm:$0xff] %v742_v56  ;;  %v735_v60 = vadd.f32 %v1052_v41, %v1020_v57 }
 0x115   : > { %v1022_v61 = vpop.f32.mrf.mxu0 }
 0x116   : > { %v743_v62 = vadd.f32 %v735_v60, %v409_v58  ;;  %v1023_v63 = vadd.f32 %v1022_v61, %v1021_v59 }
 0x118   : > { %747 = vst [vmem:[#allocation2 + $0x18] sm:$0xff] %v743_v62  ;;  %v738_v1 = vadd.f32 %v1053_v48, %v1023_v63  ;;  %752 = sbr.rel (%p988_p11) target bundleno = 301 (0x12d), region = 74 }
 0x11a   : > { %v744_v2 = vadd.f32 %v738_v1, %v410_v0 }
 0x11c   : > { %748 = vst [vmem:[#allocation2 + $0x8] sm:$0xff] %v744_v2 }
 0x11d   : > { %v753_v3 = vld [vmem:[#allocation2 + $0x10] sm:$0xff]  ;;  %v989_v4 = vld [vmem:[%s1333_s2] ss:$0 sm:$0xff]  ;;  %v780_v13 = vld [vmem:[%s1335_s4 + $0x8] sm:$0xff] }
 0x11e   : > { %v990_v5 = vld [vmem:[%s1334_s3] ss:$0 sm:$0xff]  ;;  %v764_v6 = vmul.f32 %v989_v4, %v753_v3  ;;  %v781_v17 = vld [vmem:[%s1335_s4 + $0x10] sm:$0xff]  ;;  %v782_v18 = vld [vmem:[%s1335_s4 + $0x18] sm:$0xff] }
 0x11f   : > { %v754_v7 = vld [vmem:[#allocation2] sm:$0xff]  ;;  %v755_v10 = vld [vmem:[#allocation2 + $0x18] sm:$0xff] }
 0x120   : > { %v779_v8 = vld [vmem:[%s1335_s4] sm:$0xff]  ;;  %v765_v9 = vmul.f32 %v989_v4, %v754_v7  ;;  %v775_v12 = vadd.f32 %v990_v5, %v764_v6  ;;  %v766_v14 = vmul.f32 %v989_v4, %v755_v10 }
 0x122   : > { %v776_v16 = vadd.f32 %v990_v5, %v765_v9  ;;  %v783_v19 = vadd.f32 %v779_v8, %v775_v12  ;;  %v777_v20 = vadd.f32 %v990_v5, %v766_v14 }
 0x123   : > { %v756_v11 = vld [vmem:[#allocation2 + $0x8] sm:$0xff] }
 0x124   : > { %v767_v15 = vmul.f32 %v989_v4, %v756_v11  ;;  %v784_v22 = vadd.f32 %v780_v13, %v776_v16  ;;  %v787_v23 = vmax.f32 %v783_v19, 0.0  ;;  %v785_v24 = vadd.f32 %v781_v17, %v777_v20 }
 0x126   : > { %v778_v21 = vadd.f32 %v990_v5, %v767_v15  ;;  %v788_v26 = vmax.f32 %v784_v22, 0.0  ;;  %791 = vst [vmem:[%s1336_s5] sm:$0xff] %v787_v23  ;;  %v789_v27 = vmax.f32 %v785_v24, 0.0 }
 0x128   : > { %v786_v25 = vadd.f32 %v782_v18, %v778_v21  ;;  %792 = vst [vmem:[%s1336_s5 + $0x8] sm:$0xff] %v788_v26  ;;  %793 = vst [vmem:[%s1336_s5 + $0x10] sm:$0xff] %v789_v27 }
 0x12a   : > { %v790_v28 = vmax.f32 %v786_v25, 0.0 }
 0x12c   : > { %794 = vst [vmem:[%s1336_s5 + $0x18] sm:$0xff] %v790_v28 }
 0x12d PF: > { %s15_s22 = sadd.s32 1, %s1167_s22   ;;  %s1337_s18 = smov %s1155_s19 }
 0x12e   : > { %p12_p12 = scmp.ge.s32.totalorder %s15_s22, 5   ;;  %s1338_s19 = smov %s1235_s26 }
 0x12f   : > { %s1339_s20 = smov %s1163_s21  ;;  %s1340_s21 = smov %s1342_s23 }
 0x130   :  { %14 = sbr.rel (!%p12_p12) target bundleno = 3 (0x3), region = 127 }

// kernel: _lambda_.31
= control target key start
LH: loop header
LB: loop body
LE: loop exit
PB: predicated region body
PF: predicated region fallthrough
CT: control target
= control target key end

     0   :  { %s1105_s15 = smov 0   ;;  %s1107_s16 = smov 0   ;;  %s1210_s0 = inlined_call_operand.vmem [shape: bf16[8,1152], index: 0, kind: input, shape index: {}]   ;;  %s1211_s1 = inlined_call_operand.vmem [shape: bf16[1152,256], index: 1, kind: input, shape index: {}]   ;;  %s1212_s2 = inlined_call_operand.vmem [shape: f32[1,256], index: 2, kind: input, shape index: {}]   ;;  %s1213_s3 = inlined_call_operand.vmem [shape: f32[1,256], index: 3, kind: input, shape index: {}]   ;;  %s1214_s4 = inlined_call_operand.vmem [shape: f32[8,256], index: 4, kind: output, shape index: {}]  }
   0x1   :  { %s1109_s17 = smov 0  }
   0x2 LB: > { %s26_s18 = sadd.s32 1, %s1072_s16  ;;  %p891_p0 = scmp.ge.s32.totalorder %s1076_s17, 1  ;;  %s1076_s17 = sphi %s1109_s17, %s14_s17   ;;  %s1072_s16 = sphi %s1107_s16, %s1216_s16   ;;  %s1068_s15 = sphi %s1105_s15, %s1215_s15  }
   0x3   : > { %p27_p1 = scmp.ge.s32.totalorder %s26_s18, 3  ;;  %p229_p2 = scmp.lt.s32.totalorder %s1076_s17, 4 }
   0x5   : > { %s1218_s18 = smov (%p27_p1, %s26_s18), 0  ;;  %p230_p3 = pnand %p891_p0, %p229_p2 }
   0x6   : > { %s281_s19 = smul.u32 (!%p230_p3), 3, %s1068_s15  ;;  %p895_p6 = scmp.ne.s32.totalorder (!%p230_p3), %s1068_s15, 0 }
   0x7   : > { %233 = sbr.rel (%p230_p3) target bundleno = 302 (0x12e), region = 36 }
   0x8   : > { %s291_s20 = smul.u32 (!%p230_p3), 48, %s1068_s15  ;;  %p284_p4 = scmp.lt.s32.totalorder (!%p230_p3), %s281_s19, 8 }
   0xa   : > { %p293_p5 = scmp.lt.s32.totalorder (!%p230_p3), %s291_s20, 143 }
   0xc   : > { %s1220_s19 = smov (!%p284_p4, %s281_s19), 8  ;;  %s1222_s20 = smov (!%p293_p5, %s291_s20), 143 }
   0xd   : > { %s892_s21 = sshll.u32 %s1220_s19, 2  ;;  %s952_s25 = sshll.u32 %s1222_s20, 3 }
   0xe   : > { %s1130_s24 = scalar_lea.vmem %s1210_s0, %s892_s21  ;;  %s1135_s28 = scalar_lea.vmem %s1211_s1, %s952_s25 }
   0xf   : > { %327 = sbr.rel (%p895_p6) target bundleno = 22 (0x16), region = 40 }
  0x14   : > { %v1078_v0 = vmov 0.0  }
  0x15   : > { %328 = vst [vmem:[#allocation2] sm:$0xff] %v1078_v0  ;;  %329 = vst [vmem:[#allocation2 + $0x8] sm:$0xff] %v1078_v0 }
  0x16 PF: > { %v979_v1 = vld [vmem:[%s1135_s28 + $0x74] ss:$8 sps:$4 sm:$0xff]   ;;  %v981_v2 = vld [vmem:[%s1135_s28 + $0x70] ss:$8 sps:$4 sm:$0xff]   ;;  %v1079_v3 = vmov 0   ;;  %v332_v34 = vld [vmem:[%s1130_s24] sm:$0xff] }
  0x17   : > { %706 = vmatprep.mubr.bf16.mxu1 %v1079_v3  ;;  %633 = vmatprep.subr.bf16.mxu0 %v979_v1  ;;  %v982_v4 = vld [vmem:[%s1135_s28 + $0x64] ss:$8 sps:$4 sm:$0xff]   ;;  %v984_v5 = vld [vmem:[%s1135_s28 + $0x60] ss:$8 sps:$4 sm:$0xff]   ;;  %v985_v6 = vld [vmem:[%s1135_s28 + $0x54] ss:$8 sps:$4 sm:$0xff]   ;;  %v897_v36 = vcombine.high %v332_v34, %v332_v34  ;;  %v896_v53 = vcombine.low %v332_v34, %v332_v34 }
  0x18   : > { %634 = vmatpush1.bf16.msra.mxu0 %v981_v2  ;;  %v987_v7 = vld [vmem:[%s1135_s28 + $0x50] ss:$8 sps:$4 sm:$0xff]   ;;  %v988_v8 = vld [vmem:[%s1135_s28 + $0x44] ss:$8 sps:$4 sm:$0xff]   ;;  %v1000_v9 = vld [vmem:[%s1135_s28 + $0x174] ss:$8 sps:$4 sm:$0xff]  }
  0x19   : > { %635 = vmatprep.subr.bf16.mxu0 %v982_v4  ;;  %v1002_v10 = vld [vmem:[%s1135_s28 + $0x170] ss:$8 sps:$4 sm:$0xff]   ;;  %v990_v11 = vld [vmem:[%s1135_s28 + $0x40] ss:$8 sps:$4 sm:$0xff]   ;;  %v991_v12 = vld [vmem:[%s1135_s28 + $0x34] ss:$8 sps:$4 sm:$0xff]   ;;  %674 = vmatprep.subr.bf16.mxu1 %v1000_v9 }
  0x1a   : > { %v1006_v13 = vld [vmem:[%s1135_s28 + $0x164] ss:$8 sps:$4 sm:$0xff]   ;;  %675 = vmatpush1.bf16.msra.mxu1 %v1002_v10  ;;  %v1008_v14 = vld [vmem:[%s1135_s28 + $0x160] ss:$8 sps:$4 sm:$0xff]   ;;  %v993_v15 = vld [vmem:[%s1135_s28 + $0x30] ss:$8 sps:$4 sm:$0xff]   ;;  %665 = vmatprep.mubr.bf16.mxu0 %v897_v36 }
  0x1b   : > { %676 = vmatprep.subr.bf16.mxu1 %v1006_v13  ;;  %v1012_v16 = vld [vmem:[%s1135_s28 + $0x154] ss:$8 sps:$4 sm:$0xff]   ;;  %v994_v17 = vld [vmem:[%s1135_s28 + $0x24] ss:$8 sps:$4 sm:$0xff]   ;;  %v1014_v18 = vld [vmem:[%s1135_s28 + $0x150] ss:$8 sps:$4 sm:$0xff]  }
  0x1c   : > { %636 = vmatpush1.bf16.msra.mxu0 %v984_v5  ;;  %v1018_v19 = vld [vmem:[%s1135_s28 + $0x144] ss:$8 sps:$4 sm:$0xff]   ;;  %v996_v20 = vld [vmem:[%s1135_s28 + $0x20] ss:$8 sps:$4 sm:$0xff]   ;;  %v997_v21 = vld [vmem:[%s1135_s28 + $0x14] ss:$8 sps:$4 sm:$0xff]  }
  0x1d   : > { %637 = vmatprep.subr.bf16.mxu0 %v985_v6  ;;  %v1020_v22 = vld [vmem:[%s1135_s28 + $0x140] ss:$8 sps:$4 sm:$0xff]   ;;  %v1024_v23 = vld [vmem:[%s1135_s28 + $0x134] ss:$8 sps:$4 sm:$0xff]   ;;  %v999_v24 = vld [vmem:[%s1135_s28 + $0x10] ss:$8 sps:$4 sm:$0xff]  }
  0x1e   : > { %677 = vmatpush1.bf16.msra.mxu1 %v1008_v14  ;;  %v1003_v25 = vld [vmem:[%s1135_s28 + $0x4] ss:$8 sps:$4 sm:$0xff]   ;;  %v1026_v26 = vld [vmem:[%s1135_s28 + $0x130] ss:$8 sps:$4 sm:$0xff]   ;;  %v1005_v28 = vld [vmem:[%s1135_s28] ss:$8 sps:$4 sm:$0xff]  }
  0x1f   : > { %678 = vmatprep.subr.bf16.mxu1 %v1012_v16  ;;  %v1030_v27 = vld [vmem:[%s1135_s28 + $0x124] ss:$8 sps:$4 sm:$0xff]   ;;  %v1009_v29 = vld [vmem:[%s1135_s28 + $0xf4] ss:$8 sps:$4 sm:$0xff]   ;;  %v1032_v30 = vld [vmem:[%s1135_s28 + $0x120] ss:$8 sps:$4 sm:$0xff]  }
  0x20   : > { %638 = vmatpush1.bf16.msra.mxu0 %v987_v7  ;;  %v1036_v31 = vld [vmem:[%s1135_s28 + $0x114] ss:$8 sps:$4 sm:$0xff]   ;;  %v1011_v32 = vld [vmem:[%s1135_s28 + $0xf0] ss:$8 sps:$4 sm:$0xff]   ;;  %v1015_v33 = vld [vmem:[%s1135_s28 + $0xe4] ss:$8 sps:$4 sm:$0xff]  }
  0x21   : > { %639 = vmatprep.subr.bf16.mxu0 %v988_v8  ;;  %v1038_v35 = vld [vmem:[%s1135_s28 + $0x110] ss:$8 sps:$4 sm:$0xff]   ;;  %v1042_v37 = vld [vmem:[%s1135_s28 + $0x104] ss:$8 sps:$4 sm:$0xff]   ;;  %v1017_v38 = vld [vmem:[%s1135_s28 + $0xe0] ss:$8 sps:$4 sm:$0xff]  }
  0x22   : > { %679 = vmatpush1.bf16.msra.mxu1 %v1014_v18  ;;  %v1021_v39 = vld [vmem:[%s1135_s28 + $0xd4] ss:$8 sps:$4 sm:$0xff]   ;;  %v1044_v40 = vld [vmem:[%s1135_s28 + $0x100] ss:$8 sps:$4 sm:$0xff]   ;;  %v1023_v41 = vld [vmem:[%s1135_s28 + $0xd0] ss:$8 sps:$4 sm:$0xff]  }
  0x23   : > { %680 = vmatprep.subr.bf16.mxu1 %v1018_v19  ;;  %v1027_v42 = vld [vmem:[%s1135_s28 + $0xc4] ss:$8 sps:$4 sm:$0xff]   ;;  %v1048_v43 = vld [vmem:[%s1130_s24 + $0x8] ss:$0 sps:$4 sm:$0xff]   ;;  %v1033_v45 = vld [vmem:[%s1135_s28 + $0xb4] ss:$8 sps:$4 sm:$0xff]  }
  0x24   : > { %640 = vmatpush1.bf16.msra.mxu0 %v990_v11  ;;  %v1029_v44 = vld [vmem:[%s1135_s28 + $0xc0] ss:$8 sps:$4 sm:$0xff]   ;;  %v1035_v46 = vld [vmem:[%s1135_s28 + $0xb0] ss:$8 sps:$4 sm:$0xff]   ;;  %v1039_v47 = vld [vmem:[%s1135_s28 + $0xa4] ss:$8 sps:$4 sm:$0xff]  }
  0x25   : > { %641 = vmatprep.subr.bf16.mxu0 %v991_v12  ;;  %v1041_v48 = vld [vmem:[%s1135_s28 + $0xa0] ss:$8 sps:$4 sm:$0xff]   ;;  %v1045_v49 = vld [vmem:[%s1135_s28 + $0x94] ss:$8 sps:$4 sm:$0xff]   ;;  %v1047_v50 = vld [vmem:[%s1135_s28 + $0x90] ss:$8 sps:$4 sm:$0xff]  }
  0x26   : > { %681 = vmatpush1.bf16.msra.mxu1 %v1020_v22  ;;  %v1049_v51 = vld [vmem:[%s1135_s28 + $0x84] ss:$8 sps:$4 sm:$0xff]   ;;  %v1051_v52 = vld [vmem:[%s1135_s28 + $0x80] ss:$8 sps:$4 sm:$0xff]   ;;  %p947_p7 = scmp.ne.s32.totalorder %s1068_s15, 2 }
  0x27   : > { %682 = vmatprep.subr.bf16.mxu1 %v1024_v23  ;;  %v330_v58 = vld [vmem:[#allocation2] sm:$0xff]  ;;  %v331_v61 = vld [vmem:[#allocation2 + $0x8] sm:$0xff] }
  0x28   : > { %642 = vmatpush1.bf16.msra.mxu0 %v993_v15 }
  0x29   : > { %643 = vmatprep.subr.bf16.mxu0 %v994_v17 }
  0x2a   : > { %683 = vmatpush1.bf16.msra.mxu1 %v1026_v26 }
  0x2b   : > { %684 = vmatprep.subr.bf16.mxu1 %v1030_v27 }
  0x2c   : > { %644 = vmatpush1.bf16.msra.mxu0 %v996_v20 }
  0x2d   : > { %645 = vmatprep.subr.bf16.mxu0 %v997_v21 }
  0x2e   : > { %685 = vmatpush1.bf16.msra.mxu1 %v1032_v30 }
  0x2f   : > { %686 = vmatprep.subr.bf16.mxu1 %v1036_v31 }
  0x30   : > { %646 = vmatpush1.bf16.msra.mxu0 %v999_v24 }
  0x31   : > { %647 = vmatprep.subr.bf16.mxu0 %v1003_v25 }
  0x32   : > { %687 = vmatpush1.bf16.msra.mxu1 %v1038_v35 }
  0x33   : > { %688 = vmatprep.subr.bf16.mxu1 %v1042_v37 }
  0x34   : > { %648 = vmatpush1.bf16.msra.mxu0 %v1005_v28 }
  0x35   : > { %649 = vmatprep.subr.bf16.mxu0 %v1009_v29 }
  0x36   : > { %689 = vmatpush1.bf16.msra.mxu1 %v1044_v40 }
  0x38   : > { %650 = vmatpush2.bf16.msra.mxu0 %v1011_v32 }
  0x39   : > { %651 = vmatprep.subr.bf16.mxu0 %v1015_v33  ;;  %707 = vmatmul.mubr.bf16.vlgmr.msra.gmra.mxu1 %v1048_v43 }
  0x3c   : > { %652 = vmatpush2.bf16.msra.mxu0 %v1017_v38 }
  0x3d   : > { %653 = vmatprep.subr.bf16.mxu0 %v1021_v39 }
  0x40   : > { %654 = vmatpush2.bf16.msra.mxu0 %v1023_v41 }
  0x41   : > { %655 = vmatprep.subr.bf16.mxu0 %v1027_v42 }
  0x44   : > { %656 = vmatpush2.bf16.msra.mxu0 %v1029_v44 }
  0x45   : > { %657 = vmatprep.subr.bf16.mxu0 %v1033_v45 }
  0x48   : > { %658 = vmatpush2.bf16.msra.mxu0 %v1035_v46 }
  0x49   : > { %659 = vmatprep.subr.bf16.mxu0 %v1039_v47 }
  0x4c   : > { %660 = vmatpush2.bf16.msra.mxu0 %v1041_v48 }
  0x4d   : > { %661 = vmatprep.subr.bf16.mxu0 %v1045_v49 }
  0x50   : > { %662 = vmatpush2.bf16.msra.mxu0 %v1047_v50 }
  0x51   : > { %663 = vmatprep.subr.bf16.mxu0 %v1049_v51 }
  0x54   : > { %664 = vmatpush2.bf16.msra.mxu0 %v1051_v52 }
  0x57   : > { %666 = vmatmul.mubr.bf16.vlgmr.msra.gmra.mxu0 %v896_v53 }
  0xf9   : > { %v708_v54 = vpop.f32.mrf.mxu1 }
  0xfb   : > { %v710_v55 = vpop.f32.mrf.mxu1 }
  0xfd   : > { %v712_v56 = vpop.f32.mrf.mxu1 }
  0xff   : > { %v713_v57 = vpop.f32.mrf.mxu1 }
 0x117   : > { %v667_v59 = vpop.f32.mrf.mxu0 }
 0x118   : > { %v709_v60 = vadd.f32 %v708_v54, %v667_v59 }
 0x119   : > { %v669_v62 = vpop.f32.mrf.mxu0 }
 0x11a   : > { %v715_v63 = vadd.f32 %v709_v60, %v330_v58  ;;  %v711_v0 = vadd.f32 %v710_v55, %v669_v62  ;;  %722 = sbr.rel (%p947_p7) target bundleno = 302 (0x12e), region = 44 }
 0x11b   : > { %v671_v1 = vpop.f32.mrf.mxu0 }
 0x11c   : > { %717 = vst [vmem:[#allocation2] sm:$0xff] %v715_v63  ;;  %v716_v2 = vadd.f32 %v711_v0, %v331_v61 }
 0x11d   : > { %v672_v3 = vpop.f32.mrf.mxu0 }
 0x11e   : > { %718 = vst [vmem:[#allocation2 + $0x8] sm:$0xff] %v716_v2 }
 0x11f   : > { %v727_v4 = vlaneseq  ;;  %v725_v6 = vld [vmem:[%s1212_s2] sm:$0x3] }
 0x120   : > { %v739_v7 = vld [vmem:[%s1213_s3] sm:$0x3] }
 0x121   : > { %v728_v5 = vshrl.u32 %v727_v4, 7 }
 0x123   : > { %v729_v8 = vsub.s32 0, %v728_v5  ;;  %v733_v9 = vsub.s32 1, %v728_v5  ;;  %v723_v10 = vld [vmem:[#allocation2] sm:$0xff] }
 0x125   : > { %v724_v11 = vld [vmem:[#allocation2 + $0x8] sm:$0xff]  ;;  %v730_v12 = vrot.slane %v725_v6, %v729_v8  ;;  %v744_v13 = vrot.slane %v739_v7, %v729_v8  ;;  %v734_v14 = vrot.slane %v725_v6, %v733_v9  ;;  %v748_v15 = vrot.slane %v739_v7, %v733_v9 }
 0x127   : > { %v737_v16 = vmul.f32 %v730_v12, %v723_v10  ;;  %v738_v17 = vmul.f32 %v734_v14, %v724_v11 }
 0x129   : > { %v751_v18 = vadd.f32 %v744_v13, %v737_v16  ;;  %v752_v19 = vadd.f32 %v748_v15, %v738_v17 }
 0x12b   : > { %v753_v20 = vmax.f32 %v751_v18, 0.0  ;;  %v754_v21 = vmax.f32 %v752_v19, 0.0 }
 0x12d   : > { %755 = vst [vmem:[%s1214_s4] sm:$0xff] %v753_v20  ;;  %756 = vst [vmem:[%s1214_s4 + $0x8] sm:$0xff] %v754_v21 }
 0x12e PF: > { %s14_s17 = sadd.s32 1, %s1076_s17   ;;  %s1215_s15 = smov %s1072_s16 }
 0x12f   : > { %p11_p8 = scmp.ge.s32.totalorder %s14_s17, 5   ;;  %s1216_s16 = smov %s1218_s18 }
 0x131   :  { %13 = sbr.rel (!%p11_p8) target bundleno = 2 (0x2), region = 83 }

// kernel: _lambda_.32
= control target key start
LH: loop header
LB: loop body
LE: loop exit
PB: predicated region body
PF: predicated region fallthrough
CT: control target
= control target key end

     0   :  { %v248_v1 = vmov 0   ;;  %v175_v18 = vlaneseq  ;;  %s337_s1 = inlined_call_operand.vmem [shape: bf16[128,256], index: 1, kind: input, shape index: {}]   ;;  %s338_s0 = inlined_call_operand.vmem [shape: bf16[8,128], index: 0, kind: input, shape index: {}]   ;;  %s339_s2 = inlined_call_operand.vmem [shape: f32[1,256], index: 2, kind: input, shape index: {}]   ;;  %s340_s3 = inlined_call_operand.vmem [shape: f32[1,256], index: 3, kind: input, shape index: {}]   ;;  %s341_s4 = inlined_call_operand.vmem [shape: f32[8,256], index: 4, kind: output, shape index: {}]  }
   0x1   :  { %v224_v0 = vld [vmem:[%s337_s1 + $0x74] ss:$8 sps:$4 sm:$0xff]   ;;  %155 = vmatprep.mubr.bf16.mxu0 %v248_v1  ;;  %v226_v2 = vld [vmem:[%s337_s1 + $0x70] ss:$8 sps:$4 sm:$0xff]   ;;  %v227_v3 = vld [vmem:[%s337_s1 + $0x64] ss:$8 sps:$4 sm:$0xff]  }
   0x2   :  { %123 = vmatprep.subr.bf16.mxu0 %v224_v0  ;;  %v229_v4 = vld [vmem:[%s337_s1 + $0x60] ss:$8 sps:$4 sm:$0xff]   ;;  %v230_v5 = vld [vmem:[%s337_s1 + $0x54] ss:$8 sps:$4 sm:$0xff]   ;;  %v232_v6 = vld [vmem:[%s337_s1 + $0x50] ss:$8 sps:$4 sm:$0xff]  }
   0x3   :  { %124 = vmatpush1.bf16.msra.mxu0 %v226_v2  ;;  %v233_v7 = vld [vmem:[%s337_s1 + $0x44] ss:$8 sps:$4 sm:$0xff]   ;;  %v235_v8 = vld [vmem:[%s337_s1 + $0x40] ss:$8 sps:$4 sm:$0xff]   ;;  %v236_v9 = vld [vmem:[%s337_s1 + $0x34] ss:$8 sps:$4 sm:$0xff]  }
   0x4   :  { %125 = vmatprep.subr.bf16.mxu0 %v227_v3  ;;  %v238_v10 = vld [vmem:[%s337_s1 + $0x30] ss:$8 sps:$4 sm:$0xff]   ;;  %v239_v11 = vld [vmem:[%s337_s1 + $0x24] ss:$8 sps:$4 sm:$0xff]   ;;  %v241_v12 = vld [vmem:[%s337_s1 + $0x20] ss:$8 sps:$4 sm:$0xff]  }
   0x5   :  { %v242_v13 = vld [vmem:[%s337_s1 + $0x14] ss:$8 sps:$4 sm:$0xff]   ;;  %v244_v14 = vld [vmem:[%s337_s1 + $0x10] ss:$8 sps:$4 sm:$0xff]   ;;  %v245_v15 = vld [vmem:[%s337_s1 + $0x4] ss:$8 sps:$4 sm:$0xff]  }
   0x6   :  { %v247_v16 = vld [vmem:[%s337_s1] ss:$8 sps:$4 sm:$0xff]   ;;  %v176_v19 = vshrl.u32 %v175_v18, 7 }
   0x7   :  { %126 = vmatpush1.bf16.msra.mxu0 %v229_v4  ;;  %v26_v17 = vld [vmem:[%s338_s0] sm:$0xf] }
   0x8   :  { %127 = vmatprep.subr.bf16.mxu0 %v230_v5  ;;  %v177_v20 = vsub.s32 0, %v176_v19  ;;  %v173_v21 = vld [vmem:[%s339_s2] sm:$0x3]  ;;  %v181_v22 = vsub.s32 1, %v176_v19 }
   0x9   :  { %v187_v23 = vld [vmem:[%s340_s3] sm:$0x3] }
   0xa   :  { %v178_v24 = vrot.slane %v173_v21, %v177_v20  ;;  %v192_v25 = vrot.slane %v187_v23, %v177_v20  ;;  %v182_v26 = vrot.slane %v173_v21, %v181_v22  ;;  %v196_v29 = vrot.slane %v187_v23, %v181_v22 }
   0xb   :  { %128 = vmatpush1.bf16.msra.mxu0 %v232_v6 }
   0xc   :  { %129 = vmatprep.subr.bf16.mxu0 %v233_v7 }
   0xf   :  { %130 = vmatpush1.bf16.msra.mxu0 %v235_v8 }
  0x10   :  { %131 = vmatprep.subr.bf16.mxu0 %v236_v9 }
  0x13   :  { %132 = vmatpush1.bf16.msra.mxu0 %v238_v10 }
  0x14   :  { %133 = vmatprep.subr.bf16.mxu0 %v239_v11 }
  0x17   :  { %134 = vmatpush1.bf16.msra.mxu0 %v241_v12 }
  0x18   :  { %135 = vmatprep.subr.bf16.mxu0 %v242_v13 }
  0x1b   :  { %136 = vmatpush1.bf16.msra.mxu0 %v244_v14 }
  0x1c   :  { %137 = vmatprep.subr.bf16.mxu0 %v245_v15 }
  0x1f   :  { %138 = vmatpush1.bf16.msra.mxu0 %v247_v16 }
  0x22   :  { %156 = vmatmul.mubr.bf16.vlgmr.msra.gmra.mxu0 %v26_v17 }
  0xe2   :  { %v157_v27 = vpop.f32.mrf.mxu0 }
  0xe3   :  { %v185_v28 = vmul.f32 %v178_v24, %v157_v27 }
  0xe4   :  { %v159_v30 = vpop.f32.mrf.mxu0 }
  0xe5   :  { %v199_v31 = vadd.f32 %v192_v25, %v185_v28  ;;  %v186_v32 = vmul.f32 %v182_v26, %v159_v30 }
  0xe6   :  { %v161_v33 = vpop.f32.mrf.mxu0 }
  0xe7   :  { %201 = vst [vmem:[%s341_s4] sm:$0xff] %v199_v31  ;;  %v200_v34 = vadd.f32 %v196_v29, %v186_v32 }
  0xe8   :  { %v162_v35 = vpop.f32.mrf.mxu0 }
  0xe9   :  { %202 = vst [vmem:[%s341_s4 + $0x8] sm:$0xff] %v200_v34 }

// kernel: _lambda_.34
= control target key start
LH: loop header
LB: loop body
LE: loop exit
PB: predicated region body
PF: predicated region fallthrough
CT: control target
= control target key end

     0   :  { %s1105_s15 = smov 0   ;;  %s1107_s16 = smov 0   ;;  %s1210_s0 = inlined_call_operand.vmem [shape: bf16[8,2304], index: 0, kind: input, shape index: {}]   ;;  %s1211_s1 = inlined_call_operand.vmem [shape: bf16[2304,256], index: 1, kind: input, shape index: {}]   ;;  %s1212_s2 = inlined_call_operand.vmem [shape: f32[1,256], index: 2, kind: input, shape index: {}]   ;;  %s1213_s3 = inlined_call_operand.vmem [shape: f32[1,256], index: 3, kind: input, shape index: {}]   ;;  %s1214_s4 = inlined_call_operand.vmem [shape: f32[8,256], index: 4, kind: output, shape index: {}]  }
   0x1   :  { %s1109_s17 = smov 0  }
   0x2 LB: > { %s26_s18 = sadd.s32 1, %s1072_s16  ;;  %p891_p0 = scmp.ge.s32.totalorder %s1076_s17, 1  ;;  %s1076_s17 = sphi %s1109_s17, %s14_s17   ;;  %s1072_s16 = sphi %s1107_s16, %s1216_s16   ;;  %s1068_s15 = sphi %s1105_s15, %s1215_s15  }
   0x3   : > { %p27_p1 = scmp.ge.s32.totalorder %s26_s18, 6  ;;  %p229_p2 = scmp.lt.s32.totalorder %s1076_s17, 7 }
   0x5   : > { %s1218_s18 = smov (%p27_p1, %s26_s18), 0  ;;  %p230_p3 = pnand %p891_p0, %p229_p2 }
   0x6   : > { %s281_s19 = smul.u32 (!%p230_p3), 3, %s1068_s15  ;;  %p895_p6 = scmp.ne.s32.totalorder (!%p230_p3), %s1068_s15, 0 }
   0x7   : > { %233 = sbr.rel (%p230_p3) target bundleno = 302 (0x12e), region = 36 }
   0x8   : > { %s291_s20 = smul.u32 (!%p230_p3), 48, %s1068_s15  ;;  %p284_p4 = scmp.lt.s32.totalorder (!%p230_p3), %s281_s19, 17 }
   0xa   : > { %p293_p5 = scmp.lt.s32.totalorder (!%p230_p3), %s291_s20, 287 }
   0xc   : > { %s1220_s19 = smov (!%p284_p4, %s281_s19), 17  ;;  %s1222_s20 = smov (!%p293_p5, %s291_s20), 287 }
   0xd   : > { %s892_s21 = sshll.u32 %s1220_s19, 2  ;;  %s952_s25 = sshll.u32 %s1222_s20, 3 }
   0xe   : > { %s1130_s24 = scalar_lea.vmem %s1210_s0, %s892_s21  ;;  %s1135_s28 = scalar_lea.vmem %s1211_s1, %s952_s25 }
   0xf   : > { %327 = sbr.rel (%p895_p6) target bundleno = 22 (0x16), region = 40 }
  0x14   : > { %v1078_v0 = vmov 0.0  }
  0x15   : > { %328 = vst [vmem:[#allocation2] sm:$0xff] %v1078_v0  ;;  %329 = vst [vmem:[#allocation2 + $0x8] sm:$0xff] %v1078_v0 }
  0x16 PF: > { %v979_v1 = vld [vmem:[%s1135_s28 + $0x74] ss:$8 sps:$4 sm:$0xff]   ;;  %v981_v2 = vld [vmem:[%s1135_s28 + $0x70] ss:$8 sps:$4 sm:$0xff]   ;;  %v1079_v3 = vmov 0   ;;  %v332_v34 = vld [vmem:[%s1130_s24] sm:$0xff] }
  0x17   : > { %706 = vmatprep.mubr.bf16.mxu1 %v1079_v3  ;;  %633 = vmatprep.subr.bf16.mxu0 %v979_v1  ;;  %v982_v4 = vld [vmem:[%s1135_s28 + $0x64] ss:$8 sps:$4 sm:$0xff]   ;;  %v984_v5 = vld [vmem:[%s1135_s28 + $0x60] ss:$8 sps:$4 sm:$0xff]   ;;  %v985_v6 = vld [vmem:[%s1135_s28 + $0x54] ss:$8 sps:$4 sm:$0xff]   ;;  %v897_v36 = vcombine.high %v332_v34, %v332_v34  ;;  %v896_v53 = vcombine.low %v332_v34, %v332_v34 }
  0x18   : > { %634 = vmatpush1.bf16.msra.mxu0 %v981_v2  ;;  %v987_v7 = vld [vmem:[%s1135_s28 + $0x50] ss:$8 sps:$4 sm:$0xff]   ;;  %v988_v8 = vld [vmem:[%s1135_s28 + $0x44] ss:$8 sps:$4 sm:$0xff]   ;;  %v1000_v9 = vld [vmem:[%s1135_s28 + $0x174] ss:$8 sps:$4 sm:$0xff]  }
  0x19   : > { %635 = vmatprep.subr.bf16.mxu0 %v982_v4  ;;  %v1002_v10 = vld [vmem:[%s1135_s28 + $0x170] ss:$8 sps:$4 sm:$0xff]   ;;  %v990_v11 = vld [vmem:[%s1135_s28 + $0x40] ss:$8 sps:$4 sm:$0xff]   ;;  %v991_v12 = vld [vmem:[%s1135_s28 + $0x34] ss:$8 sps:$4 sm:$0xff]   ;;  %674 = vmatprep.subr.bf16.mxu1 %v1000_v9 }
  0x1a   : > { %v1006_v13 = vld [vmem:[%s1135_s28 + $0x164] ss:$8 sps:$4 sm:$0xff]   ;;  %675 = vmatpush1.bf16.msra.mxu1 %v1002_v10  ;;  %v1008_v14 = vld [vmem:[%s1135_s28 + $0x160] ss:$8 sps:$4 sm:$0xff]   ;;  %v993_v15 = vld [vmem:[%s1135_s28 + $0x30] ss:$8 sps:$4 sm:$0xff]   ;;  %665 = vmatprep.mubr.bf16.mxu0 %v897_v36 }
  0x1b   : > { %676 = vmatprep.subr.bf16.mxu1 %v1006_v13  ;;  %v1012_v16 = vld [vmem:[%s1135_s28 + $0x154] ss:$8 sps:$4 sm:$0xff]   ;;  %v994_v17 = vld [vmem:[%s1135_s28 + $0x24] ss:$8 sps:$4 sm:$0xff]   ;;  %v1014_v18 = vld [vmem:[%s1135_s28 + $0x150] ss:$8 sps:$4 sm:$0xff]  }
  0x1c   : > { %636 = vmatpush1.bf16.msra.mxu0 %v984_v5  ;;  %v1018_v19 = vld [vmem:[%s1135_s28 + $0x144] ss:$8 sps:$4 sm:$0xff]   ;;  %v996_v20 = vld [vmem:[%s1135_s28 + $0x20] ss:$8 sps:$4 sm:$0xff]   ;;  %v997_v21 = vld [vmem:[%s1135_s28 + $0x14] ss:$8 sps:$4 sm:$0xff]  }
  0x1d   : > { %637 = vmatprep.subr.bf16.mxu0 %v985_v6  ;;  %v1020_v22 = vld [vmem:[%s1135_s28 + $0x140] ss:$8 sps:$4 sm:$0xff]   ;;  %v1024_v23 = vld [vmem:[%s1135_s28 + $0x134] ss:$8 sps:$4 sm:$0xff]   ;;  %v999_v24 = vld [vmem:[%s1135_s28 + $0x10] ss:$8 sps:$4 sm:$0xff]  }
  0x1e   : > { %677 = vmatpush1.bf16.msra.mxu1 %v1008_v14  ;;  %v1003_v25 = vld [vmem:[%s1135_s28 + $0x4] ss:$8 sps:$4 sm:$0xff]   ;;  %v1026_v26 = vld [vmem:[%s1135_s28 + $0x130] ss:$8 sps:$4 sm:$0xff]   ;;  %v1005_v28 = vld [vmem:[%s1135_s28] ss:$8 sps:$4 sm:$0xff]  }
  0x1f   : > { %678 = vmatprep.subr.bf16.mxu1 %v1012_v16  ;;  %v1030_v27 = vld [vmem:[%s1135_s28 + $0x124] ss:$8 sps:$4 sm:$0xff]   ;;  %v1009_v29 = vld [vmem:[%s1135_s28 + $0xf4] ss:$8 sps:$4 sm:$0xff]   ;;  %v1032_v30 = vld [vmem:[%s1135_s28 + $0x120] ss:$8 sps:$4 sm:$0xff]  }
  0x20   : > { %638 = vmatpush1.bf16.msra.mxu0 %v987_v7  ;;  %v1036_v31 = vld [vmem:[%s1135_s28 + $0x114] ss:$8 sps:$4 sm:$0xff]   ;;  %v1011_v32 = vld [vmem:[%s1135_s28 + $0xf0] ss:$8 sps:$4 sm:$0xff]   ;;  %v1015_v33 = vld [vmem:[%s1135_s28 + $0xe4] ss:$8 sps:$4 sm:$0xff]  }
  0x21   : > { %639 = vmatprep.subr.bf16.mxu0 %v988_v8  ;;  %v1038_v35 = vld [vmem:[%s1135_s28 + $0x110] ss:$8 sps:$4 sm:$0xff]   ;;  %v1042_v37 = vld [vmem:[%s1135_s28 + $0x104] ss:$8 sps:$4 sm:$0xff]   ;;  %v1017_v38 = vld [vmem:[%s1135_s28 + $0xe0] ss:$8 sps:$4 sm:$0xff]  }
  0x22   : > { %679 = vmatpush1.bf16.msra.mxu1 %v1014_v18  ;;  %v1021_v39 = vld [vmem:[%s1135_s28 + $0xd4] ss:$8 sps:$4 sm:$0xff]   ;;  %v1044_v40 = vld [vmem:[%s1135_s28 + $0x100] ss:$8 sps:$4 sm:$0xff]   ;;  %v1023_v41 = vld [vmem:[%s1135_s28 + $0xd0] ss:$8 sps:$4 sm:$0xff]  }
  0x23   : > { %680 = vmatprep.subr.bf16.mxu1 %v1018_v19  ;;  %v1027_v42 = vld [vmem:[%s1135_s28 + $0xc4] ss:$8 sps:$4 sm:$0xff]   ;;  %v1048_v43 = vld [vmem:[%s1130_s24 + $0x8] ss:$0 sps:$4 sm:$0xff]   ;;  %v1033_v45 = vld [vmem:[%s1135_s28 + $0xb4] ss:$8 sps:$4 sm:$0xff]  }
  0x24   : > { %640 = vmatpush1.bf16.msra.mxu0 %v990_v11  ;;  %v1029_v44 = vld [vmem:[%s1135_s28 + $0xc0] ss:$8 sps:$4 sm:$0xff]   ;;  %v1035_v46 = vld [vmem:[%s1135_s28 + $0xb0] ss:$8 sps:$4 sm:$0xff]   ;;  %v1039_v47 = vld [vmem:[%s1135_s28 + $0xa4] ss:$8 sps:$4 sm:$0xff]  }
  0x25   : > { %641 = vmatprep.subr.bf16.mxu0 %v991_v12  ;;  %v1041_v48 = vld [vmem:[%s1135_s28 + $0xa0] ss:$8 sps:$4 sm:$0xff]   ;;  %v1045_v49 = vld [vmem:[%s1135_s28 + $0x94] ss:$8 sps:$4 sm:$0xff]   ;;  %v1047_v50 = vld [vmem:[%s1135_s28 + $0x90] ss:$8 sps:$4 sm:$0xff]  }
  0x26   : > { %681 = vmatpush1.bf16.msra.mxu1 %v1020_v22  ;;  %v1049_v51 = vld [vmem:[%s1135_s28 + $0x84] ss:$8 sps:$4 sm:$0xff]   ;;  %v1051_v52 = vld [vmem:[%s1135_s28 + $0x80] ss:$8 sps:$4 sm:$0xff]   ;;  %p947_p7 = scmp.ne.s32.totalorder %s1068_s15, 5 }
  0x27   : > { %682 = vmatprep.subr.bf16.mxu1 %v1024_v23  ;;  %v330_v58 = vld [vmem:[#allocation2] sm:$0xff]  ;;  %v331_v61 = vld [vmem:[#allocation2 + $0x8] sm:$0xff] }
  0x28   : > { %642 = vmatpush1.bf16.msra.mxu0 %v993_v15 }
  0x29   : > { %643 = vmatprep.subr.bf16.mxu0 %v994_v17 }
  0x2a   : > { %683 = vmatpush1.bf16.msra.mxu1 %v1026_v26 }
  0x2b   : > { %684 = vmatprep.subr.bf16.mxu1 %v1030_v27 }
  0x2c   : > { %644 = vmatpush1.bf16.msra.mxu0 %v996_v20 }
  0x2d   : > { %645 = vmatprep.subr.bf16.mxu0 %v997_v21 }
  0x2e   : > { %685 = vmatpush1.bf16.msra.mxu1 %v1032_v30 }
  0x2f   : > { %686 = vmatprep.subr.bf16.mxu1 %v1036_v31 }
  0x30   : > { %646 = vmatpush1.bf16.msra.mxu0 %v999_v24 }
  0x31   : > { %647 = vmatprep.subr.bf16.mxu0 %v1003_v25 }
  0x32   : > { %687 = vmatpush1.bf16.msra.mxu1 %v1038_v35 }
  0x33   : > { %688 = vmatprep.subr.bf16.mxu1 %v1042_v37 }
  0x34   : > { %648 = vmatpush1.bf16.msra.mxu0 %v1005_v28 }
  0x35   : > { %649 = vmatprep.subr.bf16.mxu0 %v1009_v29 }
  0x36   : > { %689 = vmatpush1.bf16.msra.mxu1 %v1044_v40 }
  0x38   : > { %650 = vmatpush2.bf16.msra.mxu0 %v1011_v32 }
  0x39   : > { %651 = vmatprep.subr.bf16.mxu0 %v1015_v33  ;;  %707 = vmatmul.mubr.bf16.vlgmr.msra.gmra.mxu1 %v1048_v43 }
  0x3c   : > { %652 = vmatpush2.bf16.msra.mxu0 %v1017_v38 }
  0x3d   : > { %653 = vmatprep.subr.bf16.mxu0 %v1021_v39 }
  0x40   : > { %654 = vmatpush2.bf16.msra.mxu0 %v1023_v41 }
  0x41   : > { %655 = vmatprep.subr.bf16.mxu0 %v1027_v42 }
  0x44   : > { %656 = vmatpush2.bf16.msra.mxu0 %v1029_v44 }
  0x45   : > { %657 = vmatprep.subr.bf16.mxu0 %v1033_v45 }
  0x48   : > { %658 = vmatpush2.bf16.msra.mxu0 %v1035_v46 }
  0x49   : > { %659 = vmatprep.subr.bf16.mxu0 %v1039_v47 }
  0x4c   : > { %660 = vmatpush2.bf16.msra.mxu0 %v1041_v48 }
  0x4d   : > { %661 = vmatprep.subr.bf16.mxu0 %v1045_v49 }
  0x50   : > { %662 = vmatpush2.bf16.msra.mxu0 %v1047_v50 }
  0x51   : > { %663 = vmatprep.subr.bf16.mxu0 %v1049_v51 }
  0x54   : > { %664 = vmatpush2.bf16.msra.mxu0 %v1051_v52 }
  0x57   : > { %666 = vmatmul.mubr.bf16.vlgmr.msra.gmra.mxu0 %v896_v53 }
  0xf9   : > { %v708_v54 = vpop.f32.mrf.mxu1 }
  0xfb   : > { %v710_v55 = vpop.f32.mrf.mxu1 }
  0xfd   : > { %v712_v56 = vpop.f32.mrf.mxu1 }
  0xff   : > { %v713_v57 = vpop.f32.mrf.mxu1 }
 0x117   : > { %v667_v59 = vpop.f32.mrf.mxu0 }
 0x118   : > { %v709_v60 = vadd.f32 %v708_v54, %v667_v59 }
 0x119   : > { %v669_v62 = vpop.f32.mrf.mxu0 }
 0x11a   : > { %v715_v63 = vadd.f32 %v709_v60, %v330_v58  ;;  %v711_v0 = vadd.f32 %v710_v55, %v669_v62  ;;  %722 = sbr.rel (%p947_p7) target bundleno = 302 (0x12e), region = 44 }
 0x11b   : > { %v671_v1 = vpop.f32.mrf.mxu0 }
 0x11c   : > { %717 = vst [vmem:[#allocation2] sm:$0xff] %v715_v63  ;;  %v716_v2 = vadd.f32 %v711_v0, %v331_v61 }
 0x11d   : > { %v672_v3 = vpop.f32.mrf.mxu0 }
 0x11e   : > { %718 = vst [vmem:[#allocation2 + $0x8] sm:$0xff] %v716_v2 }
 0x11f   : > { %v727_v4 = vlaneseq  ;;  %v725_v6 = vld [vmem:[%s1212_s2] sm:$0x3] }
 0x120   : > { %v739_v7 = vld [vmem:[%s1213_s3] sm:$0x3] }
 0x121   : > { %v728_v5 = vshrl.u32 %v727_v4, 7 }
 0x123   : > { %v729_v8 = vsub.s32 0, %v728_v5  ;;  %v733_v9 = vsub.s32 1, %v728_v5  ;;  %v723_v10 = vld [vmem:[#allocation2] sm:$0xff] }
 0x125   : > { %v724_v11 = vld [vmem:[#allocation2 + $0x8] sm:$0xff]  ;;  %v730_v12 = vrot.slane %v725_v6, %v729_v8  ;;  %v744_v13 = vrot.slane %v739_v7, %v729_v8  ;;  %v734_v14 = vrot.slane %v725_v6, %v733_v9  ;;  %v748_v15 = vrot.slane %v739_v7, %v733_v9 }
 0x127   : > { %v737_v16 = vmul.f32 %v730_v12, %v723_v10  ;;  %v738_v17 = vmul.f32 %v734_v14, %v724_v11 }
 0x129   : > { %v751_v18 = vadd.f32 %v744_v13, %v737_v16  ;;  %v752_v19 = vadd.f32 %v748_v15, %v738_v17 }
 0x12b   : > { %v753_v20 = vmax.f32 %v751_v18, 0.0  ;;  %v754_v21 = vmax.f32 %v752_v19, 0.0 }
 0x12d   : > { %755 = vst [vmem:[%s1214_s4] sm:$0xff] %v753_v20  ;;  %756 = vst [vmem:[%s1214_s4 + $0x8] sm:$0xff] %v754_v21 }
 0x12e PF: > { %s14_s17 = sadd.s32 1, %s1076_s17   ;;  %s1215_s15 = smov %s1072_s16 }
 0x12f   : > { %p11_p8 = scmp.ge.s32.totalorder %s14_s17, 8   ;;  %s1216_s16 = smov %s1218_s18 }
 0x131   :  { %13 = sbr.rel (!%p11_p8) target bundleno = 2 (0x2), region = 83 }

// kernel: _lambda_.33
= control target key start
LH: loop header
LB: loop body
LE: loop exit
PB: predicated region body
PF: predicated region fallthrough
CT: control target
= control target key end

     0   :  { %s1199_s18 = smov 0   ;;  %s1201_s19 = smov 0   ;;  %s1310_s0 = inlined_call_operand.vmem [shape: bf16[8,2304], index: 0, kind: input, shape index: {}]   ;;  %s1311_s1 = inlined_call_operand.vmem [shape: bf16[2304,256], index: 1, kind: input, shape index: {}]   ;;  %s1312_s2 = inlined_call_operand.vmem [shape: f32[1,256], index: 2, kind: input, shape index: {}]   ;;  %s1313_s3 = inlined_call_operand.vmem [shape: f32[1,256], index: 3, kind: input, shape index: {}]   ;;  %s1314_s4 = inlined_call_operand.vmem [shape: f32[8,256], index: 4, kind: input, shape index: {}]   ;;  %s1315_s5 = inlined_call_operand.vmem [shape: f32[8,256], index: 5, kind: output, shape index: {}]  }
   0x1   :  { %s1203_s20 = smov 0  }
   0x2 LB: > { %s27_s21 = sadd.s32 1, %s1161_s19  ;;  %p980_p0 = scmp.ge.s32.totalorder %s1165_s20, 1  ;;  %s1165_s20 = sphi %s1203_s20, %s15_s20   ;;  %s1161_s19 = sphi %s1201_s19, %s1317_s19   ;;  %s1157_s18 = sphi %s1199_s18, %s1316_s18  }
   0x3   : > { %p28_p1 = scmp.ge.s32.totalorder %s27_s21, 6  ;;  %p271_p2 = scmp.lt.s32.totalorder %s1165_s20, 7 }
   0x5   : > { %s1319_s21 = smov (%p28_p1, %s27_s21), 0  ;;  %p272_p3 = pnand %p980_p0, %p271_p2 }
   0x6   : > { %s334_s22 = smul.u32 (!%p272_p3), 3, %s1157_s18  ;;  %p984_p6 = scmp.ne.s32.totalorder (!%p272_p3), %s1157_s18, 0 }
   0x7   : > { %275 = sbr.rel (%p272_p3) target bundleno = 304 (0x130), region = 40 }
   0x8   : > { %s344_s23 = smul.u32 (!%p272_p3), 48, %s1157_s18  ;;  %p337_p4 = scmp.lt.s32.totalorder (!%p272_p3), %s334_s22, 17 }
   0xa   : > { %p346_p5 = scmp.lt.s32.totalorder (!%p272_p3), %s344_s23, 287 }
   0xc   : > { %s1321_s22 = smov (!%p337_p4, %s334_s22), 17  ;;  %s1323_s23 = smov (!%p346_p5, %s344_s23), 287 }
   0xd   : > { %s981_s24 = sshll.u32 %s1321_s22, 2  ;;  %s1041_s28 = sshll.u32 %s1323_s23, 3 }
   0xe   : > { %s1224_s27 = scalar_lea.vmem %s1310_s0, %s981_s24  ;;  %s1229_s6 = scalar_lea.vmem %s1311_s1, %s1041_s28 }
   0xf   : > { %390 = sbr.rel (%p984_p6) target bundleno = 22 (0x16), region = 44 }
  0x14   : > { %v1167_v0 = vmov 0.0  }
  0x15   : > { %391 = vst [vmem:[#allocation2] sm:$0xff] %v1167_v0  ;;  %392 = vst [vmem:[#allocation2 + $0x8] sm:$0xff] %v1167_v0 }
  0x16 PF: > { %v1068_v1 = vld [vmem:[%s1229_s6 + $0x74] ss:$8 sps:$4 sm:$0xff]   ;;  %v1070_v2 = vld [vmem:[%s1229_s6 + $0x70] ss:$8 sps:$4 sm:$0xff]   ;;  %v1168_v3 = vmov 0   ;;  %v395_v34 = vld [vmem:[%s1224_s27] sm:$0xff] }
  0x17   : > { %769 = vmatprep.mubr.bf16.mxu1 %v1168_v3  ;;  %696 = vmatprep.subr.bf16.mxu0 %v1068_v1  ;;  %v1071_v4 = vld [vmem:[%s1229_s6 + $0x64] ss:$8 sps:$4 sm:$0xff]   ;;  %v1073_v5 = vld [vmem:[%s1229_s6 + $0x60] ss:$8 sps:$4 sm:$0xff]   ;;  %v1074_v6 = vld [vmem:[%s1229_s6 + $0x54] ss:$8 sps:$4 sm:$0xff]   ;;  %v986_v36 = vcombine.high %v395_v34, %v395_v34  ;;  %v985_v53 = vcombine.low %v395_v34, %v395_v34 }
  0x18   : > { %697 = vmatpush1.bf16.msra.mxu0 %v1070_v2  ;;  %v1076_v7 = vld [vmem:[%s1229_s6 + $0x50] ss:$8 sps:$4 sm:$0xff]   ;;  %v1077_v8 = vld [vmem:[%s1229_s6 + $0x44] ss:$8 sps:$4 sm:$0xff]   ;;  %v1089_v9 = vld [vmem:[%s1229_s6 + $0x174] ss:$8 sps:$4 sm:$0xff]  }
  0x19   : > { %698 = vmatprep.subr.bf16.mxu0 %v1071_v4  ;;  %v1091_v10 = vld [vmem:[%s1229_s6 + $0x170] ss:$8 sps:$4 sm:$0xff]   ;;  %v1079_v11 = vld [vmem:[%s1229_s6 + $0x40] ss:$8 sps:$4 sm:$0xff]   ;;  %v1080_v12 = vld [vmem:[%s1229_s6 + $0x34] ss:$8 sps:$4 sm:$0xff]   ;;  %737 = vmatprep.subr.bf16.mxu1 %v1089_v9 }
  0x1a   : > { %v1095_v13 = vld [vmem:[%s1229_s6 + $0x164] ss:$8 sps:$4 sm:$0xff]   ;;  %738 = vmatpush1.bf16.msra.mxu1 %v1091_v10  ;;  %v1097_v14 = vld [vmem:[%s1229_s6 + $0x160] ss:$8 sps:$4 sm:$0xff]   ;;  %v1082_v15 = vld [vmem:[%s1229_s6 + $0x30] ss:$8 sps:$4 sm:$0xff]   ;;  %728 = vmatprep.mubr.bf16.mxu0 %v986_v36 }
  0x1b   : > { %739 = vmatprep.subr.bf16.mxu1 %v1095_v13  ;;  %v1101_v16 = vld [vmem:[%s1229_s6 + $0x154] ss:$8 sps:$4 sm:$0xff]   ;;  %v1083_v17 = vld [vmem:[%s1229_s6 + $0x24] ss:$8 sps:$4 sm:$0xff]   ;;  %v1103_v18 = vld [vmem:[%s1229_s6 + $0x150] ss:$8 sps:$4 sm:$0xff]  }
  0x1c   : > { %699 = vmatpush1.bf16.msra.mxu0 %v1073_v5  ;;  %v1107_v19 = vld [vmem:[%s1229_s6 + $0x144] ss:$8 sps:$4 sm:$0xff]   ;;  %v1085_v20 = vld [vmem:[%s1229_s6 + $0x20] ss:$8 sps:$4 sm:$0xff]   ;;  %v1086_v21 = vld [vmem:[%s1229_s6 + $0x14] ss:$8 sps:$4 sm:$0xff]  }
  0x1d   : > { %700 = vmatprep.subr.bf16.mxu0 %v1074_v6  ;;  %v1109_v22 = vld [vmem:[%s1229_s6 + $0x140] ss:$8 sps:$4 sm:$0xff]   ;;  %v1113_v23 = vld [vmem:[%s1229_s6 + $0x134] ss:$8 sps:$4 sm:$0xff]   ;;  %v1088_v24 = vld [vmem:[%s1229_s6 + $0x10] ss:$8 sps:$4 sm:$0xff]  }
  0x1e   : > { %740 = vmatpush1.bf16.msra.mxu1 %v1097_v14  ;;  %v1092_v25 = vld [vmem:[%s1229_s6 + $0x4] ss:$8 sps:$4 sm:$0xff]   ;;  %v1115_v26 = vld [vmem:[%s1229_s6 + $0x130] ss:$8 sps:$4 sm:$0xff]   ;;  %v1094_v28 = vld [vmem:[%s1229_s6] ss:$8 sps:$4 sm:$0xff]  }
  0x1f   : > { %741 = vmatprep.subr.bf16.mxu1 %v1101_v16  ;;  %v1119_v27 = vld [vmem:[%s1229_s6 + $0x124] ss:$8 sps:$4 sm:$0xff]   ;;  %v1098_v29 = vld [vmem:[%s1229_s6 + $0xf4] ss:$8 sps:$4 sm:$0xff]   ;;  %v1121_v30 = vld [vmem:[%s1229_s6 + $0x120] ss:$8 sps:$4 sm:$0xff]  }
  0x20   : > { %701 = vmatpush1.bf16.msra.mxu0 %v1076_v7  ;;  %v1125_v31 = vld [vmem:[%s1229_s6 + $0x114] ss:$8 sps:$4 sm:$0xff]   ;;  %v1100_v32 = vld [vmem:[%s1229_s6 + $0xf0] ss:$8 sps:$4 sm:$0xff]   ;;  %v1104_v33 = vld [vmem:[%s1229_s6 + $0xe4] ss:$8 sps:$4 sm:$0xff]  }
  0x21   : > { %702 = vmatprep.subr.bf16.mxu0 %v1077_v8  ;;  %v1127_v35 = vld [vmem:[%s1229_s6 + $0x110] ss:$8 sps:$4 sm:$0xff]   ;;  %v1131_v37 = vld [vmem:[%s1229_s6 + $0x104] ss:$8 sps:$4 sm:$0xff]   ;;  %v1106_v38 = vld [vmem:[%s1229_s6 + $0xe0] ss:$8 sps:$4 sm:$0xff]  }
  0x22   : > { %742 = vmatpush1.bf16.msra.mxu1 %v1103_v18  ;;  %v1110_v39 = vld [vmem:[%s1229_s6 + $0xd4] ss:$8 sps:$4 sm:$0xff]   ;;  %v1133_v40 = vld [vmem:[%s1229_s6 + $0x100] ss:$8 sps:$4 sm:$0xff]   ;;  %v1112_v41 = vld [vmem:[%s1229_s6 + $0xd0] ss:$8 sps:$4 sm:$0xff]  }
  0x23   : > { %743 = vmatprep.subr.bf16.mxu1 %v1107_v19  ;;  %v1116_v42 = vld [vmem:[%s1229_s6 + $0xc4] ss:$8 sps:$4 sm:$0xff]   ;;  %v1137_v43 = vld [vmem:[%s1224_s27 + $0x8] ss:$0 sps:$4 sm:$0xff]   ;;  %v1122_v45 = vld [vmem:[%s1229_s6 + $0xb4] ss:$8 sps:$4 sm:$0xff]  }
  0x24   : > { %703 = vmatpush1.bf16.msra.mxu0 %v1079_v11  ;;  %v1118_v44 = vld [vmem:[%s1229_s6 + $0xc0] ss:$8 sps:$4 sm:$0xff]   ;;  %v1124_v46 = vld [vmem:[%s1229_s6 + $0xb0] ss:$8 sps:$4 sm:$0xff]   ;;  %v1128_v47 = vld [vmem:[%s1229_s6 + $0xa4] ss:$8 sps:$4 sm:$0xff]  }
  0x25   : > { %704 = vmatprep.subr.bf16.mxu0 %v1080_v12  ;;  %v1130_v48 = vld [vmem:[%s1229_s6 + $0xa0] ss:$8 sps:$4 sm:$0xff]   ;;  %v1134_v49 = vld [vmem:[%s1229_s6 + $0x94] ss:$8 sps:$4 sm:$0xff]   ;;  %v1136_v50 = vld [vmem:[%s1229_s6 + $0x90] ss:$8 sps:$4 sm:$0xff]  }
  0x26   : > { %744 = vmatpush1.bf16.msra.mxu1 %v1109_v22  ;;  %v1138_v51 = vld [vmem:[%s1229_s6 + $0x84] ss:$8 sps:$4 sm:$0xff]   ;;  %v1140_v52 = vld [vmem:[%s1229_s6 + $0x80] ss:$8 sps:$4 sm:$0xff]   ;;  %p1036_p7 = scmp.ne.s32.totalorder %s1157_s18, 5 }
  0x27   : > { %745 = vmatprep.subr.bf16.mxu1 %v1113_v23  ;;  %v393_v58 = vld [vmem:[#allocation2] sm:$0xff]  ;;  %v394_v61 = vld [vmem:[#allocation2 + $0x8] sm:$0xff] }
  0x28   : > { %705 = vmatpush1.bf16.msra.mxu0 %v1082_v15 }
  0x29   : > { %706 = vmatprep.subr.bf16.mxu0 %v1083_v17 }
  0x2a   : > { %746 = vmatpush1.bf16.msra.mxu1 %v1115_v26 }
  0x2b   : > { %747 = vmatprep.subr.bf16.mxu1 %v1119_v27 }
  0x2c   : > { %707 = vmatpush1.bf16.msra.mxu0 %v1085_v20 }
  0x2d   : > { %708 = vmatprep.subr.bf16.mxu0 %v1086_v21 }
  0x2e   : > { %748 = vmatpush1.bf16.msra.mxu1 %v1121_v30 }
  0x2f   : > { %749 = vmatprep.subr.bf16.mxu1 %v1125_v31 }
  0x30   : > { %709 = vmatpush1.bf16.msra.mxu0 %v1088_v24 }
  0x31   : > { %710 = vmatprep.subr.bf16.mxu0 %v1092_v25 }
  0x32   : > { %750 = vmatpush1.bf16.msra.mxu1 %v1127_v35 }
  0x33   : > { %751 = vmatprep.subr.bf16.mxu1 %v1131_v37 }
  0x34   : > { %711 = vmatpush1.bf16.msra.mxu0 %v1094_v28 }
  0x35   : > { %712 = vmatprep.subr.bf16.mxu0 %v1098_v29 }
  0x36   : > { %752 = vmatpush1.bf16.msra.mxu1 %v1133_v40 }
  0x38   : > { %713 = vmatpush2.bf16.msra.mxu0 %v1100_v32 }
  0x39   : > { %714 = vmatprep.subr.bf16.mxu0 %v1104_v33  ;;  %770 = vmatmul.mubr.bf16.vlgmr.msra.gmra.mxu1 %v1137_v43 }
  0x3c   : > { %715 = vmatpush2.bf16.msra.mxu0 %v1106_v38 }
  0x3d   : > { %716 = vmatprep.subr.bf16.mxu0 %v1110_v39 }
  0x40   : > { %717 = vmatpush2.bf16.msra.mxu0 %v1112_v41 }
  0x41   : > { %718 = vmatprep.subr.bf16.mxu0 %v1116_v42 }
  0x44   : > { %719 = vmatpush2.bf16.msra.mxu0 %v1118_v44 }
  0x45   : > { %720 = vmatprep.subr.bf16.mxu0 %v1122_v45 }
  0x48   : > { %721 = vmatpush2.bf16.msra.mxu0 %v1124_v46 }
  0x49   : > { %722 = vmatprep.subr.bf16.mxu0 %v1128_v47 }
  0x4c   : > { %723 = vmatpush2.bf16.msra.mxu0 %v1130_v48 }
  0x4d   : > { %724 = vmatprep.subr.bf16.mxu0 %v1134_v49 }
  0x50   : > { %725 = vmatpush2.bf16.msra.mxu0 %v1136_v50 }
  0x51   : > { %726 = vmatprep.subr.bf16.mxu0 %v1138_v51 }
  0x54   : > { %727 = vmatpush2.bf16.msra.mxu0 %v1140_v52 }
  0x57   : > { %729 = vmatmul.mubr.bf16.vlgmr.msra.gmra.mxu0 %v985_v53 }
  0xf9   : > { %v771_v54 = vpop.f32.mrf.mxu1 }
  0xfb   : > { %v773_v55 = vpop.f32.mrf.mxu1 }
  0xfd   : > { %v775_v56 = vpop.f32.mrf.mxu1 }
  0xff   : > { %v776_v57 = vpop.f32.mrf.mxu1 }
 0x117   : > { %v730_v59 = vpop.f32.mrf.mxu0 }
 0x118   : > { %v772_v60 = vadd.f32 %v771_v54, %v730_v59 }
 0x119   : > { %v732_v62 = vpop.f32.mrf.mxu0 }
 0x11a   : > { %v778_v63 = vadd.f32 %v772_v60, %v393_v58  ;;  %v774_v0 = vadd.f32 %v773_v55, %v732_v62  ;;  %785 = sbr.rel (%p1036_p7) target bundleno = 304 (0x130), region = 48 }
 0x11b   : > { %v734_v1 = vpop.f32.mrf.mxu0 }
 0x11c   : > { %780 = vst [vmem:[#allocation2] sm:$0xff] %v778_v63  ;;  %v779_v2 = vadd.f32 %v774_v0, %v394_v61 }
 0x11d   : > { %v735_v3 = vpop.f32.mrf.mxu0 }
 0x11e   : > { %781 = vst [vmem:[#allocation2 + $0x8] sm:$0xff] %v779_v2 }
 0x11f   : > { %v790_v4 = vlaneseq  ;;  %v788_v6 = vld [vmem:[%s1312_s2] sm:$0x3]  ;;  %v817_v19 = vld [vmem:[%s1314_s4 + $0x8] sm:$0xff] }
 0x120   : > { %v802_v7 = vld [vmem:[%s1313_s3] sm:$0x3] }
 0x121   : > { %v791_v5 = vshrl.u32 %v790_v4, 7  ;;  %v816_v18 = vld [vmem:[%s1314_s4] sm:$0xff] }
 0x123   : > { %v792_v8 = vsub.s32 0, %v791_v5  ;;  %v796_v9 = vsub.s32 1, %v791_v5  ;;  %v786_v10 = vld [vmem:[#allocation2] sm:$0xff] }
 0x125   : > { %v787_v11 = vld [vmem:[#allocation2 + $0x8] sm:$0xff]  ;;  %v793_v12 = vrot.slane %v788_v6, %v792_v8  ;;  %v807_v13 = vrot.slane %v802_v7, %v792_v8  ;;  %v797_v14 = vrot.slane %v788_v6, %v796_v9  ;;  %v811_v15 = vrot.slane %v802_v7, %v796_v9 }
 0x127   : > { %v800_v16 = vmul.f32 %v793_v12, %v786_v10  ;;  %v801_v17 = vmul.f32 %v797_v14, %v787_v11 }
 0x129   : > { %v814_v20 = vadd.f32 %v807_v13, %v800_v16  ;;  %v815_v21 = vadd.f32 %v811_v15, %v801_v17 }
 0x12b   : > { %v818_v22 = vadd.f32 %v816_v18, %v814_v20  ;;  %v819_v23 = vadd.f32 %v817_v19, %v815_v21 }
 0x12d   : > { %v820_v24 = vmax.f32 %v818_v22, 0.0  ;;  %v821_v25 = vmax.f32 %v819_v23, 0.0 }
 0x12f   : > { %822 = vst [vmem:[%s1315_s5] sm:$0xff] %v820_v24  ;;  %823 = vst [vmem:[%s1315_s5 + $0x8] sm:$0xff] %v821_v25 }
 0x130 PF: > { %s15_s20 = sadd.s32 1, %s1165_s20   ;;  %s1316_s18 = smov %s1161_s19 }
 0x131   : > { %p12_p8 = scmp.ge.s32.totalorder %s15_s20, 8   ;;  %s1317_s19 = smov %s1319_s21 }
 0x133   :  { %14 = sbr.rel (!%p12_p8) target bundleno = 2 (0x2), region = 90 }

// kernel: _lambda_.36
= control target key start
LH: loop header
LB: loop body
LE: loop exit
PB: predicated region body
PF: predicated region fallthrough
CT: control target
= control target key end

     0   :  { %s1386_s15 = smov 0   ;;  %s1388_s16 = smov 0   ;;  %s1659_s0 = inlined_call_operand.vmem [shape: bf16[8,2304], index: 0, kind: input, shape index: {}]   ;;  %s1660_s1 = inlined_call_operand.vmem [shape: bf16[2304,512], index: 1, kind: input, shape index: {}]   ;;  %s1661_s2 = inlined_call_operand.vmem [shape: f32[1,512], index: 2, kind: input, shape index: {}]   ;;  %s1662_s3 = inlined_call_operand.vmem [shape: f32[1,512], index: 3, kind: input, shape index: {}]   ;;  %s1663_s4 = inlined_call_operand.vmem [shape: f32[8,512], index: 4, kind: output, shape index: {}]  }
   0x1   :  { %s1390_s17 = smov 0   ;;  %s1392_s18 = smov 0  }
   0x2   :  { %s1394_s19 = smov 0   ;;  %s1396_s20 = smov 0  }
   0x3   :  { %s1398_s21 = smov 0  }
   0x4 LB: > { %s26_s22 = sadd.s32 1, %s1349_s19  ;;  %s29_s23 = sadd.s32 1, %s1353_s20  ;;  %s1357_s21 = sphi %s1398_s21, %s14_s21   ;;  %s1353_s20 = sphi %s1396_s20, %s1669_s20   ;;  %s1349_s19 = sphi %s1394_s19, %s1668_s19   ;;  %s1345_s18 = sphi %s1392_s18, %s1667_s18   ;;  %s1341_s17 = sphi %s1390_s17, %s1666_s17   ;;  %s1337_s16 = sphi %s1388_s16, %s1665_s16   ;;  %s1333_s15 = sphi %s1386_s15, %s1664_s15  }
   0x5   : > { %p27_p0 = scmp.ge.s32.totalorder %s26_s22, 6  ;;  %p77_p1 = scmp.ne.s32.totalorder %s1337_s16, %s1333_s15 }
   0x6   : > { %p78_p2 = scmp.eq.s32.totalorder %s1357_s21, 0  ;;  %s70_s27 = sadd.s32 1, %s1337_s16 }
   0x7   : > { %s1671_s22 = smov (%p27_p0, %s26_s22), 0  ;;  %s1673_s23 = smov (!%p27_p0, %s29_s23), %s1353_s20 }
   0x8   : > { %p79_p3 = por %p78_p2, %p77_p1  ;;  %p31_p4 = scmp.ge.s32.totalorder %s1673_s23, 2 }
   0x9   : > { %s65_s24 = ssub.s32 %s1349_s19, %s1671_s22  ;;  %p1102_p6 = scmp.ge.s32.totalorder %s1357_s21, 12 }
   0xa   : > { %s1675_s23 = smov (%p31_p4, %s1673_s23), 0 }
   0xb   : > { %s66_s25 = ssub.s32 %s1353_s20, %s1675_s23  ;;  %183 = sbr.rel (%p1102_p6) target bundleno = 48 (0x30), region = 16 }
   0xc   : > { %s67_s26 = sor.u32 %s66_s25, %s65_s24 }
   0xd   : > { %p68_p5 = scmp.eq.s32.totalorder %s67_s26, 0 }
   0xf   : > { %s1437_s28 = scalar_select %p68_p5, %s1337_s16, %s70_s27  }
  0x10   : > { %199 = sbr.rel (!%p79_p3) target bundleno = 48 (0x30), region = 24  ;;  %s201_s29 = sand.u32 (%p79_p3), 1, %s1337_s16  }
  0x11   : > { %s1168_s30 = smul.u32 (%p79_p3), 384, %s201_s29  ;;  %s1103_s5 = sshll.u32 (%p79_p3), %s1353_s20, 1 }
  0x12   : > { %s1167_s6 = smul.u32 (%p79_p3), 192, %s1349_s19 }
  0x13   : > { %s1451_s12 = scalar_lea.vmem (%p79_p3), [#allocation3], %s1168_s30 }
  0x14   : > { %s207_s7 = sadd.s32 (%p79_p3), %s1167_s6, %s1103_s5 }
  0x15   : > { %s1105_s8 = sshll.u32 %s207_s7, 2 }
  0x16   : > { %s1446_s11 = scalar_lea.vmem %s1660_s1, %s1105_s8 }
  0x17   : > { %v332_v0 = vld [vmem:[%s1446_s11] sm:$0xff]  ;;  %v334_v1 = vld [vmem:[%s1446_s11 + $0x10] sm:$0xff] }
  0x18   : > { %v336_v2 = vld [vmem:[%s1446_s11 + $0x20] sm:$0xff]  ;;  %333 = vst [vmem:[%s1451_s12] sm:$0xff] %v332_v0  ;;  %335 = vst [vmem:[%s1451_s12 + $0x8] sm:$0xff] %v334_v1  ;;  %v338_v3 = vld [vmem:[%s1446_s11 + $0x30] sm:$0xff] }
  0x19   : > { %337 = vst [vmem:[%s1451_s12 + $0x10] sm:$0xff] %v336_v2  ;;  %v340_v4 = vld [vmem:[%s1446_s11 + $0x40] sm:$0xff]  ;;  %v342_v5 = vld [vmem:[%s1446_s11 + $0x50] sm:$0xff]  ;;  %339 = vst [vmem:[%s1451_s12 + $0x18] sm:$0xff] %v338_v3 }
  0x1a   : > { %341 = vst [vmem:[%s1451_s12 + $0x20] sm:$0xff] %v340_v4  ;;  %343 = vst [vmem:[%s1451_s12 + $0x28] sm:$0xff] %v342_v5  ;;  %v344_v6 = vld [vmem:[%s1446_s11 + $0x60] sm:$0xff]  ;;  %v346_v7 = vld [vmem:[%s1446_s11 + $0x70] sm:$0xff] }
  0x1b   : > { %v348_v8 = vld [vmem:[%s1446_s11 + $0x80] sm:$0xff]  ;;  %345 = vst [vmem:[%s1451_s12 + $0x30] sm:$0xff] %v344_v6  ;;  %347 = vst [vmem:[%s1451_s12 + $0x38] sm:$0xff] %v346_v7  ;;  %v350_v9 = vld [vmem:[%s1446_s11 + $0x90] sm:$0xff] }
  0x1c   : > { %349 = vst [vmem:[%s1451_s12 + $0x40] sm:$0xff] %v348_v8  ;;  %v352_v10 = vld [vmem:[%s1446_s11 + $0xa0] sm:$0xff]  ;;  %v354_v11 = vld [vmem:[%s1446_s11 + $0xb0] sm:$0xff]  ;;  %351 = vst [vmem:[%s1451_s12 + $0x48] sm:$0xff] %v350_v9 }
  0x1d   : > { %353 = vst [vmem:[%s1451_s12 + $0x50] sm:$0xff] %v352_v10  ;;  %355 = vst [vmem:[%s1451_s12 + $0x58] sm:$0xff] %v354_v11  ;;  %v356_v12 = vld [vmem:[%s1446_s11 + $0xc0] sm:$0xff]  ;;  %v358_v13 = vld [vmem:[%s1446_s11 + $0xd0] sm:$0xff] }
  0x1e   : > { %v360_v14 = vld [vmem:[%s1446_s11 + $0xe0] sm:$0xff]  ;;  %357 = vst [vmem:[%s1451_s12 + $0x60] sm:$0xff] %v356_v12  ;;  %359 = vst [vmem:[%s1451_s12 + $0x68] sm:$0xff] %v358_v13  ;;  %v362_v15 = vld [vmem:[%s1446_s11 + $0xf0] sm:$0xff] }
  0x1f   : > { %361 = vst [vmem:[%s1451_s12 + $0x70] sm:$0xff] %v360_v14  ;;  %v364_v16 = vld [vmem:[%s1446_s11 + $0x100] sm:$0xff]  ;;  %v366_v17 = vld [vmem:[%s1446_s11 + $0x110] sm:$0xff]  ;;  %363 = vst [vmem:[%s1451_s12 + $0x78] sm:$0xff] %v362_v15 }
  0x20   : > { %365 = vst [vmem:[%s1451_s12 + $0x80] sm:$0xff] %v364_v16  ;;  %367 = vst [vmem:[%s1451_s12 + $0x88] sm:$0xff] %v366_v17  ;;  %v368_v18 = vld [vmem:[%s1446_s11 + $0x120] sm:$0xff]  ;;  %v370_v19 = vld [vmem:[%s1446_s11 + $0x130] sm:$0xff] }
  0x21   : > { %v372_v20 = vld [vmem:[%s1446_s11 + $0x140] sm:$0xff]  ;;  %369 = vst [vmem:[%s1451_s12 + $0x90] sm:$0xff] %v368_v18  ;;  %371 = vst [vmem:[%s1451_s12 + $0x98] sm:$0xff] %v370_v19  ;;  %v374_v21 = vld [vmem:[%s1446_s11 + $0x150] sm:$0xff] }
  0x22   : > { %373 = vst [vmem:[%s1451_s12 + $0xa0] sm:$0xff] %v372_v20  ;;  %v376_v22 = vld [vmem:[%s1446_s11 + $0x160] sm:$0xff]  ;;  %v378_v23 = vld [vmem:[%s1446_s11 + $0x170] sm:$0xff]  ;;  %375 = vst [vmem:[%s1451_s12 + $0xa8] sm:$0xff] %v374_v21 }
  0x23   : > { %377 = vst [vmem:[%s1451_s12 + $0xb0] sm:$0xff] %v376_v22  ;;  %379 = vst [vmem:[%s1451_s12 + $0xb8] sm:$0xff] %v378_v23  ;;  %v380_v24 = vld [vmem:[%s1446_s11 + $0x180] sm:$0xff]  ;;  %v382_v25 = vld [vmem:[%s1446_s11 + $0x190] sm:$0xff] }
  0x24   : > { %v384_v26 = vld [vmem:[%s1446_s11 + $0x1a0] sm:$0xff]  ;;  %381 = vst [vmem:[%s1451_s12 + $0xc0] sm:$0xff] %v380_v24  ;;  %383 = vst [vmem:[%s1451_s12 + $0xc8] sm:$0xff] %v382_v25  ;;  %v386_v27 = vld [vmem:[%s1446_s11 + $0x1b0] sm:$0xff] }
  0x25   : > { %385 = vst [vmem:[%s1451_s12 + $0xd0] sm:$0xff] %v384_v26  ;;  %v388_v28 = vld [vmem:[%s1446_s11 + $0x1c0] sm:$0xff]  ;;  %v390_v29 = vld [vmem:[%s1446_s11 + $0x1d0] sm:$0xff]  ;;  %387 = vst [vmem:[%s1451_s12 + $0xd8] sm:$0xff] %v386_v27 }
  0x26   : > { %389 = vst [vmem:[%s1451_s12 + $0xe0] sm:$0xff] %v388_v28  ;;  %391 = vst [vmem:[%s1451_s12 + $0xe8] sm:$0xff] %v390_v29  ;;  %v392_v30 = vld [vmem:[%s1446_s11 + $0x1e0] sm:$0xff]  ;;  %v394_v31 = vld [vmem:[%s1446_s11 + $0x1f0] sm:$0xff] }
  0x27   : > { %v396_v32 = vld [vmem:[%s1446_s11 + $0x200] sm:$0xff]  ;;  %393 = vst [vmem:[%s1451_s12 + $0xf0] sm:$0xff] %v392_v30  ;;  %395 = vst [vmem:[%s1451_s12 + $0xf8] sm:$0xff] %v394_v31  ;;  %v398_v33 = vld [vmem:[%s1446_s11 + $0x210] sm:$0xff] }
  0x28   : > { %397 = vst [vmem:[%s1451_s12 + $0x100] sm:$0xff] %v396_v32  ;;  %v400_v34 = vld [vmem:[%s1446_s11 + $0x220] sm:$0xff]  ;;  %v402_v35 = vld [vmem:[%s1446_s11 + $0x230] sm:$0xff]  ;;  %399 = vst [vmem:[%s1451_s12 + $0x108] sm:$0xff] %v398_v33 }
  0x29   : > { %401 = vst [vmem:[%s1451_s12 + $0x110] sm:$0xff] %v400_v34  ;;  %403 = vst [vmem:[%s1451_s12 + $0x118] sm:$0xff] %v402_v35  ;;  %v404_v36 = vld [vmem:[%s1446_s11 + $0x240] sm:$0xff]  ;;  %v406_v37 = vld [vmem:[%s1446_s11 + $0x250] sm:$0xff] }
  0x2a   : > { %v408_v38 = vld [vmem:[%s1446_s11 + $0x260] sm:$0xff]  ;;  %405 = vst [vmem:[%s1451_s12 + $0x120] sm:$0xff] %v404_v36  ;;  %407 = vst [vmem:[%s1451_s12 + $0x128] sm:$0xff] %v406_v37  ;;  %v410_v39 = vld [vmem:[%s1446_s11 + $0x270] sm:$0xff] }
  0x2b   : > { %409 = vst [vmem:[%s1451_s12 + $0x130] sm:$0xff] %v408_v38  ;;  %v412_v40 = vld [vmem:[%s1446_s11 + $0x280] sm:$0xff]  ;;  %v414_v41 = vld [vmem:[%s1446_s11 + $0x290] sm:$0xff]  ;;  %411 = vst [vmem:[%s1451_s12 + $0x138] sm:$0xff] %v410_v39 }
  0x2c   : > { %413 = vst [vmem:[%s1451_s12 + $0x140] sm:$0xff] %v412_v40  ;;  %415 = vst [vmem:[%s1451_s12 + $0x148] sm:$0xff] %v414_v41  ;;  %v416_v42 = vld [vmem:[%s1446_s11 + $0x2a0] sm:$0xff]  ;;  %v418_v43 = vld [vmem:[%s1446_s11 + $0x2b0] sm:$0xff] }
  0x2d   : > { %v420_v44 = vld [vmem:[%s1446_s11 + $0x2c0] sm:$0xff]  ;;  %417 = vst [vmem:[%s1451_s12 + $0x150] sm:$0xff] %v416_v42  ;;  %419 = vst [vmem:[%s1451_s12 + $0x158] sm:$0xff] %v418_v43  ;;  %v422_v45 = vld [vmem:[%s1446_s11 + $0x2d0] sm:$0xff] }
  0x2e   : > { %421 = vst [vmem:[%s1451_s12 + $0x160] sm:$0xff] %v420_v44  ;;  %v424_v46 = vld [vmem:[%s1446_s11 + $0x2e0] sm:$0xff]  ;;  %v426_v47 = vld [vmem:[%s1446_s11 + $0x2f0] sm:$0xff]  ;;  %423 = vst [vmem:[%s1451_s12 + $0x168] sm:$0xff] %v422_v45 }
  0x2f   : > { %425 = vst [vmem:[%s1451_s12 + $0x170] sm:$0xff] %v424_v46  ;;  %427 = vst [vmem:[%s1451_s12 + $0x178] sm:$0xff] %v426_v47 }
  0x30 PF: > { %p1106_p7 = scmp.ge.s32.totalorder %s1357_s21, 1  ;;  %p448_p8 = scmp.lt.s32.totalorder %s1357_s21, 13 }
  0x32   : > { %p449_p9 = pnand %p1106_p7, %p448_p8 }
  0x33   : > { %s455_s13 = sand.u32 (!%p449_p9), 1, %s1333_s15   ;;  %s501_s14 = smul.u32 (!%p449_p9), 3, %s1341_s17 }
  0x34   : > { %452 = sbr.rel (%p449_p9) target bundleno = 347 (0x15b), region = 70  ;;  %s1108_s25 = sshll.u32 (!%p449_p9), %s1345_s18, 1 }
  0x35   : > { %s1169_s24 = smul.u32 (!%p449_p9), 384, %s455_s13  ;;  %p504_p10 = scmp.lt.s32.totalorder (!%p449_p9), %s501_s14, 17 }
  0x36   : > { %p514_p11 = scmp.lt.s32.totalorder (!%p449_p9), %s1108_s25, 3  ;;  %p1112_p12 = scmp.ne.s32.totalorder (!%p449_p9), %s1341_s17, 0 }
  0x37   : > { %s1572_s13 = scalar_lea.vmem (!%p449_p9), [#allocation3], %s1169_s24 }
  0x39   : > { %s1677_s14 = smov (!%p504_p10, %s501_s14), 17  ;;  %s1679_s25 = smov (!%p514_p11, %s1108_s25), 3 }
  0x3a   : > { %s1107_s26 = sshll.u32 %s1677_s14, 2  ;;  %s516_s15 = scalar_lea.vmem %s1661_s2, %s1679_s25 }
  0x3b   : > { %s1556_s30 = scalar_lea.vmem %s1659_s0, %s1107_s26  ;;  %s521_s8 = scalar_lea.vmem %s1662_s3, %s1679_s25 }
  0x3c   : > { %s1111_s9 = sshll.u32 %s1679_s25, 3  ;;  %537 = sbr.rel (%p1112_p12) target bundleno = 67 (0x43), region = 78 }
  0x3d   : > { %s1570_s12 = scalar_lea.vmem %s1663_s4, %s1111_s9 }
  0x41   : > { %v1359_v48 = vmov 0.0  }
  0x42   : > { %538 = vst [vmem:[#allocation2] sm:$0xff] %v1359_v48  ;;  %539 = vst [vmem:[#allocation2 + $0x8] sm:$0xff] %v1359_v48 }
  0x43 PF: > { %v1228_v49 = vld [vmem:[%s1572_s13 + $0x74] ss:$8 sps:$4 sm:$0xff]   ;;  %v1230_v50 = vld [vmem:[%s1572_s13 + $0x70] ss:$8 sps:$4 sm:$0xff]   ;;  %v1360_v51 = vmov 0   ;;  %p1164_p13 = scmp.ne.s32.totalorder %s1341_s17, 5 }
  0x44   : > { %916 = vmatprep.mubr.bf16.mxu1 %v1360_v51  ;;  %843 = vmatprep.subr.bf16.mxu0 %v1228_v49  ;;  %v1231_v52 = vld [vmem:[%s1572_s13 + $0x64] ss:$8 sps:$4 sm:$0xff]   ;;  %v1233_v53 = vld [vmem:[%s1572_s13 + $0x60] ss:$8 sps:$4 sm:$0xff]   ;;  %v1234_v54 = vld [vmem:[%s1572_s13 + $0x54] ss:$8 sps:$4 sm:$0xff]  }
  0x45   : > { %844 = vmatpush1.bf16.msra.mxu0 %v1230_v50  ;;  %v1236_v55 = vld [vmem:[%s1572_s13 + $0x50] ss:$8 sps:$4 sm:$0xff]   ;;  %v1237_v56 = vld [vmem:[%s1572_s13 + $0x44] ss:$8 sps:$4 sm:$0xff]   ;;  %v1249_v57 = vld [vmem:[%s1572_s13 + $0x174] ss:$8 sps:$4 sm:$0xff]  }
  0x46   : > { %845 = vmatprep.subr.bf16.mxu0 %v1231_v52  ;;  %v1251_v58 = vld [vmem:[%s1572_s13 + $0x170] ss:$8 sps:$4 sm:$0xff]   ;;  %v1239_v59 = vld [vmem:[%s1572_s13 + $0x40] ss:$8 sps:$4 sm:$0xff]   ;;  %v1240_v60 = vld [vmem:[%s1572_s13 + $0x34] ss:$8 sps:$4 sm:$0xff]   ;;  %884 = vmatprep.subr.bf16.mxu1 %v1249_v57 }
  0x47   : > { %v1255_v61 = vld [vmem:[%s1572_s13 + $0x164] ss:$8 sps:$4 sm:$0xff]   ;;  %885 = vmatpush1.bf16.msra.mxu1 %v1251_v58  ;;  %v1257_v62 = vld [vmem:[%s1572_s13 + $0x160] ss:$8 sps:$4 sm:$0xff]   ;;  %v1242_v63 = vld [vmem:[%s1572_s13 + $0x30] ss:$8 sps:$4 sm:$0xff]  }
  0x48   : > { %886 = vmatprep.subr.bf16.mxu1 %v1255_v61  ;;  %v1261_v0 = vld [vmem:[%s1572_s13 + $0x154] ss:$8 sps:$4 sm:$0xff]   ;;  %v1243_v1 = vld [vmem:[%s1572_s13 + $0x24] ss:$8 sps:$4 sm:$0xff]   ;;  %v1263_v2 = vld [vmem:[%s1572_s13 + $0x150] ss:$8 sps:$4 sm:$0xff]  }
  0x49   : > { %846 = vmatpush1.bf16.msra.mxu0 %v1233_v53  ;;  %v1267_v3 = vld [vmem:[%s1572_s13 + $0x144] ss:$8 sps:$4 sm:$0xff]   ;;  %v1245_v4 = vld [vmem:[%s1572_s13 + $0x20] ss:$8 sps:$4 sm:$0xff]   ;;  %v1246_v5 = vld [vmem:[%s1572_s13 + $0x14] ss:$8 sps:$4 sm:$0xff]  }
  0x4a   : > { %847 = vmatprep.subr.bf16.mxu0 %v1234_v54  ;;  %v1269_v6 = vld [vmem:[%s1572_s13 + $0x140] ss:$8 sps:$4 sm:$0xff]   ;;  %v1273_v7 = vld [vmem:[%s1572_s13 + $0x134] ss:$8 sps:$4 sm:$0xff]   ;;  %v1248_v8 = vld [vmem:[%s1572_s13 + $0x10] ss:$8 sps:$4 sm:$0xff]  }
  0x4b   : > { %887 = vmatpush1.bf16.msra.mxu1 %v1257_v62  ;;  %v1252_v9 = vld [vmem:[%s1572_s13 + $0x4] ss:$8 sps:$4 sm:$0xff]   ;;  %v1275_v10 = vld [vmem:[%s1572_s13 + $0x130] ss:$8 sps:$4 sm:$0xff]   ;;  %v1254_v12 = vld [vmem:[%s1572_s13] ss:$8 sps:$4 sm:$0xff]  }
  0x4c   : > { %888 = vmatprep.subr.bf16.mxu1 %v1261_v0  ;;  %v1279_v11 = vld [vmem:[%s1572_s13 + $0x124] ss:$8 sps:$4 sm:$0xff]   ;;  %v1258_v13 = vld [vmem:[%s1572_s13 + $0xf4] ss:$8 sps:$4 sm:$0xff]   ;;  %v1281_v14 = vld [vmem:[%s1572_s13 + $0x120] ss:$8 sps:$4 sm:$0xff]  }
  0x4d   : > { %848 = vmatpush1.bf16.msra.mxu0 %v1236_v55  ;;  %v1285_v15 = vld [vmem:[%s1572_s13 + $0x114] ss:$8 sps:$4 sm:$0xff]   ;;  %v1260_v16 = vld [vmem:[%s1572_s13 + $0xf0] ss:$8 sps:$4 sm:$0xff]   ;;  %v1264_v17 = vld [vmem:[%s1572_s13 + $0xe4] ss:$8 sps:$4 sm:$0xff]  }
  0x4e   : > { %849 = vmatprep.subr.bf16.mxu0 %v1237_v56  ;;  %v542_v18 = vld [vmem:[%s1556_s30] sm:$0xff]  ;;  %v1291_v21 = vld [vmem:[%s1572_s13 + $0x104] ss:$8 sps:$4 sm:$0xff]   ;;  %v1266_v22 = vld [vmem:[%s1572_s13 + $0xe0] ss:$8 sps:$4 sm:$0xff]  }
  0x4f   : > { %889 = vmatpush1.bf16.msra.mxu1 %v1263_v2  ;;  %v1287_v19 = vld [vmem:[%s1572_s13 + $0x110] ss:$8 sps:$4 sm:$0xff]   ;;  %v1114_v20 = vcombine.high %v542_v18, %v542_v18  ;;  %v1270_v23 = vld [vmem:[%s1572_s13 + $0xd4] ss:$8 sps:$4 sm:$0xff]   ;;  %v1293_v24 = vld [vmem:[%s1572_s13 + $0x100] ss:$8 sps:$4 sm:$0xff]   ;;  %v1113_v37 = vcombine.low %v542_v18, %v542_v18 }
  0x50   : > { %890 = vmatprep.subr.bf16.mxu1 %v1267_v3  ;;  %v1272_v25 = vld [vmem:[%s1572_s13 + $0xd0] ss:$8 sps:$4 sm:$0xff]   ;;  %v1276_v26 = vld [vmem:[%s1572_s13 + $0xc4] ss:$8 sps:$4 sm:$0xff]   ;;  %v1278_v28 = vld [vmem:[%s1572_s13 + $0xc0] ss:$8 sps:$4 sm:$0xff]  }
  0x51   : > { %850 = vmatpush1.bf16.msra.mxu0 %v1239_v59  ;;  %875 = vmatprep.mubr.bf16.mxu0 %v1114_v20  ;;  %v1297_v27 = vld [vmem:[%s1556_s30 + $0x8] ss:$0 sps:$4 sm:$0xff]   ;;  %v1282_v29 = vld [vmem:[%s1572_s13 + $0xb4] ss:$8 sps:$4 sm:$0xff]   ;;  %v1288_v31 = vld [vmem:[%s1572_s13 + $0xa4] ss:$8 sps:$4 sm:$0xff]  }
  0x52   : > { %851 = vmatprep.subr.bf16.mxu0 %v1240_v60  ;;  %v1284_v30 = vld [vmem:[%s1572_s13 + $0xb0] ss:$8 sps:$4 sm:$0xff]   ;;  %v1290_v32 = vld [vmem:[%s1572_s13 + $0xa0] ss:$8 sps:$4 sm:$0xff]   ;;  %v1294_v33 = vld [vmem:[%s1572_s13 + $0x94] ss:$8 sps:$4 sm:$0xff]  }
  0x53   : > { %891 = vmatpush1.bf16.msra.mxu1 %v1269_v6  ;;  %v1296_v34 = vld [vmem:[%s1572_s13 + $0x90] ss:$8 sps:$4 sm:$0xff]   ;;  %v1298_v35 = vld [vmem:[%s1572_s13 + $0x84] ss:$8 sps:$4 sm:$0xff]   ;;  %v1300_v36 = vld [vmem:[%s1572_s13 + $0x80] ss:$8 sps:$4 sm:$0xff]  }
  0x54   : > { %892 = vmatprep.subr.bf16.mxu1 %v1273_v7  ;;  %v540_v42 = vld [vmem:[#allocation2] sm:$0xff]  ;;  %v541_v45 = vld [vmem:[#allocation2 + $0x8] sm:$0xff] }
  0x55   : > { %852 = vmatpush1.bf16.msra.mxu0 %v1242_v63 }
  0x56   : > { %853 = vmatprep.subr.bf16.mxu0 %v1243_v1 }
  0x57   : > { %893 = vmatpush1.bf16.msra.mxu1 %v1275_v10 }
  0x58   : > { %894 = vmatprep.subr.bf16.mxu1 %v1279_v11 }
  0x59   : > { %854 = vmatpush1.bf16.msra.mxu0 %v1245_v4 }
  0x5a   : > { %855 = vmatprep.subr.bf16.mxu0 %v1246_v5 }
  0x5b   : > { %895 = vmatpush1.bf16.msra.mxu1 %v1281_v14 }
  0x5c   : > { %896 = vmatprep.subr.bf16.mxu1 %v1285_v15 }
  0x5d   : > { %856 = vmatpush1.bf16.msra.mxu0 %v1248_v8 }
  0x5e   : > { %857 = vmatprep.subr.bf16.mxu0 %v1252_v9 }
  0x5f   : > { %897 = vmatpush1.bf16.msra.mxu1 %v1287_v19 }
  0x60   : > { %898 = vmatprep.subr.bf16.mxu1 %v1291_v21 }
  0x61   : > { %858 = vmatpush1.bf16.msra.mxu0 %v1254_v12 }
  0x62   : > { %859 = vmatprep.subr.bf16.mxu0 %v1258_v13 }
  0x63   : > { %899 = vmatpush1.bf16.msra.mxu1 %v1293_v24 }
  0x65   : > { %860 = vmatpush2.bf16.msra.mxu0 %v1260_v16 }
  0x66   : > { %861 = vmatprep.subr.bf16.mxu0 %v1264_v17  ;;  %917 = vmatmul.mubr.bf16.vlgmr.msra.gmra.mxu1 %v1297_v27 }
  0x69   : > { %862 = vmatpush2.bf16.msra.mxu0 %v1266_v22 }
  0x6a   : > { %863 = vmatprep.subr.bf16.mxu0 %v1270_v23 }
  0x6d   : > { %864 = vmatpush2.bf16.msra.mxu0 %v1272_v25 }
  0x6e   : > { %865 = vmatprep.subr.bf16.mxu0 %v1276_v26 }
  0x71   : > { %866 = vmatpush2.bf16.msra.mxu0 %v1278_v28 }
  0x72   : > { %867 = vmatprep.subr.bf16.mxu0 %v1282_v29 }
  0x75   : > { %868 = vmatpush2.bf16.msra.mxu0 %v1284_v30 }
  0x76   : > { %869 = vmatprep.subr.bf16.mxu0 %v1288_v31 }
  0x79   : > { %870 = vmatpush2.bf16.msra.mxu0 %v1290_v32 }
  0x7a   : > { %871 = vmatprep.subr.bf16.mxu0 %v1294_v33 }
  0x7d   : > { %872 = vmatpush2.bf16.msra.mxu0 %v1296_v34 }
  0x7e   : > { %873 = vmatprep.subr.bf16.mxu0 %v1298_v35 }
  0x81   : > { %874 = vmatpush2.bf16.msra.mxu0 %v1300_v36 }
  0x84   : > { %876 = vmatmul.mubr.bf16.vlgmr.msra.gmra.mxu0 %v1113_v37 }
 0x126   : > { %v918_v38 = vpop.f32.mrf.mxu1 }
 0x128   : > { %v920_v39 = vpop.f32.mrf.mxu1 }
 0x12a   : > { %v922_v40 = vpop.f32.mrf.mxu1 }
 0x12c   : > { %v923_v41 = vpop.f32.mrf.mxu1 }
 0x144   : > { %v877_v43 = vpop.f32.mrf.mxu0 }
 0x145   : > { %v919_v44 = vadd.f32 %v918_v38, %v877_v43 }
 0x146   : > { %v879_v46 = vpop.f32.mrf.mxu0 }
 0x147   : > { %v925_v47 = vadd.f32 %v919_v44, %v540_v42  ;;  %v921_v48 = vadd.f32 %v920_v39, %v879_v46  ;;  %932 = sbr.rel (%p1164_p13) target bundleno = 347 (0x15b), region = 82 }
 0x148   : > { %v881_v49 = vpop.f32.mrf.mxu0 }
 0x149   : > { %927 = vst [vmem:[#allocation2] sm:$0xff] %v925_v47  ;;  %v926_v50 = vadd.f32 %v921_v48, %v541_v45 }
 0x14a   : > { %v882_v51 = vpop.f32.mrf.mxu0 }
 0x14b   : > { %928 = vst [vmem:[#allocation2 + $0x8] sm:$0xff] %v926_v50 }
 0x14c   : > { %v937_v52 = vlaneseq  ;;  %v935_v54 = vld [vmem:[%s516_s15] sm:$0x3] }
 0x14d   : > { %v949_v55 = vld [vmem:[%s521_s8] sm:$0x3] }
 0x14e   : > { %v938_v53 = vshrl.u32 %v937_v52, 7 }
 0x150   : > { %v939_v56 = vsub.s32 0, %v938_v53  ;;  %v943_v57 = vsub.s32 1, %v938_v53  ;;  %v933_v58 = vld [vmem:[#allocation2] sm:$0xff] }
 0x152   : > { %v934_v59 = vld [vmem:[#allocation2 + $0x8] sm:$0xff]  ;;  %v940_v60 = vrot.slane %v935_v54, %v939_v56  ;;  %v954_v61 = vrot.slane %v949_v55, %v939_v56  ;;  %v944_v62 = vrot.slane %v935_v54, %v943_v57  ;;  %v958_v63 = vrot.slane %v949_v55, %v943_v57 }
 0x154   : > { %v947_v0 = vmul.f32 %v940_v60, %v933_v58  ;;  %v948_v1 = vmul.f32 %v944_v62, %v934_v59 }
 0x156   : > { %v961_v2 = vadd.f32 %v954_v61, %v947_v0  ;;  %v962_v3 = vadd.f32 %v958_v63, %v948_v1 }
 0x158   : > { %v963_v4 = vmax.f32 %v961_v2, 0.0  ;;  %v964_v5 = vmax.f32 %v962_v3, 0.0 }
 0x15a   : > { %965 = vst [vmem:[%s1570_s12] sm:$0xff] %v963_v4  ;;  %966 = vst [vmem:[%s1570_s12 + $0x8] sm:$0xff] %v964_v5 }
 0x15b PF: > { %s14_s21 = sadd.s32 1, %s1357_s21   ;;  %s1664_s15 = smov %s1337_s16 }
 0x15c   : > { %p11_p0 = scmp.ge.s32.totalorder %s14_s21, 14   ;;  %s1665_s16 = smov %s1437_s28 }
 0x15d   : > { %s1666_s17 = smov %s1349_s19  ;;  %s1667_s18 = smov %s1353_s20 }
 0x15e   : > { %s1668_s19 = smov %s1671_s22  ;;  %s1669_s20 = smov %s1675_s23 }
 0x15f   :  { %13 = sbr.rel (!%p11_p0) target bundleno = 4 (0x4), region = 126 }

// kernel: _lambda_.37
= control target key start
LH: loop header
LB: loop body
LE: loop exit
PB: predicated region body
PF: predicated region fallthrough
CT: control target
= control target key end

     0   :  { %s1095_s15 = smov 0   ;;  %s1097_s16 = smov 0   ;;  %s1277_s0 = inlined_call_operand.vmem [shape: bf16[8,256], index: 0, kind: input, shape index: {}]   ;;  %s1278_s1 = inlined_call_operand.vmem [shape: bf16[256,512], index: 1, kind: input, shape index: {}]   ;;  %s1279_s2 = inlined_call_operand.vmem [shape: f32[1,512], index: 2, kind: input, shape index: {}]   ;;  %s1280_s3 = inlined_call_operand.vmem [shape: f32[1,512], index: 3, kind: input, shape index: {}]   ;;  %s1281_s4 = inlined_call_operand.vmem [shape: f32[8,512], index: 4, kind: output, shape index: {}]  }
   0x1   :  { %s1099_s17 = smov 0   ;;  %s1101_s18 = smov 0  }
   0x2   :  { %s1103_s19 = smov 0  }
   0x3 LB: > { %s29_s20 = sadd.s32 1, %s1064_s18  ;;  %p77_p1 = scmp.ne.s32.totalorder %s1056_s16, %s1052_s15  ;;  %s1068_s19 = sphi %s1103_s19, %s14_s19   ;;  %s1064_s18 = sphi %s1101_s18, %s1285_s18   ;;  %s1060_s17 = sphi %s1099_s17, %s1284_s17   ;;  %s1056_s16 = sphi %s1097_s16, %s1283_s16   ;;  %s1052_s15 = sphi %s1095_s15, %s1282_s15  }
   0x4   : > { %p31_p0 = scmp.ge.s32.totalorder %s29_s20, 2  ;;  %p78_p2 = scmp.eq.s32.totalorder %s1068_s19, 0 }
   0x5   : > { %s70_s22 = sadd.s32 1, %s1056_s16  ;;  %p893_p5 = scmp.ge.s32.totalorder %s1068_s19, 2 }
   0x6   : > { %s1287_s20 = smov (%p31_p0, %s29_s20), 0  ;;  %p79_p3 = por %p78_p2, %p77_p1 }
   0x7   : > { %s66_s21 = ssub.s32 %s1064_s18, %s1287_s20  ;;  %196 = sbr.rel (%p893_p5) target bundleno = 32 (0x20), region = 20 }
   0x8   : > { %p68_p4 = scmp.eq.s32.totalorder %s66_s21, 0 }
   0xa   : > { %s1130_s23 = scalar_select %p68_p4, %s1056_s16, %s70_s22  }
   0xc   : > { %199 = sbr.rel (!%p79_p3) target bundleno = 32 (0x20), region = 24  ;;  %s201_s24 = sand.u32 (%p79_p3), 1, %s1056_s16  }
   0xd   : > { %s939_s25 = sshll.u32 (%p79_p3), %s1064_s18, 3  ;;  %s894_s26 = sshll.u32 (%p79_p3), %s201_s24, 8 }
   0xe   : > { %s1138_s29 = scalar_lea.vmem (%p79_p3), %s1278_s1, %s939_s25  ;;  %s1143_s30 = scalar_lea.vmem (%p79_p3), [#allocation3], %s894_s26 }
   0xf   : > { %v300_v0 = vld [vmem:[%s1138_s29] sm:$0xff] (%p79_p3)  ;;  %v302_v1 = vld [vmem:[%s1138_s29 + $0x10] sm:$0xff] (%p79_p3) }
  0x10   : > { %v304_v2 = vld [vmem:[%s1138_s29 + $0x20] sm:$0xff] (%p79_p3)  ;;  %301 = vst [vmem:[%s1143_s30] sm:$0xff] (%p79_p3), %v300_v0  ;;  %303 = vst [vmem:[%s1143_s30 + $0x8] sm:$0xff] (%p79_p3), %v302_v1  ;;  %v306_v3 = vld [vmem:[%s1138_s29 + $0x30] sm:$0xff] (%p79_p3) }
  0x11   : > { %305 = vst [vmem:[%s1143_s30 + $0x10] sm:$0xff] %v304_v2  ;;  %v308_v4 = vld [vmem:[%s1138_s29 + $0x40] sm:$0xff]  ;;  %v310_v5 = vld [vmem:[%s1138_s29 + $0x50] sm:$0xff]  ;;  %307 = vst [vmem:[%s1143_s30 + $0x18] sm:$0xff] %v306_v3 }
  0x12   : > { %309 = vst [vmem:[%s1143_s30 + $0x20] sm:$0xff] %v308_v4  ;;  %311 = vst [vmem:[%s1143_s30 + $0x28] sm:$0xff] %v310_v5  ;;  %v312_v6 = vld [vmem:[%s1138_s29 + $0x60] sm:$0xff]  ;;  %v314_v7 = vld [vmem:[%s1138_s29 + $0x70] sm:$0xff] }
  0x13   : > { %v316_v8 = vld [vmem:[%s1138_s29 + $0x80] sm:$0xff]  ;;  %313 = vst [vmem:[%s1143_s30 + $0x30] sm:$0xff] %v312_v6  ;;  %315 = vst [vmem:[%s1143_s30 + $0x38] sm:$0xff] %v314_v7  ;;  %v318_v9 = vld [vmem:[%s1138_s29 + $0x90] sm:$0xff] }
  0x14   : > { %317 = vst [vmem:[%s1143_s30 + $0x40] sm:$0xff] %v316_v8  ;;  %v320_v10 = vld [vmem:[%s1138_s29 + $0xa0] sm:$0xff]  ;;  %v322_v11 = vld [vmem:[%s1138_s29 + $0xb0] sm:$0xff]  ;;  %319 = vst [vmem:[%s1143_s30 + $0x48] sm:$0xff] %v318_v9 }
  0x15   : > { %321 = vst [vmem:[%s1143_s30 + $0x50] sm:$0xff] %v320_v10  ;;  %323 = vst [vmem:[%s1143_s30 + $0x58] sm:$0xff] %v322_v11  ;;  %v324_v12 = vld [vmem:[%s1138_s29 + $0xc0] sm:$0xff]  ;;  %v326_v13 = vld [vmem:[%s1138_s29 + $0xd0] sm:$0xff] }
  0x16   : > { %v328_v14 = vld [vmem:[%s1138_s29 + $0xe0] sm:$0xff]  ;;  %325 = vst [vmem:[%s1143_s30 + $0x60] sm:$0xff] %v324_v12  ;;  %327 = vst [vmem:[%s1143_s30 + $0x68] sm:$0xff] %v326_v13  ;;  %v330_v15 = vld [vmem:[%s1138_s29 + $0xf0] sm:$0xff] }
  0x17   : > { %329 = vst [vmem:[%s1143_s30 + $0x70] sm:$0xff] %v328_v14  ;;  %v332_v16 = vld [vmem:[%s1138_s29 + $0x100] sm:$0xff]  ;;  %v334_v17 = vld [vmem:[%s1138_s29 + $0x110] sm:$0xff]  ;;  %331 = vst [vmem:[%s1143_s30 + $0x78] sm:$0xff] %v330_v15 }
  0x18   : > { %333 = vst [vmem:[%s1143_s30 + $0x80] sm:$0xff] %v332_v16  ;;  %335 = vst [vmem:[%s1143_s30 + $0x88] sm:$0xff] %v334_v17  ;;  %v336_v18 = vld [vmem:[%s1138_s29 + $0x120] sm:$0xff]  ;;  %v338_v19 = vld [vmem:[%s1138_s29 + $0x130] sm:$0xff] }
  0x19   : > { %v340_v20 = vld [vmem:[%s1138_s29 + $0x140] sm:$0xff]  ;;  %337 = vst [vmem:[%s1143_s30 + $0x90] sm:$0xff] %v336_v18  ;;  %339 = vst [vmem:[%s1143_s30 + $0x98] sm:$0xff] %v338_v19  ;;  %v342_v21 = vld [vmem:[%s1138_s29 + $0x150] sm:$0xff] }
  0x1a   : > { %341 = vst [vmem:[%s1143_s30 + $0xa0] sm:$0xff] %v340_v20  ;;  %v344_v22 = vld [vmem:[%s1138_s29 + $0x160] sm:$0xff]  ;;  %v346_v23 = vld [vmem:[%s1138_s29 + $0x170] sm:$0xff]  ;;  %343 = vst [vmem:[%s1143_s30 + $0xa8] sm:$0xff] %v342_v21 }
  0x1b   : > { %345 = vst [vmem:[%s1143_s30 + $0xb0] sm:$0xff] %v344_v22  ;;  %347 = vst [vmem:[%s1143_s30 + $0xb8] sm:$0xff] %v346_v23  ;;  %v348_v24 = vld [vmem:[%s1138_s29 + $0x180] sm:$0xff]  ;;  %v350_v25 = vld [vmem:[%s1138_s29 + $0x190] sm:$0xff] }
  0x1c   : > { %v352_v26 = vld [vmem:[%s1138_s29 + $0x1a0] sm:$0xff]  ;;  %349 = vst [vmem:[%s1143_s30 + $0xc0] sm:$0xff] %v348_v24  ;;  %351 = vst [vmem:[%s1143_s30 + $0xc8] sm:$0xff] %v350_v25  ;;  %v354_v27 = vld [vmem:[%s1138_s29 + $0x1b0] sm:$0xff] }
  0x1d   : > { %353 = vst [vmem:[%s1143_s30 + $0xd0] sm:$0xff] %v352_v26  ;;  %v356_v28 = vld [vmem:[%s1138_s29 + $0x1c0] sm:$0xff]  ;;  %v358_v29 = vld [vmem:[%s1138_s29 + $0x1d0] sm:$0xff]  ;;  %355 = vst [vmem:[%s1143_s30 + $0xd8] sm:$0xff] %v354_v27 }
  0x1e   : > { %357 = vst [vmem:[%s1143_s30 + $0xe0] sm:$0xff] %v356_v28  ;;  %359 = vst [vmem:[%s1143_s30 + $0xe8] sm:$0xff] %v358_v29  ;;  %v360_v30 = vld [vmem:[%s1138_s29 + $0x1e0] sm:$0xff]  ;;  %v362_v31 = vld [vmem:[%s1138_s29 + $0x1f0] sm:$0xff] }
  0x1f   : > { %361 = vst [vmem:[%s1143_s30 + $0xf0] sm:$0xff] %v360_v30  ;;  %363 = vst [vmem:[%s1143_s30 + $0xf8] sm:$0xff] %v362_v31 }
  0x20 PF: > { %p897_p6 = scmp.ge.s32.totalorder %s1068_s19, 1  ;;  %p384_p7 = scmp.lt.s32.totalorder %s1068_s19, 3 }
  0x22   : > { %p385_p8 = pnand %p897_p6, %p384_p7 }
  0x23   : > { %s391_s5 = sand.u32 (!%p385_p8), 1, %s1052_s15   ;;  %s899_s10 = sshll.u32 (!%p385_p8), %s1060_s17, 1 }
  0x24   : > { %388 = sbr.rel (%p385_p8) target bundleno = 306 (0x132), region = 70  ;;  %s898_s8 = sshll.u32 (!%p385_p8), %s391_s5, 8 }
  0x25   : > { %s1216_s9 = scalar_lea.vmem (!%p385_p8), [#allocation3], %s898_s8  ;;  %p450_p9 = scmp.lt.s32.totalorder (!%p385_p8), %s899_s10, 3 }
  0x29   : > { %v1212_v32 = vld [vmem:[%s1277_s0] sm:$0xff]  ;;  %v980_v34 = vld [vmem:[%s1216_s9 + $0x74] ss:$8 sps:$4 sm:$0xff]   ;;  %v982_v35 = vld [vmem:[%s1216_s9 + $0x70] ss:$8 sps:$4 sm:$0xff]   ;;  %v729_v3 = vlaneseq  ;;  %s1289_s10 = smov (!%p450_p9, %s899_s10), 3 }
  0x2a   : > { %v904_v33 = vcombine.high %v1212_v32, %v1212_v32  ;;  %677 = vmatprep.subr.bf16.mxu0 %v980_v34  ;;  %v983_v36 = vld [vmem:[%s1216_s9 + $0x64] ss:$8 sps:$4 sm:$0xff]   ;;  %v985_v37 = vld [vmem:[%s1216_s9 + $0x60] ss:$8 sps:$4 sm:$0xff]   ;;  %v986_v38 = vld [vmem:[%s1216_s9 + $0x54] ss:$8 sps:$4 sm:$0xff]   ;;  %v903_v2 = vcombine.low %v1212_v32, %v1212_v32  ;;  %s452_s13 = scalar_lea.vmem %s1279_s2, %s1289_s10  ;;  %s457_s21 = scalar_lea.vmem %s1280_s3, %s1289_s10 }
  0x2b   : > { %678 = vmatpush1.bf16.msra.mxu0 %v982_v35  ;;  %v988_v39 = vld [vmem:[%s1216_s9 + $0x50] ss:$8 sps:$4 sm:$0xff]   ;;  %v989_v40 = vld [vmem:[%s1216_s9 + $0x44] ss:$8 sps:$4 sm:$0xff]   ;;  %v991_v41 = vld [vmem:[%s1216_s9 + $0x40] ss:$8 sps:$4 sm:$0xff]  }
  0x2c   : > { %709 = vmatprep.mubr.bf16.mxu0 %v904_v33  ;;  %679 = vmatprep.subr.bf16.mxu0 %v983_v36  ;;  %v992_v42 = vld [vmem:[%s1216_s9 + $0x34] ss:$8 sps:$4 sm:$0xff]   ;;  %v994_v43 = vld [vmem:[%s1216_s9 + $0x30] ss:$8 sps:$4 sm:$0xff]   ;;  %v995_v44 = vld [vmem:[%s1216_s9 + $0x24] ss:$8 sps:$4 sm:$0xff]  }
  0x2d   : > { %v997_v45 = vld [vmem:[%s1216_s9 + $0x20] ss:$8 sps:$4 sm:$0xff]   ;;  %v998_v46 = vld [vmem:[%s1216_s9 + $0x14] ss:$8 sps:$4 sm:$0xff]   ;;  %v1000_v47 = vld [vmem:[%s1216_s9 + $0x10] ss:$8 sps:$4 sm:$0xff]  }
  0x2e   : > { %v1001_v48 = vld [vmem:[%s1216_s9 + $0x4] ss:$8 sps:$4 sm:$0xff]   ;;  %v1003_v49 = vld [vmem:[%s1216_s9] ss:$8 sps:$4 sm:$0xff]   ;;  %v1004_v50 = vld [vmem:[%s1216_s9 + $0xf4] ss:$8 sps:$4 sm:$0xff]  }
  0x2f   : > { %680 = vmatpush1.bf16.msra.mxu0 %v985_v37  ;;  %v1006_v51 = vld [vmem:[%s1216_s9 + $0xf0] ss:$8 sps:$4 sm:$0xff]   ;;  %v1007_v52 = vld [vmem:[%s1216_s9 + $0xe4] ss:$8 sps:$4 sm:$0xff]   ;;  %v1009_v53 = vld [vmem:[%s1216_s9 + $0xe0] ss:$8 sps:$4 sm:$0xff]  }
  0x30   : > { %681 = vmatprep.subr.bf16.mxu0 %v986_v38  ;;  %v1010_v54 = vld [vmem:[%s1216_s9 + $0xd4] ss:$8 sps:$4 sm:$0xff]   ;;  %v1012_v55 = vld [vmem:[%s1216_s9 + $0xd0] ss:$8 sps:$4 sm:$0xff]   ;;  %v1013_v56 = vld [vmem:[%s1216_s9 + $0xc4] ss:$8 sps:$4 sm:$0xff]  }
  0x31   : > { %v1015_v57 = vld [vmem:[%s1216_s9 + $0xc0] ss:$8 sps:$4 sm:$0xff]   ;;  %v1016_v58 = vld [vmem:[%s1216_s9 + $0xb4] ss:$8 sps:$4 sm:$0xff]   ;;  %v1018_v59 = vld [vmem:[%s1216_s9 + $0xb0] ss:$8 sps:$4 sm:$0xff]  }
  0x32   : > { %v1019_v60 = vld [vmem:[%s1216_s9 + $0xa4] ss:$8 sps:$4 sm:$0xff]   ;;  %v1021_v61 = vld [vmem:[%s1216_s9 + $0xa0] ss:$8 sps:$4 sm:$0xff]   ;;  %v1022_v62 = vld [vmem:[%s1216_s9 + $0x94] ss:$8 sps:$4 sm:$0xff]  }
  0x33   : > { %682 = vmatpush1.bf16.msra.mxu0 %v988_v39  ;;  %v1024_v63 = vld [vmem:[%s1216_s9 + $0x90] ss:$8 sps:$4 sm:$0xff]   ;;  %v1025_v0 = vld [vmem:[%s1216_s9 + $0x84] ss:$8 sps:$4 sm:$0xff]   ;;  %v1027_v1 = vld [vmem:[%s1216_s9 + $0x80] ss:$8 sps:$4 sm:$0xff]  }
  0x34   : > { %683 = vmatprep.subr.bf16.mxu0 %v989_v40  ;;  %v730_v4 = vshrl.u32 %v729_v3, 7  ;;  %v727_v6 = vld [vmem:[%s452_s13] sm:$0x3]  ;;  %s902_s22 = sshll.u32 %s1289_s10, 3 }
  0x35   : > { %v741_v8 = vld [vmem:[%s457_s21] sm:$0x3]  ;;  %s467_s25 = scalar_lea.vmem %s1281_s4, %s902_s22 }
  0x36   : > { %v731_v5 = vsub.s32 0, %v730_v4  ;;  %v735_v7 = vsub.s32 1, %v730_v4 }
  0x37   : > { %684 = vmatpush1.bf16.msra.mxu0 %v991_v41 }
  0x38   : > { %685 = vmatprep.subr.bf16.mxu0 %v992_v42  ;;  %v732_v9 = vrot.slane %v727_v6, %v731_v5  ;;  %v746_v10 = vrot.slane %v741_v8, %v731_v5  ;;  %v736_v11 = vrot.slane %v727_v6, %v735_v7  ;;  %v750_v14 = vrot.slane %v741_v8, %v735_v7 }
  0x3b   : > { %686 = vmatpush1.bf16.msra.mxu0 %v994_v43 }
  0x3c   : > { %687 = vmatprep.subr.bf16.mxu0 %v995_v44 }
  0x3f   : > { %688 = vmatpush1.bf16.msra.mxu0 %v997_v45 }
  0x40   : > { %689 = vmatprep.subr.bf16.mxu0 %v998_v46 }
  0x43   : > { %690 = vmatpush1.bf16.msra.mxu0 %v1000_v47 }
  0x44   : > { %691 = vmatprep.subr.bf16.mxu0 %v1001_v48 }
  0x47   : > { %692 = vmatpush1.bf16.msra.mxu0 %v1003_v49 }
  0x48   : > { %693 = vmatprep.subr.bf16.mxu0 %v1004_v50 }
  0x4b   : > { %694 = vmatpush2.bf16.msra.mxu0 %v1006_v51 }
  0x4c   : > { %695 = vmatprep.subr.bf16.mxu0 %v1007_v52 }
  0x4f   : > { %696 = vmatpush2.bf16.msra.mxu0 %v1009_v53 }
  0x50   : > { %697 = vmatprep.subr.bf16.mxu0 %v1010_v54 }
  0x53   : > { %698 = vmatpush2.bf16.msra.mxu0 %v1012_v55 }
  0x54   : > { %699 = vmatprep.subr.bf16.mxu0 %v1013_v56 }
  0x57   : > { %700 = vmatpush2.bf16.msra.mxu0 %v1015_v57 }
  0x58   : > { %701 = vmatprep.subr.bf16.mxu0 %v1016_v58 }
  0x5b   : > { %702 = vmatpush2.bf16.msra.mxu0 %v1018_v59 }
  0x5c   : > { %703 = vmatprep.subr.bf16.mxu0 %v1019_v60 }
  0x5f   : > { %704 = vmatpush2.bf16.msra.mxu0 %v1021_v61 }
  0x60   : > { %705 = vmatprep.subr.bf16.mxu0 %v1022_v62 }
  0x63   : > { %706 = vmatpush2.bf16.msra.mxu0 %v1024_v63 }
  0x64   : > { %707 = vmatprep.subr.bf16.mxu0 %v1025_v0 }
  0x67   : > { %708 = vmatpush2.bf16.msra.mxu0 %v1027_v1 }
  0x6a   : > { %710 = vmatmul.mubr.bf16.vlgmr.msra.gmra.mxu0 %v903_v2 }
 0x12a   : > { %v711_v12 = vpop.f32.mrf.mxu0 }
 0x12b   : > { %v739_v13 = vmul.f32 %v732_v9, %v711_v12 }
 0x12c   : > { %v713_v15 = vpop.f32.mrf.mxu0 }
 0x12d   : > { %v753_v16 = vadd.f32 %v746_v10, %v739_v13  ;;  %v740_v17 = vmul.f32 %v736_v11, %v713_v15 }
 0x12e   : > { %v715_v18 = vpop.f32.mrf.mxu0 }
 0x12f   : > { %755 = vst [vmem:[%s467_s25] sm:$0xff] %v753_v16  ;;  %v754_v19 = vadd.f32 %v750_v14, %v740_v17 }
 0x130   : > { %v716_v20 = vpop.f32.mrf.mxu0 }
 0x131   : > { %756 = vst [vmem:[%s467_s25 + $0x8] sm:$0xff] %v754_v19 }
 0x132 PF: > { %s14_s19 = sadd.s32 1, %s1068_s19   ;;  %s1282_s15 = smov %s1056_s16 }
 0x133   : > { %p11_p10 = scmp.ge.s32.totalorder %s14_s19, 4   ;;  %s1283_s16 = smov %s1130_s23 }
 0x134   : > { %s1284_s17 = smov %s1064_s18  ;;  %s1285_s18 = smov %s1287_s20 }
 0x135   :  { %13 = sbr.rel (!%p11_p10) target bundleno = 3 (0x3), region = 126 }

// kernel: _lambda_.38
= control target key start
LH: loop header
LB: loop body
LE: loop exit
PB: predicated region body
PF: predicated region fallthrough
CT: control target
= control target key end

     0   :  { %s1682_s18 = smov 0   ;;  %s1684_s19 = smov 0   ;;  %s2010_s0 = inlined_call_operand.vmem [shape: bf16[8,4608], index: 0, kind: input, shape index: {}]   ;;  %s2011_s1 = inlined_call_operand.vmem [shape: bf16[4608,512], index: 1, kind: input, shape index: {}]   ;;  %s2012_s2 = inlined_call_operand.vmem [shape: f32[1,512], index: 2, kind: input, shape index: {}]   ;;  %s2013_s3 = inlined_call_operand.vmem [shape: f32[1,512], index: 3, kind: input, shape index: {}]   ;;  %s2014_s4 = inlined_call_operand.vmem [shape: f32[8,512], index: 4, kind: input, shape index: {}]   ;;  %s2015_s5 = inlined_call_operand.vmem [shape: f32[8,512], index: 5, kind: output, shape index: {}]  }
   0x1   :  { %s1686_s20 = smov 0   ;;  %s1688_s21 = smov 0  }
   0x2   :  { %s1690_s22 = smov 0   ;;  %s1692_s23 = smov 0  }
   0x3   :  { %s1694_s24 = smov 0  }
   0x4 LB: > { %s27_s25 = sadd.s32 1, %s1641_s22  ;;  %s30_s26 = sadd.s32 1, %s1645_s23  ;;  %s1649_s24 = sphi %s1694_s24, %s15_s24   ;;  %s1645_s23 = sphi %s1692_s23, %s2021_s23   ;;  %s1641_s22 = sphi %s1690_s22, %s2020_s22   ;;  %s1637_s21 = sphi %s1688_s21, %s2019_s21   ;;  %s1633_s20 = sphi %s1686_s20, %s2018_s20   ;;  %s1629_s19 = sphi %s1684_s19, %s2017_s19   ;;  %s1625_s18 = sphi %s1682_s18, %s2016_s18  }
   0x5   : > { %p28_p0 = scmp.ge.s32.totalorder %s27_s25, 9  ;;  %p78_p1 = scmp.ne.s32.totalorder %s1629_s19, %s1625_s18 }
   0x6   : > { %p79_p2 = scmp.eq.s32.totalorder %s1649_s24, 0  ;;  %s71_s30 = sadd.s32 1, %s1629_s19 }
   0x7   : > { %s2023_s25 = smov (%p28_p0, %s27_s25), 0  ;;  %s2025_s26 = smov (!%p28_p0, %s30_s26), %s1645_s23 }
   0x8   : > { %p80_p3 = por %p79_p2, %p78_p1  ;;  %p32_p4 = scmp.ge.s32.totalorder %s2025_s26, 2 }
   0x9   : > { %s66_s27 = ssub.s32 %s1641_s22, %s2023_s25  ;;  %p1349_p6 = scmp.ge.s32.totalorder %s1649_s24, 18 }
   0xa   : > { %s2027_s26 = smov (%p32_p4, %s2025_s26), 0 }
   0xb   : > { %s67_s28 = ssub.s32 %s1645_s23, %s2027_s26  ;;  %212 = sbr.rel (%p1349_p6) target bundleno = 55 (0x37), region = 16 }
   0xc   : > { %s68_s29 = sor.u32 %s67_s28, %s66_s27 }
   0xd   : > { %p69_p5 = scmp.eq.s32.totalorder %s68_s29, 0 }
   0xf   : > { %s1733_s6 = scalar_select %p69_p5, %s1629_s19, %s71_s30  }
  0x10   : > { %228 = sbr.rel (!%p80_p3) target bundleno = 55 (0x37), region = 24  ;;  %s230_s7 = sand.u32 (%p80_p3), 1, %s1629_s19  }
  0x11   : > { %s1352_s8 = sshll.u32 (%p80_p3), %s1645_s23, 1  ;;  %s1350_s9 = sshll.u32 (%p80_p3), %s230_s7, 9 }
  0x12   : > { %s1437_s10 = sshll.u32 (%p80_p3), %s1641_s22, 8  ;;  %s1747_s16 = scalar_lea.vmem (%p80_p3), [#allocation3], %s1350_s9 }
  0x13   : > { %s236_s11 = sadd.s32 (%p80_p3), %s1437_s10, %s1352_s8 }
  0x14   : > { %s1354_s12 = sshll.u32 (%p80_p3), %s236_s11, 2 }
  0x15   : > { %s1742_s15 = scalar_lea.vmem %s2011_s1, %s1354_s12 }
  0x16   : > { %v393_v0 = vld [vmem:[%s1742_s15] sm:$0xff]  ;;  %v395_v1 = vld [vmem:[%s1742_s15 + $0x10] sm:$0xff] }
  0x17   : > { %v397_v2 = vld [vmem:[%s1742_s15 + $0x20] sm:$0xff]  ;;  %394 = vst [vmem:[%s1747_s16] sm:$0xff] %v393_v0  ;;  %396 = vst [vmem:[%s1747_s16 + $0x8] sm:$0xff] %v395_v1  ;;  %v399_v3 = vld [vmem:[%s1742_s15 + $0x30] sm:$0xff] }
  0x18   : > { %398 = vst [vmem:[%s1747_s16 + $0x10] sm:$0xff] %v397_v2  ;;  %v401_v4 = vld [vmem:[%s1742_s15 + $0x40] sm:$0xff]  ;;  %v403_v5 = vld [vmem:[%s1742_s15 + $0x50] sm:$0xff]  ;;  %400 = vst [vmem:[%s1747_s16 + $0x18] sm:$0xff] %v399_v3 }
  0x19   : > { %402 = vst [vmem:[%s1747_s16 + $0x20] sm:$0xff] %v401_v4  ;;  %404 = vst [vmem:[%s1747_s16 + $0x28] sm:$0xff] %v403_v5  ;;  %v405_v6 = vld [vmem:[%s1742_s15 + $0x60] sm:$0xff]  ;;  %v407_v7 = vld [vmem:[%s1742_s15 + $0x70] sm:$0xff] }
  0x1a   : > { %v409_v8 = vld [vmem:[%s1742_s15 + $0x80] sm:$0xff]  ;;  %406 = vst [vmem:[%s1747_s16 + $0x30] sm:$0xff] %v405_v6  ;;  %408 = vst [vmem:[%s1747_s16 + $0x38] sm:$0xff] %v407_v7  ;;  %v411_v9 = vld [vmem:[%s1742_s15 + $0x90] sm:$0xff] }
  0x1b   : > { %410 = vst [vmem:[%s1747_s16 + $0x40] sm:$0xff] %v409_v8  ;;  %v413_v10 = vld [vmem:[%s1742_s15 + $0xa0] sm:$0xff]  ;;  %v415_v11 = vld [vmem:[%s1742_s15 + $0xb0] sm:$0xff]  ;;  %412 = vst [vmem:[%s1747_s16 + $0x48] sm:$0xff] %v411_v9 }
  0x1c   : > { %414 = vst [vmem:[%s1747_s16 + $0x50] sm:$0xff] %v413_v10  ;;  %416 = vst [vmem:[%s1747_s16 + $0x58] sm:$0xff] %v415_v11  ;;  %v417_v12 = vld [vmem:[%s1742_s15 + $0xc0] sm:$0xff]  ;;  %v419_v13 = vld [vmem:[%s1742_s15 + $0xd0] sm:$0xff] }
  0x1d   : > { %v421_v14 = vld [vmem:[%s1742_s15 + $0xe0] sm:$0xff]  ;;  %418 = vst [vmem:[%s1747_s16 + $0x60] sm:$0xff] %v417_v12  ;;  %420 = vst [vmem:[%s1747_s16 + $0x68] sm:$0xff] %v419_v13  ;;  %v423_v15 = vld [vmem:[%s1742_s15 + $0xf0] sm:$0xff] }
  0x1e   : > { %422 = vst [vmem:[%s1747_s16 + $0x70] sm:$0xff] %v421_v14  ;;  %v425_v16 = vld [vmem:[%s1742_s15 + $0x100] sm:$0xff]  ;;  %v427_v17 = vld [vmem:[%s1742_s15 + $0x110] sm:$0xff]  ;;  %424 = vst [vmem:[%s1747_s16 + $0x78] sm:$0xff] %v423_v15 }
  0x1f   : > { %426 = vst [vmem:[%s1747_s16 + $0x80] sm:$0xff] %v425_v16  ;;  %428 = vst [vmem:[%s1747_s16 + $0x88] sm:$0xff] %v427_v17  ;;  %v429_v18 = vld [vmem:[%s1742_s15 + $0x120] sm:$0xff]  ;;  %v431_v19 = vld [vmem:[%s1742_s15 + $0x130] sm:$0xff] }
  0x20   : > { %v433_v20 = vld [vmem:[%s1742_s15 + $0x140] sm:$0xff]  ;;  %430 = vst [vmem:[%s1747_s16 + $0x90] sm:$0xff] %v429_v18  ;;  %432 = vst [vmem:[%s1747_s16 + $0x98] sm:$0xff] %v431_v19  ;;  %v435_v21 = vld [vmem:[%s1742_s15 + $0x150] sm:$0xff] }
  0x21   : > { %434 = vst [vmem:[%s1747_s16 + $0xa0] sm:$0xff] %v433_v20  ;;  %v437_v22 = vld [vmem:[%s1742_s15 + $0x160] sm:$0xff]  ;;  %v439_v23 = vld [vmem:[%s1742_s15 + $0x170] sm:$0xff]  ;;  %436 = vst [vmem:[%s1747_s16 + $0xa8] sm:$0xff] %v435_v21 }
  0x22   : > { %438 = vst [vmem:[%s1747_s16 + $0xb0] sm:$0xff] %v437_v22  ;;  %440 = vst [vmem:[%s1747_s16 + $0xb8] sm:$0xff] %v439_v23  ;;  %v441_v24 = vld [vmem:[%s1742_s15 + $0x180] sm:$0xff]  ;;  %v443_v25 = vld [vmem:[%s1742_s15 + $0x190] sm:$0xff] }
  0x23   : > { %v445_v26 = vld [vmem:[%s1742_s15 + $0x1a0] sm:$0xff]  ;;  %442 = vst [vmem:[%s1747_s16 + $0xc0] sm:$0xff] %v441_v24  ;;  %444 = vst [vmem:[%s1747_s16 + $0xc8] sm:$0xff] %v443_v25  ;;  %v447_v27 = vld [vmem:[%s1742_s15 + $0x1b0] sm:$0xff] }
  0x24   : > { %446 = vst [vmem:[%s1747_s16 + $0xd0] sm:$0xff] %v445_v26  ;;  %v449_v28 = vld [vmem:[%s1742_s15 + $0x1c0] sm:$0xff]  ;;  %v451_v29 = vld [vmem:[%s1742_s15 + $0x1d0] sm:$0xff]  ;;  %448 = vst [vmem:[%s1747_s16 + $0xd8] sm:$0xff] %v447_v27 }
  0x25   : > { %450 = vst [vmem:[%s1747_s16 + $0xe0] sm:$0xff] %v449_v28  ;;  %452 = vst [vmem:[%s1747_s16 + $0xe8] sm:$0xff] %v451_v29  ;;  %v453_v30 = vld [vmem:[%s1742_s15 + $0x1e0] sm:$0xff]  ;;  %v455_v31 = vld [vmem:[%s1742_s15 + $0x1f0] sm:$0xff] }
  0x26   : > { %v457_v32 = vld [vmem:[%s1742_s15 + $0x200] sm:$0xff]  ;;  %454 = vst [vmem:[%s1747_s16 + $0xf0] sm:$0xff] %v453_v30  ;;  %456 = vst [vmem:[%s1747_s16 + $0xf8] sm:$0xff] %v455_v31  ;;  %v459_v33 = vld [vmem:[%s1742_s15 + $0x210] sm:$0xff] }
  0x27   : > { %458 = vst [vmem:[%s1747_s16 + $0x100] sm:$0xff] %v457_v32  ;;  %v461_v34 = vld [vmem:[%s1742_s15 + $0x220] sm:$0xff]  ;;  %v463_v35 = vld [vmem:[%s1742_s15 + $0x230] sm:$0xff]  ;;  %460 = vst [vmem:[%s1747_s16 + $0x108] sm:$0xff] %v459_v33 }
  0x28   : > { %462 = vst [vmem:[%s1747_s16 + $0x110] sm:$0xff] %v461_v34  ;;  %464 = vst [vmem:[%s1747_s16 + $0x118] sm:$0xff] %v463_v35  ;;  %v465_v36 = vld [vmem:[%s1742_s15 + $0x240] sm:$0xff]  ;;  %v467_v37 = vld [vmem:[%s1742_s15 + $0x250] sm:$0xff] }
  0x29   : > { %v469_v38 = vld [vmem:[%s1742_s15 + $0x260] sm:$0xff]  ;;  %466 = vst [vmem:[%s1747_s16 + $0x120] sm:$0xff] %v465_v36  ;;  %468 = vst [vmem:[%s1747_s16 + $0x128] sm:$0xff] %v467_v37  ;;  %v471_v39 = vld [vmem:[%s1742_s15 + $0x270] sm:$0xff] }
  0x2a   : > { %470 = vst [vmem:[%s1747_s16 + $0x130] sm:$0xff] %v469_v38  ;;  %v473_v40 = vld [vmem:[%s1742_s15 + $0x280] sm:$0xff]  ;;  %v475_v41 = vld [vmem:[%s1742_s15 + $0x290] sm:$0xff]  ;;  %472 = vst [vmem:[%s1747_s16 + $0x138] sm:$0xff] %v471_v39 }
  0x2b   : > { %474 = vst [vmem:[%s1747_s16 + $0x140] sm:$0xff] %v473_v40  ;;  %476 = vst [vmem:[%s1747_s16 + $0x148] sm:$0xff] %v475_v41  ;;  %v477_v42 = vld [vmem:[%s1742_s15 + $0x2a0] sm:$0xff]  ;;  %v479_v43 = vld [vmem:[%s1742_s15 + $0x2b0] sm:$0xff] }
  0x2c   : > { %v481_v44 = vld [vmem:[%s1742_s15 + $0x2c0] sm:$0xff]  ;;  %478 = vst [vmem:[%s1747_s16 + $0x150] sm:$0xff] %v477_v42  ;;  %480 = vst [vmem:[%s1747_s16 + $0x158] sm:$0xff] %v479_v43  ;;  %v483_v45 = vld [vmem:[%s1742_s15 + $0x2d0] sm:$0xff] }
  0x2d   : > { %482 = vst [vmem:[%s1747_s16 + $0x160] sm:$0xff] %v481_v44  ;;  %v485_v46 = vld [vmem:[%s1742_s15 + $0x2e0] sm:$0xff]  ;;  %v487_v47 = vld [vmem:[%s1742_s15 + $0x2f0] sm:$0xff]  ;;  %484 = vst [vmem:[%s1747_s16 + $0x168] sm:$0xff] %v483_v45 }
  0x2e   : > { %486 = vst [vmem:[%s1747_s16 + $0x170] sm:$0xff] %v485_v46  ;;  %488 = vst [vmem:[%s1747_s16 + $0x178] sm:$0xff] %v487_v47  ;;  %v489_v48 = vld [vmem:[%s1742_s15 + $0x300] sm:$0xff]  ;;  %v491_v49 = vld [vmem:[%s1742_s15 + $0x310] sm:$0xff] }
  0x2f   : > { %v493_v50 = vld [vmem:[%s1742_s15 + $0x320] sm:$0xff]  ;;  %490 = vst [vmem:[%s1747_s16 + $0x180] sm:$0xff] %v489_v48  ;;  %492 = vst [vmem:[%s1747_s16 + $0x188] sm:$0xff] %v491_v49  ;;  %v495_v51 = vld [vmem:[%s1742_s15 + $0x330] sm:$0xff] }
  0x30   : > { %494 = vst [vmem:[%s1747_s16 + $0x190] sm:$0xff] %v493_v50  ;;  %v497_v52 = vld [vmem:[%s1742_s15 + $0x340] sm:$0xff]  ;;  %v499_v53 = vld [vmem:[%s1742_s15 + $0x350] sm:$0xff]  ;;  %496 = vst [vmem:[%s1747_s16 + $0x198] sm:$0xff] %v495_v51 }
  0x31   : > { %498 = vst [vmem:[%s1747_s16 + $0x1a0] sm:$0xff] %v497_v52  ;;  %500 = vst [vmem:[%s1747_s16 + $0x1a8] sm:$0xff] %v499_v53  ;;  %v501_v54 = vld [vmem:[%s1742_s15 + $0x360] sm:$0xff]  ;;  %v503_v55 = vld [vmem:[%s1742_s15 + $0x370] sm:$0xff] }
  0x32   : > { %v505_v56 = vld [vmem:[%s1742_s15 + $0x380] sm:$0xff]  ;;  %502 = vst [vmem:[%s1747_s16 + $0x1b0] sm:$0xff] %v501_v54  ;;  %504 = vst [vmem:[%s1747_s16 + $0x1b8] sm:$0xff] %v503_v55  ;;  %v507_v57 = vld [vmem:[%s1742_s15 + $0x390] sm:$0xff] }
  0x33   : > { %506 = vst [vmem:[%s1747_s16 + $0x1c0] sm:$0xff] %v505_v56  ;;  %v509_v58 = vld [vmem:[%s1742_s15 + $0x3a0] sm:$0xff]  ;;  %v511_v59 = vld [vmem:[%s1742_s15 + $0x3b0] sm:$0xff]  ;;  %508 = vst [vmem:[%s1747_s16 + $0x1c8] sm:$0xff] %v507_v57 }
  0x34   : > { %510 = vst [vmem:[%s1747_s16 + $0x1d0] sm:$0xff] %v509_v58  ;;  %512 = vst [vmem:[%s1747_s16 + $0x1d8] sm:$0xff] %v511_v59  ;;  %v513_v60 = vld [vmem:[%s1742_s15 + $0x3c0] sm:$0xff]  ;;  %v515_v61 = vld [vmem:[%s1742_s15 + $0x3d0] sm:$0xff] }
  0x35   : > { %v517_v62 = vld [vmem:[%s1742_s15 + $0x3e0] sm:$0xff]  ;;  %514 = vst [vmem:[%s1747_s16 + $0x1e0] sm:$0xff] %v513_v60  ;;  %516 = vst [vmem:[%s1747_s16 + $0x1e8] sm:$0xff] %v515_v61  ;;  %v519_v63 = vld [vmem:[%s1742_s15 + $0x3f0] sm:$0xff] }
  0x36   : > { %518 = vst [vmem:[%s1747_s16 + $0x1f0] sm:$0xff] %v517_v62  ;;  %520 = vst [vmem:[%s1747_s16 + $0x1f8] sm:$0xff] %v519_v63 }
  0x37 PF: > { %p1355_p7 = scmp.ge.s32.totalorder %s1649_s24, 1  ;;  %p554_p8 = scmp.lt.s32.totalorder %s1649_s24, 19 }
  0x39   : > { %p555_p9 = pnand %p1355_p7, %p554_p8 }
  0x3a   : > { %s561_s17 = sand.u32 (!%p555_p9), 1, %s1625_s18   ;;  %s1357_s27 = sshll.u32 (!%p555_p9), %s1633_s20, 2 }
  0x3b   : > { %558 = sbr.rel (%p555_p9) target bundleno = 357 (0x165), region = 74  ;;  %s1356_s28 = sshll.u32 (!%p555_p9), %s561_s17, 9 }
  0x3c   : > { %p621_p10 = scmp.lt.s32.totalorder (!%p555_p9), %s1357_s27, 35  ;;  %s1359_s29 = sshll.u32 (!%p555_p9), %s1637_s21, 1 }
  0x3d   : > { %p631_p11 = scmp.lt.s32.totalorder (!%p555_p9), %s1359_s29, 3  ;;  %s1905_s8 = scalar_lea.vmem (!%p555_p9), [#allocation3], %s1356_s28 }
  0x3e   : > { %p1365_p12 = scmp.ne.s32.totalorder (!%p555_p9), %s1633_s20, 0 }
  0x40   : > { %s2029_s27 = smov (!%p621_p10, %s1357_s27), 35  ;;  %s2031_s29 = smov (!%p631_p11, %s1359_s29), 3 }
  0x41   : > { %s1358_s30 = sshll.u32 %s2029_s27, 2  ;;  %s633_s18 = scalar_lea.vmem %s2012_s2, %s2031_s29 }
  0x42   : > { %s1882_s9 = scalar_lea.vmem %s2010_s0, %s1358_s30  ;;  %s638_s21 = scalar_lea.vmem %s2013_s3, %s2031_s29 }
  0x43   : > { %s1362_s14 = sshll.u32 %s2031_s29, 3  ;;  %663 = sbr.rel (%p1365_p12) target bundleno = 74 (0x4a), region = 82 }
  0x44   : > { %s1898_s17 = scalar_lea.vmem %s2014_s4, %s1362_s14  ;;  %s1903_s7 = scalar_lea.vmem %s2015_s5, %s1362_s14 }
  0x48   : > { %v1651_v0 = vmov 0.0  }
  0x49   : > { %664 = vst [vmem:[#allocation2] sm:$0xff] %v1651_v0  ;;  %665 = vst [vmem:[#allocation2 + $0x8] sm:$0xff] %v1651_v0 }
  0x4a PF: > { %v1495_v1 = vld [vmem:[%s1905_s8 + $0x74] ss:$8 sps:$4 sm:$0xff]   ;;  %v1499_v3 = vld [vmem:[%s1905_s8 + $0x70] ss:$8 sps:$4 sm:$0xff]   ;;  %v1501_v5 = vld [vmem:[%s1905_s8 + $0x64] ss:$8 sps:$4 sm:$0xff]  }
  0x4b   : > { %v1497_v2 = vld [vmem:[%s1905_s8 + $0x174] ss:$8 sps:$4 sm:$0xff]   ;;  %1068 = vmatprep.subr.bf16.mxu0 %v1495_v1  ;;  %v1500_v4 = vld [vmem:[%s1905_s8 + $0x170] ss:$8 sps:$4 sm:$0xff]   ;;  %v1503_v6 = vld [vmem:[%s1905_s8 + $0x164] ss:$8 sps:$4 sm:$0xff]  }
  0x4c   : > { %1109 = vmatprep.subr.bf16.mxu1 %v1497_v2  ;;  %1069 = vmatpush1.bf16.msra.mxu0 %v1499_v3  ;;  %v1505_v7 = vld [vmem:[%s1905_s8 + $0x60] ss:$8 sps:$4 sm:$0xff]   ;;  %v1507_v9 = vld [vmem:[%s1905_s8 + $0x54] ss:$8 sps:$4 sm:$0xff]   ;;  %v1511_v11 = vld [vmem:[%s1905_s8 + $0x50] ss:$8 sps:$4 sm:$0xff]  }
  0x4d   : > { %1110 = vmatpush1.bf16.msra.mxu1 %v1500_v4  ;;  %1070 = vmatprep.subr.bf16.mxu0 %v1501_v5  ;;  %v1506_v8 = vld [vmem:[%s1905_s8 + $0x160] ss:$8 sps:$4 sm:$0xff]   ;;  %v1509_v10 = vld [vmem:[%s1905_s8 + $0x154] ss:$8 sps:$4 sm:$0xff]   ;;  %v1512_v12 = vld [vmem:[%s1905_s8 + $0x150] ss:$8 sps:$4 sm:$0xff]  }
  0x4e   : > { %1111 = vmatprep.subr.bf16.mxu1 %v1503_v6  ;;  %v1513_v13 = vld [vmem:[%s1905_s8 + $0x44] ss:$8 sps:$4 sm:$0xff]   ;;  %v1517_v15 = vld [vmem:[%s1905_s8 + $0x40] ss:$8 sps:$4 sm:$0xff]   ;;  %v1519_v17 = vld [vmem:[%s1905_s8 + $0x34] ss:$8 sps:$4 sm:$0xff]  }
  0x4f   : > { %v1515_v14 = vld [vmem:[%s1905_s8 + $0x144] ss:$8 sps:$4 sm:$0xff]   ;;  %v1518_v16 = vld [vmem:[%s1905_s8 + $0x140] ss:$8 sps:$4 sm:$0xff]   ;;  %v1521_v18 = vld [vmem:[%s1905_s8 + $0x134] ss:$8 sps:$4 sm:$0xff]  }
  0x50   : > { %1071 = vmatpush1.bf16.msra.mxu0 %v1505_v7  ;;  %v1523_v19 = vld [vmem:[%s1905_s8 + $0x30] ss:$8 sps:$4 sm:$0xff]   ;;  %v1525_v21 = vld [vmem:[%s1905_s8 + $0x24] ss:$8 sps:$4 sm:$0xff]   ;;  %v1529_v23 = vld [vmem:[%s1905_s8 + $0x20] ss:$8 sps:$4 sm:$0xff]  }
  0x51   : > { %1112 = vmatpush1.bf16.msra.mxu1 %v1506_v8  ;;  %1072 = vmatprep.subr.bf16.mxu0 %v1507_v9  ;;  %v1524_v20 = vld [vmem:[%s1905_s8 + $0x130] ss:$8 sps:$4 sm:$0xff]   ;;  %v1527_v22 = vld [vmem:[%s1905_s8 + $0x124] ss:$8 sps:$4 sm:$0xff]   ;;  %v1530_v24 = vld [vmem:[%s1905_s8 + $0x120] ss:$8 sps:$4 sm:$0xff]  }
  0x52   : > { %1113 = vmatprep.subr.bf16.mxu1 %v1509_v10  ;;  %v1531_v25 = vld [vmem:[%s1905_s8 + $0x14] ss:$8 sps:$4 sm:$0xff]   ;;  %v1535_v27 = vld [vmem:[%s1905_s8 + $0x10] ss:$8 sps:$4 sm:$0xff]   ;;  %v1537_v29 = vld [vmem:[%s1905_s8 + $0x4] ss:$8 sps:$4 sm:$0xff]  }
  0x53   : > { %v1533_v26 = vld [vmem:[%s1905_s8 + $0x114] ss:$8 sps:$4 sm:$0xff]   ;;  %v1536_v28 = vld [vmem:[%s1905_s8 + $0x110] ss:$8 sps:$4 sm:$0xff]   ;;  %v1539_v30 = vld [vmem:[%s1905_s8 + $0x104] ss:$8 sps:$4 sm:$0xff]  }
  0x54   : > { %1073 = vmatpush1.bf16.msra.mxu0 %v1511_v11  ;;  %v1541_v31 = vld [vmem:[%s1905_s8] ss:$8 sps:$4 sm:$0xff]   ;;  %v1543_v33 = vld [vmem:[%s1905_s8 + $0xf4] ss:$8 sps:$4 sm:$0xff]   ;;  %v1547_v35 = vld [vmem:[%s1905_s8 + $0xf0] ss:$8 sps:$4 sm:$0xff]  }
  0x55   : > { %1114 = vmatpush1.bf16.msra.mxu1 %v1512_v12  ;;  %1074 = vmatprep.subr.bf16.mxu0 %v1513_v13  ;;  %v1542_v32 = vld [vmem:[%s1905_s8 + $0x100] ss:$8 sps:$4 sm:$0xff]   ;;  %v1545_v34 = vld [vmem:[%s1905_s8 + $0x1f4] ss:$8 sps:$4 sm:$0xff]   ;;  %v1548_v36 = vld [vmem:[%s1905_s8 + $0x1f0] ss:$8 sps:$4 sm:$0xff]  }
  0x56   : > { %1115 = vmatprep.subr.bf16.mxu1 %v1515_v14  ;;  %v1549_v37 = vld [vmem:[%s1905_s8 + $0xe4] ss:$8 sps:$4 sm:$0xff]   ;;  %v1553_v39 = vld [vmem:[%s1905_s8 + $0xe0] ss:$8 sps:$4 sm:$0xff]   ;;  %v1555_v41 = vld [vmem:[%s1905_s8 + $0xd4] ss:$8 sps:$4 sm:$0xff]  }
  0x57   : > { %v1551_v38 = vld [vmem:[%s1905_s8 + $0x1e4] ss:$8 sps:$4 sm:$0xff]   ;;  %v1554_v40 = vld [vmem:[%s1905_s8 + $0x1e0] ss:$8 sps:$4 sm:$0xff]   ;;  %v1557_v42 = vld [vmem:[%s1905_s8 + $0x1d4] ss:$8 sps:$4 sm:$0xff]  }
  0x58   : > { %1075 = vmatpush1.bf16.msra.mxu0 %v1517_v15  ;;  %v1559_v43 = vld [vmem:[%s1905_s8 + $0xd0] ss:$8 sps:$4 sm:$0xff]   ;;  %v1561_v45 = vld [vmem:[%s1905_s8 + $0xc4] ss:$8 sps:$4 sm:$0xff]   ;;  %v1565_v50 = vld [vmem:[%s1905_s8 + $0xc0] ss:$8 sps:$4 sm:$0xff]  }
  0x59   : > { %1116 = vmatpush1.bf16.msra.mxu1 %v1518_v16  ;;  %1076 = vmatprep.subr.bf16.mxu0 %v1519_v17  ;;  %v1560_v44 = vld [vmem:[%s1905_s8 + $0x1d0] ss:$8 sps:$4 sm:$0xff]   ;;  %v1563_v46 = vld [vmem:[%s1905_s8 + $0x1c4] ss:$8 sps:$4 sm:$0xff]   ;;  %v1566_v51 = vld [vmem:[%s1905_s8 + $0x1c0] ss:$8 sps:$4 sm:$0xff]  }
  0x5a   : > { %1117 = vmatprep.subr.bf16.mxu1 %v1521_v18  ;;  %v668_v47 = vld [vmem:[%s1882_s9] sm:$0xff]  ;;  %v669_v49 = vld [vmem:[%s1882_s9 + $0x8] sm:$0xff]  ;;  %v1573_v57 = vld [vmem:[%s1905_s8 + $0xa4] ss:$8 sps:$4 sm:$0xff]   ;;  %p1434_p13 = scmp.ne.s32.totalorder %s1633_s20, 8 }
  0x5b   : > { %v1367_v48 = vcombine.high %v668_v47, %v668_v47  ;;  %v1369_v52 = vcombine.high %v669_v49, %v669_v49  ;;  %v1567_v53 = vld [vmem:[%s1905_s8 + $0xb4] ss:$8 sps:$4 sm:$0xff]   ;;  %v1571_v55 = vld [vmem:[%s1905_s8 + $0xb0] ss:$8 sps:$4 sm:$0xff]   ;;  %v1575_v58 = vld [vmem:[%s1905_s8 + $0x1a4] ss:$8 sps:$4 sm:$0xff]   ;;  %v1366_v5 = vcombine.low %v668_v47, %v668_v47  ;;  %v1368_v6 = vcombine.low %v669_v49, %v669_v49 }
  0x5c   : > { %1077 = vmatpush1.bf16.msra.mxu0 %v1523_v19  ;;  %v1569_v54 = vld [vmem:[%s1905_s8 + $0x1b4] ss:$8 sps:$4 sm:$0xff]   ;;  %v1572_v56 = vld [vmem:[%s1905_s8 + $0x1b0] ss:$8 sps:$4 sm:$0xff]   ;;  %v1577_v59 = vld [vmem:[%s1905_s8 + $0xa0] ss:$8 sps:$4 sm:$0xff]  }
  0x5d   : > { %1118 = vmatpush1.bf16.msra.mxu1 %v1524_v20  ;;  %1078 = vmatprep.subr.bf16.mxu0 %v1525_v21  ;;  %v1578_v60 = vld [vmem:[%s1905_s8 + $0x1a0] ss:$8 sps:$4 sm:$0xff]   ;;  %v1579_v61 = vld [vmem:[%s1905_s8 + $0x94] ss:$8 sps:$4 sm:$0xff]   ;;  %v1583_v63 = vld [vmem:[%s1905_s8 + $0x90] ss:$8 sps:$4 sm:$0xff]  }
  0x5e   : > { %1119 = vmatprep.subr.bf16.mxu1 %v1527_v22  ;;  %1100 = vmatprep.mubr.bf16.mxu0 %v1367_v48  ;;  %v1581_v62 = vld [vmem:[%s1905_s8 + $0x194] ss:$8 sps:$4 sm:$0xff]   ;;  %v1584_v0 = vld [vmem:[%s1905_s8 + $0x190] ss:$8 sps:$4 sm:$0xff]   ;;  %v1585_v1 = vld [vmem:[%s1905_s8 + $0x84] ss:$8 sps:$4 sm:$0xff]  }
  0x5f   : > { %1141 = vmatprep.mubr.bf16.mxu1 %v1369_v52  ;;  %v1587_v2 = vld [vmem:[%s1905_s8 + $0x184] ss:$8 sps:$4 sm:$0xff]   ;;  %v1589_v3 = vld [vmem:[%s1905_s8 + $0x80] ss:$8 sps:$4 sm:$0xff]   ;;  %v666_v8 = vld [vmem:[#allocation2] sm:$0xff] }
  0x60   : > { %1079 = vmatpush1.bf16.msra.mxu0 %v1529_v23  ;;  %v1590_v4 = vld [vmem:[%s1905_s8 + $0x180] ss:$8 sps:$4 sm:$0xff]   ;;  %v667_v12 = vld [vmem:[#allocation2 + $0x8] sm:$0xff] }
  0x61   : > { %1120 = vmatpush1.bf16.msra.mxu1 %v1530_v24  ;;  %1080 = vmatprep.subr.bf16.mxu0 %v1531_v25 }
  0x62   : > { %1121 = vmatprep.subr.bf16.mxu1 %v1533_v26 }
  0x64   : > { %1081 = vmatpush1.bf16.msra.mxu0 %v1535_v27 }
  0x65   : > { %1122 = vmatpush1.bf16.msra.mxu1 %v1536_v28  ;;  %1082 = vmatprep.subr.bf16.mxu0 %v1537_v29 }
  0x66   : > { %1123 = vmatprep.subr.bf16.mxu1 %v1539_v30 }
  0x68   : > { %1083 = vmatpush1.bf16.msra.mxu0 %v1541_v31 }
  0x69   : > { %1124 = vmatpush1.bf16.msra.mxu1 %v1542_v32  ;;  %1084 = vmatprep.subr.bf16.mxu0 %v1543_v33 }
  0x6a   : > { %1125 = vmatprep.subr.bf16.mxu1 %v1545_v34 }
  0x6c   : > { %1085 = vmatpush2.bf16.msra.mxu0 %v1547_v35 }
  0x6d   : > { %1126 = vmatpush2.bf16.msra.mxu1 %v1548_v36  ;;  %1086 = vmatprep.subr.bf16.mxu0 %v1549_v37 }
  0x6e   : > { %1127 = vmatprep.subr.bf16.mxu1 %v1551_v38 }
  0x70   : > { %1087 = vmatpush2.bf16.msra.mxu0 %v1553_v39 }
  0x71   : > { %1128 = vmatpush2.bf16.msra.mxu1 %v1554_v40  ;;  %1088 = vmatprep.subr.bf16.mxu0 %v1555_v41 }
  0x72   : > { %1129 = vmatprep.subr.bf16.mxu1 %v1557_v42 }
  0x74   : > { %1089 = vmatpush2.bf16.msra.mxu0 %v1559_v43 }
  0x75   : > { %1130 = vmatpush2.bf16.msra.mxu1 %v1560_v44  ;;  %1090 = vmatprep.subr.bf16.mxu0 %v1561_v45 }
  0x76   : > { %1131 = vmatprep.subr.bf16.mxu1 %v1563_v46 }
  0x78   : > { %1091 = vmatpush2.bf16.msra.mxu0 %v1565_v50 }
  0x79   : > { %1132 = vmatpush2.bf16.msra.mxu1 %v1566_v51  ;;  %1092 = vmatprep.subr.bf16.mxu0 %v1567_v53 }
  0x7a   : > { %1133 = vmatprep.subr.bf16.mxu1 %v1569_v54 }
  0x7c   : > { %1093 = vmatpush2.bf16.msra.mxu0 %v1571_v55 }
  0x7d   : > { %1134 = vmatpush2.bf16.msra.mxu1 %v1572_v56  ;;  %1094 = vmatprep.subr.bf16.mxu0 %v1573_v57 }
  0x7e   : > { %1135 = vmatprep.subr.bf16.mxu1 %v1575_v58 }
  0x80   : > { %1095 = vmatpush2.bf16.msra.mxu0 %v1577_v59 }
  0x81   : > { %1136 = vmatpush2.bf16.msra.mxu1 %v1578_v60  ;;  %1096 = vmatprep.subr.bf16.mxu0 %v1579_v61 }
  0x82   : > { %1137 = vmatprep.subr.bf16.mxu1 %v1581_v62 }
  0x84   : > { %1097 = vmatpush2.bf16.msra.mxu0 %v1583_v63 }
  0x85   : > { %1138 = vmatpush2.bf16.msra.mxu1 %v1584_v0  ;;  %1098 = vmatprep.subr.bf16.mxu0 %v1585_v1 }
  0x86   : > { %1139 = vmatprep.subr.bf16.mxu1 %v1587_v2 }
  0x88   : > { %1099 = vmatpush2.bf16.msra.mxu0 %v1589_v3 }
  0x89   : > { %1140 = vmatpush2.bf16.msra.mxu1 %v1590_v4 }
  0x8b   : > { %1101 = vmatmul.mubr.bf16.vlgmr.msra.gmra.mxu0 %v1366_v5 }
  0x8c   : > { %1142 = vmatmul.mubr.bf16.vlgmr.msra.gmra.mxu1 %v1368_v6 }
 0x14b   : > { %v1102_v7 = vpop.f32.mrf.mxu0 }
 0x14c   : > { %v1143_v9 = vpop.f32.mrf.mxu1 }
 0x14d   : > { %v1144_v10 = vadd.f32 %v1143_v9, %v1102_v7  ;;  %v1104_v11 = vpop.f32.mrf.mxu0 }
 0x14e   : > { %v1145_v13 = vpop.f32.mrf.mxu1 }
 0x14f   : > { %v1150_v14 = vadd.f32 %v1144_v10, %v666_v8  ;;  %v1146_v15 = vadd.f32 %v1145_v13, %v1104_v11  ;;  %v1106_v16 = vpop.f32.mrf.mxu0  ;;  %1157 = sbr.rel (%p1434_p13) target bundleno = 357 (0x165), region = 86 }
 0x150   : > { %v1147_v17 = vpop.f32.mrf.mxu1 }
 0x151   : > { %1152 = vst [vmem:[#allocation2] sm:$0xff] %v1150_v14  ;;  %v1151_v18 = vadd.f32 %v1146_v15, %v667_v12  ;;  %v1107_v19 = vpop.f32.mrf.mxu0 }
 0x152   : > { %v1148_v20 = vpop.f32.mrf.mxu1 }
 0x153   : > { %1153 = vst [vmem:[#allocation2 + $0x8] sm:$0xff] %v1151_v18 }
 0x154   : > { %v1162_v21 = vlaneseq  ;;  %v1160_v23 = vld [vmem:[%s633_s18] sm:$0x3]  ;;  %v1189_v36 = vld [vmem:[%s1898_s17 + $0x8] sm:$0xff] }
 0x155   : > { %v1174_v24 = vld [vmem:[%s638_s21] sm:$0x3] }
 0x156   : > { %v1163_v22 = vshrl.u32 %v1162_v21, 7  ;;  %v1188_v35 = vld [vmem:[%s1898_s17] sm:$0xff] }
 0x158   : > { %v1164_v25 = vsub.s32 0, %v1163_v22  ;;  %v1168_v26 = vsub.s32 1, %v1163_v22  ;;  %v1158_v27 = vld [vmem:[#allocation2] sm:$0xff] }
 0x15a   : > { %v1159_v28 = vld [vmem:[#allocation2 + $0x8] sm:$0xff]  ;;  %v1165_v29 = vrot.slane %v1160_v23, %v1164_v25  ;;  %v1179_v30 = vrot.slane %v1174_v24, %v1164_v25  ;;  %v1169_v31 = vrot.slane %v1160_v23, %v1168_v26  ;;  %v1183_v32 = vrot.slane %v1174_v24, %v1168_v26 }
 0x15c   : > { %v1172_v33 = vmul.f32 %v1165_v29, %v1158_v27  ;;  %v1173_v34 = vmul.f32 %v1169_v31, %v1159_v28 }
 0x15e   : > { %v1186_v37 = vadd.f32 %v1179_v30, %v1172_v33  ;;  %v1187_v38 = vadd.f32 %v1183_v32, %v1173_v34 }
 0x160   : > { %v1190_v39 = vadd.f32 %v1188_v35, %v1186_v37  ;;  %v1191_v40 = vadd.f32 %v1189_v36, %v1187_v38 }
 0x162   : > { %v1192_v41 = vmax.f32 %v1190_v39, 0.0  ;;  %v1193_v42 = vmax.f32 %v1191_v40, 0.0 }
 0x164   : > { %1194 = vst [vmem:[%s1903_s7] sm:$0xff] %v1192_v41  ;;  %1195 = vst [vmem:[%s1903_s7 + $0x8] sm:$0xff] %v1193_v42 }
 0x165 PF: > { %s15_s24 = sadd.s32 1, %s1649_s24   ;;  %s2016_s18 = smov %s1629_s19 }
 0x166   : > { %p12_p0 = scmp.ge.s32.totalorder %s15_s24, 20   ;;  %s2017_s19 = smov %s1733_s6 }
 0x167   : > { %s2018_s20 = smov %s1641_s22  ;;  %s2019_s21 = smov %s1645_s23 }
 0x168   : > { %s2020_s22 = smov %s2023_s25  ;;  %s2021_s23 = smov %s2027_s26 }
 0x169   :  { %14 = sbr.rel (!%p12_p0) target bundleno = 4 (0x4), region = 133 }

// kernel: _lambda_.39
= control target key start
LH: loop header
LB: loop body
LE: loop exit
PB: predicated region body
PF: predicated region fallthrough
CT: control target
= control target key end

     0   :  { %s1590_s15 = smov 0   ;;  %s1592_s16 = smov 0   ;;  %s1911_s0 = inlined_call_operand.vmem [shape: bf16[8,4608], index: 0, kind: input, shape index: {}]   ;;  %s1912_s1 = inlined_call_operand.vmem [shape: bf16[4608,512], index: 1, kind: input, shape index: {}]   ;;  %s1913_s2 = inlined_call_operand.vmem [shape: f32[1,512], index: 2, kind: input, shape index: {}]   ;;  %s1914_s3 = inlined_call_operand.vmem [shape: f32[1,512], index: 3, kind: input, shape index: {}]   ;;  %s1915_s4 = inlined_call_operand.vmem [shape: f32[8,512], index: 4, kind: output, shape index: {}]  }
   0x1   :  { %s1594_s17 = smov 0   ;;  %s1596_s18 = smov 0  }
   0x2   :  { %s1598_s19 = smov 0   ;;  %s1600_s20 = smov 0  }
   0x3   :  { %s1602_s21 = smov 0  }
   0x4 LB: > { %s26_s22 = sadd.s32 1, %s1554_s19  ;;  %s29_s23 = sadd.s32 1, %s1558_s20  ;;  %s1562_s21 = sphi %s1602_s21, %s14_s21   ;;  %s1558_s20 = sphi %s1600_s20, %s1921_s20   ;;  %s1554_s19 = sphi %s1598_s19, %s1920_s19   ;;  %s1550_s18 = sphi %s1596_s18, %s1919_s18   ;;  %s1546_s17 = sphi %s1594_s17, %s1918_s17   ;;  %s1542_s16 = sphi %s1592_s16, %s1917_s16   ;;  %s1538_s15 = sphi %s1590_s15, %s1916_s15  }
   0x5   : > { %p27_p0 = scmp.ge.s32.totalorder %s26_s22, 9  ;;  %p77_p1 = scmp.ne.s32.totalorder %s1542_s16, %s1538_s15 }
   0x6   : > { %p78_p2 = scmp.eq.s32.totalorder %s1562_s21, 0  ;;  %s70_s27 = sadd.s32 1, %s1542_s16 }
   0x7   : > { %s1923_s22 = smov (%p27_p0, %s26_s22), 0  ;;  %s1925_s23 = smov (!%p27_p0, %s29_s23), %s1558_s20 }
   0x8   : > { %p79_p3 = por %p78_p2, %p77_p1  ;;  %p31_p4 = scmp.ge.s32.totalorder %s1925_s23, 2 }
   0x9   : > { %s65_s24 = ssub.s32 %s1554_s19, %s1923_s22  ;;  %p1264_p6 = scmp.ge.s32.totalorder %s1562_s21, 18 }
   0xa   : > { %s1927_s23 = smov (%p31_p4, %s1925_s23), 0 }
   0xb   : > { %s66_s25 = ssub.s32 %s1558_s20, %s1927_s23  ;;  %183 = sbr.rel (%p1264_p6) target bundleno = 55 (0x37), region = 16 }
   0xc   : > { %s67_s26 = sor.u32 %s66_s25, %s65_s24 }
   0xd   : > { %p68_p5 = scmp.eq.s32.totalorder %s67_s26, 0 }
   0xf   : > { %s1641_s28 = scalar_select %p68_p5, %s1542_s16, %s70_s27  }
  0x10   : > { %199 = sbr.rel (!%p79_p3) target bundleno = 55 (0x37), region = 24  ;;  %s201_s29 = sand.u32 (%p79_p3), 1, %s1542_s16  }
  0x11   : > { %s1267_s30 = sshll.u32 (%p79_p3), %s1558_s20, 1  ;;  %s1265_s5 = sshll.u32 (%p79_p3), %s201_s29, 9 }
  0x12   : > { %s1350_s6 = sshll.u32 (%p79_p3), %s1554_s19, 8  ;;  %s1655_s12 = scalar_lea.vmem (%p79_p3), [#allocation3], %s1265_s5 }
  0x13   : > { %s207_s7 = sadd.s32 (%p79_p3), %s1350_s6, %s1267_s30 }
  0x14   : > { %s1269_s8 = sshll.u32 (%p79_p3), %s207_s7, 2 }
  0x15   : > { %s1650_s11 = scalar_lea.vmem %s1912_s1, %s1269_s8 }
  0x16   : > { %v364_v0 = vld [vmem:[%s1650_s11] sm:$0xff]  ;;  %v366_v1 = vld [vmem:[%s1650_s11 + $0x10] sm:$0xff] }
  0x17   : > { %v368_v2 = vld [vmem:[%s1650_s11 + $0x20] sm:$0xff]  ;;  %365 = vst [vmem:[%s1655_s12] sm:$0xff] %v364_v0  ;;  %367 = vst [vmem:[%s1655_s12 + $0x8] sm:$0xff] %v366_v1  ;;  %v370_v3 = vld [vmem:[%s1650_s11 + $0x30] sm:$0xff] }
  0x18   : > { %369 = vst [vmem:[%s1655_s12 + $0x10] sm:$0xff] %v368_v2  ;;  %v372_v4 = vld [vmem:[%s1650_s11 + $0x40] sm:$0xff]  ;;  %v374_v5 = vld [vmem:[%s1650_s11 + $0x50] sm:$0xff]  ;;  %371 = vst [vmem:[%s1655_s12 + $0x18] sm:$0xff] %v370_v3 }
  0x19   : > { %373 = vst [vmem:[%s1655_s12 + $0x20] sm:$0xff] %v372_v4  ;;  %375 = vst [vmem:[%s1655_s12 + $0x28] sm:$0xff] %v374_v5  ;;  %v376_v6 = vld [vmem:[%s1650_s11 + $0x60] sm:$0xff]  ;;  %v378_v7 = vld [vmem:[%s1650_s11 + $0x70] sm:$0xff] }
  0x1a   : > { %v380_v8 = vld [vmem:[%s1650_s11 + $0x80] sm:$0xff]  ;;  %377 = vst [vmem:[%s1655_s12 + $0x30] sm:$0xff] %v376_v6  ;;  %379 = vst [vmem:[%s1655_s12 + $0x38] sm:$0xff] %v378_v7  ;;  %v382_v9 = vld [vmem:[%s1650_s11 + $0x90] sm:$0xff] }
  0x1b   : > { %381 = vst [vmem:[%s1655_s12 + $0x40] sm:$0xff] %v380_v8  ;;  %v384_v10 = vld [vmem:[%s1650_s11 + $0xa0] sm:$0xff]  ;;  %v386_v11 = vld [vmem:[%s1650_s11 + $0xb0] sm:$0xff]  ;;  %383 = vst [vmem:[%s1655_s12 + $0x48] sm:$0xff] %v382_v9 }
  0x1c   : > { %385 = vst [vmem:[%s1655_s12 + $0x50] sm:$0xff] %v384_v10  ;;  %387 = vst [vmem:[%s1655_s12 + $0x58] sm:$0xff] %v386_v11  ;;  %v388_v12 = vld [vmem:[%s1650_s11 + $0xc0] sm:$0xff]  ;;  %v390_v13 = vld [vmem:[%s1650_s11 + $0xd0] sm:$0xff] }
  0x1d   : > { %v392_v14 = vld [vmem:[%s1650_s11 + $0xe0] sm:$0xff]  ;;  %389 = vst [vmem:[%s1655_s12 + $0x60] sm:$0xff] %v388_v12  ;;  %391 = vst [vmem:[%s1655_s12 + $0x68] sm:$0xff] %v390_v13  ;;  %v394_v15 = vld [vmem:[%s1650_s11 + $0xf0] sm:$0xff] }
  0x1e   : > { %393 = vst [vmem:[%s1655_s12 + $0x70] sm:$0xff] %v392_v14  ;;  %v396_v16 = vld [vmem:[%s1650_s11 + $0x100] sm:$0xff]  ;;  %v398_v17 = vld [vmem:[%s1650_s11 + $0x110] sm:$0xff]  ;;  %395 = vst [vmem:[%s1655_s12 + $0x78] sm:$0xff] %v394_v15 }
  0x1f   : > { %397 = vst [vmem:[%s1655_s12 + $0x80] sm:$0xff] %v396_v16  ;;  %399 = vst [vmem:[%s1655_s12 + $0x88] sm:$0xff] %v398_v17  ;;  %v400_v18 = vld [vmem:[%s1650_s11 + $0x120] sm:$0xff]  ;;  %v402_v19 = vld [vmem:[%s1650_s11 + $0x130] sm:$0xff] }
  0x20   : > { %v404_v20 = vld [vmem:[%s1650_s11 + $0x140] sm:$0xff]  ;;  %401 = vst [vmem:[%s1655_s12 + $0x90] sm:$0xff] %v400_v18  ;;  %403 = vst [vmem:[%s1655_s12 + $0x98] sm:$0xff] %v402_v19  ;;  %v406_v21 = vld [vmem:[%s1650_s11 + $0x150] sm:$0xff] }
  0x21   : > { %405 = vst [vmem:[%s1655_s12 + $0xa0] sm:$0xff] %v404_v20  ;;  %v408_v22 = vld [vmem:[%s1650_s11 + $0x160] sm:$0xff]  ;;  %v410_v23 = vld [vmem:[%s1650_s11 + $0x170] sm:$0xff]  ;;  %407 = vst [vmem:[%s1655_s12 + $0xa8] sm:$0xff] %v406_v21 }
  0x22   : > { %409 = vst [vmem:[%s1655_s12 + $0xb0] sm:$0xff] %v408_v22  ;;  %411 = vst [vmem:[%s1655_s12 + $0xb8] sm:$0xff] %v410_v23  ;;  %v412_v24 = vld [vmem:[%s1650_s11 + $0x180] sm:$0xff]  ;;  %v414_v25 = vld [vmem:[%s1650_s11 + $0x190] sm:$0xff] }
  0x23   : > { %v416_v26 = vld [vmem:[%s1650_s11 + $0x1a0] sm:$0xff]  ;;  %413 = vst [vmem:[%s1655_s12 + $0xc0] sm:$0xff] %v412_v24  ;;  %415 = vst [vmem:[%s1655_s12 + $0xc8] sm:$0xff] %v414_v25  ;;  %v418_v27 = vld [vmem:[%s1650_s11 + $0x1b0] sm:$0xff] }
  0x24   : > { %417 = vst [vmem:[%s1655_s12 + $0xd0] sm:$0xff] %v416_v26  ;;  %v420_v28 = vld [vmem:[%s1650_s11 + $0x1c0] sm:$0xff]  ;;  %v422_v29 = vld [vmem:[%s1650_s11 + $0x1d0] sm:$0xff]  ;;  %419 = vst [vmem:[%s1655_s12 + $0xd8] sm:$0xff] %v418_v27 }
  0x25   : > { %421 = vst [vmem:[%s1655_s12 + $0xe0] sm:$0xff] %v420_v28  ;;  %423 = vst [vmem:[%s1655_s12 + $0xe8] sm:$0xff] %v422_v29  ;;  %v424_v30 = vld [vmem:[%s1650_s11 + $0x1e0] sm:$0xff]  ;;  %v426_v31 = vld [vmem:[%s1650_s11 + $0x1f0] sm:$0xff] }
  0x26   : > { %v428_v32 = vld [vmem:[%s1650_s11 + $0x200] sm:$0xff]  ;;  %425 = vst [vmem:[%s1655_s12 + $0xf0] sm:$0xff] %v424_v30  ;;  %427 = vst [vmem:[%s1655_s12 + $0xf8] sm:$0xff] %v426_v31  ;;  %v430_v33 = vld [vmem:[%s1650_s11 + $0x210] sm:$0xff] }
  0x27   : > { %429 = vst [vmem:[%s1655_s12 + $0x100] sm:$0xff] %v428_v32  ;;  %v432_v34 = vld [vmem:[%s1650_s11 + $0x220] sm:$0xff]  ;;  %v434_v35 = vld [vmem:[%s1650_s11 + $0x230] sm:$0xff]  ;;  %431 = vst [vmem:[%s1655_s12 + $0x108] sm:$0xff] %v430_v33 }
  0x28   : > { %433 = vst [vmem:[%s1655_s12 + $0x110] sm:$0xff] %v432_v34  ;;  %435 = vst [vmem:[%s1655_s12 + $0x118] sm:$0xff] %v434_v35  ;;  %v436_v36 = vld [vmem:[%s1650_s11 + $0x240] sm:$0xff]  ;;  %v438_v37 = vld [vmem:[%s1650_s11 + $0x250] sm:$0xff] }
  0x29   : > { %v440_v38 = vld [vmem:[%s1650_s11 + $0x260] sm:$0xff]  ;;  %437 = vst [vmem:[%s1655_s12 + $0x120] sm:$0xff] %v436_v36  ;;  %439 = vst [vmem:[%s1655_s12 + $0x128] sm:$0xff] %v438_v37  ;;  %v442_v39 = vld [vmem:[%s1650_s11 + $0x270] sm:$0xff] }
  0x2a   : > { %441 = vst [vmem:[%s1655_s12 + $0x130] sm:$0xff] %v440_v38  ;;  %v444_v40 = vld [vmem:[%s1650_s11 + $0x280] sm:$0xff]  ;;  %v446_v41 = vld [vmem:[%s1650_s11 + $0x290] sm:$0xff]  ;;  %443 = vst [vmem:[%s1655_s12 + $0x138] sm:$0xff] %v442_v39 }
  0x2b   : > { %445 = vst [vmem:[%s1655_s12 + $0x140] sm:$0xff] %v444_v40  ;;  %447 = vst [vmem:[%s1655_s12 + $0x148] sm:$0xff] %v446_v41  ;;  %v448_v42 = vld [vmem:[%s1650_s11 + $0x2a0] sm:$0xff]  ;;  %v450_v43 = vld [vmem:[%s1650_s11 + $0x2b0] sm:$0xff] }
  0x2c   : > { %v452_v44 = vld [vmem:[%s1650_s11 + $0x2c0] sm:$0xff]  ;;  %449 = vst [vmem:[%s1655_s12 + $0x150] sm:$0xff] %v448_v42  ;;  %451 = vst [vmem:[%s1655_s12 + $0x158] sm:$0xff] %v450_v43  ;;  %v454_v45 = vld [vmem:[%s1650_s11 + $0x2d0] sm:$0xff] }
  0x2d   : > { %453 = vst [vmem:[%s1655_s12 + $0x160] sm:$0xff] %v452_v44  ;;  %v456_v46 = vld [vmem:[%s1650_s11 + $0x2e0] sm:$0xff]  ;;  %v458_v47 = vld [vmem:[%s1650_s11 + $0x2f0] sm:$0xff]  ;;  %455 = vst [vmem:[%s1655_s12 + $0x168] sm:$0xff] %v454_v45 }
  0x2e   : > { %457 = vst [vmem:[%s1655_s12 + $0x170] sm:$0xff] %v456_v46  ;;  %459 = vst [vmem:[%s1655_s12 + $0x178] sm:$0xff] %v458_v47  ;;  %v460_v48 = vld [vmem:[%s1650_s11 + $0x300] sm:$0xff]  ;;  %v462_v49 = vld [vmem:[%s1650_s11 + $0x310] sm:$0xff] }
  0x2f   : > { %v464_v50 = vld [vmem:[%s1650_s11 + $0x320] sm:$0xff]  ;;  %461 = vst [vmem:[%s1655_s12 + $0x180] sm:$0xff] %v460_v48  ;;  %463 = vst [vmem:[%s1655_s12 + $0x188] sm:$0xff] %v462_v49  ;;  %v466_v51 = vld [vmem:[%s1650_s11 + $0x330] sm:$0xff] }
  0x30   : > { %465 = vst [vmem:[%s1655_s12 + $0x190] sm:$0xff] %v464_v50  ;;  %v468_v52 = vld [vmem:[%s1650_s11 + $0x340] sm:$0xff]  ;;  %v470_v53 = vld [vmem:[%s1650_s11 + $0x350] sm:$0xff]  ;;  %467 = vst [vmem:[%s1655_s12 + $0x198] sm:$0xff] %v466_v51 }
  0x31   : > { %469 = vst [vmem:[%s1655_s12 + $0x1a0] sm:$0xff] %v468_v52  ;;  %471 = vst [vmem:[%s1655_s12 + $0x1a8] sm:$0xff] %v470_v53  ;;  %v472_v54 = vld [vmem:[%s1650_s11 + $0x360] sm:$0xff]  ;;  %v474_v55 = vld [vmem:[%s1650_s11 + $0x370] sm:$0xff] }
  0x32   : > { %v476_v56 = vld [vmem:[%s1650_s11 + $0x380] sm:$0xff]  ;;  %473 = vst [vmem:[%s1655_s12 + $0x1b0] sm:$0xff] %v472_v54  ;;  %475 = vst [vmem:[%s1655_s12 + $0x1b8] sm:$0xff] %v474_v55  ;;  %v478_v57 = vld [vmem:[%s1650_s11 + $0x390] sm:$0xff] }
  0x33   : > { %477 = vst [vmem:[%s1655_s12 + $0x1c0] sm:$0xff] %v476_v56  ;;  %v480_v58 = vld [vmem:[%s1650_s11 + $0x3a0] sm:$0xff]  ;;  %v482_v59 = vld [vmem:[%s1650_s11 + $0x3b0] sm:$0xff]  ;;  %479 = vst [vmem:[%s1655_s12 + $0x1c8] sm:$0xff] %v478_v57 }
  0x34   : > { %481 = vst [vmem:[%s1655_s12 + $0x1d0] sm:$0xff] %v480_v58  ;;  %483 = vst [vmem:[%s1655_s12 + $0x1d8] sm:$0xff] %v482_v59  ;;  %v484_v60 = vld [vmem:[%s1650_s11 + $0x3c0] sm:$0xff]  ;;  %v486_v61 = vld [vmem:[%s1650_s11 + $0x3d0] sm:$0xff] }
  0x35   : > { %v488_v62 = vld [vmem:[%s1650_s11 + $0x3e0] sm:$0xff]  ;;  %485 = vst [vmem:[%s1655_s12 + $0x1e0] sm:$0xff] %v484_v60  ;;  %487 = vst [vmem:[%s1655_s12 + $0x1e8] sm:$0xff] %v486_v61  ;;  %v490_v63 = vld [vmem:[%s1650_s11 + $0x3f0] sm:$0xff] }
  0x36   : > { %489 = vst [vmem:[%s1655_s12 + $0x1f0] sm:$0xff] %v488_v62  ;;  %491 = vst [vmem:[%s1655_s12 + $0x1f8] sm:$0xff] %v490_v63 }
  0x37 PF: > { %p1270_p7 = scmp.ge.s32.totalorder %s1562_s21, 1  ;;  %p512_p8 = scmp.lt.s32.totalorder %s1562_s21, 19 }
  0x39   : > { %p513_p9 = pnand %p1270_p7, %p512_p8 }
  0x3a   : > { %s519_s13 = sand.u32 (!%p513_p9), 1, %s1538_s15   ;;  %s1272_s14 = sshll.u32 (!%p513_p9), %s1546_s17, 2 }
  0x3b   : > { %516 = sbr.rel (%p513_p9) target bundleno = 355 (0x163), region = 70  ;;  %s1271_s24 = sshll.u32 (!%p513_p9), %s519_s13, 9 }
  0x3c   : > { %p568_p10 = scmp.lt.s32.totalorder (!%p513_p9), %s1272_s14, 35  ;;  %s1274_s25 = sshll.u32 (!%p513_p9), %s1550_s18, 1 }
  0x3d   : > { %p578_p11 = scmp.lt.s32.totalorder (!%p513_p9), %s1274_s25, 3  ;;  %s1808_s13 = scalar_lea.vmem (!%p513_p9), [#allocation3], %s1271_s24 }
  0x3e   : > { %p1278_p12 = scmp.ne.s32.totalorder (!%p513_p9), %s1546_s17, 0 }
  0x40   : > { %s1929_s14 = smov (!%p568_p10, %s1272_s14), 35  ;;  %s1931_s25 = smov (!%p578_p11, %s1274_s25), 3 }
  0x41   : > { %s1273_s26 = sshll.u32 %s1929_s14, 2  ;;  %s580_s15 = scalar_lea.vmem %s1913_s2, %s1931_s25 }
  0x42   : > { %s1790_s30 = scalar_lea.vmem %s1911_s0, %s1273_s26  ;;  %s585_s18 = scalar_lea.vmem %s1914_s3, %s1931_s25 }
  0x43   : > { %s1277_s9 = sshll.u32 %s1931_s25, 3  ;;  %600 = sbr.rel (%p1278_p12) target bundleno = 74 (0x4a), region = 78 }
  0x44   : > { %s1806_s12 = scalar_lea.vmem %s1915_s4, %s1277_s9 }
  0x48   : > { %v1564_v0 = vmov 0.0  }
  0x49   : > { %601 = vst [vmem:[#allocation2] sm:$0xff] %v1564_v0  ;;  %602 = vst [vmem:[#allocation2 + $0x8] sm:$0xff] %v1564_v0 }
  0x4a PF: > { %v1408_v1 = vld [vmem:[%s1808_s13 + $0x74] ss:$8 sps:$4 sm:$0xff]   ;;  %v1412_v3 = vld [vmem:[%s1808_s13 + $0x70] ss:$8 sps:$4 sm:$0xff]   ;;  %v1414_v5 = vld [vmem:[%s1808_s13 + $0x64] ss:$8 sps:$4 sm:$0xff]  }
  0x4b   : > { %v1410_v2 = vld [vmem:[%s1808_s13 + $0x174] ss:$8 sps:$4 sm:$0xff]   ;;  %1005 = vmatprep.subr.bf16.mxu0 %v1408_v1  ;;  %v1413_v4 = vld [vmem:[%s1808_s13 + $0x170] ss:$8 sps:$4 sm:$0xff]   ;;  %v1416_v6 = vld [vmem:[%s1808_s13 + $0x164] ss:$8 sps:$4 sm:$0xff]  }
  0x4c   : > { %1046 = vmatprep.subr.bf16.mxu1 %v1410_v2  ;;  %1006 = vmatpush1.bf16.msra.mxu0 %v1412_v3  ;;  %v1418_v7 = vld [vmem:[%s1808_s13 + $0x60] ss:$8 sps:$4 sm:$0xff]   ;;  %v1420_v9 = vld [vmem:[%s1808_s13 + $0x54] ss:$8 sps:$4 sm:$0xff]   ;;  %v1424_v11 = vld [vmem:[%s1808_s13 + $0x50] ss:$8 sps:$4 sm:$0xff]  }
  0x4d   : > { %1047 = vmatpush1.bf16.msra.mxu1 %v1413_v4  ;;  %1007 = vmatprep.subr.bf16.mxu0 %v1414_v5  ;;  %v1419_v8 = vld [vmem:[%s1808_s13 + $0x160] ss:$8 sps:$4 sm:$0xff]   ;;  %v1422_v10 = vld [vmem:[%s1808_s13 + $0x154] ss:$8 sps:$4 sm:$0xff]   ;;  %v1425_v12 = vld [vmem:[%s1808_s13 + $0x150] ss:$8 sps:$4 sm:$0xff]  }
  0x4e   : > { %1048 = vmatprep.subr.bf16.mxu1 %v1416_v6  ;;  %v1426_v13 = vld [vmem:[%s1808_s13 + $0x44] ss:$8 sps:$4 sm:$0xff]   ;;  %v1430_v15 = vld [vmem:[%s1808_s13 + $0x40] ss:$8 sps:$4 sm:$0xff]   ;;  %v1432_v17 = vld [vmem:[%s1808_s13 + $0x34] ss:$8 sps:$4 sm:$0xff]  }
  0x4f   : > { %v1428_v14 = vld [vmem:[%s1808_s13 + $0x144] ss:$8 sps:$4 sm:$0xff]   ;;  %v1431_v16 = vld [vmem:[%s1808_s13 + $0x140] ss:$8 sps:$4 sm:$0xff]   ;;  %v1434_v18 = vld [vmem:[%s1808_s13 + $0x134] ss:$8 sps:$4 sm:$0xff]  }
  0x50   : > { %1008 = vmatpush1.bf16.msra.mxu0 %v1418_v7  ;;  %v1436_v19 = vld [vmem:[%s1808_s13 + $0x30] ss:$8 sps:$4 sm:$0xff]   ;;  %v1438_v21 = vld [vmem:[%s1808_s13 + $0x24] ss:$8 sps:$4 sm:$0xff]   ;;  %v1442_v23 = vld [vmem:[%s1808_s13 + $0x20] ss:$8 sps:$4 sm:$0xff]  }
  0x51   : > { %1049 = vmatpush1.bf16.msra.mxu1 %v1419_v8  ;;  %1009 = vmatprep.subr.bf16.mxu0 %v1420_v9  ;;  %v1437_v20 = vld [vmem:[%s1808_s13 + $0x130] ss:$8 sps:$4 sm:$0xff]   ;;  %v1440_v22 = vld [vmem:[%s1808_s13 + $0x124] ss:$8 sps:$4 sm:$0xff]   ;;  %v1443_v24 = vld [vmem:[%s1808_s13 + $0x120] ss:$8 sps:$4 sm:$0xff]  }
  0x52   : > { %1050 = vmatprep.subr.bf16.mxu1 %v1422_v10  ;;  %v1444_v25 = vld [vmem:[%s1808_s13 + $0x14] ss:$8 sps:$4 sm:$0xff]   ;;  %v1448_v27 = vld [vmem:[%s1808_s13 + $0x10] ss:$8 sps:$4 sm:$0xff]   ;;  %v1450_v29 = vld [vmem:[%s1808_s13 + $0x4] ss:$8 sps:$4 sm:$0xff]  }
  0x53   : > { %v1446_v26 = vld [vmem:[%s1808_s13 + $0x114] ss:$8 sps:$4 sm:$0xff]   ;;  %v1449_v28 = vld [vmem:[%s1808_s13 + $0x110] ss:$8 sps:$4 sm:$0xff]   ;;  %v1452_v30 = vld [vmem:[%s1808_s13 + $0x104] ss:$8 sps:$4 sm:$0xff]  }
  0x54   : > { %1010 = vmatpush1.bf16.msra.mxu0 %v1424_v11  ;;  %v1454_v31 = vld [vmem:[%s1808_s13] ss:$8 sps:$4 sm:$0xff]   ;;  %v1456_v33 = vld [vmem:[%s1808_s13 + $0xf4] ss:$8 sps:$4 sm:$0xff]   ;;  %v1460_v35 = vld [vmem:[%s1808_s13 + $0xf0] ss:$8 sps:$4 sm:$0xff]  }
  0x55   : > { %1051 = vmatpush1.bf16.msra.mxu1 %v1425_v12  ;;  %1011 = vmatprep.subr.bf16.mxu0 %v1426_v13  ;;  %v1455_v32 = vld [vmem:[%s1808_s13 + $0x100] ss:$8 sps:$4 sm:$0xff]   ;;  %v1458_v34 = vld [vmem:[%s1808_s13 + $0x1f4] ss:$8 sps:$4 sm:$0xff]   ;;  %v1461_v36 = vld [vmem:[%s1808_s13 + $0x1f0] ss:$8 sps:$4 sm:$0xff]  }
  0x56   : > { %1052 = vmatprep.subr.bf16.mxu1 %v1428_v14  ;;  %v1462_v37 = vld [vmem:[%s1808_s13 + $0xe4] ss:$8 sps:$4 sm:$0xff]   ;;  %v1466_v39 = vld [vmem:[%s1808_s13 + $0xe0] ss:$8 sps:$4 sm:$0xff]   ;;  %v1468_v41 = vld [vmem:[%s1808_s13 + $0xd4] ss:$8 sps:$4 sm:$0xff]  }
  0x57   : > { %v1464_v38 = vld [vmem:[%s1808_s13 + $0x1e4] ss:$8 sps:$4 sm:$0xff]   ;;  %v1467_v40 = vld [vmem:[%s1808_s13 + $0x1e0] ss:$8 sps:$4 sm:$0xff]   ;;  %v1470_v42 = vld [vmem:[%s1808_s13 + $0x1d4] ss:$8 sps:$4 sm:$0xff]  }
  0x58   : > { %1012 = vmatpush1.bf16.msra.mxu0 %v1430_v15  ;;  %v1472_v43 = vld [vmem:[%s1808_s13 + $0xd0] ss:$8 sps:$4 sm:$0xff]   ;;  %v1474_v45 = vld [vmem:[%s1808_s13 + $0xc4] ss:$8 sps:$4 sm:$0xff]   ;;  %v1478_v50 = vld [vmem:[%s1808_s13 + $0xc0] ss:$8 sps:$4 sm:$0xff]  }
  0x59   : > { %1053 = vmatpush1.bf16.msra.mxu1 %v1431_v16  ;;  %1013 = vmatprep.subr.bf16.mxu0 %v1432_v17  ;;  %v1473_v44 = vld [vmem:[%s1808_s13 + $0x1d0] ss:$8 sps:$4 sm:$0xff]   ;;  %v1476_v46 = vld [vmem:[%s1808_s13 + $0x1c4] ss:$8 sps:$4 sm:$0xff]   ;;  %v1479_v51 = vld [vmem:[%s1808_s13 + $0x1c0] ss:$8 sps:$4 sm:$0xff]  }
  0x5a   : > { %1054 = vmatprep.subr.bf16.mxu1 %v1434_v18  ;;  %v605_v47 = vld [vmem:[%s1790_s30] sm:$0xff]  ;;  %v606_v49 = vld [vmem:[%s1790_s30 + $0x8] sm:$0xff]  ;;  %v1486_v57 = vld [vmem:[%s1808_s13 + $0xa4] ss:$8 sps:$4 sm:$0xff]   ;;  %p1347_p13 = scmp.ne.s32.totalorder %s1546_s17, 8 }
  0x5b   : > { %v1280_v48 = vcombine.high %v605_v47, %v605_v47  ;;  %v1282_v52 = vcombine.high %v606_v49, %v606_v49  ;;  %v1480_v53 = vld [vmem:[%s1808_s13 + $0xb4] ss:$8 sps:$4 sm:$0xff]   ;;  %v1484_v55 = vld [vmem:[%s1808_s13 + $0xb0] ss:$8 sps:$4 sm:$0xff]   ;;  %v1488_v58 = vld [vmem:[%s1808_s13 + $0x1a4] ss:$8 sps:$4 sm:$0xff]   ;;  %v1279_v5 = vcombine.low %v605_v47, %v605_v47  ;;  %v1281_v6 = vcombine.low %v606_v49, %v606_v49 }
  0x5c   : > { %1014 = vmatpush1.bf16.msra.mxu0 %v1436_v19  ;;  %v1482_v54 = vld [vmem:[%s1808_s13 + $0x1b4] ss:$8 sps:$4 sm:$0xff]   ;;  %v1485_v56 = vld [vmem:[%s1808_s13 + $0x1b0] ss:$8 sps:$4 sm:$0xff]   ;;  %v1490_v59 = vld [vmem:[%s1808_s13 + $0xa0] ss:$8 sps:$4 sm:$0xff]  }
  0x5d   : > { %1055 = vmatpush1.bf16.msra.mxu1 %v1437_v20  ;;  %1015 = vmatprep.subr.bf16.mxu0 %v1438_v21  ;;  %v1491_v60 = vld [vmem:[%s1808_s13 + $0x1a0] ss:$8 sps:$4 sm:$0xff]   ;;  %v1492_v61 = vld [vmem:[%s1808_s13 + $0x94] ss:$8 sps:$4 sm:$0xff]   ;;  %v1496_v63 = vld [vmem:[%s1808_s13 + $0x90] ss:$8 sps:$4 sm:$0xff]  }
  0x5e   : > { %1056 = vmatprep.subr.bf16.mxu1 %v1440_v22  ;;  %1037 = vmatprep.mubr.bf16.mxu0 %v1280_v48  ;;  %v1494_v62 = vld [vmem:[%s1808_s13 + $0x194] ss:$8 sps:$4 sm:$0xff]   ;;  %v1497_v0 = vld [vmem:[%s1808_s13 + $0x190] ss:$8 sps:$4 sm:$0xff]   ;;  %v1498_v1 = vld [vmem:[%s1808_s13 + $0x84] ss:$8 sps:$4 sm:$0xff]  }
  0x5f   : > { %1078 = vmatprep.mubr.bf16.mxu1 %v1282_v52  ;;  %v1500_v2 = vld [vmem:[%s1808_s13 + $0x184] ss:$8 sps:$4 sm:$0xff]   ;;  %v1502_v3 = vld [vmem:[%s1808_s13 + $0x80] ss:$8 sps:$4 sm:$0xff]   ;;  %v603_v8 = vld [vmem:[#allocation2] sm:$0xff] }
  0x60   : > { %1016 = vmatpush1.bf16.msra.mxu0 %v1442_v23  ;;  %v1503_v4 = vld [vmem:[%s1808_s13 + $0x180] ss:$8 sps:$4 sm:$0xff]   ;;  %v604_v12 = vld [vmem:[#allocation2 + $0x8] sm:$0xff] }
  0x61   : > { %1057 = vmatpush1.bf16.msra.mxu1 %v1443_v24  ;;  %1017 = vmatprep.subr.bf16.mxu0 %v1444_v25 }
  0x62   : > { %1058 = vmatprep.subr.bf16.mxu1 %v1446_v26 }
  0x64   : > { %1018 = vmatpush1.bf16.msra.mxu0 %v1448_v27 }
  0x65   : > { %1059 = vmatpush1.bf16.msra.mxu1 %v1449_v28  ;;  %1019 = vmatprep.subr.bf16.mxu0 %v1450_v29 }
  0x66   : > { %1060 = vmatprep.subr.bf16.mxu1 %v1452_v30 }
  0x68   : > { %1020 = vmatpush1.bf16.msra.mxu0 %v1454_v31 }
  0x69   : > { %1061 = vmatpush1.bf16.msra.mxu1 %v1455_v32  ;;  %1021 = vmatprep.subr.bf16.mxu0 %v1456_v33 }
  0x6a   : > { %1062 = vmatprep.subr.bf16.mxu1 %v1458_v34 }
  0x6c   : > { %1022 = vmatpush2.bf16.msra.mxu0 %v1460_v35 }
  0x6d   : > { %1063 = vmatpush2.bf16.msra.mxu1 %v1461_v36  ;;  %1023 = vmatprep.subr.bf16.mxu0 %v1462_v37 }
  0x6e   : > { %1064 = vmatprep.subr.bf16.mxu1 %v1464_v38 }
  0x70   : > { %1024 = vmatpush2.bf16.msra.mxu0 %v1466_v39 }
  0x71   : > { %1065 = vmatpush2.bf16.msra.mxu1 %v1467_v40  ;;  %1025 = vmatprep.subr.bf16.mxu0 %v1468_v41 }
  0x72   : > { %1066 = vmatprep.subr.bf16.mxu1 %v1470_v42 }
  0x74   : > { %1026 = vmatpush2.bf16.msra.mxu0 %v1472_v43 }
  0x75   : > { %1067 = vmatpush2.bf16.msra.mxu1 %v1473_v44  ;;  %1027 = vmatprep.subr.bf16.mxu0 %v1474_v45 }
  0x76   : > { %1068 = vmatprep.subr.bf16.mxu1 %v1476_v46 }
  0x78   : > { %1028 = vmatpush2.bf16.msra.mxu0 %v1478_v50 }
  0x79   : > { %1069 = vmatpush2.bf16.msra.mxu1 %v1479_v51  ;;  %1029 = vmatprep.subr.bf16.mxu0 %v1480_v53 }
  0x7a   : > { %1070 = vmatprep.subr.bf16.mxu1 %v1482_v54 }
  0x7c   : > { %1030 = vmatpush2.bf16.msra.mxu0 %v1484_v55 }
  0x7d   : > { %1071 = vmatpush2.bf16.msra.mxu1 %v1485_v56  ;;  %1031 = vmatprep.subr.bf16.mxu0 %v1486_v57 }
  0x7e   : > { %1072 = vmatprep.subr.bf16.mxu1 %v1488_v58 }
  0x80   : > { %1032 = vmatpush2.bf16.msra.mxu0 %v1490_v59 }
  0x81   : > { %1073 = vmatpush2.bf16.msra.mxu1 %v1491_v60  ;;  %1033 = vmatprep.subr.bf16.mxu0 %v1492_v61 }
  0x82   : > { %1074 = vmatprep.subr.bf16.mxu1 %v1494_v62 }
  0x84   : > { %1034 = vmatpush2.bf16.msra.mxu0 %v1496_v63 }
  0x85   : > { %1075 = vmatpush2.bf16.msra.mxu1 %v1497_v0  ;;  %1035 = vmatprep.subr.bf16.mxu0 %v1498_v1 }
  0x86   : > { %1076 = vmatprep.subr.bf16.mxu1 %v1500_v2 }
  0x88   : > { %1036 = vmatpush2.bf16.msra.mxu0 %v1502_v3 }
  0x89   : > { %1077 = vmatpush2.bf16.msra.mxu1 %v1503_v4 }
  0x8b   : > { %1038 = vmatmul.mubr.bf16.vlgmr.msra.gmra.mxu0 %v1279_v5 }
  0x8c   : > { %1079 = vmatmul.mubr.bf16.vlgmr.msra.gmra.mxu1 %v1281_v6 }
 0x14b   : > { %v1039_v7 = vpop.f32.mrf.mxu0 }
 0x14c   : > { %v1080_v9 = vpop.f32.mrf.mxu1 }
 0x14d   : > { %v1081_v10 = vadd.f32 %v1080_v9, %v1039_v7  ;;  %v1041_v11 = vpop.f32.mrf.mxu0 }
 0x14e   : > { %v1082_v13 = vpop.f32.mrf.mxu1 }
 0x14f   : > { %v1087_v14 = vadd.f32 %v1081_v10, %v603_v8  ;;  %v1083_v15 = vadd.f32 %v1082_v13, %v1041_v11  ;;  %v1043_v16 = vpop.f32.mrf.mxu0  ;;  %1094 = sbr.rel (%p1347_p13) target bundleno = 355 (0x163), region = 82 }
 0x150   : > { %v1084_v17 = vpop.f32.mrf.mxu1 }
 0x151   : > { %1089 = vst [vmem:[#allocation2] sm:$0xff] %v1087_v14  ;;  %v1088_v18 = vadd.f32 %v1083_v15, %v604_v12  ;;  %v1044_v19 = vpop.f32.mrf.mxu0 }
 0x152   : > { %v1085_v20 = vpop.f32.mrf.mxu1 }
 0x153   : > { %1090 = vst [vmem:[#allocation2 + $0x8] sm:$0xff] %v1088_v18 }
 0x154   : > { %v1099_v21 = vlaneseq  ;;  %v1097_v23 = vld [vmem:[%s580_s15] sm:$0x3] }
 0x155   : > { %v1111_v24 = vld [vmem:[%s585_s18] sm:$0x3] }
 0x156   : > { %v1100_v22 = vshrl.u32 %v1099_v21, 7 }
 0x158   : > { %v1101_v25 = vsub.s32 0, %v1100_v22  ;;  %v1105_v26 = vsub.s32 1, %v1100_v22  ;;  %v1095_v27 = vld [vmem:[#allocation2] sm:$0xff] }
 0x15a   : > { %v1096_v28 = vld [vmem:[#allocation2 + $0x8] sm:$0xff]  ;;  %v1102_v29 = vrot.slane %v1097_v23, %v1101_v25  ;;  %v1116_v30 = vrot.slane %v1111_v24, %v1101_v25  ;;  %v1106_v31 = vrot.slane %v1097_v23, %v1105_v26  ;;  %v1120_v32 = vrot.slane %v1111_v24, %v1105_v26 }
 0x15c   : > { %v1109_v33 = vmul.f32 %v1102_v29, %v1095_v27  ;;  %v1110_v34 = vmul.f32 %v1106_v31, %v1096_v28 }
 0x15e   : > { %v1123_v35 = vadd.f32 %v1116_v30, %v1109_v33  ;;  %v1124_v36 = vadd.f32 %v1120_v32, %v1110_v34 }
 0x160   : > { %v1125_v37 = vmax.f32 %v1123_v35, 0.0  ;;  %v1126_v38 = vmax.f32 %v1124_v36, 0.0 }
 0x162   : > { %1127 = vst [vmem:[%s1806_s12] sm:$0xff] %v1125_v37  ;;  %1128 = vst [vmem:[%s1806_s12 + $0x8] sm:$0xff] %v1126_v38 }
 0x163 PF: > { %s14_s21 = sadd.s32 1, %s1562_s21   ;;  %s1916_s15 = smov %s1542_s16 }
 0x164   : > { %p11_p0 = scmp.ge.s32.totalorder %s14_s21, 20   ;;  %s1917_s16 = smov %s1641_s28 }
 0x165   : > { %s1918_s17 = smov %s1554_s19  ;;  %s1919_s18 = smov %s1558_s20 }
 0x166   : > { %s1920_s19 = smov %s1923_s22  ;;  %s1921_s20 = smov %s1927_s23 }
 0x167   :  { %13 = sbr.rel (!%p11_p0) target bundleno = 4 (0x4), region = 126 }

// kernel: _lambda_.41
= control target key start
LH: loop header
LB: loop body
LE: loop exit
PB: predicated region body
PF: predicated region fallthrough
CT: control target
= control target key end

     0   :  { %s81_s0 = inlined_call_operand.vmem [shape: f32[2,1,512], index: 0, kind: input, shape index: {}]   ;;  %s82_s1 = inlined_call_operand.hbm [shape: f32[2,512], index: 1, kind: output, shape index: {}]  }
   0x1   :  { %v41_v0 = vld [vmem:[%s81_s0] sm:$0xff]  }
   0x2   :  { %6 = vsyncpa [#allocation3], 0  ;;  %s64_s8 = smov [#allocation2]   ;;  %39 = vst.sshfl [vmem:[#allocation2] sm:$0xff pattern:$0x75316420] %v41_v0 }
   0x3   :  { %s31_s9 = sshll.u32 %s64_s8, 4  ;;  %s32_s9 = int_to_ptr.vmem [resolvable:$true] %s31_s9 }
   0x4   :  { %s42_s10 = scalar_lea.vmem %s32_s9, 128  ;;  %p47_p1 = scmp.lt.s32.totalorder %s32_s9, %s32_s9 }
   0x5   :  { %p43_p0 = scmp.ne.s32.totalorder %s32_s9, %s42_s10  ;;  %p48_p2 = scmp.lt.s32.totalorder %s42_s10, %s42_s10 }
   0x7   :  { %p49_p3 = por %p48_p2, %p47_p1 }
   0x9   :  { %p50_p4 = pnand %p49_p3, %p43_p0 }
   0xb   :  { %53 = shalt.err (!%p50_p4)
}
   0xc   :  { %34 = dma.vmem_to_hbm [thread:$0]  %s32_s9, 128, %s82_s1, [#allocation3]  }
   0xd   :  { %62 = dma.done.wait [#allocation3], 128  }
   0xe   :  { %63 = vsyncadd [#allocation3], 4294967168 }
   0xf   :  { %38 = vsyncpa [#allocation3], 1 }

</bundles_post_ra>
